<compile_context>
chip_gen: v7x
topology: tpu7x:2x2x1
jax: 0.10.0
libtpu: 0.0.40
codegen_flags: <defaults>
</compile_context>

<pallas_src>
import functools

import jax
import jax.numpy as jnp
from jax.experimental import pallas as pl
from jax.experimental.pallas import tpu as pltpu

_VMEM_LIMIT = 32 * 1024 * 1024


def _round_up(x, m):
    return (x + m - 1) // m * m


# ----------------------------------------------------------------------------
# Pallas kernel 1: M-tiled matmul + bias + activation (used by every conv layer)
# ----------------------------------------------------------------------------
def _matmul_bias_act_kernel(x_ref, w_ref, b_ref, o_ref, *, activation):
    y = jnp.dot(x_ref[...], w_ref[...], preferred_element_type=jnp.float32)
    y = y + b_ref[...]                         # (1, N) broadcasts over the M tile
    if activation == "relu":
        y = jnp.maximum(y, 0.0)
    o_ref[...] = y.astype(o_ref.dtype)


def matmul_bias_act(x, w, b, activation="none", tm=256):
    """y = act(x @ w + b). x:(M,K), w:(K,N), b:(N,) -> (M,N) float32.

    M is tiled (double-buffered pipeline, "parallel" for megacore); N is zero-padded
    to a multiple of 128 so stores are lane-dense; operands are cast to bf16 for the
    MXU with f32 accumulation. K stays un-tiled (small for every layer here).
    """
    M, K = x.shape
    K2, N = w.shape
    assert K == K2

    Np = _round_up(max(N, 128), 128)
    if Np != N:
        w = jnp.pad(w, ((0, 0), (0, Np - N)))
        b = jnp.pad(b, (0, Np - N))

    if M < tm:
        tm = _round_up(M, 8)
    Mp = _round_up(M, tm)
    if Mp != M:
        x = jnp.pad(x, ((0, Mp - M), (0, 0)))

    xb = x.astype(jnp.bfloat16)
    wb = w.astype(jnp.bfloat16)
    b2 = b.reshape(1, Np).astype(jnp.float32)

    kernel = functools.partial(_matmul_bias_act_kernel, activation=activation)
    out = pl.pallas_call(
        kernel,
        out_shape=jax.ShapeDtypeStruct((Mp, Np), jnp.float32),
        grid=(Mp // tm,),
        in_specs=[
            pl.BlockSpec((tm, K), lambda i: (i, 0)),
            pl.BlockSpec((K, Np), lambda i: (0, 0)),
            pl.BlockSpec((1, Np), lambda i: (0, 0)),
        ],
        out_specs=pl.BlockSpec((tm, Np), lambda i: (i, 0)),
        compiler_params=pltpu.CompilerParams(
            dimension_semantics=("parallel",),
            vmem_limit_bytes=_VMEM_LIMIT,
        ),
    )(xb, wb, b2)

    if Mp == M and Np == N:
        return out
    return out[:M, :N]


# ----------------------------------------------------------------------------
# Pallas kernel 2: fused bottleneck  (fc -> feature, dfc+ReLU, clustering layer)
# ----------------------------------------------------------------------------
def _bottleneck_kernel(flat_ref, wf_ref, bf_ref, wd_ref, bd_ref, ct_ref, cn_ref,
                       feat_ref, dec_ref, src_ref, *, alpha, n_clusters):
    flat = flat_ref[...]                                        # (B, Dfc)
    # fc -> latent feature (no activation); padded latent columns stay exactly 0.
    z = jnp.dot(flat, wf_ref[...], preferred_element_type=jnp.float32) + bf_ref[...]
    feat_ref[...] = z
    # dfc + ReLU (padded latent rows of wd are zero -> no contribution).
    d = jnp.dot(z, wd_ref[...], preferred_element_type=jnp.float32) + bd_ref[...]
    dec_ref[...] = jnp.maximum(d, 0.0)
    # clustering layer via the MXU identity:  ||z-c||^2 = ||z||^2 + ||c||^2 - 2 z.c
    zz = jnp.sum(z * z, axis=1, keepdims=True)                  # (B, 1)
    votes = zz + cn_ref[...] - 2.0 * jnp.dot(
        z, ct_ref[...], preferred_element_type=jnp.float32)     # (B, Kp)
    conf = 1.0 / (1.0 + votes * (1.0 / alpha))                  # scalar mul, not divide
    power = (alpha + 1.0) / 2.0
    if power != 1.0:                                            # resolved at trace time
        conf = conf ** power
    col = jax.lax.broadcasted_iota(jnp.int32, conf.shape, 1)
    conf = jnp.where(col < n_clusters, conf, 0.0)               # mask padded clusters
    denom = jnp.sum(conf, axis=1, keepdims=True)
    src_ref[...] = conf * pl.reciprocal(denom, approx=False)


def bottleneck(flat, fc, dfc, centers, alpha):
    """Returns (feature (B,L), decoded_flat (B,Dfc), source (B,K)) from one kernel."""
    wf, bf = fc            # wf: (L, Dfc)  (PyTorch Linear: out x in), bf: (L,)
    wd, bd = dfc           # wd: (Dfc, L), bd: (Dfc,)
    B, Dfc = flat.shape
    L = wf.shape[0]
    K = centers.shape[0]
    Lp = _round_up(max(L, 128), 128)       # lane-dense latent
    Kp = _round_up(max(K, 128), 128)       # lane-dense clusters

    f32 = jnp.float32
    wf_p = jnp.zeros((Dfc, Lp), f32).at[:, :L].set(wf.T.astype(f32))
    bf_p = jnp.zeros((1, Lp), f32).at[0, :L].set(bf.astype(f32))
    wd_p = jnp.zeros((Lp, Dfc), f32).at[:L, :].set(wd.T.astype(f32))
    bd_p = bd.reshape(1, Dfc).astype(f32)
    ct_p = jnp.zeros((Lp, Kp), f32).at[:L, :K].set(centers.T.astype(f32))
    cn_p = jnp.zeros((1, Kp), f32).at[0, :K].set(
        jnp.sum(centers.astype(f32) * centers.astype(f32), axis=1))

    kernel = functools.partial(_bottleneck_kernel, alpha=float(alpha), n_clusters=K)
    feat, dec, src = pl.pallas_call(
        kernel,
        out_shape=(
            jax.ShapeDtypeStruct((B, Lp), f32),
            jax.ShapeDtypeStruct((B, Dfc), f32),
            jax.ShapeDtypeStruct((B, Kp), f32),
        ),
        grid=(1,),
        in_specs=[
            pl.BlockSpec((B, Dfc), lambda i: (0, 0)),
            pl.BlockSpec((Dfc, Lp), lambda i: (0, 0)),
            pl.BlockSpec((1, Lp), lambda i: (0, 0)),
            pl.BlockSpec((Lp, Dfc), lambda i: (0, 0)),
            pl.BlockSpec((1, Dfc), lambda i: (0, 0)),
            pl.BlockSpec((Lp, Kp), lambda i: (0, 0)),
            pl.BlockSpec((1, Kp), lambda i: (0, 0)),
        ],
        out_specs=(
            pl.BlockSpec((B, Lp), lambda i: (0, 0)),
            pl.BlockSpec((B, Dfc), lambda i: (0, 0)),
            pl.BlockSpec((B, Kp), lambda i: (0, 0)),
        ),
        compiler_params=pltpu.CompilerParams(
            dimension_semantics=("arbitrary",),
            vmem_limit_bytes=_VMEM_LIMIT,
        ),
    )(flat.astype(f32), wf_p, bf_p, wd_p, bd_p, ct_p, cn_p)
    return feat[:, :L], dec, src[:, :K]


# ----------------------------------------------------------------------------
# Conv / ConvTranspose via NHWC im2col + Pallas matmul
# ----------------------------------------------------------------------------
def _im2col_nhwc(x, kh, kw, stride, pad):
    """x: (B, H, W, C) -> patches (B*OH*OW, kh*kw*C), ordering (kh, kw, C)."""
    if pad > 0:
        x = jnp.pad(x, ((0, 0), (pad, pad), (pad, pad), (0, 0)))
    B, H, W, C = x.shape
    OH = (H - kh) // stride + 1
    OW = (W - kw) // stride + 1
    cols = []
    for i in range(kh):
        for j in range(kw):
            cols.append(
                x[:, i:i + stride * (OH - 1) + 1:stride,
                      j:j + stride * (OW - 1) + 1:stride, :]
            )
    patches = jnp.stack(cols, axis=3)                 # (B, OH, OW, kh*kw, C)
    patches = patches.reshape(B * OH * OW, kh * kw * C)
    return patches, OH, OW


def conv2d_nhwc(x, w, b, stride, pad, activation="none"):
    """x:(B,H,W,Cin) NHWC, w:(Cout,Cin,kh,kw) (PyTorch layout), b:(Cout,) -> NHWC."""
    Cout, Cin, kh, kw = w.shape
    B = x.shape[0]
    patches, OH, OW = _im2col_nhwc(x, kh, kw, stride, pad)
    w_mat = jnp.transpose(w, (2, 3, 1, 0)).reshape(kh * kw * Cin, Cout)
    out = matmul_bias_act(patches, w_mat, b, activation)        # (B*OH*OW, Cout)
    return out.reshape(B, OH, OW, Cout)


def conv_transpose2d_nhwc(x, w, b, stride, pad, activation="none"):
    """PyTorch ConvTranspose2d semantics. x:(B,H,W,Cin) NHWC, w:(Cin,Cout,kh,kw)."""
    Cin, Cout, kh, kw = w.shape
    B, H, W, _ = x.shape
    if stride > 1:
        Hd = (H - 1) * stride + 1
        Wd = (W - 1) * stride + 1
        xd = jnp.zeros((B, Hd, Wd, Cin), x.dtype)
        xd = xd.at[:, ::stride, ::stride, :].set(x)
    else:
        xd = x
    # equivalent direct conv: spatially-flipped kernel, channels swapped
    w_eff = jnp.flip(w, axis=(2, 3)).transpose(1, 0, 2, 3)      # (Cout, Cin, kh, kw)
    return conv2d_nhwc(xd, w_eff, b, stride=1, pad=kh - 1 - pad, activation=activation)


# ----------------------------------------------------------------------------
# Parameter init (deterministic, synthetic) + forward
# ----------------------------------------------------------------------------
def init_dcec(key, input_dims=(1, 28, 28), latent_dim=10, n_clusters=10):
    C0, H, W = input_dims
    channels = [C0, 32, 64, 128]
    kernel_size = [5, 5, 3]
    stride = [2, 2, 2]
    padding = [kernel_size[i] // stride[i] for i in range(3)]
    if H % 8 != 0:
        padding[-1] = 0

    keys = iter(jax.random.split(key, 20))
    params = {"convs": [], "dconvs": []}

    # encoder convs
    for i in range(3):
        k = kernel_size[i]
        fan_in = channels[i] * k * k
        wshape = (channels[i + 1], channels[i], k, k)
        wc = jax.random.normal(next(keys), wshape, jnp.float32) / jnp.sqrt(fan_in)
        bc = jax.random.normal(next(keys), (channels[i + 1],), jnp.float32) * 0.01
        params["convs"].append((wc, bc))

    fc_dims = channels[-1] * (H // 8) * (W // 8)
    params["fc"] = (
        jax.random.normal(next(keys), (latent_dim, fc_dims), jnp.float32) / jnp.sqrt(fc_dims),
        jax.random.normal(next(keys), (latent_dim,), jnp.float32) * 0.01,
    )
    params["dfc"] = (
        jax.random.normal(next(keys), (fc_dims, latent_dim), jnp.float32) / jnp.sqrt(latent_dim),
        jax.random.normal(next(keys), (fc_dims,), jnp.float32) * 0.01,
    )

    # decoder transposed convs (PyTorch weight layout: (in_ch, out_ch, k, k))
    dk = list(kernel_size)
    if H % 8 != 0:
        dk[-1] -= 1
    dstride, dpadding = [], []
    for i in range(2, -1, -1):
        k = dk[i] + 1
        fan_in = channels[i + 1] * k * k
        wshape = (channels[i + 1], channels[i], k, k)
        wc = jax.random.normal(next(keys), wshape, jnp.float32) / jnp.sqrt(fan_in)
        bc = jax.random.normal(next(keys), (channels[i],), jnp.float32) * 0.01
        params["dconvs"].append((wc, bc))
        dstride.append(stride[i])
        dpadding.append(padding[i])

    # clustering centers, xavier-normal-ish
    std = (2.0 / (n_clusters + latent_dim)) ** 0.5
    params["centers"] = jax.random.normal(next(keys), (n_clusters, latent_dim), jnp.float32) * std

    cfg = {"stride": stride, "padding": padding,
           "dstride": dstride, "dpadding": dpadding, "alpha": 1.0}
    return params, cfg


def dcec_forward(params, x, cfg):
    # NCHW -> NHWC at the model boundary only (kept NHWC between layers).
    h = jnp.transpose(x, (0, 2, 3, 1))

    # ----- encoder convs (+ReLU) -----
    for (w, b), s, p in zip(params["convs"], cfg["stride"], cfg["padding"]):
        h = conv2d_nhwc(h, w, b, s, p, activation="relu")
    B, Hh, Ww, C = h.shape
    flat = h.reshape(B, -1)

    # ----- fused fc -> feature, dfc(+ReLU), clustering layer -----
    feature, dec_flat, source = bottleneck(
        flat, params["fc"], params["dfc"], params["centers"], cfg["alpha"])
    d = dec_flat.reshape(B, Hh, Ww, C)

    # ----- decoder transposed convs (ReLU except last) -----
    n = len(params["dconvs"])
    for idx, ((w, b), s, p) in enumerate(zip(params["dconvs"], cfg["dstride"], cfg["dpadding"])):
        act = "relu" if idx != n - 1 else "none"
        d = conv_transpose2d_nhwc(d, w, b, s, p, activation=act)

    rec = jnp.transpose(d, (0, 3, 1, 2))   # NHWC -> NCHW at the boundary
    return {"rec": rec, "feature": feature, "source": source}


# ----------------------------------------------------------------------------
if __name__ == "__main__":
    key = jax.random.PRNGKey(0)
    pkey, xkey = jax.random.split(key)

    input_dims = (1, 28, 28)            # (C, H, W) — MNIST-like, matches module default
    latent_dim, n_clusters, batch = 10, 10, 2

    params, cfg = init_dcec(pkey, input_dims, latent_dim, n_clusters)
    x = jax.random.normal(xkey, (batch,) + input_dims, jnp.float32)

    fwd = jax.jit(lambda p, xx: dcec_forward(p, xx, cfg))
    out = fwd(params, x)
    jax.block_until_ready(out)

    assert out["rec"].shape == (batch, 1, 28, 28)
    assert out["feature"].shape == (batch, latent_dim)
    assert out["source"].shape == (batch, n_clusters)
    # source rows sum to 1
    assert bool(jnp.allclose(jnp.sum(out["source"], axis=1), 1.0, atol=1e-5))
    print("KERNEL_OK")
</pallas_src>

<mosaic_0001>
module attributes {stable_mosaic.version = 11 : i64} {
  func.func @_matmul_bias_act_kernel(%arg0: i32, %arg1: memref<256x25xbf16, #tpu.memory_space<vmem>>, %arg2: memref<25x128xbf16, #tpu.memory_space<vmem>>, %arg3: memref<1x128xf32, #tpu.memory_space<vmem>>, %arg4: memref<256x128xf32, #tpu.memory_space<vmem>>) attributes {dimension_semantics = [#tpu.dimension_semantics<parallel>], iteration_bounds = array<i64: 2>, scalar_prefetch = 0 : i64, scratch_operands = 0 : i64, tpu.core_type = #tpu.core_type<tc>, window_params = [{transform_indices = @transform_0, window_bounds = array<i64: 256, 25>}, {pipeline_mode = #tpu.pipeline_mode<synchronous>, transform_indices = @transform_1, window_bounds = array<i64: 25, 128>}, {pipeline_mode = #tpu.pipeline_mode<synchronous>, transform_indices = @transform_2, window_bounds = array<i64: 1, 128>}, {transform_indices = @transform_3, window_bounds = array<i64: 256, 128>}]} {
    %c0 = arith.constant 0 : index
    %c0_0 = arith.constant 0 : index
    %0 = vector.load %arg1[%c0, %c0_0] : memref<256x25xbf16, #tpu.memory_space<vmem>>, vector<256x25xbf16>
    %c0_1 = arith.constant 0 : index
    %c0_2 = arith.constant 0 : index
    %1 = vector.load %arg2[%c0_1, %c0_2] : memref<25x128xbf16, #tpu.memory_space<vmem>>, vector<25x128xbf16>
    %cst = arith.constant dense<0.000000e+00> : vector<256x128xf32>
    %2 = tpu.matmul %0, %1, %cst {dimension_numbers = #tpu.dot_dimension_numbers<[1], [0], [0], [1], [0, 0, 1, 1], [], []>} : vector<256x25xbf16>, vector<25x128xbf16>, vector<256x128xf32> -> vector<256x128xf32>
    %c0_3 = arith.constant 0 : index
    %c0_4 = arith.constant 0 : index
    %3 = vector.load %arg3[%c0_3, %c0_4] : memref<1x128xf32, #tpu.memory_space<vmem>>, vector<1x128xf32>
    %4 = vector.broadcast %3 : vector<1x128xf32> to vector<256x128xf32>
    %5 = arith.addf %2, %4 : vector<256x128xf32>
    %cst_5 = arith.constant 0.000000e+00 : f32
    %6 = vector.broadcast %cst_5 : f32 to vector<256x128xf32>
    %7 = arith.maximumf %5, %6 : vector<256x128xf32>
    %c0_6 = arith.constant 0 : index
    %c0_7 = arith.constant 0 : index
    %8 = vector.load %arg4[%c0_6, %c0_7] : memref<256x128xf32, #tpu.memory_space<vmem>>, vector<256x128xf32>
    tpu.vector_store %arg4[%c0_6, %c0_7], %7 {strides = array<i32>} : memref<256x128xf32, #tpu.memory_space<vmem>>, vector<256x128xf32>,
    return
  }
  func.func @transform_0(%arg0: i32) -> (i32, i32) {
    %c0_i32 = arith.constant 0 : i32
    %c0_i32_0 = arith.constant 0 : i32
    return %arg0, %c0_i32 : i32, i32
  }
  func.func @transform_1(%arg0: i32) -> (i32, i32) {
    %c0_i32 = arith.constant 0 : i32
    %c0_i32_0 = arith.constant 0 : i32
    %c0_i32_1 = arith.constant 0 : i32
    return %c0_i32, %c0_i32_0 : i32, i32
  }
  func.func @transform_2(%arg0: i32) -> (i32, i32) {
    %c0_i32 = arith.constant 0 : i32
    %c0_i32_0 = arith.constant 0 : i32
    %c0_i32_1 = arith.constant 0 : i32
    return %c0_i32, %c0_i32_0 : i32, i32
  }
  func.func @transform_3(%arg0: i32) -> (i32, i32) {
    %c0_i32 = arith.constant 0 : i32
    %c0_i32_0 = arith.constant 0 : i32
    return %arg0, %c0_i32 : i32, i32
  }
}

module attributes {stable_mosaic.version = 11 : i64} {
  func.func @_matmul_bias_act_kernel(%arg0: i32, %arg1: memref<104x800xbf16, #tpu.memory_space<vmem>>, %arg2: memref<800x128xbf16, #tpu.memory_space<vmem>>, %arg3: memref<1x128xf32, #tpu.memory_space<vmem>>, %arg4: memref<104x128xf32, #tpu.memory_space<vmem>>) attributes {dimension_semantics = [#tpu.dimension_semantics<parallel>], iteration_bounds = array<i64: 1>, scalar_prefetch = 0 : i64, scratch_operands = 0 : i64, tpu.core_type = #tpu.core_type<tc>, window_params = [{transform_indices = @transform_0, window_bounds = array<i64: 104, 800>}, {pipeline_mode = #tpu.pipeline_mode<synchronous>, transform_indices = @transform_1, window_bounds = array<i64: 800, 128>}, {pipeline_mode = #tpu.pipeline_mode<synchronous>, transform_indices = @transform_2, window_bounds = array<i64: 1, 128>}, {transform_indices = @transform_3, window_bounds = array<i64: 104, 128>}]} {
    %c0 = arith.constant 0 : index
    %c0_0 = arith.constant 0 : index
    %0 = vector.load %arg1[%c0, %c0_0] : memref<104x800xbf16, #tpu.memory_space<vmem>>, vector<104x800xbf16>
    %c0_1 = arith.constant 0 : index
    %c0_2 = arith.constant 0 : index
    %1 = vector.load %arg2[%c0_1, %c0_2] : memref<800x128xbf16, #tpu.memory_space<vmem>>, vector<800x128xbf16>
    %cst = arith.constant dense<0.000000e+00> : vector<104x128xf32>
    %2 = tpu.matmul %0, %1, %cst {dimension_numbers = #tpu.dot_dimension_numbers<[1], [0], [0], [1], [0, 0, 1, 1], [], []>} : vector<104x800xbf16>, vector<800x128xbf16>, vector<104x128xf32> -> vector<104x128xf32>
    %c0_3 = arith.constant 0 : index
    %c0_4 = arith.constant 0 : index
    %3 = vector.load %arg3[%c0_3, %c0_4] : memref<1x128xf32, #tpu.memory_space<vmem>>, vector<1x128xf32>
    %4 = vector.broadcast %3 : vector<1x128xf32> to vector<104x128xf32>
    %5 = arith.addf %2, %4 : vector<104x128xf32>
    %cst_5 = arith.constant 0.000000e+00 : f32
    %6 = vector.broadcast %cst_5 : f32 to vector<104x128xf32>
    %7 = arith.maximumf %5, %6 : vector<104x128xf32>
    %c0_6 = arith.constant 0 : index
    %c0_7 = arith.constant 0 : index
    %8 = vector.load %arg4[%c0_6, %c0_7] : memref<104x128xf32, #tpu.memory_space<vmem>>, vector<104x128xf32>
    tpu.vector_store %arg4[%c0_6, %c0_7], %7 {strides = array<i32>} : memref<104x128xf32, #tpu.memory_space<vmem>>, vector<104x128xf32>,
    return
  }
  func.func @transform_0(%arg0: i32) -> (i32, i32) {
    %c0_i32 = arith.constant 0 : i32
    %c0_i32_0 = arith.constant 0 : i32
    return %arg0, %c0_i32 : i32, i32
  }
  func.func @transform_1(%arg0: i32) -> (i32, i32) {
    %c0_i32 = arith.constant 0 : i32
    %c0_i32_0 = arith.constant 0 : i32
    %c0_i32_1 = arith.constant 0 : i32
    return %c0_i32, %c0_i32_0 : i32, i32
  }
  func.func @transform_2(%arg0: i32) -> (i32, i32) {
    %c0_i32 = arith.constant 0 : i32
    %c0_i32_0 = arith.constant 0 : i32
    %c0_i32_1 = arith.constant 0 : i32
    return %c0_i32, %c0_i32_0 : i32, i32
  }
  func.func @transform_3(%arg0: i32) -> (i32, i32) {
    %c0_i32 = arith.constant 0 : i32
    %c0_i32_0 = arith.constant 0 : i32
    return %arg0, %c0_i32 : i32, i32
  }
}

module attributes {stable_mosaic.version = 11 : i64} {
  func.func @_matmul_bias_act_kernel(%arg0: i32, %arg1: memref<24x576xbf16, #tpu.memory_space<vmem>>, %arg2: memref<576x128xbf16, #tpu.memory_space<vmem>>, %arg3: memref<1x128xf32, #tpu.memory_space<vmem>>, %arg4: memref<24x128xf32, #tpu.memory_space<vmem>>) attributes {dimension_semantics = [#tpu.dimension_semantics<parallel>], iteration_bounds = array<i64: 1>, scalar_prefetch = 0 : i64, scratch_operands = 0 : i64, tpu.core_type = #tpu.core_type<tc>, window_params = [{transform_indices = @transform_0, window_bounds = array<i64: 24, 576>}, {pipeline_mode = #tpu.pipeline_mode<synchronous>, transform_indices = @transform_1, window_bounds = array<i64: 576, 128>}, {pipeline_mode = #tpu.pipeline_mode<synchronous>, transform_indices = @transform_2, window_bounds = array<i64: 1, 128>}, {transform_indices = @transform_3, window_bounds = array<i64: 24, 128>}]} {
    %c0 = arith.constant 0 : index
    %c0_0 = arith.constant 0 : index
    %0 = vector.load %arg1[%c0, %c0_0] : memref<24x576xbf16, #tpu.memory_space<vmem>>, vector<24x576xbf16>
    %c0_1 = arith.constant 0 : index
    %c0_2 = arith.constant 0 : index
    %1 = vector.load %arg2[%c0_1, %c0_2] : memref<576x128xbf16, #tpu.memory_space<vmem>>, vector<576x128xbf16>
    %cst = arith.constant dense<0.000000e+00> : vector<24x128xf32>
    %2 = tpu.matmul %0, %1, %cst {dimension_numbers = #tpu.dot_dimension_numbers<[1], [0], [0], [1], [0, 0, 1, 1], [], []>} : vector<24x576xbf16>, vector<576x128xbf16>, vector<24x128xf32> -> vector<24x128xf32>
    %c0_3 = arith.constant 0 : index
    %c0_4 = arith.constant 0 : index
    %3 = vector.load %arg3[%c0_3, %c0_4] : memref<1x128xf32, #tpu.memory_space<vmem>>, vector<1x128xf32>
    %4 = vector.broadcast %3 : vector<1x128xf32> to vector<24x128xf32>
    %5 = arith.addf %2, %4 : vector<24x128xf32>
    %cst_5 = arith.constant 0.000000e+00 : f32
    %6 = vector.broadcast %cst_5 : f32 to vector<24x128xf32>
    %7 = arith.maximumf %5, %6 : vector<24x128xf32>
    %c0_6 = arith.constant 0 : index
    %c0_7 = arith.constant 0 : index
    %8 = vector.load %arg4[%c0_6, %c0_7] : memref<24x128xf32, #tpu.memory_space<vmem>>, vector<24x128xf32>
    tpu.vector_store %arg4[%c0_6, %c0_7], %7 {strides = array<i32>} : memref<24x128xf32, #tpu.memory_space<vmem>>, vector<24x128xf32>,
    return
  }
  func.func @transform_0(%arg0: i32) -> (i32, i32) {
    %c0_i32 = arith.constant 0 : i32
    %c0_i32_0 = arith.constant 0 : i32
    return %arg0, %c0_i32 : i32, i32
  }
  func.func @transform_1(%arg0: i32) -> (i32, i32) {
    %c0_i32 = arith.constant 0 : i32
    %c0_i32_0 = arith.constant 0 : i32
    %c0_i32_1 = arith.constant 0 : i32
    return %c0_i32, %c0_i32_0 : i32, i32
  }
  func.func @transform_2(%arg0: i32) -> (i32, i32) {
    %c0_i32 = arith.constant 0 : i32
    %c0_i32_0 = arith.constant 0 : i32
    %c0_i32_1 = arith.constant 0 : i32
    return %c0_i32, %c0_i32_0 : i32, i32
  }
  func.func @transform_3(%arg0: i32) -> (i32, i32) {
    %c0_i32 = arith.constant 0 : i32
    %c0_i32_0 = arith.constant 0 : i32
    return %arg0, %c0_i32 : i32, i32
  }
}

module attributes {stable_mosaic.version = 11 : i64} {
  func.func @_bottleneck_kernel(%arg0: i32, %arg1: memref<2x1152xf32, #tpu.memory_space<vmem>>, %arg2: memref<1152x128xf32, #tpu.memory_space<vmem>>, %arg3: memref<1x128xf32, #tpu.memory_space<vmem>>, %arg4: memref<128x1152xf32, #tpu.memory_space<vmem>>, %arg5: memref<1x1152xf32, #tpu.memory_space<vmem>>, %arg6: memref<128x128xf32, #tpu.memory_space<vmem>>, %arg7: memref<1x128xf32, #tpu.memory_space<vmem>>, %arg8: memref<2x128xf32, #tpu.memory_space<vmem>>, %arg9: memref<2x1152xf32, #tpu.memory_space<vmem>>, %arg10: memref<2x128xf32, #tpu.memory_space<vmem>>) attributes {dimension_semantics = [#tpu.dimension_semantics<arbitrary>], iteration_bounds = array<i64: 1>, scalar_prefetch = 0 : i64, scratch_operands = 0 : i64, tpu.core_type = #tpu.core_type<tc>, window_params = [{pipeline_mode = #tpu.pipeline_mode<synchronous>, transform_indices = @transform_0, window_bounds = array<i64: 2, 1152>}, {pipeline_mode = #tpu.pipeline_mode<synchronous>, transform_indices = @transform_1, window_bounds = array<i64: 1152, 128>}, {pipeline_mode = #tpu.pipeline_mode<synchronous>, transform_indices = @transform_2, window_bounds = array<i64: 1, 128>}, {pipeline_mode = #tpu.pipeline_mode<synchronous>, transform_indices = @transform_3, window_bounds = array<i64: 128, 1152>}, {pipeline_mode = #tpu.pipeline_mode<synchronous>, transform_indices = @transform_4, window_bounds = array<i64: 1, 1152>}, {pipeline_mode = #tpu.pipeline_mode<synchronous>, transform_indices = @transform_5, window_bounds = array<i64: 128, 128>}, {pipeline_mode = #tpu.pipeline_mode<synchronous>, transform_indices = @transform_6, window_bounds = array<i64: 1, 128>}, {pipeline_mode = #tpu.pipeline_mode<synchronous>, transform_indices = @transform_7, window_bounds = array<i64: 2, 128>}, {pipeline_mode = #tpu.pipeline_mode<synchronous>, transform_indices = @transform_8, window_bounds = array<i64: 2, 1152>}, {pipeline_mode = #tpu.pipeline_mode<synchronous>, transform_indices = @transform_9, window_bounds = array<i64: 2, 128>}]} {
    %c0 = arith.constant 0 : index
    %c0_0 = arith.constant 0 : index
    %0 = vector.load %arg1[%c0, %c0_0] : memref<2x1152xf32, #tpu.memory_space<vmem>>, vector<2x1152xf32>
    %c0_1 = arith.constant 0 : index
    %c0_2 = arith.constant 0 : index
    %1 = vector.load %arg2[%c0_1, %c0_2] : memref<1152x128xf32, #tpu.memory_space<vmem>>, vector<1152x128xf32>
    %cst = arith.constant dense<0.000000e+00> : vector<2x128xf32>
    %2 = tpu.matmul %0, %1, %cst {dimension_numbers = #tpu.dot_dimension_numbers<[1], [0], [0], [1], [0, 0, 1, 1], [], []>} : vector<2x1152xf32>, vector<1152x128xf32>, vector<2x128xf32> -> vector<2x128xf32>
    %c0_3 = arith.constant 0 : index
    %c0_4 = arith.constant 0 : index
    %3 = vector.load %arg3[%c0_3, %c0_4] : memref<1x128xf32, #tpu.memory_space<vmem>>, vector<1x128xf32>
    %4 = vector.broadcast %3 : vector<1x128xf32> to vector<2x128xf32>
    %5 = arith.addf %2, %4 : vector<2x128xf32>
    %c0_5 = arith.constant 0 : index
    %c0_6 = arith.constant 0 : index
    %6 = vector.load %arg8[%c0_5, %c0_6] : memref<2x128xf32, #tpu.memory_space<vmem>>, vector<2x128xf32>
    tpu.vector_store %arg8[%c0_5, %c0_6], %5 {strides = array<i32>} : memref<2x128xf32, #tpu.memory_space<vmem>>, vector<2x128xf32>,
    %c0_7 = arith.constant 0 : index
    %c0_8 = arith.constant 0 : index
    %7 = vector.load %arg4[%c0_7, %c0_8] : memref<128x1152xf32, #tpu.memory_space<vmem>>, vector<128x1152xf32>
    %cst_9 = arith.constant dense<0.000000e+00> : vector<2x1152xf32>
    %8 = tpu.matmul %5, %7, %cst_9 {dimension_numbers = #tpu.dot_dimension_numbers<[1], [0], [0], [1], [0, 0, 1, 1], [], []>} : vector<2x128xf32>, vector<128x1152xf32>, vector<2x1152xf32> -> vector<2x1152xf32>
    %c0_10 = arith.constant 0 : index
    %c0_11 = arith.constant 0 : index
    %9 = vector.load %arg5[%c0_10, %c0_11] : memref<1x1152xf32, #tpu.memory_space<vmem>>, vector<1x1152xf32>
    %10 = vector.broadcast %9 : vector<1x1152xf32> to vector<2x1152xf32>
    %11 = arith.addf %8, %10 : vector<2x1152xf32>
    %cst_12 = arith.constant 0.000000e+00 : f32
    %12 = vector.broadcast %cst_12 : f32 to vector<2x1152xf32>
    %13 = arith.maximumf %11, %12 : vector<2x1152xf32>
    %c0_13 = arith.constant 0 : index
    %c0_14 = arith.constant 0 : index
    %14 = vector.load %arg9[%c0_13, %c0_14] : memref<2x1152xf32, #tpu.memory_space<vmem>>, vector<2x1152xf32>
    tpu.vector_store %arg9[%c0_13, %c0_14], %13 {strides = array<i32>} : memref<2x1152xf32, #tpu.memory_space<vmem>>, vector<2x1152xf32>,
    %15 = arith.mulf %5, %5 : vector<2x128xf32>
    %cst_15 = arith.constant dense<0.000000e+00> : vector<2xf32>
    %16 = vector.multi_reduction <add>, %15, %cst_15 [1] : vector<2x128xf32> to vector<2xf32>
    %17 = vector.shape_cast %16 : vector<2xf32> to vector<2x1xf32>
    %c0_16 = arith.constant 0 : index
    %c0_17 = arith.constant 0 : index
    %18 = vector.load %arg7[%c0_16, %c0_17] : memref<1x128xf32, #tpu.memory_space<vmem>>, vector<1x128xf32>
    %19 = vector.broadcast %17 : vector<2x1xf32> to vector<2x128xf32>
    %20 = vector.broadcast %18 : vector<1x128xf32> to vector<2x128xf32>
    %21 = arith.addf %19, %20 : vector<2x128xf32>
    %c0_18 = arith.constant 0 : index
    %c0_19 = arith.constant 0 : index
    %22 = vector.load %arg6[%c0_18, %c0_19] : memref<128x128xf32, #tpu.memory_space<vmem>>, vector<128x128xf32>
    %cst_20 = arith.constant dense<0.000000e+00> : vector<2x128xf32>
    %23 = tpu.matmul %5, %22, %cst_20 {dimension_numbers = #tpu.dot_dimension_numbers<[1], [0], [0], [1], [0, 0, 1, 1], [], []>} : vector<2x128xf32>, vector<128x128xf32>, vector<2x128xf32> -> vector<2x128xf32>
    %cst_21 = arith.constant 2.000000e+00 : f32
    %24 = vector.broadcast %cst_21 : f32 to vector<2x128xf32>
    %25 = arith.mulf %24, %23 : vector<2x128xf32>
    %26 = arith.subf %21, %25 : vector<2x128xf32>
    %cst_22 = arith.constant 1.000000e+00 : f32
    %27 = vector.broadcast %cst_22 : f32 to vector<2x128xf32>
    %28 = arith.mulf %26, %27 : vector<2x128xf32>
    %cst_23 = arith.constant 1.000000e+00 : f32
    %29 = vector.broadcast %cst_23 : f32 to vector<2x128xf32>
    %30 = arith.addf %29, %28 : vector<2x128xf32>
    %cst_24 = arith.constant 1.000000e+00 : f32
    %31 = vector.broadcast %cst_24 : f32 to vector<2x128xf32>
    %32 = arith.divf %31, %30 : vector<2x128xf32>
    %33 = tpu.iota {dimensions = array<i32: 1>} : vector<2x128xi32>
    %c10_i32 = arith.constant 10 : i32
    %34 = vector.broadcast %c10_i32 : i32 to vector<2x128xi32>
    %35 = arith.cmpi slt, %33, %34 : vector<2x128xi32>
    %cst_25 = arith.constant 0.000000e+00 : f32
    %36 = vector.broadcast %cst_25 : f32 to vector<2x128xf32>
    %37 = arith.select %35, %32, %36 : vector<2x128xi1>, vector<2x128xf32>
    %cst_26 = arith.constant dense<0.000000e+00> : vector<2xf32>
    %38 = vector.multi_reduction <add>, %37, %cst_26 [1] : vector<2x128xf32> to vector<2xf32>
    %39 = vector.shape_cast %38 : vector<2xf32> to vector<2x1xf32>
    %40 = tpu.reciprocal %39 : vector<2x1xf32> -> vector<2x1xf32>
    %41 = vector.broadcast %40 : vector<2x1xf32> to vector<2x128xf32>
    %42 = arith.mulf %37, %41 : vector<2x128xf32>
    %c0_27 = arith.constant 0 : index
    %c0_28 = arith.constant 0 : index
    %43 = vector.load %arg10[%c0_27, %c0_28] : memref<2x128xf32, #tpu.memory_space<vmem>>, vector<2x128xf32>
    tpu.vector_store %arg10[%c0_27, %c0_28], %42 {strides = array<i32>} : memref<2x128xf32, #tpu.memory_space<vmem>>, vector<2x128xf32>,
    return
  }
  func.func @transform_0(%arg0: i32) -> (i32, i32) {
    %c0_i32 = arith.constant 0 : i32
    %c0_i32_0 = arith.constant 0 : i32
    %c0_i32_1 = arith.constant 0 : i32
    return %c0_i32, %c0_i32_0 : i32, i32
  }
  func.func @transform_1(%arg0: i32) -> (i32, i32) {
    %c0_i32 = arith.constant 0 : i32
    %c0_i32_0 = arith.constant 0 : i32
    %c0_i32_1 = arith.constant 0 : i32
    return %c0_i32, %c0_i32_0 : i32, i32
  }
  func.func @transform_2(%arg0: i32) -> (i32, i32) {
    %c0_i32 = arith.constant 0 : i32
    %c0_i32_0 = arith.constant 0 : i32
    %c0_i32_1 = arith.constant 0 : i32
    return %c0_i32, %c0_i32_0 : i32, i32
  }
  func.func @transform_3(%arg0: i32) -> (i32, i32) {
    %c0_i32 = arith.constant 0 : i32
    %c0_i32_0 = arith.constant 0 : i32
    %c0_i32_1 = arith.constant 0 : i32
    return %c0_i32, %c0_i32_0 : i32, i32
  }
  func.func @transform_4(%arg0: i32) -> (i32, i32) {
    %c0_i32 = arith.constant 0 : i32
    %c0_i32_0 = arith.constant 0 : i32
    %c0_i32_1 = arith.constant 0 : i32
    return %c0_i32, %c0_i32_0 : i32, i32
  }
  func.func @transform_5(%arg0: i32) -> (i32, i32) {
    %c0_i32 = arith.constant 0 : i32
    %c0_i32_0 = arith.constant 0 : i32
    %c0_i32_1 = arith.constant 0 : i32
    return %c0_i32, %c0_i32_0 : i32, i32
  }
  func.func @transform_6(%arg0: i32) -> (i32, i32) {
    %c0_i32 = arith.constant 0 : i32
    %c0_i32_0 = arith.constant 0 : i32
    %c0_i32_1 = arith.constant 0 : i32
    return %c0_i32, %c0_i32_0 : i32, i32
  }
  func.func @transform_7(%arg0: i32) -> (i32, i32) {
    %c0_i32 = arith.constant 0 : i32
    %c0_i32_0 = arith.constant 0 : i32
    %c0_i32_1 = arith.constant 0 : i32
    return %c0_i32, %c0_i32_0 : i32, i32
  }
  func.func @transform_8(%arg0: i32) -> (i32, i32) {
    %c0_i32 = arith.constant 0 : i32
    %c0_i32_0 = arith.constant 0 : i32
    %c0_i32_1 = arith.constant 0 : i32
    return %c0_i32, %c0_i32_0 : i32, i32
  }
  func.func @transform_9(%arg0: i32) -> (i32, i32) {
    %c0_i32 = arith.constant 0 : i32
    %c0_i32_0 = arith.constant 0 : i32
    %c0_i32_1 = arith.constant 0 : i32
    return %c0_i32, %c0_i32_0 : i32, i32
  }
}

module attributes {stable_mosaic.version = 11 : i64} {
  func.func @_matmul_bias_act_kernel(%arg0: i32, %arg1: memref<104x1152xbf16, #tpu.memory_space<vmem>>, %arg2: memref<1152x128xbf16, #tpu.memory_space<vmem>>, %arg3: memref<1x128xf32, #tpu.memory_space<vmem>>, %arg4: memref<104x128xf32, #tpu.memory_space<vmem>>) attributes {dimension_semantics = [#tpu.dimension_semantics<parallel>], iteration_bounds = array<i64: 1>, scalar_prefetch = 0 : i64, scratch_operands = 0 : i64, tpu.core_type = #tpu.core_type<tc>, window_params = [{transform_indices = @transform_0, window_bounds = array<i64: 104, 1152>}, {pipeline_mode = #tpu.pipeline_mode<synchronous>, transform_indices = @transform_1, window_bounds = array<i64: 1152, 128>}, {pipeline_mode = #tpu.pipeline_mode<synchronous>, transform_indices = @transform_2, window_bounds = array<i64: 1, 128>}, {transform_indices = @transform_3, window_bounds = array<i64: 104, 128>}]} {
    %c0 = arith.constant 0 : index
    %c0_0 = arith.constant 0 : index
    %0 = vector.load %arg1[%c0, %c0_0] : memref<104x1152xbf16, #tpu.memory_space<vmem>>, vector<104x1152xbf16>
    %c0_1 = arith.constant 0 : index
    %c0_2 = arith.constant 0 : index
    %1 = vector.load %arg2[%c0_1, %c0_2] : memref<1152x128xbf16, #tpu.memory_space<vmem>>, vector<1152x128xbf16>
    %cst = arith.constant dense<0.000000e+00> : vector<104x128xf32>
    %2 = tpu.matmul %0, %1, %cst {dimension_numbers = #tpu.dot_dimension_numbers<[1], [0], [0], [1], [0, 0, 1, 1], [], []>} : vector<104x1152xbf16>, vector<1152x128xbf16>, vector<104x128xf32> -> vector<104x128xf32>
    %c0_3 = arith.constant 0 : index
    %c0_4 = arith.constant 0 : index
    %3 = vector.load %arg3[%c0_3, %c0_4] : memref<1x128xf32, #tpu.memory_space<vmem>>, vector<1x128xf32>
    %4 = vector.broadcast %3 : vector<1x128xf32> to vector<104x128xf32>
    %5 = arith.addf %2, %4 : vector<104x128xf32>
    %cst_5 = arith.constant 0.000000e+00 : f32
    %6 = vector.broadcast %cst_5 : f32 to vector<104x128xf32>
    %7 = arith.maximumf %5, %6 : vector<104x128xf32>
    %c0_6 = arith.constant 0 : index
    %c0_7 = arith.constant 0 : index
    %8 = vector.load %arg4[%c0_6, %c0_7] : memref<104x128xf32, #tpu.memory_space<vmem>>, vector<104x128xf32>
    tpu.vector_store %arg4[%c0_6, %c0_7], %7 {strides = array<i32>} : memref<104x128xf32, #tpu.memory_space<vmem>>, vector<104x128xf32>,
    return
  }
  func.func @transform_0(%arg0: i32) -> (i32, i32) {
    %c0_i32 = arith.constant 0 : i32
    %c0_i32_0 = arith.constant 0 : i32
    return %arg0, %c0_i32 : i32, i32
  }
  func.func @transform_1(%arg0: i32) -> (i32, i32) {
    %c0_i32 = arith.constant 0 : i32
    %c0_i32_0 = arith.constant 0 : i32
    %c0_i32_1 = arith.constant 0 : i32
    return %c0_i32, %c0_i32_0 : i32, i32
  }
  func.func @transform_2(%arg0: i32) -> (i32, i32) {
    %c0_i32 = arith.constant 0 : i32
    %c0_i32_0 = arith.constant 0 : i32
    %c0_i32_1 = arith.constant 0 : i32
    return %c0_i32, %c0_i32_0 : i32, i32
  }
  func.func @transform_3(%arg0: i32) -> (i32, i32) {
    %c0_i32 = arith.constant 0 : i32
    %c0_i32_0 = arith.constant 0 : i32
    return %arg0, %c0_i32 : i32, i32
  }
}

module attributes {stable_mosaic.version = 11 : i64} {
  func.func @_matmul_bias_act_kernel(%arg0: i32, %arg1: memref<256x2304xbf16, #tpu.memory_space<vmem>>, %arg2: memref<2304x128xbf16, #tpu.memory_space<vmem>>, %arg3: memref<1x128xf32, #tpu.memory_space<vmem>>, %arg4: memref<256x128xf32, #tpu.memory_space<vmem>>) attributes {dimension_semantics = [#tpu.dimension_semantics<parallel>], iteration_bounds = array<i64: 2>, scalar_prefetch = 0 : i64, scratch_operands = 0 : i64, tpu.core_type = #tpu.core_type<tc>, window_params = [{transform_indices = @transform_0, window_bounds = array<i64: 256, 2304>}, {pipeline_mode = #tpu.pipeline_mode<synchronous>, transform_indices = @transform_1, window_bounds = array<i64: 2304, 128>}, {pipeline_mode = #tpu.pipeline_mode<synchronous>, transform_indices = @transform_2, window_bounds = array<i64: 1, 128>}, {transform_indices = @transform_3, window_bounds = array<i64: 256, 128>}]} {
    %c0 = arith.constant 0 : index
    %c0_0 = arith.constant 0 : index
    %0 = vector.load %arg1[%c0, %c0_0] : memref<256x2304xbf16, #tpu.memory_space<vmem>>, vector<256x2304xbf16>
    %c0_1 = arith.constant 0 : index
    %c0_2 = arith.constant 0 : index
    %1 = vector.load %arg2[%c0_1, %c0_2] : memref<2304x128xbf16, #tpu.memory_space<vmem>>, vector<2304x128xbf16>
    %cst = arith.constant dense<0.000000e+00> : vector<256x128xf32>
    %2 = tpu.matmul %0, %1, %cst {dimension_numbers = #tpu.dot_dimension_numbers<[1], [0], [0], [1], [0, 0, 1, 1], [], []>} : vector<256x2304xbf16>, vector<2304x128xbf16>, vector<256x128xf32> -> vector<256x128xf32>
    %c0_3 = arith.constant 0 : index
    %c0_4 = arith.constant 0 : index
    %3 = vector.load %arg3[%c0_3, %c0_4] : memref<1x128xf32, #tpu.memory_space<vmem>>, vector<1x128xf32>
    %4 = vector.broadcast %3 : vector<1x128xf32> to vector<256x128xf32>
    %5 = arith.addf %2, %4 : vector<256x128xf32>
    %cst_5 = arith.constant 0.000000e+00 : f32
    %6 = vector.broadcast %cst_5 : f32 to vector<256x128xf32>
    %7 = arith.maximumf %5, %6 : vector<256x128xf32>
    %c0_6 = arith.constant 0 : index
    %c0_7 = arith.constant 0 : index
    %8 = vector.load %arg4[%c0_6, %c0_7] : memref<256x128xf32, #tpu.memory_space<vmem>>, vector<256x128xf32>
    tpu.vector_store %arg4[%c0_6, %c0_7], %7 {strides = array<i32>} : memref<256x128xf32, #tpu.memory_space<vmem>>, vector<256x128xf32>,
    return
  }
  func.func @transform_0(%arg0: i32) -> (i32, i32) {
    %c0_i32 = arith.constant 0 : i32
    %c0_i32_0 = arith.constant 0 : i32
    return %arg0, %c0_i32 : i32, i32
  }
  func.func @transform_1(%arg0: i32) -> (i32, i32) {
    %c0_i32 = arith.constant 0 : i32
    %c0_i32_0 = arith.constant 0 : i32
    %c0_i32_1 = arith.constant 0 : i32
    return %c0_i32, %c0_i32_0 : i32, i32
  }
  func.func @transform_2(%arg0: i32) -> (i32, i32) {
    %c0_i32 = arith.constant 0 : i32
    %c0_i32_0 = arith.constant 0 : i32
    %c0_i32_1 = arith.constant 0 : i32
    return %c0_i32, %c0_i32_0 : i32, i32
  }
  func.func @transform_3(%arg0: i32) -> (i32, i32) {
    %c0_i32 = arith.constant 0 : i32
    %c0_i32_0 = arith.constant 0 : i32
    return %arg0, %c0_i32 : i32, i32
  }
}

module attributes {stable_mosaic.version = 11 : i64} {
  func.func @_matmul_bias_act_kernel(%arg0: i32, %arg1: memref<256x1152xbf16, #tpu.memory_space<vmem>>, %arg2: memref<1152x128xbf16, #tpu.memory_space<vmem>>, %arg3: memref<1x128xf32, #tpu.memory_space<vmem>>, %arg4: memref<256x128xf32, #tpu.memory_space<vmem>>) attributes {dimension_semantics = [#tpu.dimension_semantics<parallel>], iteration_bounds = array<i64: 7>, scalar_prefetch = 0 : i64, scratch_operands = 0 : i64, tpu.core_type = #tpu.core_type<tc>, window_params = [{transform_indices = @transform_0, window_bounds = array<i64: 256, 1152>}, {pipeline_mode = #tpu.pipeline_mode<synchronous>, transform_indices = @transform_1, window_bounds = array<i64: 1152, 128>}, {pipeline_mode = #tpu.pipeline_mode<synchronous>, transform_indices = @transform_2, window_bounds = array<i64: 1, 128>}, {transform_indices = @transform_3, window_bounds = array<i64: 256, 128>}]} {
    %c0 = arith.constant 0 : index
    %c0_0 = arith.constant 0 : index
    %0 = vector.load %arg1[%c0, %c0_0] : memref<256x1152xbf16, #tpu.memory_space<vmem>>, vector<256x1152xbf16>
    %c0_1 = arith.constant 0 : index
    %c0_2 = arith.constant 0 : index
    %1 = vector.load %arg2[%c0_1, %c0_2] : memref<1152x128xbf16, #tpu.memory_space<vmem>>, vector<1152x128xbf16>
    %cst = arith.constant dense<0.000000e+00> : vector<256x128xf32>
    %2 = tpu.matmul %0, %1, %cst {dimension_numbers = #tpu.dot_dimension_numbers<[1], [0], [0], [1], [0, 0, 1, 1], [], []>} : vector<256x1152xbf16>, vector<1152x128xbf16>, vector<256x128xf32> -> vector<256x128xf32>
    %c0_3 = arith.constant 0 : index
    %c0_4 = arith.constant 0 : index
    %3 = vector.load %arg3[%c0_3, %c0_4] : memref<1x128xf32, #tpu.memory_space<vmem>>, vector<1x128xf32>
    %4 = vector.broadcast %3 : vector<1x128xf32> to vector<256x128xf32>
    %5 = arith.addf %2, %4 : vector<256x128xf32>
    %c0_5 = arith.constant 0 : index
    %c0_6 = arith.constant 0 : index
    %6 = vector.load %arg4[%c0_5, %c0_6] : memref<256x128xf32, #tpu.memory_space<vmem>>, vector<256x128xf32>
    tpu.vector_store %arg4[%c0_5, %c0_6], %5 {strides = array<i32>} : memref<256x128xf32, #tpu.memory_space<vmem>>, vector<256x128xf32>,
    return
  }
  func.func @transform_0(%arg0: i32) -> (i32, i32) {
    %c0_i32 = arith.constant 0 : i32
    %c0_i32_0 = arith.constant 0 : i32
    return %arg0, %c0_i32 : i32, i32
  }
  func.func @transform_1(%arg0: i32) -> (i32, i32) {
    %c0_i32 = arith.constant 0 : i32
    %c0_i32_0 = arith.constant 0 : i32
    %c0_i32_1 = arith.constant 0 : i32
    return %c0_i32, %c0_i32_0 : i32, i32
  }
  func.func @transform_2(%arg0: i32) -> (i32, i32) {
    %c0_i32 = arith.constant 0 : i32
    %c0_i32_0 = arith.constant 0 : i32
    %c0_i32_1 = arith.constant 0 : i32
    return %c0_i32, %c0_i32_0 : i32, i32
  }
  func.func @transform_3(%arg0: i32) -> (i32, i32) {
    %c0_i32 = arith.constant 0 : i32
    %c0_i32_0 = arith.constant 0 : i32
    return %arg0, %c0_i32 : i32, i32
  }
}

</mosaic_0001>

<bundles_post_ra>
// kernel: _lambda_.7
= control target key start
LH: loop header
LB: loop body
LE: loop exit
PB: predicated region body
PF: predicated region fallthrough
CT: control target
= control target key end

     0   :  { %s806_s12 = smov 0   ;;  %s938_s0 = inlined_call_operand.vmem [shape: bf16[512,25], index: 0, kind: input, shape index: {}]   ;;  %s939_s1 = inlined_call_operand.vmem [shape: bf16[25,128], index: 1, kind: input, shape index: {}]   ;;  %s940_s2 = inlined_call_operand.vmem [shape: f32[1,128], index: 2, kind: input, shape index: {}]   ;;  %s941_s3 = inlined_call_operand.vmem [shape: f32[512,128], index: 3, kind: output, shape index: {}]  }
   0x1 LB: > { %s646_s13 = sadd.s32 4294967295, %s783_s12   ;;  %p650_p0 = scmp.ge.s32.totalorder %s783_s12, 1  ;;  %s783_s12 = sphi %s806_s12, %s13_s12  }
   0x2   : > { %p138_p1 = scmp.lt.s32.totalorder %s783_s12, 3 }
   0x4   : > { %p139_p2 = pnand %p650_p0, %p138_p1 }
   0x5   : > { %v759_v0 = vld [vmem:[%s939_s1] sm:$0xff] (!%p139_p2)   ;;  %vm358_vm0 = vcmask (!%p139_p2), 1043456   ;;  %v760_v1 = vld [vmem:[%s939_s1 + $0x8] sm:$0x1f] (!%p139_p2)   ;;  %vm359_vm1 = vcmask (!%p139_p2), 1044480   ;;  %s651_s18 = sshll.u32 (!%p139_p2), %s646_s13, 5 }
   0x6   : > { %142 = sbr.rel (%p139_p2) target bundleno = 263 (0x107), region = 32  ;;  %710 = vmatprep.subr.bf16.mxu0 (!%p139_p2), %v759_v0  ;;  %746 = vmatprep.subr.bf16.mxu1 (!%p139_p2), %v759_v0  ;;  %v785_v2 = vmov (!%p139_p2), 65535   ;;  %p163_p3 = scmp.lt.s32.totalorder (!%p139_p2), %s651_s18, 63  ;;  %vm309_vm2 = vcmask (!%p139_p2), 203776   ;;  %v863_v22 = vld [vmem:[%s940_s2] ss:$0 sm:$0xff] (!%p139_p2) }
   0x7   : > { %711 = vmatpush3.bf16.msra.mxu0 (!%p139_p2), %v759_v0  ;;  %748 = vmatpush3.bf16.msra.mxu1 (!%p139_p2), %v759_v0  ;;  %v360_v3 = vsel (!%p139_p2), %vm358_vm0, 4294967295, %v785_v2 }
   0x8   : > { %v361_v4 = vsel (!%p139_p2), %vm359_vm1, %v360_v3, 0 }
   0x9   : > { %v363_v5 = vand.u32 (!%p139_p2), %v760_v1, %v361_v4 }
   0xb   : > { %712 = vmatprep.subr.bf16.mxu0 (!%p139_p2), %v363_v5  ;;  %747 = vmatprep.subr.bf16.mxu1 (!%p139_p2), %v363_v5 }
   0xc   : > { %713 = vmatpush3.bf16.msra.mxu0 (!%p139_p2), %v363_v5  ;;  %749 = vmatpush3.bf16.msra.mxu1 (!%p139_p2), %v363_v5 }
   0xd   : > { %s943_s18 = smov (!%p163_p3, %s651_s18), 63 }
   0xe   : > { %s652_s19 = sshll.u32 %s943_s18, 2  ;;  %s654_s25 = sshll.u32 %s943_s18, 3 }
   0xf   : > { %s826_s22 = scalar_lea.vmem %s938_s0, %s652_s19  ;;  %s870_s28 = scalar_lea.vmem %s941_s3, %s654_s25 }
  0x10   : > { %v761_v6 = vld [vmem:[%s826_s22] sm:$0xff]   ;;  %v763_v8 = vld [vmem:[%s826_s22 + $0x8] sm:$0xff]   ;;  %v765_v10 = vld [vmem:[%s826_s22 + $0x10] sm:$0xff]  }
  0x11   : > { %v762_v7 = vld [vmem:[%s826_s22 + $0x40] sm:$0xff]   ;;  %714 = vmatprep.mubr.msk.bf16.mxu0 %vm309_vm2, %v761_v6  ;;  %v764_v9 = vld [vmem:[%s826_s22 + $0x48] sm:$0xff]   ;;  %v766_v11 = vld [vmem:[%s826_s22 + $0x50] sm:$0xff]  }
  0x12   : > { %730 = vmatprep.mubr.msk.bf16.mxu1 %vm309_vm2, %v762_v7  ;;  %715 = vmatmul.mubr.msk.bf16.vlgmr.msra.gmra.mrb[0].mxu0 %vm309_vm2, %v763_v8  ;;  %v767_v12 = vld [vmem:[%s826_s22 + $0x18] sm:$0xff]   ;;  %v769_v14 = vld [vmem:[%s826_s22 + $0x20] sm:$0xff]   ;;  %v771_v16 = vld [vmem:[%s826_s22 + $0x28] sm:$0xff]  }
  0x13   : > { %731 = vmatmul.mubr.msk.bf16.vlgmr.msra.gmra.mrb[0].mxu1 %vm309_vm2, %v764_v9  ;;  %718 = vmatprep.mubr.msk.bf16.mxu0 %vm309_vm2, %v765_v10  ;;  %v768_v13 = vld [vmem:[%s826_s22 + $0x58] sm:$0xff]   ;;  %v770_v15 = vld [vmem:[%s826_s22 + $0x60] sm:$0xff]   ;;  %v772_v17 = vld [vmem:[%s826_s22 + $0x68] sm:$0xff]  }
  0x14   : > { %734 = vmatprep.mubr.msk.bf16.mxu1 %vm309_vm2, %v766_v11  ;;  %v773_v18 = vld [vmem:[%s826_s22 + $0x30] sm:$0xff]   ;;  %v775_v20 = vld [vmem:[%s826_s22 + $0x38] sm:$0xff]  }
  0x15   : > { %v774_v19 = vld [vmem:[%s826_s22 + $0x70] sm:$0xff]   ;;  %v776_v21 = vld [vmem:[%s826_s22 + $0x78] sm:$0xff]  }
  0x1a   : > { %719 = vmatmul.mubr.msk.bf16.gmra.mrb[4].mxu0 %vm309_vm2, %v767_v12 }
  0x1b   : > { %735 = vmatmul.mubr.msk.bf16.gmra.mrb[4].mxu1 %vm309_vm2, %v768_v13  ;;  %722 = vmatprep.mubr.msk.bf16.mxu0 %vm309_vm2, %v769_v14 }
  0x1c   : > { %738 = vmatprep.mubr.msk.bf16.mxu1 %vm309_vm2, %v770_v15 }
  0x22   : > { %723 = vmatmul.mubr.msk.bf16.gmra.mrb[8].mxu0 %vm309_vm2, %v771_v16 }
  0x23   : > { %739 = vmatmul.mubr.msk.bf16.gmra.mrb[8].mxu1 %vm309_vm2, %v772_v17  ;;  %726 = vmatprep.mubr.msk.bf16.mxu0 %vm309_vm2, %v773_v18 }
  0x24   : > { %742 = vmatprep.mubr.msk.bf16.mxu1 %vm309_vm2, %v774_v19 }
  0x2a   : > { %727 = vmatmul.mubr.msk.bf16.gmra.mrb[12].mxu0 %vm309_vm2, %v775_v20 }
  0x2b   : > { %743 = vmatmul.mubr.msk.bf16.gmra.mrb[12].mxu1 %vm309_vm2, %v776_v21 }
  0xe5   : > { %v716_v23 = vpop.f32.mrb[0].mxu0 }
  0xe6   : > { %v408_v24 = vadd.f32 %v716_v23, %v863_v22  ;;  %v732_v25 = vpop.f32.mrb[0].mxu1  ;;  %v399_v26 = vpop.f32.mrb[1].mxu0 }
  0xe7   : > { %v472_v27 = vadd.f32 %v732_v25, %v863_v22  ;;  %v400_v28 = vadd.f32 %v863_v22, %v399_v26  ;;  %v463_v29 = vpop.f32.mrb[1].mxu1  ;;  %v717_v30 = vpop.f32.mrb[2].mxu0 }
  0xe8   : > { %v528_v31 = vmax.f32 %v408_v24, 0.0  ;;  %v464_v32 = vadd.f32 %v863_v22, %v463_v29  ;;  %v411_v33 = vadd.f32 %v717_v30, %v863_v22  ;;  %v733_v34 = vpop.f32.mrb[2].mxu1  ;;  %v402_v35 = vpop.f32.mrb[3].mxu0 }
  0xe9   : > { %v544_v36 = vmax.f32 %v472_v27, 0.0  ;;  %v526_v37 = vmax.f32 %v400_v28, 0.0  ;;  %v475_v38 = vadd.f32 %v733_v34, %v863_v22  ;;  %v403_v39 = vadd.f32 %v863_v22, %v402_v35  ;;  %v466_v40 = vpop.f32.mrb[3].mxu1 }
  0xea   : > { %560 = vst [vmem:[%s870_s28 + $0x10] sm:$0xff] %v528_v31  ;;  %v542_v41 = vmax.f32 %v464_v32, 0.0  ;;  %v529_v42 = vmax.f32 %v411_v33, 0.0  ;;  %v467_v43 = vadd.f32 %v863_v22, %v466_v40 }
  0xeb   : > { %576 = vst [vmem:[%s870_s28 + $0x90] sm:$0xff] %v544_v36  ;;  %558 = vst [vmem:[%s870_s28] sm:$0xff] %v526_v37  ;;  %v545_v44 = vmax.f32 %v475_v38, 0.0  ;;  %v527_v45 = vmax.f32 %v403_v39, 0.0 }
  0xec   : > { %574 = vst [vmem:[%s870_s28 + $0x80] sm:$0xff] %v542_v41  ;;  %561 = vst [vmem:[%s870_s28 + $0x18] sm:$0xff] %v529_v42  ;;  %v543_v46 = vmax.f32 %v467_v43, 0.0 }
  0xed   : > { %577 = vst [vmem:[%s870_s28 + $0x98] sm:$0xff] %v545_v44  ;;  %559 = vst [vmem:[%s870_s28 + $0x8] sm:$0xff] %v527_v45  ;;  %v720_v47 = vpop.f32.mrb[4].mxu0 }
  0xee   : > { %575 = vst [vmem:[%s870_s28 + $0x88] sm:$0xff] %v543_v46  ;;  %v424_v48 = vadd.f32 %v720_v47, %v863_v22  ;;  %v736_v49 = vpop.f32.mrb[4].mxu1  ;;  %v415_v50 = vpop.f32.mrb[5].mxu0 }
  0xef   : > { %v488_v51 = vadd.f32 %v736_v49, %v863_v22  ;;  %v416_v52 = vadd.f32 %v863_v22, %v415_v50  ;;  %v479_v53 = vpop.f32.mrb[5].mxu1  ;;  %v721_v54 = vpop.f32.mrb[6].mxu0 }
  0xf0   : > { %v532_v55 = vmax.f32 %v424_v48, 0.0  ;;  %v480_v56 = vadd.f32 %v863_v22, %v479_v53  ;;  %v427_v57 = vadd.f32 %v721_v54, %v863_v22  ;;  %v737_v58 = vpop.f32.mrb[6].mxu1  ;;  %v418_v59 = vpop.f32.mrb[7].mxu0 }
  0xf1   : > { %v548_v60 = vmax.f32 %v488_v51, 0.0  ;;  %v530_v61 = vmax.f32 %v416_v52, 0.0  ;;  %v491_v62 = vadd.f32 %v737_v58, %v863_v22  ;;  %v419_v63 = vadd.f32 %v863_v22, %v418_v59  ;;  %v482_v0 = vpop.f32.mrb[7].mxu1 }
  0xf2   : > { %564 = vst [vmem:[%s870_s28 + $0x30] sm:$0xff] %v532_v55  ;;  %v546_v1 = vmax.f32 %v480_v56, 0.0  ;;  %v533_v2 = vmax.f32 %v427_v57, 0.0  ;;  %v483_v3 = vadd.f32 %v863_v22, %v482_v0 }
  0xf3   : > { %580 = vst [vmem:[%s870_s28 + $0xb0] sm:$0xff] %v548_v60  ;;  %562 = vst [vmem:[%s870_s28 + $0x20] sm:$0xff] %v530_v61  ;;  %v549_v4 = vmax.f32 %v491_v62, 0.0  ;;  %v531_v5 = vmax.f32 %v419_v63, 0.0 }
  0xf4   : > { %578 = vst [vmem:[%s870_s28 + $0xa0] sm:$0xff] %v546_v1  ;;  %565 = vst [vmem:[%s870_s28 + $0x38] sm:$0xff] %v533_v2  ;;  %v547_v6 = vmax.f32 %v483_v3, 0.0 }
  0xf5   : > { %581 = vst [vmem:[%s870_s28 + $0xb8] sm:$0xff] %v549_v4  ;;  %563 = vst [vmem:[%s870_s28 + $0x28] sm:$0xff] %v531_v5  ;;  %v724_v7 = vpop.f32.mrb[8].mxu0 }
  0xf6   : > { %579 = vst [vmem:[%s870_s28 + $0xa8] sm:$0xff] %v547_v6  ;;  %v440_v8 = vadd.f32 %v724_v7, %v863_v22  ;;  %v740_v9 = vpop.f32.mrb[8].mxu1  ;;  %v431_v10 = vpop.f32.mrb[9].mxu0 }
  0xf7   : > { %v504_v11 = vadd.f32 %v740_v9, %v863_v22  ;;  %v432_v12 = vadd.f32 %v863_v22, %v431_v10  ;;  %v495_v13 = vpop.f32.mrb[9].mxu1  ;;  %v725_v14 = vpop.f32.mrb[10].mxu0 }
  0xf8   : > { %v536_v15 = vmax.f32 %v440_v8, 0.0  ;;  %v496_v16 = vadd.f32 %v863_v22, %v495_v13  ;;  %v443_v17 = vadd.f32 %v725_v14, %v863_v22  ;;  %v741_v18 = vpop.f32.mrb[10].mxu1  ;;  %v434_v19 = vpop.f32.mrb[11].mxu0 }
  0xf9   : > { %v552_v20 = vmax.f32 %v504_v11, 0.0  ;;  %v534_v21 = vmax.f32 %v432_v12, 0.0  ;;  %v507_v23 = vadd.f32 %v741_v18, %v863_v22  ;;  %v435_v24 = vadd.f32 %v863_v22, %v434_v19  ;;  %v498_v25 = vpop.f32.mrb[11].mxu1 }
  0xfa   : > { %568 = vst [vmem:[%s870_s28 + $0x50] sm:$0xff] %v536_v15  ;;  %v550_v26 = vmax.f32 %v496_v16, 0.0  ;;  %v537_v27 = vmax.f32 %v443_v17, 0.0  ;;  %v499_v28 = vadd.f32 %v863_v22, %v498_v25 }
  0xfb   : > { %584 = vst [vmem:[%s870_s28 + $0xd0] sm:$0xff] %v552_v20  ;;  %566 = vst [vmem:[%s870_s28 + $0x40] sm:$0xff] %v534_v21  ;;  %v553_v29 = vmax.f32 %v507_v23, 0.0  ;;  %v535_v30 = vmax.f32 %v435_v24, 0.0 }
  0xfc   : > { %582 = vst [vmem:[%s870_s28 + $0xc0] sm:$0xff] %v550_v26  ;;  %569 = vst [vmem:[%s870_s28 + $0x58] sm:$0xff] %v537_v27  ;;  %v551_v31 = vmax.f32 %v499_v28, 0.0 }
  0xfd   : > { %585 = vst [vmem:[%s870_s28 + $0xd8] sm:$0xff] %v553_v29  ;;  %567 = vst [vmem:[%s870_s28 + $0x48] sm:$0xff] %v535_v30  ;;  %v728_v32 = vpop.f32.mrb[12].mxu0 }
  0xfe   : > { %583 = vst [vmem:[%s870_s28 + $0xc8] sm:$0xff] %v551_v31  ;;  %v456_v33 = vadd.f32 %v728_v32, %v863_v22  ;;  %v744_v34 = vpop.f32.mrb[12].mxu1  ;;  %v447_v35 = vpop.f32.mrb[13].mxu0 }
  0xff   : > { %v520_v36 = vadd.f32 %v744_v34, %v863_v22  ;;  %v448_v37 = vadd.f32 %v863_v22, %v447_v35  ;;  %v511_v38 = vpop.f32.mrb[13].mxu1  ;;  %v729_v39 = vpop.f32.mrb[14].mxu0 }
 0x100   : > { %v540_v40 = vmax.f32 %v456_v33, 0.0  ;;  %v512_v41 = vadd.f32 %v863_v22, %v511_v38  ;;  %v459_v42 = vadd.f32 %v729_v39, %v863_v22  ;;  %v745_v43 = vpop.f32.mrb[14].mxu1  ;;  %v450_v44 = vpop.f32.mrb[15].mxu0 }
 0x101   : > { %v556_v45 = vmax.f32 %v520_v36, 0.0  ;;  %v538_v46 = vmax.f32 %v448_v37, 0.0  ;;  %v523_v47 = vadd.f32 %v745_v43, %v863_v22  ;;  %v451_v48 = vadd.f32 %v863_v22, %v450_v44  ;;  %v514_v49 = vpop.f32.mrb[15].mxu1 }
 0x102   : > { %572 = vst [vmem:[%s870_s28 + $0x70] sm:$0xff] %v540_v40  ;;  %v554_v50 = vmax.f32 %v512_v41, 0.0  ;;  %v541_v51 = vmax.f32 %v459_v42, 0.0  ;;  %v515_v52 = vadd.f32 %v863_v22, %v514_v49 }
 0x103   : > { %588 = vst [vmem:[%s870_s28 + $0xf0] sm:$0xff] %v556_v45  ;;  %570 = vst [vmem:[%s870_s28 + $0x60] sm:$0xff] %v538_v46  ;;  %v557_v53 = vmax.f32 %v523_v47, 0.0  ;;  %v539_v54 = vmax.f32 %v451_v48, 0.0 }
 0x104   : > { %586 = vst [vmem:[%s870_s28 + $0xe0] sm:$0xff] %v554_v50  ;;  %573 = vst [vmem:[%s870_s28 + $0x78] sm:$0xff] %v541_v51  ;;  %v555_v55 = vmax.f32 %v515_v52, 0.0 }
 0x105   : > { %589 = vst [vmem:[%s870_s28 + $0xf8] sm:$0xff] %v557_v53  ;;  %571 = vst [vmem:[%s870_s28 + $0x68] sm:$0xff] %v539_v54 }
 0x106   : > { %587 = vst [vmem:[%s870_s28 + $0xe8] sm:$0xff] %v555_v55 }
 0x107 PF: > { %s13_s12 = sadd.s32 1, %s783_s12  }
 0x108   : > { %p10_p4 = scmp.ge.s32.totalorder %s13_s12, 4  }
 0x10a   :  { %12 = sbr.rel (!%p10_p4) target bundleno = 1 (0x1), region = 62 }

// kernel: _lambda_.8
= control target key start
LH: loop header
LB: loop body
LE: loop exit
PB: predicated region body
PF: predicated region fallthrough
CT: control target
= control target key end

     0   :  { %v1553_v38 = vmov 0.0   ;;  %vm1554_vm0 = vmmov 0   ;;  %vm708_vm1 = vcmask 261120   ;;  %s1982_s1 = inlined_call_operand.vmem [shape: bf16[800,128], index: 1, kind: input, shape index: {}]   ;;  %s1983_s0 = inlined_call_operand.vmem [shape: bf16[104,800], index: 0, kind: input, shape index: {}]   ;;  %s1984_s2 = inlined_call_operand.vmem [shape: f32[1,128], index: 2, kind: input, shape index: {}]   ;;  %s1985_s3 = inlined_call_operand.vmem [shape: f32[104,128], index: 3, kind: output, shape index: {}]  }
   0x1   :  { %v1436_v0 = vld [vmem:[%s1982_s1 + $0x40] sm:$0xff]   ;;  %v1440_v4 = vld [vmem:[%s1982_s1 + $0x48] sm:$0xff]   ;;  %v1444_v8 = vld [vmem:[%s1982_s1 + $0x50] sm:$0xff]  }
   0x2   :  { %v1437_v1 = vld [vmem:[%s1982_s1] sm:$0xff]   ;;  %1219 = vmatprep.subr.bf16.mxu0 %v1436_v0  ;;  %v1441_v5 = vld [vmem:[%s1982_s1 + $0x8] sm:$0xff]   ;;  %v1445_v9 = vld [vmem:[%s1982_s1 + $0x10] sm:$0xff]  }
   0x3   :  { %v1438_v2 = vld [vmem:[%s1982_s1 + $0xc0] sm:$0xff]   ;;  %1220 = vmatpush3.bf16.msra.mxu0 %v1437_v1  ;;  %v1442_v6 = vld [vmem:[%s1982_s1 + $0xc8] sm:$0xff]   ;;  %v1446_v10 = vld [vmem:[%s1982_s1 + $0xd0] sm:$0xff]  }
   0x4   :  { %v1439_v3 = vld [vmem:[%s1982_s1 + $0x80] sm:$0xff]   ;;  %1277 = vmatprep.subr.bf16.mxu1 %v1438_v2  ;;  %1221 = vmatprep.subr.bf16.mxu0 %v1440_v4  ;;  %v1443_v7 = vld [vmem:[%s1982_s1 + $0x88] sm:$0xff]   ;;  %v1447_v11 = vld [vmem:[%s1982_s1 + $0x90] sm:$0xff]  }
   0x5   :  { %1278 = vmatpush3.bf16.msra.mxu1 %v1439_v3  ;;  %v1448_v12 = vld [vmem:[%s1982_s1 + $0x58] sm:$0xff]   ;;  %v1452_v16 = vld [vmem:[%s1982_s1 + $0x60] sm:$0xff]   ;;  %v1456_v20 = vld [vmem:[%s1982_s1 + $0x68] sm:$0xff]  }
   0x6   :  { %1279 = vmatprep.subr.bf16.mxu1 %v1442_v6  ;;  %v1449_v13 = vld [vmem:[%s1982_s1 + $0x18] sm:$0xff]   ;;  %v1453_v17 = vld [vmem:[%s1982_s1 + $0x20] sm:$0xff]   ;;  %v1457_v21 = vld [vmem:[%s1982_s1 + $0x28] sm:$0xff]  }
   0x7   :  { %1222 = vmatpush3.bf16.msra.mxu0 %v1441_v5  ;;  %v1450_v14 = vld [vmem:[%s1982_s1 + $0xd8] sm:$0xff]   ;;  %v1454_v18 = vld [vmem:[%s1982_s1 + $0xe0] sm:$0xff]   ;;  %v1458_v22 = vld [vmem:[%s1982_s1 + $0xe8] sm:$0xff]  }
   0x8   :  { %1223 = vmatprep.subr.bf16.mxu0 %v1444_v8  ;;  %v1451_v15 = vld [vmem:[%s1982_s1 + $0x98] sm:$0xff]   ;;  %v1455_v19 = vld [vmem:[%s1982_s1 + $0xa0] sm:$0xff]   ;;  %v1459_v23 = vld [vmem:[%s1982_s1 + $0xa8] sm:$0xff]  }
   0x9   :  { %1280 = vmatpush3.bf16.msra.mxu1 %v1443_v7  ;;  %v1460_v24 = vld [vmem:[%s1982_s1 + $0x70] sm:$0xff]   ;;  %v1464_v28 = vld [vmem:[%s1982_s1 + $0x78] sm:$0xff]   ;;  %v1469_v32 = vld [vmem:[%s1983_s0 + $0x4] ss:$28 sps:$4 sm:$0xff]  }
   0xa   :  { %1281 = vmatprep.subr.bf16.mxu1 %v1446_v10  ;;  %v1461_v25 = vld [vmem:[%s1982_s1 + $0x30] sm:$0xff]   ;;  %v1465_v29 = vld [vmem:[%s1982_s1 + $0x38] sm:$0xff]   ;;  %762 = vmatprep.mubr.bf16.mxu0 %v1469_v32  ;;  %v1471_v34 = vld [vmem:[%s1982_s1 + $0x140] sm:$0xff]  }
   0xb   :  { %1224 = vmatpush3.bf16.msra.mxu0 %v1445_v9  ;;  %v1462_v26 = vld [vmem:[%s1982_s1 + $0xf0] sm:$0xff]   ;;  %v1466_v30 = vld [vmem:[%s1982_s1 + $0xf8] sm:$0xff]   ;;  %v1472_v35 = vld [vmem:[%s1983_s0 + $0x8] ss:$28 sps:$4 sm:$0xff]  }
   0xc   :  { %1225 = vmatprep.subr.bf16.mxu0 %v1448_v12  ;;  %v1463_v27 = vld [vmem:[%s1982_s1 + $0xb0] sm:$0xff]   ;;  %v1467_v31 = vld [vmem:[%s1983_s0] ss:$28 sps:$4 sm:$0xff]   ;;  %v1474_v36 = vld [vmem:[%s1983_s0 + $0xc] ss:$28 sps:$4 sm:$0xff]  }
   0xd   :  { %1282 = vmatpush3.bf16.msra.mxu1 %v1447_v11  ;;  %v1470_v33 = vld [vmem:[%s1982_s1 + $0xb8] sm:$0xff]   ;;  %v1475_v37 = vld [vmem:[%s1982_s1 + $0x100] sm:$0xff]   ;;  %850 = vmatprep.mubr.bf16.mxu1 %v1474_v36  ;;  %v1479_v41 = vld [vmem:[%s1982_s1 + $0x148] sm:$0xff]  }
   0xe   :  { %1283 = vmatprep.subr.bf16.mxu1 %v1450_v14  ;;  %v1476_v39 = vld [vmem:[%s1982_s1 + $0x180] sm:$0xff]   ;;  %v1477_v40 = vld [vmem:[%s1983_s0 + $0x3c] ss:$28 sps:$4 sm:$0xff]   ;;  %v1481_v43 = vld [vmem:[%s1982_s1 + $0x108] sm:$0xff]  }
   0xf   :  { %1226 = vmatpush3.bf16.msra.mxu0 %v1449_v13  ;;  %v1480_v42 = vld [vmem:[%s1983_s0 + $0x38] ss:$28 sps:$4 sm:$0xff]   ;;  %v1482_v44 = vld [vmem:[%s1983_s0 + $0x44] ss:$28 sps:$4 sm:$0xff]   ;;  %v1489_v49 = vld [vmem:[%s1983_s0 + $0x70] ss:$28 sps:$4 sm:$0xff]  }
  0x10   :  { %1227 = vmatprep.subr.bf16.mxu0 %v1452_v16  ;;  %v1484_v45 = vld [vmem:[%s1983_s0 + $0x40] ss:$28 sps:$4 sm:$0xff]   ;;  %v1485_v46 = vld [vmem:[%s1982_s1 + $0x150] sm:$0xff]   ;;  %v1495_v53 = vld [vmem:[%s1983_s0 + $0xac] ss:$28 sps:$4 sm:$0xff]  }
  0x11   :  { %1284 = vmatpush3.bf16.msra.mxu1 %v1451_v15  ;;  %v1486_v47 = vld [vmem:[%s1983_s0 + $0x74] ss:$28 sps:$4 sm:$0xff]   ;;  %v1490_v50 = vld [vmem:[%s1983_s0 + $0x7c] ss:$28 sps:$4 sm:$0xff]   ;;  %v1501_v56 = vld [vmem:[%s1982_s1 + $0x160] sm:$0xff]  }
  0x12   :  { %1285 = vmatprep.subr.bf16.mxu1 %v1454_v18  ;;  %v1488_v48 = vld [vmem:[%s1982_s1 + $0x110] sm:$0xff]   ;;  %v1493_v51 = vld [vmem:[%s1982_s1 + $0x158] sm:$0xff]   ;;  %v1502_v57 = vld [vmem:[%s1982_s1 + $0x120] sm:$0xff]  }
  0x13   :  { %1228 = vmatpush3.bf16.msra.mxu0 %v1453_v17  ;;  %v1494_v52 = vld [vmem:[%s1982_s1 + $0x118] sm:$0xff]   ;;  %v1498_v55 = vld [vmem:[%s1983_s0 + $0xb4] ss:$28 sps:$4 sm:$0xff]   ;;  %v1497_v58 = vld [vmem:[%s1983_s0 + $0xa8] ss:$28 sps:$4 sm:$0xff]  }
  0x14   :  { %1229 = vmatprep.subr.bf16.mxu0 %v1456_v20  ;;  %v1492_v54 = vld [vmem:[%s1983_s0 + $0x78] ss:$28 sps:$4 sm:$0xff]   ;;  %v1500_v59 = vld [vmem:[%s1983_s0 + $0xb0] ss:$28 sps:$4 sm:$0xff]   ;;  %v1503_v60 = vld [vmem:[%s1983_s0 + $0xe4] ss:$28 sps:$4 sm:$0xff]  }
  0x15   :  { %1286 = vmatpush3.bf16.msra.mxu1 %v1455_v19  ;;  %v1506_v61 = vld [vmem:[%s1983_s0 + $0xec] ss:$28 sps:$4 sm:$0xff]   ;;  %v1505_v1 = vld [vmem:[%s1983_s0 + $0xe0] ss:$28 sps:$4 sm:$0xff]   ;;  %v1518_v2 = vld [vmem:[%s1982_s1 + $0x170] sm:$0xff]  }
  0x16   :  { %1287 = vmatprep.subr.bf16.mxu1 %v1458_v22  ;;  %v1509_v62 = vld [vmem:[%s1982_s1 + $0x188] sm:$0xff]   ;;  %v1519_v3 = vld [vmem:[%s1982_s1 + $0x130] sm:$0xff]   ;;  %v1512_v5 = vld [vmem:[%s1983_s0 + $0x11c] ss:$28 sps:$4 sm:$0xff]  }
  0x17   :  { %1230 = vmatpush3.bf16.msra.mxu0 %v1457_v21  ;;  %v1510_v63 = vld [vmem:[%s1982_s1 + $0x168] sm:$0xff]   ;;  %v1523_v6 = vld [vmem:[%s1982_s1 + $0x178] sm:$0xff]   ;;  %v1515_v8 = vld [vmem:[%s1983_s0 + $0x124] ss:$28 sps:$4 sm:$0xff]  }
  0x18   :  { %1231 = vmatprep.subr.bf16.mxu0 %v1460_v24  ;;  %v1511_v0 = vld [vmem:[%s1982_s1 + $0x128] sm:$0xff]   ;;  %v1525_v7 = vld [vmem:[%s1982_s1 + $0x138] sm:$0xff]   ;;  %v63_v9 = vld [vmem:[%s1983_s0 + $0x150] sm:$0xff] }
  0x19   :  { %1288 = vmatpush3.bf16.msra.mxu1 %v1459_v23  ;;  %v1508_v4 = vld [vmem:[%s1983_s0 + $0xe8] ss:$28 sps:$4 sm:$0xff]   ;;  %v1514_v10 = vld [vmem:[%s1983_s0 + $0x118] ss:$28 sps:$4 sm:$0xff]   ;;  %v1156_v11 = vcombine.high %v63_v9, %v63_v9  ;;  %v1517_v13 = vld [vmem:[%s1983_s0 + $0x120] ss:$28 sps:$4 sm:$0xff]   ;;  %v1155_v15 = vcombine.low %v63_v9, %v63_v9 }
  0x1a   :  { %1289 = vmatprep.subr.bf16.mxu1 %v1462_v26  ;;  %v64_v12 = vld [vmem:[%s1983_s0 + $0x158] sm:$0xff]  ;;  %v1528_v16 = vld [vmem:[%s1983_s0 + $0x14] ss:$28 sps:$4 sm:$0xff]   ;;  %v1530_v19 = vld [vmem:[%s1983_s0 + $0x4c] ss:$28 sps:$4 sm:$0xff]  }
  0x1b   :  { %1232 = vmatpush3.bf16.msra.mxu0 %v1461_v25  ;;  %v1158_v14 = vcombine.high %v64_v12, %v64_v12  ;;  %v1157_v17 = vcombine.low %v64_v12, %v64_v12  ;;  %v1526_v18 = vld [vmem:[%s1983_s0 + $0x10] ss:$28 sps:$4 sm:$0xff]   ;;  %v1529_v20 = vld [vmem:[%s1983_s0 + $0x18] ss:$28 sps:$4 sm:$0xff]   ;;  %v1532_v21 = vld [vmem:[%s1983_s0 + $0x48] ss:$28 sps:$4 sm:$0xff]  }
  0x1c   :  { %1233 = vmatprep.subr.bf16.mxu0 %v1464_v28  ;;  %v1534_v22 = vld [vmem:[%s1983_s0 + $0x84] ss:$28 sps:$4 sm:$0xff]   ;;  %v1533_v23 = vld [vmem:[%s1983_s0 + $0x50] ss:$28 sps:$4 sm:$0xff]   ;;  %v1538_v25 = vld [vmem:[%s1983_s0 + $0xbc] ss:$28 sps:$4 sm:$0xff]  }
  0x1d   :  { %1290 = vmatpush3.bf16.msra.mxu1 %v1463_v27  ;;  %v1536_v24 = vld [vmem:[%s1983_s0 + $0x80] ss:$28 sps:$4 sm:$0xff]   ;;  %v1537_v26 = vld [vmem:[%s1983_s0 + $0x88] ss:$28 sps:$4 sm:$0xff]   ;;  %v1540_v27 = vld [vmem:[%s1983_s0 + $0xb8] ss:$28 sps:$4 sm:$0xff]  }
  0x1e   :  { %1291 = vmatprep.subr.bf16.mxu1 %v1466_v30  ;;  %v1542_v28 = vld [vmem:[%s1983_s0 + $0xf4] ss:$28 sps:$4 sm:$0xff]  }
  0x1f   :  { %1234 = vmatpush3.bf16.msra.mxu0 %v1465_v29  ;;  %v1541_v29 = vld [vmem:[%s1983_s0 + $0xc0] ss:$28 sps:$4 sm:$0xff]   ;;  %v1544_v30 = vld [vmem:[%s1983_s0 + $0xf0] ss:$28 sps:$4 sm:$0xff]   ;;  %v1545_v32 = vld [vmem:[%s1983_s0 + $0xf8] ss:$28 sps:$4 sm:$0xff]  }
  0x20   :  { %1335 = vmatprep.subr.bf16.mxu0 %v1471_v34  ;;  %v1548_v34 = vld [vmem:[%s1983_s0 + $0x128] ss:$28 sps:$4 sm:$0xff]   ;;  %v1549_v36 = vld [vmem:[%s1983_s0 + $0x130] ss:$28 sps:$4 sm:$0xff]  }
  0x21   :  { %1292 = vmatpush3.bf16.msra.mxu1 %v1470_v33  ;;  %v65_v33 = vld [vmem:[%s1983_s0 + $0x160] sm:$0xff] }
  0x22   :  { %763 = vmatmul.mubr.bf16.vlgmr.msra.gmra.mrb[0].mxu0 %v1467_v31  ;;  %1402 = vmatprep.subr.bf16.mxu1 %v1553_v38  ;;  %v1546_v31 = vld [vmem:[%s1983_s0 + $0x12c] ss:$28 sps:$4 sm:$0xff]  }
  0x23   :  { %1336 = vmatpush3.bf16.msra.mxu0 %v1475_v37  ;;  %770 = vmatprep.mubr.bf16.mxu0 %v1477_v40  ;;  %v1159_v37 = vcombine.low %v65_v33, %v65_v33 }
  0x24   :  { %851 = vmatmul.mubr.bf16.vlgmr.msra.gmra.mrb[0].mxu1 %v1472_v35  ;;  %1337 = vmatprep.subr.bf16.mxu0 %v1479_v41  ;;  %v1160_v35 = vcombine.high %v65_v33, %v65_v33  ;;  %v1889_v41 = vld [vmem:[%s1984_s2] ss:$0 sm:$0xff] }
  0x25   :  { %1403 = vmatpush3.bf16.msra.mxu1 %v1476_v39  ;;  %858 = vmatprep.mubr.bf16.mxu1 %v1482_v44  ;;  %v1552_v39 = vld [vmem:[%s1983_s0 + $0x168] ss:$0 sps:$4 sm:$0xff]  }
  0x26   :  { %1404 = vmatprep.subr.bf16.mxu1 %v1553_v38 }
  0x27   :  { %1338 = vmatpush3.bf16.msra.mxu0 %v1481_v43 }
  0x28   :  { %1339 = vmatprep.subr.bf16.mxu0 %v1485_v46 }
  0x29   :  { %1405 = vmatpush3.bf16.msra.mxu1 %v1509_v62 }
  0x2a   :  { %771 = vmatmul.mubr.bf16.gmra.mrb[4].mxu0 %v1480_v42 }
  0x2b   :  { %778 = vmatprep.mubr.bf16.mxu0 %v1486_v47  ;;  %1340 = vmatpush3.bf16.msra.mxu0 %v1488_v48 }
  0x2c   :  { %859 = vmatmul.mubr.bf16.gmra.mrb[4].mxu1 %v1484_v45  ;;  %1341 = vmatprep.subr.bf16.mxu0 %v1493_v51 }
  0x2d   :  { %866 = vmatprep.mubr.bf16.mxu1 %v1490_v50 }
  0x2f   :  { %1342 = vmatpush3.bf16.msra.mxu0 %v1494_v52 }
  0x30   :  { %1343 = vmatprep.subr.bf16.mxu0 %v1501_v56 }
  0x32   :  { %779 = vmatmul.mubr.bf16.gmra.mrb[8].mxu0 %v1489_v49 }
  0x33   :  { %786 = vmatprep.mubr.bf16.mxu0 %v1495_v53  ;;  %1344 = vmatpush3.bf16.msra.mxu0 %v1502_v57 }
  0x34   :  { %867 = vmatmul.mubr.bf16.gmra.mrb[8].mxu1 %v1492_v54  ;;  %1345 = vmatprep.subr.bf16.mxu0 %v1510_v63 }
  0x35   :  { %874 = vmatprep.mubr.bf16.mxu1 %v1498_v55 }
  0x37   :  { %1346 = vmatpush3.bf16.msra.mxu0 %v1511_v0 }
  0x38   :  { %1347 = vmatprep.subr.bf16.mxu0 %v1518_v2 }
  0x3a   :  { %787 = vmatmul.mubr.bf16.gmra.mrb[12].mxu0 %v1497_v58 }
  0x3b   :  { %794 = vmatprep.mubr.bf16.mxu0 %v1503_v60  ;;  %1348 = vmatpush3.bf16.msra.mxu0 %v1519_v3 }
  0x3c   :  { %875 = vmatmul.mubr.bf16.gmra.mrb[12].mxu1 %v1500_v59  ;;  %1349 = vmatprep.subr.bf16.mxu0 %v1523_v6 }
  0x3d   :  { %882 = vmatprep.mubr.bf16.mxu1 %v1506_v61 }
  0x3f   :  { %1350 = vmatpush3.bf16.msra.mxu0 %v1525_v7 }
  0x42   :  { %795 = vmatmul.mubr.bf16.gmra.mrb[16].mxu0 %v1505_v1 }
  0x43   :  { %802 = vmatprep.mubr.bf16.mxu0 %v1512_v5 }
  0x44   :  { %883 = vmatmul.mubr.bf16.gmra.mrb[16].mxu1 %v1508_v4 }
  0x45   :  { %890 = vmatprep.mubr.bf16.mxu1 %v1515_v8 }
  0x4a   :  { %803 = vmatmul.mubr.bf16.gmra.mrb[20].mxu0 %v1514_v10 }
  0x4b   :  { %810 = vmatprep.mubr.bf16.mxu0 %v1156_v11 }
  0x4c   :  { %891 = vmatmul.mubr.bf16.gmra.mrb[20].mxu1 %v1517_v13 }
  0x4d   :  { %898 = vmatprep.mubr.bf16.mxu1 %v1158_v14 }
  0x52   :  { %811 = vmatmul.mubr.bf16.gmra.mrb[24].mxu0 %v1155_v15 }
  0x53   :  { %938 = vmatprep.mubr.bf16.mxu0 %v1528_v16 }
  0x54   :  { %899 = vmatmul.mubr.bf16.gmra.mrb[24].mxu1 %v1157_v17 }
  0x55   :  { %1406 = vmatprep.mubr.msk.bf16.mxu1 %vm1554_vm0, %v1553_v38 }
  0x5a   :  { %939 = vmatmul.mubr.bf16.vlgmr.msra.gmra.mrb[28].mxu0 %v1526_v18 }
  0x5b   :  { %946 = vmatprep.mubr.bf16.mxu0 %v1530_v19 }
  0x5c   :  { %1407 = vmatmul.mubr.msk.bf16.vlgmr.msra.gmra.mrb[28].mxu1 %vm708_vm1, %v1529_v20 }
  0x5d   :  { %1410 = vmatprep.mubr.msk.bf16.mxu1 %vm1554_vm0, %v1553_v38 }
  0x62   :  { %947 = vmatmul.mubr.bf16.gmra.mrb[32].mxu0 %v1532_v21 }
  0x63   :  { %954 = vmatprep.mubr.bf16.mxu0 %v1534_v22 }
  0x64   :  { %1411 = vmatmul.mubr.msk.bf16.gmra.mrb[32].mxu1 %vm708_vm1, %v1533_v23 }
  0x65   :  { %1414 = vmatprep.mubr.msk.bf16.mxu1 %vm1554_vm0, %v1553_v38 }
  0x6a   :  { %955 = vmatmul.mubr.bf16.gmra.mrb[36].mxu0 %v1536_v24 }
  0x6b   :  { %962 = vmatprep.mubr.bf16.mxu0 %v1538_v25 }
  0x6c   :  { %1415 = vmatmul.mubr.msk.bf16.gmra.mrb[36].mxu1 %vm708_vm1, %v1537_v26 }
  0x6d   :  { %1418 = vmatprep.mubr.msk.bf16.mxu1 %vm1554_vm0, %v1553_v38 }
  0x72   :  { %963 = vmatmul.mubr.bf16.gmra.mrb[40].mxu0 %v1540_v27 }
  0x73   :  { %970 = vmatprep.mubr.bf16.mxu0 %v1542_v28 }
  0x74   :  { %1419 = vmatmul.mubr.msk.bf16.gmra.mrb[40].mxu1 %vm708_vm1, %v1541_v29 }
  0x75   :  { %1422 = vmatprep.mubr.msk.bf16.mxu1 %vm1554_vm0, %v1553_v38 }
  0x7a   :  { %971 = vmatmul.mubr.bf16.gmra.mrb[44].mxu0 %v1544_v30 }
  0x7b   :  { %978 = vmatprep.mubr.bf16.mxu0 %v1546_v31 }
  0x7c   :  { %1423 = vmatmul.mubr.msk.bf16.gmra.mrb[44].mxu1 %vm708_vm1, %v1545_v32 }
  0x7d   :  { %1426 = vmatprep.mubr.msk.bf16.mxu1 %vm1554_vm0, %v1553_v38 }
  0x82   :  { %979 = vmatmul.mubr.bf16.gmra.mrb[48].mxu0 %v1548_v34 }
  0x83   :  { %986 = vmatprep.mubr.bf16.mxu0 %v1160_v35 }
  0x84   :  { %1427 = vmatmul.mubr.msk.bf16.gmra.mrb[48].mxu1 %vm708_vm1, %v1549_v36 }
  0x85   :  { %1430 = vmatprep.mubr.msk.bf16.mxu1 %vm1554_vm0, %v1553_v38 }
  0x8a   :  { %987 = vmatmul.mubr.bf16.gmra.mrb[52].mxu0 %v1159_v37 }
  0x8c   :  { %1431 = vmatmul.mubr.msk.bf16.gmra.mrb[52].mxu1 %vm708_vm1, %v1552_v39 }
  0xf5   :  { %v1235_v40 = vpop.f32.mrb[0].mxu0 }
  0xf6   :  { %v1236_v42 = vpop.f32.mrb[1].mxu0 }
  0xf7   :  { %v1237_v43 = vadd.f32 %v1236_v42, %v1235_v40  ;;  %v1238_v44 = vpop.f32.mrb[2].mxu0  ;;  %v1293_v45 = vpop.f32.mrb[0].mxu1 }
  0xf8   :  { %v1239_v46 = vpop.f32.mrb[3].mxu0  ;;  %v1294_v48 = vpop.f32.mrb[1].mxu1 }
  0xf9   :  { %v765_v38 = vadd.f32 %v1237_v43, %v1889_v41  ;;  %v1240_v47 = vadd.f32 %v1239_v46, %v1238_v44  ;;  %v1295_v49 = vadd.f32 %v1294_v48, %v1293_v45  ;;  %v1296_v50 = vpop.f32.mrb[2].mxu1 }
  0xfa   :  { %v1297_v52 = vpop.f32.mrb[3].mxu1 }
  0xfb   :  { %v768_v51 = vadd.f32 %v1240_v47, %v1889_v41  ;;  %v1893_v53 = vadd.f32 %v1295_v49, %v765_v38  ;;  %v1298_v54 = vadd.f32 %v1297_v52, %v1296_v50 }
  0xfd   :  { %v1241_v55 = vpop.f32.mrb[4].mxu0  ;;  %v1895_v56 = vadd.f32 %v1298_v54, %v768_v51 }
  0xfe   :  { %v1242_v57 = vpop.f32.mrb[5].mxu0 }
  0xff   :  { %v1243_v58 = vadd.f32 %v1242_v57, %v1241_v55  ;;  %v1244_v59 = vpop.f32.mrb[6].mxu0  ;;  %v1299_v60 = vpop.f32.mrb[4].mxu1 }
 0x100   :  { %v1245_v61 = vpop.f32.mrb[7].mxu0  ;;  %v1300_v0 = vpop.f32.mrb[5].mxu1 }
 0x101   :  { %v773_v62 = vadd.f32 %v1243_v58, %v1889_v41  ;;  %v1246_v63 = vadd.f32 %v1245_v61, %v1244_v59  ;;  %v1301_v1 = vadd.f32 %v1300_v0, %v1299_v60  ;;  %v1302_v2 = vpop.f32.mrb[6].mxu1 }
 0x102   :  { %v1303_v4 = vpop.f32.mrb[7].mxu1 }
 0x103   :  { %v776_v3 = vadd.f32 %v1246_v63, %v1889_v41  ;;  %v1899_v5 = vadd.f32 %v1301_v1, %v773_v62  ;;  %v1304_v6 = vadd.f32 %v1303_v4, %v1302_v2 }
 0x105   :  { %v1247_v7 = vpop.f32.mrb[8].mxu0  ;;  %v1901_v8 = vadd.f32 %v1304_v6, %v776_v3 }
 0x106   :  { %v1248_v9 = vpop.f32.mrb[9].mxu0 }
 0x107   :  { %v1249_v10 = vadd.f32 %v1248_v9, %v1247_v7  ;;  %v1250_v11 = vpop.f32.mrb[10].mxu0  ;;  %v1305_v12 = vpop.f32.mrb[8].mxu1 }
 0x108   :  { %v1251_v13 = vpop.f32.mrb[11].mxu0  ;;  %v1306_v16 = vpop.f32.mrb[9].mxu1 }
 0x109   :  { %v781_v14 = vadd.f32 %v1249_v10, %v1889_v41  ;;  %v1252_v15 = vadd.f32 %v1251_v13, %v1250_v11  ;;  %v1307_v17 = vadd.f32 %v1306_v16, %v1305_v12  ;;  %v1308_v18 = vpop.f32.mrb[10].mxu1 }
 0x10a   :  { %v1309_v20 = vpop.f32.mrb[11].mxu1 }
 0x10b   :  { %v784_v19 = vadd.f32 %v1252_v15, %v1889_v41  ;;  %v1905_v21 = vadd.f32 %v1307_v17, %v781_v14  ;;  %v1310_v22 = vadd.f32 %v1309_v20, %v1308_v18 }
 0x10d   :  { %v1253_v23 = vpop.f32.mrb[12].mxu0  ;;  %v1907_v24 = vadd.f32 %v1310_v22, %v784_v19 }
 0x10e   :  { %v1254_v25 = vpop.f32.mrb[13].mxu0 }
 0x10f   :  { %v1255_v26 = vadd.f32 %v1254_v25, %v1253_v23  ;;  %v1256_v27 = vpop.f32.mrb[14].mxu0  ;;  %v1311_v28 = vpop.f32.mrb[12].mxu1 }
 0x110   :  { %v1257_v29 = vpop.f32.mrb[15].mxu0  ;;  %v1312_v32 = vpop.f32.mrb[13].mxu1 }
 0x111   :  { %v789_v30 = vadd.f32 %v1255_v26, %v1889_v41  ;;  %v1258_v31 = vadd.f32 %v1257_v29, %v1256_v27  ;;  %v1313_v33 = vadd.f32 %v1312_v32, %v1311_v28  ;;  %v1314_v34 = vpop.f32.mrb[14].mxu1 }
 0x112   :  { %v1315_v36 = vpop.f32.mrb[15].mxu1 }
 0x113   :  { %v792_v35 = vadd.f32 %v1258_v31, %v1889_v41  ;;  %v1911_v37 = vadd.f32 %v1313_v33, %v789_v30  ;;  %v1316_v39 = vadd.f32 %v1315_v36, %v1314_v34 }
 0x115   :  { %v1259_v40 = vpop.f32.mrb[16].mxu0  ;;  %v1913_v42 = vadd.f32 %v1316_v39, %v792_v35 }
 0x116   :  { %v1260_v43 = vpop.f32.mrb[17].mxu0 }
 0x117   :  { %v1261_v44 = vadd.f32 %v1260_v43, %v1259_v40  ;;  %v1262_v45 = vpop.f32.mrb[18].mxu0  ;;  %v1317_v46 = vpop.f32.mrb[16].mxu1 }
 0x118   :  { %v1263_v38 = vpop.f32.mrb[19].mxu0  ;;  %v1318_v49 = vpop.f32.mrb[17].mxu1 }
 0x119   :  { %v797_v47 = vadd.f32 %v1261_v44, %v1889_v41  ;;  %v1264_v48 = vadd.f32 %v1263_v38, %v1262_v45  ;;  %v1319_v50 = vadd.f32 %v1318_v49, %v1317_v46  ;;  %v1320_v51 = vpop.f32.mrb[18].mxu1 }
 0x11a   :  { %v1321_v54 = vpop.f32.mrb[19].mxu1 }
 0x11b   :  { %v800_v52 = vadd.f32 %v1264_v48, %v1889_v41  ;;  %v1917_v55 = vadd.f32 %v1319_v50, %v797_v47  ;;  %v1322_v57 = vadd.f32 %v1321_v54, %v1320_v51 }
 0x11d   :  { %v1265_v58 = vpop.f32.mrb[20].mxu0  ;;  %v1919_v59 = vadd.f32 %v1322_v57, %v800_v52 }
 0x11e   :  { %v1266_v60 = vpop.f32.mrb[21].mxu0 }
 0x11f   :  { %v1267_v61 = vadd.f32 %v1266_v60, %v1265_v58  ;;  %v1268_v62 = vpop.f32.mrb[22].mxu0  ;;  %v1323_v63 = vpop.f32.mrb[20].mxu1 }
 0x120   :  { %v1269_v0 = vpop.f32.mrb[23].mxu0  ;;  %v1324_v3 = vpop.f32.mrb[21].mxu1 }
 0x121   :  { %v805_v1 = vadd.f32 %v1267_v61, %v1889_v41  ;;  %v1270_v2 = vadd.f32 %v1269_v0, %v1268_v62  ;;  %v1325_v4 = vadd.f32 %v1324_v3, %v1323_v63  ;;  %v1326_v6 = vpop.f32.mrb[22].mxu1 }
 0x122   :  { %v1327_v9 = vpop.f32.mrb[23].mxu1 }
 0x123   :  { %v808_v7 = vadd.f32 %v1270_v2, %v1889_v41  ;;  %v1923_v10 = vadd.f32 %v1325_v4, %v805_v1  ;;  %v1328_v11 = vadd.f32 %v1327_v9, %v1326_v6 }
 0x125   :  { %v1271_v12 = vpop.f32.mrb[24].mxu0  ;;  %v1925_v13 = vadd.f32 %v1328_v11, %v808_v7 }
 0x126   :  { %v1272_v14 = vpop.f32.mrb[25].mxu0 }
 0x127   :  { %v1273_v15 = vadd.f32 %v1272_v14, %v1271_v12  ;;  %v1274_v16 = vpop.f32.mrb[26].mxu0  ;;  %v1329_v17 = vpop.f32.mrb[24].mxu1 }
 0x128   :  { %v1275_v18 = vpop.f32.mrb[27].mxu0  ;;  %v1330_v20 = vpop.f32.mrb[25].mxu1 }
 0x129   :  { %v813_v19 = vadd.f32 %v1273_v15, %v1889_v41  ;;  %v1331_v22 = vadd.f32 %v1330_v20, %v1329_v17  ;;  %v1332_v23 = vpop.f32.mrb[26].mxu1 }
 0x12a   :  { %v1333_v25 = vpop.f32.mrb[27].mxu1 }
 0x12b   :  { %v1928_v26 = vadd.f32 %v1331_v22, %v813_v19 }
 0x12d   :  { %v1351_v27 = vpop.f32.mrb[28].mxu0 }
 0x12e   :  { %v1352_v28 = vpop.f32.mrb[29].mxu0 }
 0x12f   :  { %v1353_v29 = vadd.f32 %v1352_v28, %v1351_v27  ;;  %v1354_v30 = vpop.f32.mrb[30].mxu0  ;;  %v1028_v32 = vpop.f32.mrb[28].mxu1 }
 0x130   :  { %v1355_v31 = vpop.f32.mrb[31].mxu0  ;;  %v1408_v35 = vpop.f32.mrb[29].mxu1 }
 0x131   :  { %v1356_v33 = vadd.f32 %v1355_v31, %v1354_v30  ;;  %v941_v34 = vadd.f32 %v1353_v29, %v1893_v53  ;;  %v1031_v36 = vpop.f32.mrb[30].mxu1 }
 0x132   :  { %v1409_v40 = vpop.f32.mrb[31].mxu1 }
 0x133   :  { %v1029_v39 = vadd.f32 %v1028_v32, %v941_v34  ;;  %v944_v41 = vadd.f32 %v1356_v33, %v1895_v56 }
 0x135   :  { %v1082_v43 = vmax.f32 %v1029_v39, 0.0  ;;  %v1032_v44 = vadd.f32 %v1031_v36, %v944_v41  ;;  %v1357_v45 = vpop.f32.mrb[32].mxu0 }
 0x136   :  { %v1358_v46 = vpop.f32.mrb[33].mxu0 }
 0x137   :  { %1095 = vst [vmem:[%s1985_s3] sm:$0xff] %v1082_v43  ;;  %v1083_v38 = vmax.f32 %v1032_v44, 0.0  ;;  %v1359_v47 = vadd.f32 %v1358_v46, %v1357_v45  ;;  %v1360_v48 = vpop.f32.mrb[34].mxu0  ;;  %v1036_v50 = vpop.f32.mrb[32].mxu1 }
 0x138   :  { %v1361_v49 = vpop.f32.mrb[35].mxu0  ;;  %v1412_v51 = vpop.f32.mrb[33].mxu1 }
 0x139   :  { %1096 = vst [vmem:[%s1985_s3 + $0x8] sm:$0xff] %v1083_v38  ;;  %v1362_v53 = vadd.f32 %v1361_v49, %v1360_v48  ;;  %v949_v56 = vadd.f32 %v1359_v47, %v1899_v5  ;;  %v1039_v52 = vpop.f32.mrb[34].mxu1 }
 0x13a   :  { %v1413_v58 = vpop.f32.mrb[35].mxu1 }
 0x13b   :  { %v1037_v54 = vadd.f32 %v1036_v50, %v949_v56  ;;  %v952_v57 = vadd.f32 %v1362_v53, %v1901_v8 }
 0x13d   :  { %v1084_v60 = vmax.f32 %v1037_v54, 0.0  ;;  %v1040_v61 = vadd.f32 %v1039_v52, %v952_v57  ;;  %v1363_v62 = vpop.f32.mrb[36].mxu0 }
 0x13e   :  { %v1364_v63 = vpop.f32.mrb[37].mxu0 }
 0x13f   :  { %1097 = vst [vmem:[%s1985_s3 + $0x10] sm:$0xff] %v1084_v60  ;;  %v1085_v0 = vmax.f32 %v1040_v61, 0.0  ;;  %v1365_v1 = vadd.f32 %v1364_v63, %v1363_v62  ;;  %v1366_v2 = vpop.f32.mrb[38].mxu0  ;;  %v1044_v4 = vpop.f32.mrb[36].mxu1 }
 0x140   :  { %v1367_v3 = vpop.f32.mrb[39].mxu0  ;;  %v1416_v6 = vpop.f32.mrb[37].mxu1 }
 0x141   :  { %1098 = vst [vmem:[%s1985_s3 + $0x18] sm:$0xff] %v1085_v0  ;;  %v1368_v5 = vadd.f32 %v1367_v3, %v1366_v2  ;;  %v957_v8 = vadd.f32 %v1365_v1, %v1905_v21  ;;  %v1047_v7 = vpop.f32.mrb[38].mxu1 }
 0x142   :  { %v1417_v12 = vpop.f32.mrb[39].mxu1 }
 0x143   :  { %v1045_v9 = vadd.f32 %v1044_v4, %v957_v8  ;;  %v960_v11 = vadd.f32 %v1368_v5, %v1907_v24 }
 0x145   :  { %v1086_v14 = vmax.f32 %v1045_v9, 0.0  ;;  %v1048_v15 = vadd.f32 %v1047_v7, %v960_v11  ;;  %v1369_v16 = vpop.f32.mrb[40].mxu0 }
 0x146   :  { %v1370_v17 = vpop.f32.mrb[41].mxu0 }
 0x147   :  { %1099 = vst [vmem:[%s1985_s3 + $0x20] sm:$0xff] %v1086_v14  ;;  %v1087_v18 = vmax.f32 %v1048_v15, 0.0  ;;  %v1371_v19 = vadd.f32 %v1370_v17, %v1369_v16  ;;  %v1372_v20 = vpop.f32.mrb[42].mxu0  ;;  %v1052_v23 = vpop.f32.mrb[40].mxu1 }
 0x148   :  { %v1373_v22 = vpop.f32.mrb[43].mxu0  ;;  %v1420_v25 = vpop.f32.mrb[41].mxu1 }
 0x149   :  { %1100 = vst [vmem:[%s1985_s3 + $0x28] sm:$0xff] %v1087_v18  ;;  %v1374_v21 = vadd.f32 %v1373_v22, %v1372_v20  ;;  %v965_v24 = vadd.f32 %v1371_v19, %v1911_v37  ;;  %v1055_v27 = vpop.f32.mrb[42].mxu1 }
 0x14a   :  { %v1421_v30 = vpop.f32.mrb[43].mxu1 }
 0x14b   :  { %v1053_v28 = vadd.f32 %v1052_v23, %v965_v24  ;;  %v968_v29 = vadd.f32 %v1374_v21, %v1913_v42 }
 0x14d   :  { %v1088_v31 = vmax.f32 %v1053_v28, 0.0  ;;  %v1056_v32 = vadd.f32 %v1055_v27, %v968_v29  ;;  %v1375_v33 = vpop.f32.mrb[44].mxu0 }
 0x14e   :  { %v1376_v34 = vpop.f32.mrb[45].mxu0 }
 0x14f   :  { %1101 = vst [vmem:[%s1985_s3 + $0x30] sm:$0xff] %v1088_v31  ;;  %v1089_v35 = vmax.f32 %v1056_v32, 0.0  ;;  %v1377_v36 = vadd.f32 %v1376_v34, %v1375_v33  ;;  %v1378_v39 = vpop.f32.mrb[46].mxu0  ;;  %v1060_v40 = vpop.f32.mrb[44].mxu1 }
 0x150   :  { %v1379_v41 = vpop.f32.mrb[47].mxu0  ;;  %v1424_v43 = vpop.f32.mrb[45].mxu1 }
 0x151   :  { %1102 = vst [vmem:[%s1985_s3 + $0x38] sm:$0xff] %v1089_v35  ;;  %v1380_v37 = vadd.f32 %v1379_v41, %v1378_v39  ;;  %v973_v42 = vadd.f32 %v1377_v36, %v1917_v55  ;;  %v1063_v44 = vpop.f32.mrb[46].mxu1 }
 0x152   :  { %v1425_v38 = vpop.f32.mrb[47].mxu1 }
 0x153   :  { %v1061_v45 = vadd.f32 %v1060_v40, %v973_v42  ;;  %v976_v46 = vadd.f32 %v1380_v37, %v1919_v59 }
 0x155   :  { %v1090_v47 = vmax.f32 %v1061_v45, 0.0  ;;  %v1064_v48 = vadd.f32 %v1063_v44, %v976_v46  ;;  %v1381_v49 = vpop.f32.mrb[48].mxu0 }
 0x156   :  { %v1382_v50 = vpop.f32.mrb[49].mxu0 }
 0x157   :  { %1103 = vst [vmem:[%s1985_s3 + $0x40] sm:$0xff] %v1090_v47  ;;  %v1091_v53 = vmax.f32 %v1064_v48, 0.0  ;;  %v1383_v56 = vadd.f32 %v1382_v50, %v1381_v49  ;;  %v1384_v51 = vpop.f32.mrb[50].mxu0  ;;  %v1068_v54 = vpop.f32.mrb[48].mxu1 }
 0x158   :  { %v1385_v52 = vpop.f32.mrb[51].mxu0  ;;  %v1428_v57 = vpop.f32.mrb[49].mxu1 }
 0x159   :  { %1104 = vst [vmem:[%s1985_s3 + $0x48] sm:$0xff] %v1091_v53  ;;  %v1386_v55 = vadd.f32 %v1385_v52, %v1384_v51  ;;  %v981_v59 = vadd.f32 %v1383_v56, %v1923_v10  ;;  %v1071_v58 = vpop.f32.mrb[50].mxu1 }
 0x15a   :  { %v1429_v62 = vpop.f32.mrb[51].mxu1 }
 0x15b   :  { %v1069_v60 = vadd.f32 %v1068_v54, %v981_v59  ;;  %v984_v61 = vadd.f32 %v1386_v55, %v1925_v13 }
 0x15d   :  { %v1092_v63 = vmax.f32 %v1069_v60, 0.0  ;;  %v1072_v0 = vadd.f32 %v1071_v58, %v984_v61  ;;  %v1387_v1 = vpop.f32.mrb[52].mxu0 }
 0x15e   :  { %v1388_v2 = vpop.f32.mrb[53].mxu0 }
 0x15f   :  { %1105 = vst [vmem:[%s1985_s3 + $0x50] sm:$0xff] %v1092_v63  ;;  %v1093_v3 = vmax.f32 %v1072_v0, 0.0  ;;  %v1389_v4 = vadd.f32 %v1388_v2, %v1387_v1  ;;  %v1390_v5 = vpop.f32.mrb[54].mxu0  ;;  %v1076_v6 = vpop.f32.mrb[52].mxu1 }
 0x160   :  { %v1391_v8 = vpop.f32.mrb[55].mxu0  ;;  %v1432_v13 = vpop.f32.mrb[53].mxu1 }
 0x161   :  { %1106 = vst [vmem:[%s1985_s3 + $0x58] sm:$0xff] %v1093_v3  ;;  %v989_v10 = vadd.f32 %v1389_v4, %v1928_v26  ;;  %v1079_v7 = vpop.f32.mrb[54].mxu1 }
 0x162   :  { %v1433_v11 = vpop.f32.mrb[55].mxu1 }
 0x163   :  { %v1077_v9 = vadd.f32 %v1076_v6, %v989_v10 }
 0x165   :  { %v1094_v12 = vmax.f32 %v1077_v9, 0.0 }
 0x167   :  { %1107 = vst [vmem:[%s1985_s3 + $0x60] sm:$0xff] %v1094_v12 }

// kernel: _lambda_.9
= control target key start
LH: loop header
LB: loop body
LE: loop exit
PB: predicated region body
PF: predicated region fallthrough
CT: control target
= control target key end

     0   :  { %vm361_vm0 = vcmask 523264   ;;  %s857_s1 = inlined_call_operand.vmem [shape: bf16[576,128], index: 1, kind: input, shape index: {}]   ;;  %s858_s0 = inlined_call_operand.vmem [shape: bf16[24,576], index: 0, kind: input, shape index: {}]   ;;  %s859_s2 = inlined_call_operand.vmem [shape: f32[1,128], index: 2, kind: input, shape index: {}]   ;;  %s860_s3 = inlined_call_operand.vmem [shape: f32[24,128], index: 3, kind: output, shape index: {}]  }
   0x1   :  { %v645_v0 = vld [vmem:[%s857_s1 + $0x40] sm:$0xff]   ;;  %v649_v4 = vld [vmem:[%s857_s1 + $0x48] sm:$0xff]   ;;  %v653_v8 = vld [vmem:[%s857_s1 + $0x50] sm:$0xff]  }
   0x2   :  { %v646_v1 = vld [vmem:[%s857_s1] sm:$0xff]   ;;  %571 = vmatprep.subr.bf16.mxu0 %v645_v0  ;;  %v650_v5 = vld [vmem:[%s857_s1 + $0x8] sm:$0xff]   ;;  %v654_v9 = vld [vmem:[%s857_s1 + $0x10] sm:$0xff]  }
   0x3   :  { %v647_v2 = vld [vmem:[%s857_s1 + $0xc0] sm:$0xff]   ;;  %572 = vmatpush3.bf16.msra.mxu0 %v646_v1  ;;  %v651_v6 = vld [vmem:[%s857_s1 + $0xc8] sm:$0xff]   ;;  %v655_v10 = vld [vmem:[%s857_s1 + $0xd0] sm:$0xff]  }
   0x4   :  { %v648_v3 = vld [vmem:[%s857_s1 + $0x80] sm:$0xff]   ;;  %599 = vmatprep.subr.bf16.mxu1 %v647_v2  ;;  %573 = vmatprep.subr.bf16.mxu0 %v649_v4  ;;  %v652_v7 = vld [vmem:[%s857_s1 + $0x88] sm:$0xff]   ;;  %v656_v11 = vld [vmem:[%s857_s1 + $0x90] sm:$0xff]  }
   0x5   :  { %600 = vmatpush3.bf16.msra.mxu1 %v648_v3  ;;  %v657_v12 = vld [vmem:[%s857_s1 + $0x58] sm:$0xff]   ;;  %v661_v16 = vld [vmem:[%s857_s1 + $0x60] sm:$0xff]   ;;  %v665_v20 = vld [vmem:[%s857_s1 + $0x68] sm:$0xff]  }
   0x6   :  { %601 = vmatprep.subr.bf16.mxu1 %v651_v6  ;;  %v658_v13 = vld [vmem:[%s857_s1 + $0x18] sm:$0xff]   ;;  %v662_v17 = vld [vmem:[%s857_s1 + $0x20] sm:$0xff]   ;;  %v666_v21 = vld [vmem:[%s857_s1 + $0x28] sm:$0xff]  }
   0x7   :  { %574 = vmatpush3.bf16.msra.mxu0 %v650_v5  ;;  %v659_v14 = vld [vmem:[%s857_s1 + $0xd8] sm:$0xff]   ;;  %v663_v18 = vld [vmem:[%s857_s1 + $0xe0] sm:$0xff]   ;;  %v667_v22 = vld [vmem:[%s857_s1 + $0xe8] sm:$0xff]  }
   0x8   :  { %575 = vmatprep.subr.bf16.mxu0 %v653_v8  ;;  %v660_v15 = vld [vmem:[%s857_s1 + $0x98] sm:$0xff]   ;;  %v664_v19 = vld [vmem:[%s857_s1 + $0xa0] sm:$0xff]   ;;  %v668_v23 = vld [vmem:[%s857_s1 + $0xa8] sm:$0xff]  }
   0x9   :  { %602 = vmatpush3.bf16.msra.mxu1 %v652_v7  ;;  %v669_v24 = vld [vmem:[%s857_s1 + $0x70] sm:$0xff]   ;;  %v673_v28 = vld [vmem:[%s857_s1 + $0x78] sm:$0xff]   ;;  %v680_v34 = vld [vmem:[%s857_s1 + $0x100] sm:$0xff]  }
   0xa   :  { %603 = vmatprep.subr.bf16.mxu1 %v655_v10  ;;  %v670_v25 = vld [vmem:[%s857_s1 + $0x30] sm:$0xff]   ;;  %v674_v29 = vld [vmem:[%s857_s1 + $0x38] sm:$0xff]   ;;  %v683_v36 = vld [vmem:[%s858_s0 + $0xc] ss:$20 sps:$4 sm:$0xff]  }
   0xb   :  { %576 = vmatpush3.bf16.msra.mxu0 %v654_v9  ;;  %v671_v26 = vld [vmem:[%s857_s1 + $0xf0] sm:$0xff]   ;;  %v675_v30 = vld [vmem:[%s857_s1 + $0xf8] sm:$0xff]   ;;  %v684_v37 = vld [vmem:[%s857_s1 + $0x108] sm:$0xff]   ;;  %448 = vmatprep.mubr.bf16.mxu1 %v683_v36 }
   0xc   :  { %577 = vmatprep.subr.bf16.mxu0 %v657_v12  ;;  %v672_v27 = vld [vmem:[%s857_s1 + $0xb0] sm:$0xff]   ;;  %v678_v32 = vld [vmem:[%s858_s0 + $0x4] ss:$20 sps:$4 sm:$0xff]   ;;  %v681_v35 = vld [vmem:[%s858_s0 + $0x8] ss:$20 sps:$4 sm:$0xff]  }
   0xd   :  { %604 = vmatpush3.bf16.msra.mxu1 %v656_v11  ;;  %v676_v31 = vld [vmem:[%s858_s0] ss:$20 sps:$4 sm:$0xff]   ;;  %v679_v33 = vld [vmem:[%s857_s1 + $0xb8] sm:$0xff]   ;;  %400 = vmatprep.mubr.bf16.mxu0 %v678_v32  ;;  %v21_v38 = vld [vmem:[%s858_s0 + $0x28] sm:$0xff] }
   0xe   :  { %605 = vmatprep.subr.bf16.mxu1 %v659_v14  ;;  %v529_v39 = vcombine.high %v21_v38, %v21_v38  ;;  %v687_v40 = vld [vmem:[%s857_s1 + $0x110] sm:$0xff]   ;;  %v528_v42 = vcombine.low %v21_v38, %v21_v38  ;;  %v690_v46 = vld [vmem:[%s857_s1 + $0x118] sm:$0xff]   ;;  %v522_v49 = vld [vmem:[%s859_s2] ss:$0 sm:$0xff] }
   0xf   :  { %578 = vmatpush3.bf16.msra.mxu0 %v658_v13  ;;  %v22_v41 = vld [vmem:[%s858_s0 + $0x30] sm:$0xff]  ;;  %v692_v47 = vld [vmem:[%s858_s0 + $0x38] ss:$0 sps:$4 sm:$0xff]  }
  0x10   :  { %579 = vmatprep.subr.bf16.mxu0 %v661_v16  ;;  %v531_v43 = vcombine.high %v22_v41, %v22_v41  ;;  %v691_v44 = vld [vmem:[%s858_s0 + $0x10] ss:$20 sps:$4 sm:$0xff]   ;;  %v530_v45 = vcombine.low %v22_v41, %v22_v41 }
  0x11   :  { %606 = vmatpush3.bf16.msra.mxu1 %v660_v15 }
  0x12   :  { %607 = vmatprep.subr.bf16.mxu1 %v663_v18 }
  0x13   :  { %580 = vmatpush3.bf16.msra.mxu0 %v662_v17 }
  0x14   :  { %581 = vmatprep.subr.bf16.mxu0 %v665_v20 }
  0x15   :  { %608 = vmatpush3.bf16.msra.mxu1 %v664_v19 }
  0x16   :  { %609 = vmatprep.subr.bf16.mxu1 %v667_v22 }
  0x17   :  { %582 = vmatpush3.bf16.msra.mxu0 %v666_v21 }
  0x18   :  { %583 = vmatprep.subr.bf16.mxu0 %v669_v24 }
  0x19   :  { %610 = vmatpush3.bf16.msra.mxu1 %v668_v23 }
  0x1a   :  { %611 = vmatprep.subr.bf16.mxu1 %v671_v26 }
  0x1b   :  { %584 = vmatpush3.bf16.msra.mxu0 %v670_v25 }
  0x1c   :  { %585 = vmatprep.subr.bf16.mxu0 %v673_v28 }
  0x1d   :  { %612 = vmatpush3.bf16.msra.mxu1 %v672_v27 }
  0x1e   :  { %613 = vmatprep.subr.bf16.mxu1 %v675_v30 }
  0x1f   :  { %586 = vmatpush3.bf16.msra.mxu0 %v674_v29 }
  0x20   :  { %633 = vmatprep.subr.bf16.mxu0 %v680_v34 }
  0x21   :  { %614 = vmatpush3.bf16.msra.mxu1 %v679_v33 }
  0x22   :  { %401 = vmatmul.mubr.bf16.vlgmr.msra.gmra.mrb[0].mxu0 %v676_v31 }
  0x23   :  { %634 = vmatpush3.bf16.msra.mxu0 %v680_v34  ;;  %408 = vmatprep.mubr.bf16.mxu0 %v529_v39 }
  0x24   :  { %449 = vmatmul.mubr.bf16.vlgmr.msra.gmra.mrb[0].mxu1 %v681_v35  ;;  %635 = vmatprep.subr.bf16.mxu0 %v684_v37 }
  0x25   :  { %456 = vmatprep.mubr.bf16.mxu1 %v531_v43 }
  0x27   :  { %636 = vmatpush3.bf16.msra.mxu0 %v684_v37 }
  0x28   :  { %637 = vmatprep.subr.bf16.mxu0 %v687_v40 }
  0x2a   :  { %409 = vmatmul.mubr.bf16.gmra.mrb[4].mxu0 %v528_v42 }
  0x2b   :  { %641 = vmatprep.mubr.msk.bf16.mxu0 %vm361_vm0, %v691_v44  ;;  %638 = vmatpush3.bf16.msra.mxu0 %v687_v40 }
  0x2c   :  { %457 = vmatmul.mubr.bf16.gmra.mrb[4].mxu1 %v530_v45  ;;  %639 = vmatprep.subr.bf16.mxu0 %v690_v46 }
  0x2f   :  { %640 = vmatpush3.bf16.msra.mxu0 %v690_v46 }
  0x32   :  { %642 = vmatmul.mubr.msk.bf16.vlgmr.msra.gmra.mrb[8].mxu0 %vm361_vm0, %v692_v47 }
  0xf5   :  { %v587_v48 = vpop.f32.mrb[0].mxu0 }
  0xf6   :  { %v588_v50 = vpop.f32.mrb[1].mxu0 }
  0xf7   :  { %v589_v51 = vadd.f32 %v588_v50, %v587_v48  ;;  %v590_v52 = vpop.f32.mrb[2].mxu0  ;;  %v615_v53 = vpop.f32.mrb[0].mxu1 }
  0xf8   :  { %v591_v54 = vpop.f32.mrb[3].mxu0  ;;  %v616_v57 = vpop.f32.mrb[1].mxu1 }
  0xf9   :  { %v403_v55 = vadd.f32 %v589_v51, %v522_v49  ;;  %v592_v56 = vadd.f32 %v591_v54, %v590_v52  ;;  %v617_v58 = vadd.f32 %v616_v57, %v615_v53  ;;  %v618_v59 = vpop.f32.mrb[2].mxu1 }
  0xfa   :  { %v619_v61 = vpop.f32.mrb[3].mxu1 }
  0xfb   :  { %v406_v60 = vadd.f32 %v592_v56, %v522_v49  ;;  %v620_v62 = vadd.f32 %v619_v61, %v618_v59  ;;  %v451_v63 = vadd.f32 %v617_v58, %v403_v55 }
  0xfd   :  { %v593_v0 = vpop.f32.mrb[4].mxu0  ;;  %v454_v2 = vadd.f32 %v620_v62, %v406_v60 }
  0xfe   :  { %v594_v1 = vpop.f32.mrb[5].mxu0 }
  0xff   :  { %v595_v3 = vadd.f32 %v594_v1, %v593_v0  ;;  %v596_v4 = vpop.f32.mrb[6].mxu0  ;;  %v621_v5 = vpop.f32.mrb[4].mxu1 }
 0x100   :  { %v597_v6 = vpop.f32.mrb[7].mxu0  ;;  %v622_v8 = vpop.f32.mrb[5].mxu1 }
 0x101   :  { %v411_v7 = vadd.f32 %v595_v3, %v522_v49  ;;  %v623_v9 = vadd.f32 %v622_v8, %v621_v5  ;;  %v624_v10 = vpop.f32.mrb[6].mxu1 }
 0x102   :  { %v625_v11 = vpop.f32.mrb[7].mxu1 }
 0x103   :  { %v459_v12 = vadd.f32 %v623_v9, %v411_v7 }
 0x105   :  { %v643_v13 = vpop.f32.mrb[8].mxu0 }
 0x106   :  { %v507_v14 = vadd.f32 %v643_v13, %v459_v12  ;;  %v498_v15 = vpop.f32.mrb[9].mxu0 }
 0x107   :  { %v499_v16 = vadd.f32 %v498_v15, %v451_v63  ;;  %v644_v17 = vpop.f32.mrb[10].mxu0 }
 0x108   :  { %v514_v18 = vmax.f32 %v507_v14, 0.0  ;;  %v501_v19 = vpop.f32.mrb[11].mxu0 }
 0x109   :  { %v512_v20 = vmax.f32 %v499_v16, 0.0  ;;  %v502_v21 = vadd.f32 %v501_v19, %v454_v2 }
 0x10a   :  { %517 = vst [vmem:[%s860_s3 + $0x10] sm:$0xff] %v514_v18 }
 0x10b   :  { %515 = vst [vmem:[%s860_s3] sm:$0xff] %v512_v20  ;;  %v513_v22 = vmax.f32 %v502_v21, 0.0 }
 0x10d   :  { %516 = vst [vmem:[%s860_s3 + $0x8] sm:$0xff] %v513_v22 }

// kernel: _lambda_.10
= control target key start
LH: loop header
LB: loop body
LE: loop exit
PB: predicated region body
PF: predicated region fallthrough
CT: control target
= control target key end

     0   :  { %15 = vsyncpa [#allocation3], 0  ;;  %v2036_v43 = vmov 1983009808   ;;  %v192_v45 = vlaneseq  ;;  %s3138_s0 = inlined_call_operand.vmem [shape: f32[2,1152], index: 0, kind: input, shape index: {}]   ;;  %s3139_s1 = inlined_call_operand.vmem [shape: f32[1152,128], index: 1, kind: input, shape index: {}]   ;;  %s3140_s2 = inlined_call_operand.vmem [shape: f32[1,128], index: 2, kind: input, shape index: {}]   ;;  %s3141_s3 = inlined_call_operand.vmem [shape: f32[128,1152], index: 3, kind: input, shape index: {}]   ;;  %s3142_s4 = inlined_call_operand.vmem [shape: f32[1,1152], index: 4, kind: input, shape index: {}]   ;;  %s3143_s5 = inlined_call_operand.vmem [shape: f32[128,128], index: 5, kind: input, shape index: {}]   ;;  %s3144_s6 = inlined_call_operand.vmem [shape: f32[1,128], index: 6, kind: input, shape index: {}]   ;;  %s3145_s7 = inlined_call_operand.hbm [shape: f32[2,128], index: 7, kind: output, shape index: {0}]   ;;  %s3146_s8 = inlined_call_operand.vmem [shape: f32[2,1152], index: 8, kind: output, shape index: {1}]   ;;  %s3147_s9 = inlined_call_operand.hbm [shape: f32[2,128], index: 9, kind: output, shape index: {2}]  }
   0x1   :  { %v50_v0 = vld [vmem:[%s3139_s1 + $0x80] sm:$0xff]  ;;  %v51_v1 = vld [vmem:[%s3139_s1 + $0x88] sm:$0xff]  ;;  %v52_v11 = vld [vmem:[%s3139_s1 + $0x90] sm:$0xff]  ;;  %v190_v44 = vunpack.c.l.s4 %v2036_v43 }
   0x2   :  { %v34_v2 = vld [vmem:[%s3139_s1] sm:$0xff]  ;;  %v1648_v3 = vpack.c.bf16 %v51_v1, %v50_v0  ;;  %v35_v4 = vld [vmem:[%s3139_s1 + $0x8] sm:$0xff]  ;;  %v53_v13 = vld [vmem:[%s3139_s1 + $0x98] sm:$0xff]  ;;  %v2210_v60 = vshrl.u32 %v192_v45, 7 }
   0x3   :  { %v82_v5 = vld [vmem:[%s3139_s1 + $0x180] sm:$0xff]  ;;  %v83_v6 = vld [vmem:[%s3139_s1 + $0x188] sm:$0xff]  ;;  %v1650_v7 = vpack.c.bf16 %v35_v4, %v34_v2  ;;  %v36_v14 = vld [vmem:[%s3139_s1 + $0x10] sm:$0xff]  ;;  %v1652_v16 = vpack.c.bf16 %v53_v13, %v52_v11  ;;  %v191_v59 = vunpack.c.0.s8 %v190_v44 }
   0x4   :  { %v1680_v8 = vpack.c.bf16 %v83_v6, %v82_v5  ;;  %v66_v9 = vld [vmem:[%s3139_s1 + $0x100] sm:$0xff]  ;;  %v67_v10 = vld [vmem:[%s3139_s1 + $0x108] sm:$0xff]  ;;  %1649 = vmatprep.subr.bf16.mxu0 %v1648_v3  ;;  %v37_v15 = vld [vmem:[%s3139_s1 + $0x18] sm:$0xff] }
   0x5   :  { %v1682_v12 = vpack.c.bf16 %v67_v10, %v66_v9  ;;  %1651 = vmatpush3.bf16.msra.mxu0 %v1650_v7  ;;  %v1654_v17 = vpack.c.bf16 %v37_v15, %v36_v14  ;;  %v84_v18 = vld [vmem:[%s3139_s1 + $0x190] sm:$0xff]  ;;  %v85_v19 = vld [vmem:[%s3139_s1 + $0x198] sm:$0xff]  ;;  %v54_v23 = vld [vmem:[%s3139_s1 + $0xa0] sm:$0xff]  ;;  %v2240_v10 = vsub.s32 %v191_v59, %v2210_v60 }
   0x6   :  { %1681 = vmatprep.subr.bf16.mxu1 %v1680_v8  ;;  %v68_v20 = vld [vmem:[%s3139_s1 + $0x110] sm:$0xff]  ;;  %v1684_v21 = vpack.c.bf16 %v85_v19, %v84_v18  ;;  %v69_v22 = vld [vmem:[%s3139_s1 + $0x118] sm:$0xff]  ;;  %v55_v24 = vld [vmem:[%s3139_s1 + $0xa8] sm:$0xff]  ;;  %1653 = vmatprep.subr.bf16.mxu0 %v1652_v16 }
   0x7   :  { %1683 = vmatpush3.bf16.msra.mxu1 %v1682_v12  ;;  %v1686_v25 = vpack.c.bf16 %v69_v22, %v68_v20  ;;  %v1656_v26 = vpack.c.bf16 %v55_v24, %v54_v23  ;;  %v38_v27 = vld [vmem:[%s3139_s1 + $0x20] sm:$0xff]  ;;  %v39_v28 = vld [vmem:[%s3139_s1 + $0x28] sm:$0xff]  ;;  %v56_v35 = vld [vmem:[%s3139_s1 + $0xb0] sm:$0xff] }
   0x8   :  { %v86_v29 = vld [vmem:[%s3139_s1 + $0x1a0] sm:$0xff]  ;;  %1685 = vmatprep.subr.bf16.mxu1 %v1684_v21  ;;  %v87_v30 = vld [vmem:[%s3139_s1 + $0x1a8] sm:$0xff]  ;;  %v1658_v33 = vpack.c.bf16 %v39_v28, %v38_v27  ;;  %v57_v36 = vld [vmem:[%s3139_s1 + $0xb8] sm:$0xff] }
   0x9   :  { %v70_v31 = vld [vmem:[%s3139_s1 + $0x120] sm:$0xff]  ;;  %v71_v32 = vld [vmem:[%s3139_s1 + $0x128] sm:$0xff]  ;;  %1655 = vmatpush3.bf16.msra.mxu0 %v1654_v17  ;;  %v1688_v34 = vpack.c.bf16 %v87_v30, %v86_v29  ;;  %v40_v37 = vld [vmem:[%s3139_s1 + $0x30] sm:$0xff]  ;;  %v1660_v39 = vpack.c.bf16 %v57_v36, %v56_v35 }
   0xa   :  { %1657 = vmatprep.subr.bf16.mxu0 %v1656_v26  ;;  %v1690_v38 = vpack.c.bf16 %v71_v32, %v70_v31  ;;  %v41_v40 = vld [vmem:[%s3139_s1 + $0x38] sm:$0xff]  ;;  %v88_v41 = vld [vmem:[%s3139_s1 + $0x1b0] sm:$0xff]  ;;  %v58_v49 = vld [vmem:[%s3139_s1 + $0xc0] sm:$0xff] }
   0xb   :  { %1687 = vmatpush3.bf16.msra.mxu1 %v1686_v25  ;;  %v89_v42 = vld [vmem:[%s3139_s1 + $0x1b8] sm:$0xff]  ;;  %v72_v47 = vld [vmem:[%s3139_s1 + $0x130] sm:$0xff]  ;;  %v59_v50 = vld [vmem:[%s3139_s1 + $0xc8] sm:$0xff]  ;;  %v1662_v51 = vpack.c.bf16 %v41_v40, %v40_v37 }
   0xc   :  { %1689 = vmatprep.subr.bf16.mxu1 %v1688_v34  ;;  %v1692_v46 = vpack.c.bf16 %v89_v42, %v88_v41  ;;  %v73_v48 = vld [vmem:[%s3139_s1 + $0x138] sm:$0xff]  ;;  %v90_v52 = vld [vmem:[%s3139_s1 + $0x1c0] sm:$0xff]  ;;  %v91_v53 = vld [vmem:[%s3139_s1 + $0x1c8] sm:$0xff]  ;;  %v1664_v55 = vpack.c.bf16 %v59_v50, %v58_v49 }
   0xd   :  { %1659 = vmatpush3.bf16.msra.mxu0 %v1658_v33  ;;  %v1694_v54 = vpack.c.bf16 %v73_v48, %v72_v47  ;;  %v42_v56 = vld [vmem:[%s3139_s1 + $0x40] sm:$0xff]  ;;  %v43_v57 = vld [vmem:[%s3139_s1 + $0x48] sm:$0xff]  ;;  %v1696_v61 = vpack.c.bf16 %v91_v53, %v90_v52  ;;  %v60_v63 = vld [vmem:[%s3139_s1 + $0xd0] sm:$0xff] }
   0xe   :  { %1661 = vmatprep.subr.bf16.mxu0 %v1660_v39  ;;  %v74_v58 = vld [vmem:[%s3139_s1 + $0x140] sm:$0xff]  ;;  %v75_v62 = vld [vmem:[%s3139_s1 + $0x148] sm:$0xff]  ;;  %v61_v0 = vld [vmem:[%s3139_s1 + $0xd8] sm:$0xff]  ;;  %v1666_v3 = vpack.c.bf16 %v43_v57, %v42_v56 }
   0xf   :  { %1691 = vmatpush3.bf16.msra.mxu1 %v1690_v38  ;;  %v92_v1 = vld [vmem:[%s3139_s1 + $0x1d0] sm:$0xff]  ;;  %v93_v2 = vld [vmem:[%s3139_s1 + $0x1d8] sm:$0xff]  ;;  %v1698_v5 = vpack.c.bf16 %v75_v62, %v74_v58  ;;  %v1668_v6 = vpack.c.bf16 %v61_v0, %v60_v63  ;;  %v62_v12 = vld [vmem:[%s3139_s1 + $0xe0] sm:$0xff] }
  0x10   :  { %1693 = vmatprep.subr.bf16.mxu1 %v1692_v46  ;;  %v44_v4 = vld [vmem:[%s3139_s1 + $0x50] sm:$0xff]  ;;  %v45_v7 = vld [vmem:[%s3139_s1 + $0x58] sm:$0xff]  ;;  %v1700_v11 = vpack.c.bf16 %v93_v2, %v92_v1  ;;  %v63_v13 = vld [vmem:[%s3139_s1 + $0xe8] sm:$0xff] }
  0x11   :  { %1663 = vmatpush3.bf16.msra.mxu0 %v1662_v51  ;;  %v76_v8 = vld [vmem:[%s3139_s1 + $0x150] sm:$0xff]  ;;  %v77_v9 = vld [vmem:[%s3139_s1 + $0x158] sm:$0xff]  ;;  %v94_v14 = vld [vmem:[%s3139_s1 + $0x1e0] sm:$0xff]  ;;  %v1670_v16 = vpack.c.bf16 %v45_v7, %v44_v4  ;;  %v1672_v19 = vpack.c.bf16 %v63_v13, %v62_v12 }
  0x12   :  { %1665 = vmatprep.subr.bf16.mxu0 %v1664_v55  ;;  %v95_v15 = vld [vmem:[%s3139_s1 + $0x1e8] sm:$0xff]  ;;  %v1702_v17 = vpack.c.bf16 %v77_v9, %v76_v8  ;;  %v31_v18 = vld [vmem:[%s3138_s0] sm:$0xff]  ;;  %v64_v27 = vld [vmem:[%s3139_s1 + $0xf0] sm:$0xff] }
  0x13   :  { %1695 = vmatpush3.bf16.msra.mxu1 %v1694_v54  ;;  %v46_v20 = vld [vmem:[%s3139_s1 + $0x60] sm:$0xff]  ;;  %v47_v21 = vld [vmem:[%s3139_s1 + $0x68] sm:$0xff]  ;;  %v195_v23 = vrot.slane %v31_v18, %v2240_v10  ;;  %v188_v24 = vcombine.high %v31_v18, %v31_v18  ;;  %v1704_v25 = vpack.c.bf16 %v95_v15, %v94_v14  ;;  %v65_v28 = vld [vmem:[%s3139_s1 + $0xf8] sm:$0xff] }
  0x14   :  { %1697 = vmatprep.subr.bf16.mxu1 %v1696_v61  ;;  %v78_v22 = vld [vmem:[%s3139_s1 + $0x160] sm:$0xff]  ;;  %v79_v26 = vld [vmem:[%s3139_s1 + $0x168] sm:$0xff]  ;;  %v96_v29 = vld [vmem:[%s3139_s1 + $0x1f0] sm:$0xff]  ;;  %v1674_v33 = vpack.c.bf16 %v47_v21, %v46_v20  ;;  %v1676_v35 = vpack.c.bf16 %v65_v28, %v64_v27 }
  0x15   :  { %1667 = vmatpush3.bf16.msra.mxu0 %v1666_v3  ;;  %v97_v30 = vld [vmem:[%s3139_s1 + $0x1f8] sm:$0xff]  ;;  %v203_v31 = vcombine.high %v195_v23, %v195_v23  ;;  %v202_v32 = vrot.slane %v188_v24, %v2240_v10  ;;  %v1706_v34 = vpack.c.bf16 %v79_v26, %v78_v22  ;;  %v48_v36 = vld [vmem:[%s3139_s1 + $0x70] sm:$0xff]  ;;  %v114_v42 = vld [vmem:[%s3139_s1 + $0x280] sm:$0xff] }
  0x16   :  { %1669 = vmatprep.subr.bf16.mxu0 %v1668_v6  ;;  %v49_v37 = vld [vmem:[%s3139_s1 + $0x78] sm:$0xff]  ;;  %v80_v38 = vld [vmem:[%s3139_s1 + $0x170] sm:$0xff]  ;;  %v1708_v40 = vpack.c.bf16 %v97_v30, %v96_v29  ;;  %v115_v43 = vld [vmem:[%s3139_s1 + $0x288] sm:$0xff] }
  0x17   :  { %1699 = vmatpush3.bf16.msra.mxu1 %v1698_v5  ;;  %v204_v39 = vcombine.high %v202_v32, %v202_v32  ;;  %302 = vmatprep.mubr.f32.mxu0 %v203_v31  ;;  %v81_v41 = vld [vmem:[%s3139_s1 + $0x178] sm:$0xff]  ;;  %v146_v44 = vld [vmem:[%s3139_s1 + $0x380] sm:$0xff]  ;;  %v147_v46 = vld [vmem:[%s3139_s1 + $0x388] sm:$0xff]  ;;  %v1678_v47 = vpack.c.bf16 %v49_v37, %v48_v36  ;;  %v1712_v49 = vpack.c.bf16 %v115_v43, %v114_v42 }
  0x18   :  { %1701 = vmatprep.subr.bf16.mxu1 %v1700_v11  ;;  %v1710_v48 = vpack.c.bf16 %v81_v41, %v80_v38  ;;  %v98_v50 = vld [vmem:[%s3139_s1 + $0x200] sm:$0xff]  ;;  %v99_v51 = vld [vmem:[%s3139_s1 + $0x208] sm:$0xff]  ;;  %v1744_v53 = vpack.c.bf16 %v147_v46, %v146_v44  ;;  %v116_v55 = vld [vmem:[%s3139_s1 + $0x290] sm:$0xff] }
  0x19   :  { %1671 = vmatpush3.bf16.msra.mxu0 %v1670_v16  ;;  %372 = vmatprep.mubr.f32.mxu1 %v204_v39  ;;  %v130_v52 = vld [vmem:[%s3139_s1 + $0x300] sm:$0xff]  ;;  %v131_v54 = vld [vmem:[%s3139_s1 + $0x308] sm:$0xff]  ;;  %v117_v56 = vld [vmem:[%s3139_s1 + $0x298] sm:$0xff]  ;;  %v1714_v59 = vpack.c.bf16 %v99_v51, %v98_v50 }
  0x1a   :  { %1673 = vmatprep.subr.bf16.mxu0 %v1672_v19  ;;  %v148_v57 = vld [vmem:[%s3139_s1 + $0x390] sm:$0xff]  ;;  %v149_v58 = vld [vmem:[%s3139_s1 + $0x398] sm:$0xff]  ;;  %v1746_v61 = vpack.c.bf16 %v131_v54, %v130_v52  ;;  %v1716_v62 = vpack.c.bf16 %v117_v56, %v116_v55  ;;  %v118_v4 = vld [vmem:[%s3139_s1 + $0x2a0] sm:$0xff] }
  0x1b   :  { %1703 = vmatpush3.bf16.msra.mxu1 %v1702_v17  ;;  %v100_v63 = vld [vmem:[%s3139_s1 + $0x210] sm:$0xff]  ;;  %v101_v0 = vld [vmem:[%s3139_s1 + $0x218] sm:$0xff]  ;;  %v1748_v2 = vpack.c.bf16 %v149_v58, %v148_v57  ;;  %v119_v5 = vld [vmem:[%s3139_s1 + $0x2a8] sm:$0xff] }
  0x1c   :  { %1705 = vmatprep.subr.bf16.mxu1 %v1704_v25  ;;  %v132_v1 = vld [vmem:[%s3139_s1 + $0x310] sm:$0xff]  ;;  %v133_v3 = vld [vmem:[%s3139_s1 + $0x318] sm:$0xff]  ;;  %v150_v6 = vld [vmem:[%s3139_s1 + $0x3a0] sm:$0xff]  ;;  %v1718_v8 = vpack.c.bf16 %v101_v0, %v100_v63  ;;  %v1720_v11 = vpack.c.bf16 %v119_v5, %v118_v4 }
  0x1d   :  { %1675 = vmatpush3.bf16.msra.mxu0 %v1674_v33  ;;  %v151_v7 = vld [vmem:[%s3139_s1 + $0x3a8] sm:$0xff]  ;;  %v1750_v9 = vpack.c.bf16 %v133_v3, %v132_v1  ;;  %v102_v12 = vld [vmem:[%s3139_s1 + $0x220] sm:$0xff]  ;;  %v120_v17 = vld [vmem:[%s3139_s1 + $0x2b0] sm:$0xff] }
  0x1e   :  { %1677 = vmatprep.subr.bf16.mxu0 %v1676_v35  ;;  %v103_v13 = vld [vmem:[%s3139_s1 + $0x228] sm:$0xff]  ;;  %v134_v14 = vld [vmem:[%s3139_s1 + $0x320] sm:$0xff]  ;;  %v1752_v15 = vpack.c.bf16 %v151_v7, %v150_v6  ;;  %v121_v18 = vld [vmem:[%s3139_s1 + $0x2b8] sm:$0xff] }
  0x1f   :  { %1707 = vmatpush3.bf16.msra.mxu1 %v1706_v34  ;;  %v135_v16 = vld [vmem:[%s3139_s1 + $0x328] sm:$0xff]  ;;  %v152_v19 = vld [vmem:[%s3139_s1 + $0x3b0] sm:$0xff]  ;;  %v153_v20 = vld [vmem:[%s3139_s1 + $0x3b8] sm:$0xff]  ;;  %v1722_v21 = vpack.c.bf16 %v103_v13, %v102_v12  ;;  %v1724_v24 = vpack.c.bf16 %v121_v18, %v120_v17 }
  0x20   :  { %1709 = vmatprep.subr.bf16.mxu1 %v1708_v40  ;;  %v104_v22 = vld [vmem:[%s3139_s1 + $0x230] sm:$0xff]  ;;  %v105_v25 = vld [vmem:[%s3139_s1 + $0x238] sm:$0xff]  ;;  %v1756_v28 = vpack.c.bf16 %v153_v20, %v152_v19  ;;  %v122_v29 = vld [vmem:[%s3139_s1 + $0x2c0] sm:$0xff] }
  0x21   :  { %1679 = vmatpush3.bf16.msra.mxu0 %v1678_v47  ;;  %v136_v26 = vld [vmem:[%s3139_s1 + $0x330] sm:$0xff]  ;;  %v137_v27 = vld [vmem:[%s3139_s1 + $0x338] sm:$0xff]  ;;  %v123_v30 = vld [vmem:[%s3139_s1 + $0x2c8] sm:$0xff]  ;;  %v1726_v36 = vpack.c.bf16 %v105_v25, %v104_v22 }
  0x22   :  { %1713 = vmatprep.subr.bf16.mxu0 %v1712_v49  ;;  %v32_v31 = vld [vmem:[%s3138_s0 + $0x8] sm:$0xff]  ;;  %v1758_v37 = vpack.c.bf16 %v137_v27, %v136_v26  ;;  %v1728_v38 = vpack.c.bf16 %v123_v30, %v122_v29  ;;  %v106_v39 = vld [vmem:[%s3139_s1 + $0x240] sm:$0xff]  ;;  %v124_v47 = vld [vmem:[%s3139_s1 + $0x2d0] sm:$0xff] }
  0x23   :  { %1711 = vmatpush3.bf16.msra.mxu1 %v1710_v48  ;;  %v155_v33 = vld [vmem:[%s3139_s1 + $0x3c8] sm:$0xff]  ;;  %v2407_v34 = vrot.slane %v32_v31, %v2240_v10  ;;  %v205_v35 = vcombine.high %v32_v31, %v32_v31  ;;  %v138_v41 = vld [vmem:[%s3139_s1 + $0x340] sm:$0xff]  ;;  %v125_v48 = vld [vmem:[%s3139_s1 + $0x2d8] sm:$0xff] }
  0x24   :  { %1745 = vmatprep.subr.bf16.mxu1 %v1744_v53  ;;  %303 = vmatmul.mubr.f32.vlgmr.msra.gmra.mrb[0].mxu0 %v195_v23  ;;  %v1754_v23 = vpack.c.bf16 %v135_v16, %v134_v14  ;;  %v107_v40 = vld [vmem:[%s3139_s1 + $0x248] sm:$0xff]  ;;  %v156_v49 = vld [vmem:[%s3139_s1 + $0x3d0] sm:$0xff]  ;;  %v157_v50 = vld [vmem:[%s3139_s1 + $0x3d8] sm:$0xff]  ;;  %v1732_v55 = vpack.c.bf16 %v125_v48, %v124_v47 }
  0x25   :  { %1715 = vmatpush3.bf16.msra.mxu0 %v1714_v59  ;;  %v220_v42 = vcombine.high %v2407_v34, %v2407_v34  ;;  %v2421_v43 = vrot.slane %v205_v35, %v2240_v10  ;;  %v139_v46 = vld [vmem:[%s3139_s1 + $0x348] sm:$0xff]  ;;  %v1730_v52 = vpack.c.bf16 %v107_v40, %v106_v39  ;;  %v108_v53 = vld [vmem:[%s3139_s1 + $0x250] sm:$0xff]  ;;  %v109_v56 = vld [vmem:[%s3139_s1 + $0x258] sm:$0xff] }
  0x26   :  { %373 = vmatmul.mubr.f32.vlgmr.msra.gmra.mrb[0].mxu1 %v202_v32  ;;  %1717 = vmatprep.subr.bf16.mxu0 %v1716_v62  ;;  %v154_v32 = vld [vmem:[%s3139_s1 + $0x3c0] sm:$0xff]  ;;  %v1762_v54 = vpack.c.bf16 %v139_v46, %v138_v41  ;;  %v140_v57 = vld [vmem:[%s3139_s1 + $0x350] sm:$0xff] }
  0x27   :  { %1747 = vmatpush3.bf16.msra.mxu1 %v1746_v61  ;;  %v1760_v44 = vpack.c.bf16 %v155_v33, %v154_v32  ;;  %442 = vmatprep.mubr.f32.mxu0 %v220_v42  ;;  %v221_v51 = vcombine.high %v2421_v43, %v2421_v43 }
  0x28   :  { %1749 = vmatprep.subr.bf16.mxu1 %v1748_v2 }
  0x29   :  { %1719 = vmatpush3.bf16.msra.mxu0 %v1718_v8 }
  0x2a   :  { %1721 = vmatprep.subr.bf16.mxu0 %v1720_v11 }
  0x2b   :  { %1751 = vmatpush3.bf16.msra.mxu1 %v1750_v9 }
  0x2c   :  { %1753 = vmatprep.subr.bf16.mxu1 %v1752_v15 }
  0x2d   :  { %1723 = vmatpush3.bf16.msra.mxu0 %v1722_v21 }
  0x2e   :  { %1725 = vmatprep.subr.bf16.mxu0 %v1724_v24 }
  0x2f   :  { %1755 = vmatpush3.bf16.msra.mxu1 %v1754_v23 }
  0x30   :  { %1757 = vmatprep.subr.bf16.mxu1 %v1756_v28 }
  0x31   :  { %1727 = vmatpush3.bf16.msra.mxu0 %v1726_v36 }
  0x32   :  { %1729 = vmatprep.subr.bf16.mxu0 %v1728_v38 }
  0x33   :  { %1759 = vmatpush3.bf16.msra.mxu1 %v1758_v37 }
  0x34   :  { %16 = vsyncpa [#allocation5], 0  ;;  %1761 = vmatprep.subr.bf16.mxu1 %v1760_v44  ;;  %v1764_v58 = vpack.c.bf16 %v157_v50, %v156_v49  ;;  %v141_v59 = vld [vmem:[%s3139_s1 + $0x358] sm:$0xff]  ;;  %v126_v61 = vld [vmem:[%s3139_s1 + $0x2e0] sm:$0xff]  ;;  %512 = vmatprep.mubr.f32.mxu1 %v221_v51  ;;  %v1734_v1 = vpack.c.bf16 %v109_v56, %v108_v53  ;;  %v2037_v27 = vmov 0.0|0.0   ;;  %vm2038_vm0 = vmmov 0  }
  0x35   :  { %v127_v62 = vld [vmem:[%s3139_s1 + $0x2e8] sm:$0xff]  ;;  %v158_v63 = vld [vmem:[%s3139_s1 + $0x3e0] sm:$0xff]  ;;  %1731 = vmatpush3.bf16.msra.mxu0 %v1730_v52  ;;  %v1766_v2 = vpack.c.bf16 %v141_v59, %v140_v57  ;;  %v128_v9 = vld [vmem:[%s3139_s1 + $0x2f0] sm:$0xff]  ;;  %v2039_v33 = vmov 0.0   ;;  %vm1202_vm1 = vcmask 1041408  }
  0x36   :  { %v159_v0 = vld [vmem:[%s3139_s1 + $0x3e8] sm:$0xff]  ;;  %1733 = vmatprep.subr.bf16.mxu0 %v1732_v55  ;;  %v1736_v3 = vpack.c.bf16 %v127_v62, %v126_v61  ;;  %v110_v4 = vld [vmem:[%s3139_s1 + $0x260] sm:$0xff]  ;;  %v129_v11 = vld [vmem:[%s3139_s1 + $0x2f8] sm:$0xff] }
  0x37   :  { %1763 = vmatpush3.bf16.msra.mxu1 %v1762_v54  ;;  %v111_v5 = vld [vmem:[%s3139_s1 + $0x268] sm:$0xff]  ;;  %v142_v6 = vld [vmem:[%s3139_s1 + $0x360] sm:$0xff]  ;;  %v1768_v7 = vpack.c.bf16 %v159_v0, %v158_v63  ;;  %v160_v12 = vld [vmem:[%s3139_s1 + $0x3f0] sm:$0xff]  ;;  %v1740_v16 = vpack.c.bf16 %v129_v11, %v128_v9 }
  0x38   :  { %1765 = vmatprep.subr.bf16.mxu1 %v1764_v58  ;;  %v143_v8 = vld [vmem:[%s3139_s1 + $0x368] sm:$0xff]  ;;  %v161_v13 = vld [vmem:[%s3139_s1 + $0x3f8] sm:$0xff]  ;;  %v1738_v14 = vpack.c.bf16 %v111_v5, %v110_v4  ;;  %v112_v17 = vld [vmem:[%s3139_s1 + $0x270] sm:$0xff] }
  0x39   :  { %1735 = vmatpush3.bf16.msra.mxu0 %v1734_v1  ;;  %v1770_v15 = vpack.c.bf16 %v143_v8, %v142_v6  ;;  %v113_v18 = vld [vmem:[%s3139_s1 + $0x278] sm:$0xff]  ;;  %v1772_v19 = vpack.c.bf16 %v161_v13, %v160_v12  ;;  %v144_v20 = vld [vmem:[%s3139_s1 + $0x370] sm:$0xff]  ;;  %v162_v24 = vld [vmem:[%s3139_s1 + $0x400] sm:$0xff] }
  0x3a   :  { %1737 = vmatprep.subr.bf16.mxu0 %v1736_v3  ;;  %v145_v21 = vld [vmem:[%s3139_s1 + $0x378] sm:$0xff]  ;;  %v1742_v22 = vpack.c.bf16 %v113_v18, %v112_v17  ;;  %v163_v25 = vld [vmem:[%s3139_s1 + $0x408] sm:$0xff]  ;;  %v164_v28 = vld [vmem:[%s3139_s1 + $0x410] sm:$0xff] }
  0x3b   :  { %1767 = vmatpush3.bf16.msra.mxu1 %v1766_v2  ;;  %v1774_v23 = vpack.c.bf16 %v145_v21, %v144_v20  ;;  %v1777_v26 = vpack.c.bf16 %v163_v25, %v162_v24  ;;  %v165_v29 = vld [vmem:[%s3139_s1 + $0x418] sm:$0xff]  ;;  %v166_v31 = vld [vmem:[%s3139_s1 + $0x420] sm:$0xff]  ;;  %v167_v32 = vld [vmem:[%s3139_s1 + $0x428] sm:$0xff] }
  0x3c   :  { %1769 = vmatprep.subr.bf16.mxu1 %v1768_v7  ;;  %v1780_v30 = vpack.c.bf16 %v165_v29, %v164_v28  ;;  %v168_v35 = vld [vmem:[%s3139_s1 + $0x430] sm:$0xff]  ;;  %v169_v36 = vld [vmem:[%s3139_s1 + $0x438] sm:$0xff]  ;;  %v170_v38 = vld [vmem:[%s3139_s1 + $0x440] sm:$0xff] }
  0x3d   :  { %1739 = vmatpush3.bf16.msra.mxu0 %v1738_v14  ;;  %v1786_v37 = vpack.c.bf16 %v169_v36, %v168_v35  ;;  %v171_v39 = vld [vmem:[%s3139_s1 + $0x448] sm:$0xff]  ;;  %v172_v41 = vld [vmem:[%s3139_s1 + $0x450] sm:$0xff]  ;;  %v173_v42 = vld [vmem:[%s3139_s1 + $0x458] sm:$0xff] }
  0x3e   :  { %1741 = vmatprep.subr.bf16.mxu0 %v1740_v16  ;;  %v1789_v40 = vpack.c.bf16 %v171_v39, %v170_v38  ;;  %v174_v44 = vld [vmem:[%s3139_s1 + $0x460] sm:$0xff]  ;;  %v175_v46 = vld [vmem:[%s3139_s1 + $0x468] sm:$0xff]  ;;  %v176_v48 = vld [vmem:[%s3139_s1 + $0x470] sm:$0xff] }
  0x3f   :  { %1771 = vmatpush3.bf16.msra.mxu1 %v1770_v15  ;;  %v1795_v47 = vpack.c.bf16 %v175_v46, %v174_v44  ;;  %v177_v49 = vld [vmem:[%s3139_s1 + $0x478] sm:$0xff]  ;;  %v1348_v51 = vld.sshfl [vmem:[%s3138_s0 + $0x10] sm:$0x3 pattern:$0x76325410]  ;;  %v590_v52 = vld [vmem:[%s3141_s3 + $0x8] sm:$0xff] }
  0x40   :  { %1773 = vmatprep.subr.bf16.mxu1 %v1772_v19  ;;  %v1798_v50 = vpack.c.bf16 %v177_v49, %v176_v48  ;;  %v599_v53 = vld [vmem:[%s3141_s3 + $0x50] sm:$0xff]  ;;  %v592_v54 = vld [vmem:[%s3141_s3 + $0x18] sm:$0xff]  ;;  %v601_v56 = vld [vmem:[%s3141_s3 + $0x60] sm:$0xff] }
  0x41   :  { %1743 = vmatpush3.bf16.msra.mxu0 %v1742_v22  ;;  %v1800_v55 = vpack.c.bf16 %v599_v53, %v590_v52  ;;  %v589_v57 = vld [vmem:[%s3141_s3] sm:$0xff]  ;;  %v598_v58 = vld [vmem:[%s3141_s3 + $0x48] sm:$0xff]  ;;  %v1832_v59 = vpack.c.bf16 %v601_v56, %v592_v54  ;;  %v591_v62 = vld [vmem:[%s3141_s3 + $0x10] sm:$0xff] }
  0x42   :  { %1776 = vmatprep.subr.bf16.mxu0 %v2037_v27  ;;  %v1802_v61 = vpack.c.bf16 %v598_v58, %v589_v57  ;;  %v600_v63 = vld [vmem:[%s3141_s3 + $0x58] sm:$0xff]  ;;  %v617_v2 = vld [vmem:[%s3141_s3 + $0xe0] sm:$0xff]  ;;  %v610_v3 = vld [vmem:[%s3141_s3 + $0xa8] sm:$0xff] }
  0x43   :  { %1775 = vmatpush3.bf16.msra.mxu1 %v1774_v23  ;;  %v1834_v0 = vpack.c.bf16 %v600_v63, %v591_v62  ;;  %v608_v1 = vld [vmem:[%s3141_s3 + $0x98] sm:$0xff]  ;;  %v619_v5 = vld [vmem:[%s3141_s3 + $0xf0] sm:$0xff]  ;;  %v609_v11 = vld [vmem:[%s3141_s3 + $0xa0] sm:$0xff] }
  0x44   :  { %443 = vmatmul.mubr.f32.vlgmr.msra.gmra.mrb[2].mxu0 %v2407_v34  ;;  %v1783_v34 = vpack.c.bf16 %v167_v32, %v166_v31  ;;  %1801 = vmatprep.subr.bf16.mxu1 %v1800_v55  ;;  %v1804_v4 = vpack.c.bf16 %v617_v2, %v608_v1  ;;  %v607_v6 = vld [vmem:[%s3141_s3 + $0x90] sm:$0xff]  ;;  %v616_v7 = vld [vmem:[%s3141_s3 + $0xd8] sm:$0xff]  ;;  %v1836_v8 = vpack.c.bf16 %v619_v5, %v610_v3  ;;  %v618_v12 = vld [vmem:[%s3141_s3 + $0xe8] sm:$0xff] }
  0x45   :  { %1778 = vmatpush3.bf16.msra.mxu0 %v1777_v26  ;;  %1575 = vmatprep.mubr.msk.f32.mxu0 %vm2038_vm0, %v2039_v33  ;;  %v1806_v9 = vpack.c.bf16 %v616_v7, %v607_v6  ;;  %v626_v13 = vld [vmem:[%s3141_s3 + $0x128] sm:$0xff]  ;;  %v1838_v14 = vpack.c.bf16 %v618_v12, %v609_v11  ;;  %v635_v15 = vld [vmem:[%s3141_s3 + $0x170] sm:$0xff]  ;;  %v628_v16 = vld [vmem:[%s3141_s3 + $0x138] sm:$0xff] }
  0x46   :  { %513 = vmatmul.mubr.f32.vlgmr.msra.gmra.mrb[2].mxu1 %v2421_v43  ;;  %1779 = vmatprep.subr.bf16.mxu0 %v2037_v27  ;;  %v1792_v43 = vpack.c.bf16 %v173_v42, %v172_v41  ;;  %v637_v17 = vld [vmem:[%s3141_s3 + $0x180] sm:$0xff]  ;;  %v1808_v18 = vpack.c.bf16 %v635_v15, %v626_v13  ;;  %v634_v21 = vld [vmem:[%s3141_s3 + $0x168] sm:$0xff]  ;;  %v627_v22 = vld [vmem:[%s3141_s3 + $0x130] sm:$0xff] }
  0x47   :  { %846 = vmatprep.mubr.f32.mxu1 %v2039_v33  ;;  %1803 = vmatpush1.bf16.msra.mxu1 %v1802_v61  ;;  %v1840_v19 = vpack.c.bf16 %v637_v17, %v628_v16  ;;  %v625_v20 = vld [vmem:[%s3141_s3 + $0x120] sm:$0xff]  ;;  %v636_v24 = vld [vmem:[%s3141_s3 + $0x178] sm:$0xff]  ;;  %v655_v31 = vld [vmem:[%s3141_s3 + $0x210] sm:$0xff] }
  0x48   :  { %1805 = vmatprep.subr.bf16.mxu1 %v1804_v4  ;;  %v1810_v23 = vpack.c.bf16 %v634_v21, %v625_v20  ;;  %v644_v25 = vld [vmem:[%s3141_s3 + $0x1b8] sm:$0xff]  ;;  %v653_v26 = vld [vmem:[%s3141_s3 + $0x200] sm:$0xff]  ;;  %v1842_v28 = vpack.c.bf16 %v636_v24, %v627_v22  ;;  %v643_v32 = vld [vmem:[%s3141_s3 + $0x1b0] sm:$0xff] }
  0x49   :  { %1781 = vmatpush3.bf16.msra.mxu0 %v1780_v30  ;;  %v1812_v29 = vpack.c.bf16 %v653_v26, %v644_v25  ;;  %v646_v30 = vld [vmem:[%s3141_s3 + $0x1c8] sm:$0xff]  ;;  %v652_v35 = vld [vmem:[%s3141_s3 + $0x1f8] sm:$0xff]  ;;  %v645_v36 = vld [vmem:[%s3141_s3 + $0x1c0] sm:$0xff] }
  0x4a   :  { %1782 = vmatprep.subr.bf16.mxu0 %v2037_v27  ;;  %v1814_v38 = vpack.c.bf16 %v652_v35, %v643_v32  ;;  %v662_v39 = vld [vmem:[%s3141_s3 + $0x248] sm:$0xff]  ;;  %v664_v41 = vld [vmem:[%s3141_s3 + $0x258] sm:$0xff]  ;;  %v673_v44 = vld [vmem:[%s3141_s3 + $0x2a0] sm:$0xff] }
  0x4b   :  { %1807 = vmatpush1.bf16.msra.mxu1 %v1806_v9  ;;  %v661_v46 = vld [vmem:[%s3141_s3 + $0x240] sm:$0xff]  ;;  %v1848_v48 = vpack.c.bf16 %v673_v44, %v664_v41  ;;  %v663_v49 = vld [vmem:[%s3141_s3 + $0x250] sm:$0xff]  ;;  %v682_v53 = vld [vmem:[%s3141_s3 + $0x2e8] sm:$0xff] }
  0x4c   :  { %1809 = vmatprep.subr.bf16.mxu1 %v1808_v18  ;;  %v689_v52 = vld [vmem:[%s3141_s3 + $0x320] sm:$0xff]  ;;  %v691_v54 = vld [vmem:[%s3141_s3 + $0x330] sm:$0xff]  ;;  %v690_v63 = vld [vmem:[%s3141_s3 + $0x328] sm:$0xff] }
  0x4d   :  { %1784 = vmatpush3.bf16.msra.mxu0 %v1783_v34  ;;  %v1844_v34 = vpack.c.bf16 %v655_v31, %v646_v30  ;;  %v679_v58 = vld [vmem:[%s3141_s3 + $0x2d0] sm:$0xff]  ;;  %v681_v61 = vld [vmem:[%s3141_s3 + $0x2e0] sm:$0xff]  ;;  %v1852_v62 = vpack.c.bf16 %v691_v54, %v682_v53  ;;  %v700_v2 = vld [vmem:[%s3141_s3 + $0x378] sm:$0xff] }
  0x4e   :  { %1785 = vmatprep.subr.bf16.mxu0 %v2037_v27  ;;  %v707_v1 = vld [vmem:[%s3141_s3 + $0x3b0] sm:$0xff]  ;;  %v709_v3 = vld [vmem:[%s3141_s3 + $0x3c0] sm:$0xff]  ;;  %v1854_v5 = vpack.c.bf16 %v690_v63, %v681_v61  ;;  %v708_v12 = vld [vmem:[%s3141_s3 + $0x3b8] sm:$0xff] }
  0x4f   :  { %1811 = vmatpush1.bf16.msra.mxu1 %v1810_v23  ;;  %v697_v7 = vld [vmem:[%s3141_s3 + $0x360] sm:$0xff]  ;;  %v699_v9 = vld [vmem:[%s3141_s3 + $0x370] sm:$0xff]  ;;  %v1856_v11 = vpack.c.bf16 %v709_v3, %v700_v2  ;;  %v716_v13 = vld [vmem:[%s3141_s3 + $0x3f8] sm:$0xff] }
  0x50   :  { %1813 = vmatprep.subr.bf16.mxu1 %v1812_v29  ;;  %v718_v15 = vld [vmem:[%s3141_s3 + $0x408] sm:$0xff]  ;;  %v727_v16 = vld [vmem:[%s3141_s3 + $0x450] sm:$0xff]  ;;  %v1858_v18 = vpack.c.bf16 %v708_v12, %v699_v9  ;;  %v724_v21 = vld [vmem:[%s3141_s3 + $0x438] sm:$0xff] }
  0x51   :  { %1787 = vmatpush3.bf16.msra.mxu0 %v1786_v37  ;;  %v654_v37 = vld [vmem:[%s3141_s3 + $0x208] sm:$0xff]  ;;  %v715_v20 = vld [vmem:[%s3141_s3 + $0x3f0] sm:$0xff]  ;;  %v1860_v22 = vpack.c.bf16 %v727_v16, %v718_v15  ;;  %v717_v23 = vld [vmem:[%s3141_s3 + $0x400] sm:$0xff] }
  0x52   :  { %1788 = vmatprep.subr.bf16.mxu0 %v2037_v27  ;;  %v1846_v42 = vpack.c.bf16 %v654_v37, %v645_v36  ;;  %v726_v24 = vld [vmem:[%s3141_s3 + $0x448] sm:$0xff]  ;;  %v1830_v25 = vpack.c.bf16 %v724_v21, %v715_v20  ;;  %v603_v29 = vld [vmem:[%s3141_s3 + $0x70] sm:$0xff]  ;;  %v596_v30 = vld [vmem:[%s3141_s3 + $0x38] sm:$0xff] }
  0x53   :  { %1815 = vmatpush1.bf16.msra.mxu1 %v1814_v38  ;;  %v1862_v26 = vpack.c.bf16 %v726_v24, %v717_v23  ;;  %v605_v32 = vld [vmem:[%s3141_s3 + $0x80] sm:$0xff]  ;;  %v602_v54 = vld [vmem:[%s3141_s3 + $0x68] sm:$0xff]  ;;  %v623_v61 = vld [vmem:[%s3141_s3 + $0x110] sm:$0xff] }
  0x54   :  { %v1347_v36 = vld [vmem:[%s3140_s2] ss:$0 sm:$0xff]  ;;  %v620_v2 = vld [vmem:[%s3141_s3 + $0xf8] sm:$0xff]  ;;  %v630_v9 = vld [vmem:[%s3141_s3 + $0x148] sm:$0xff] }
  0x55   :  { %1790 = vmatpush3.bf16.msra.mxu0 %v1789_v40  ;;  %v671_v40 = vld [vmem:[%s3141_s3 + $0x290] sm:$0xff]  ;;  %v593_v53 = vld [vmem:[%s3141_s3 + $0x20] sm:$0xff]  ;;  %v632_v12 = vld [vmem:[%s3141_s3 + $0x158] sm:$0xff] }
  0x56   :  { %1791 = vmatprep.subr.bf16.mxu0 %v2037_v27  ;;  %v1866_v63 = vpack.c.bf16 %v602_v54, %v593_v53  ;;  %v640_v23 = vld [vmem:[%s3141_s3 + $0x198] sm:$0xff]  ;;  %v686_v53 = vld [vmem:[%s3141_s3 + $0x308] sm:$0xff]  ;;  %v695_v54 = vld [vmem:[%s3141_s3 + $0x350] sm:$0xff] }
  0x57   :  { %v648_v24 = vld [vmem:[%s3141_s3 + $0x1d8] sm:$0xff] }
  0x59   :  { %1793 = vmatpush3.bf16.msra.mxu0 %v1792_v43  ;;  %v1816_v43 = vpack.c.bf16 %v671_v40, %v662_v39 }
  0x5a   :  { %1794 = vmatprep.subr.bf16.mxu0 %v2037_v27 }
  0x5b   :  { %1817 = vmatprep.subr.bf16.mxu1 %v1816_v43 }
  0x5d   :  { %1796 = vmatpush3.bf16.msra.mxu0 %v1795_v47  ;;  %v670_v47 = vld [vmem:[%s3141_s3 + $0x288] sm:$0xff] }
  0x5e   :  { %1797 = vmatprep.subr.bf16.mxu0 %v2037_v27  ;;  %v1818_v55 = vpack.c.bf16 %v670_v47, %v661_v46 }
  0x60   :  { %1819 = vmatpush1.bf16.msra.mxu1 %v1818_v55  ;;  %v595_v55 = vld [vmem:[%s3141_s3 + $0x30] sm:$0xff] }
  0x61   :  { %1799 = vmatpush3.bf16.msra.mxu0 %v1798_v50  ;;  %v672_v50 = vld [vmem:[%s3141_s3 + $0x298] sm:$0xff] }
  0x62   :  { %1833 = vmatprep.subr.bf16.mxu0 %v1832_v59  ;;  %v1850_v56 = vpack.c.bf16 %v672_v50, %v663_v49  ;;  %v688_v59 = vld [vmem:[%s3141_s3 + $0x318] sm:$0xff] }
  0x63   :  { %v1822_v4 = vpack.c.bf16 %v688_v59, %v679_v58  ;;  %v621_v58 = vld [vmem:[%s3141_s3 + $0x100] sm:$0xff]  ;;  %v614_v59 = vld [vmem:[%s3141_s3 + $0xc8] sm:$0xff] }
  0x64   :  { %1576 = vmatmul.mubr.f32.vlgmr.msra.gmra.mrb[4].mxu0 %v1348_v51  ;;  %v680_v51 = vld [vmem:[%s3141_s3 + $0x2d8] sm:$0xff] }
  0x65   :  { %917 = vmatprep.mubr.f32.mxu0 %v2039_v33  ;;  %1835 = vmatpush1.bf16.msra.mxu0 %v1834_v0  ;;  %v1820_v57 = vpack.c.bf16 %v689_v52, %v680_v51  ;;  %v698_v0 = vld [vmem:[%s3141_s3 + $0x368] sm:$0xff] }
  0x66   :  { %1837 = vmatprep.subr.bf16.mxu0 %v1836_v8  ;;  %v1824_v6 = vpack.c.bf16 %v707_v1, %v698_v0  ;;  %v706_v8 = vld [vmem:[%s3141_s3 + $0x3a8] sm:$0xff]  ;;  %v611_v1 = vld [vmem:[%s3141_s3 + $0xb0] sm:$0xff] }
  0x67   :  { %1821 = vmatprep.subr.bf16.mxu1 %v1820_v57  ;;  %v1826_v17 = vpack.c.bf16 %v706_v8, %v697_v7  ;;  %v612_v57 = vld [vmem:[%s3141_s3 + $0xb8] sm:$0xff]  ;;  %v613_v7 = vld [vmem:[%s3141_s3 + $0xc0] sm:$0xff]  ;;  %v622_v8 = vld [vmem:[%s3141_s3 + $0x108] sm:$0xff]  ;;  %v1870_v15 = vpack.c.bf16 %v620_v2, %v611_v1 }
  0x68   :  { %1823 = vmatpush1.bf16.msra.mxu1 %v1822_v4  ;;  %v1902_v16 = vpack.c.bf16 %v622_v8, %v613_v7  ;;  %v711_v1 = vld [vmem:[%s3141_s3 + $0x3d0] sm:$0xff]  ;;  %v704_v2 = vld [vmem:[%s3141_s3 + $0x398] sm:$0xff]  ;;  %v701_v7 = vld [vmem:[%s3141_s3 + $0x380] sm:$0xff] }
  0x69   :  { %1839 = vmatpush1.bf16.msra.mxu0 %v1838_v14  ;;  %v725_v14 = vld [vmem:[%s3141_s3 + $0x440] sm:$0xff]  ;;  %1825 = vmatprep.subr.bf16.mxu1 %v1824_v6  ;;  %v1900_v6 = vpack.c.bf16 %v623_v61, %v614_v59  ;;  %v1916_v61 = vpack.c.bf16 %v695_v54, %v686_v53  ;;  %v710_v8 = vld [vmem:[%s3141_s3 + $0x3c8] sm:$0xff] }
  0x6a   :  { %1841 = vmatprep.subr.bf16.mxu0 %v1840_v19  ;;  %v1828_v19 = vpack.c.bf16 %v725_v14, %v716_v13  ;;  %v641_v13 = vld [vmem:[%s3141_s3 + $0x1a0] sm:$0xff] }
  0x6b   :  { %v1904_v21 = vpack.c.bf16 %v641_v13, %v632_v12  ;;  %v703_v12 = vld [vmem:[%s3141_s3 + $0x390] sm:$0xff]  ;;  %v712_v13 = vld [vmem:[%s3141_s3 + $0x3d8] sm:$0xff]  ;;  %v669_v54 = vld [vmem:[%s3141_s3 + $0x280] sm:$0xff] }
  0x6c   :  { %1827 = vmatpush1.bf16.msra.mxu1 %v1826_v17  ;;  %v629_v17 = vld [vmem:[%s3141_s3 + $0x140] sm:$0xff] }
  0x6d   :  { %1843 = vmatpush1.bf16.msra.mxu0 %v1842_v28  ;;  %1829 = vmatprep.subr.bf16.mxu1 %v1828_v19  ;;  %v594_v28 = vld [vmem:[%s3141_s3 + $0x28] sm:$0xff] }
  0x6e   :  { %1845 = vmatprep.subr.bf16.mxu0 %v1844_v34  ;;  %v1864_v31 = vpack.c.bf16 %v603_v29, %v594_v28  ;;  %v1896_v34 = vpack.c.bf16 %v605_v32, %v596_v30  ;;  %v659_v28 = vld [vmem:[%s3141_s3 + $0x230] sm:$0xff]  ;;  %v656_v32 = vld [vmem:[%s3141_s3 + $0x218] sm:$0xff] }
  0x70   :  { %1831 = vmatpush1.bf16.msra.mxu1 %v1830_v25  ;;  %v657_v25 = vld [vmem:[%s3141_s3 + $0x220] sm:$0xff] }
  0x71   :  { %1847 = vmatpush1.bf16.msra.mxu0 %v1846_v42  ;;  %1865 = vmatprep.subr.bf16.mxu1 %v1864_v31  ;;  %v647_v31 = vld [vmem:[%s3141_s3 + $0x1d0] sm:$0xff] }
  0x72   :  { %1849 = vmatprep.subr.bf16.mxu0 %v1848_v48 }
  0x75   :  { %1851 = vmatpush1.bf16.msra.mxu0 %v1850_v56  ;;  %v604_v56 = vld [vmem:[%s3141_s3 + $0x78] sm:$0xff] }
  0x76   :  { %1853 = vmatprep.subr.bf16.mxu0 %v1852_v62  ;;  %v1898_v0 = vpack.c.bf16 %v604_v56, %v595_v55 }
  0x79   :  { %1855 = vmatpush1.bf16.msra.mxu0 %v1854_v5  ;;  %v1868_v5 = vpack.c.bf16 %v621_v58, %v612_v57  ;;  %v683_v57 = vld [vmem:[%s3141_s3 + $0x2f0] sm:$0xff]  ;;  %v692_v58 = vld [vmem:[%s3141_s3 + $0x338] sm:$0xff] }
  0x7a   :  { %1857 = vmatprep.subr.bf16.mxu0 %v1856_v11  ;;  %v639_v11 = vld [vmem:[%s3141_s3 + $0x190] sm:$0xff] }
  0x7b   :  { %v1872_v20 = vpack.c.bf16 %v639_v11, %v630_v9 }
  0x7d   :  { %1859 = vmatpush1.bf16.msra.mxu0 %v1858_v18  ;;  %v638_v18 = vld [vmem:[%s3141_s3 + $0x188] sm:$0xff] }
  0x7e   :  { %1861 = vmatprep.subr.bf16.mxu0 %v1860_v22  ;;  %v631_v22 = vld [vmem:[%s3141_s3 + $0x150] sm:$0xff]  ;;  %v1874_v29 = vpack.c.bf16 %v638_v18, %v629_v17  ;;  %v1890_v18 = vpack.c.bf16 %v710_v8, %v701_v7  ;;  %v1227_v7 = vld [vmem:[%s3143_s5 + $0x68] sm:$0xff] }
  0x7f   :  { %v1906_v30 = vpack.c.bf16 %v640_v23, %v631_v22  ;;  %v731_v17 = vld [vmem:[%s3141_s3 + $0x470] sm:$0xff]  ;;  %v728_v23 = vld [vmem:[%s3141_s3 + $0x458] sm:$0xff] }
  0x81   :  { %1863 = vmatpush1.bf16.msra.mxu0 %v1862_v26  ;;  %v650_v26 = vld [vmem:[%s3141_s3 + $0x1e8] sm:$0xff] }
  0x82   :  { %1897 = vmatprep.subr.bf16.mxu0 %v1896_v34  ;;  %v1876_v34 = vpack.c.bf16 %v657_v25, %v648_v24  ;;  %v721_v24 = vld [vmem:[%s3141_s3 + $0x420] sm:$0xff]  ;;  %v730_v25 = vld [vmem:[%s3141_s3 + $0x468] sm:$0xff] }
  0xf7   :  { %v1384_v35 = vpop.f32.mrb[0].mxu0 }
  0xf8   :  { %v1385_v37 = vpop.f32.mrb[1].mxu0 }
  0xf9   :  { %v1419_v38 = vpop.f32.mrb[0].mxu1  ;;  %v1386_v39 = vadd.f32 %v1385_v37, %v1384_v35  ;;  %v1908_v35 = vpack.c.bf16 %v659_v28, %v650_v26  ;;  %v658_v37 = vld [vmem:[%s3141_s3 + $0x228] sm:$0xff]  ;;  %v1926_v28 = vpack.c.bf16 %v730_v25, %v721_v24 }
  0xfa   :  { %v1420_v40 = vpop.f32.mrb[1].mxu1 }
  0xfb   :  { %v1421_v41 = vadd.f32 %v1420_v40, %v1419_v38  ;;  %v305_v42 = vadd.f32 %v1386_v39, %v1347_v36  ;;  %v649_v36 = vld [vmem:[%s3141_s3 + $0x1e0] sm:$0xff]  ;;  %v666_v38 = vld [vmem:[%s3141_s3 + $0x268] sm:$0xff]  ;;  %v675_v39 = vld [vmem:[%s3141_s3 + $0x2b0] sm:$0xff] }
  0xfc   :  { %v668_v40 = vld [vmem:[%s3141_s3 + $0x278] sm:$0xff] }
  0xfd   :  { %v375_v43 = vadd.f32 %v1421_v41, %v305_v42  ;;  %v677_v41 = vld [vmem:[%s3141_s3 + $0x2c0] sm:$0xff]  ;;  %v1878_v42 = vpack.c.bf16 %v656_v32, %v647_v31  ;;  %v1215_v32 = vld [vmem:[%s3143_s5 + $0x8] sm:$0xff] }
  0xfe   :  { %v1214_v31 = vld [vmem:[%s3143_s5] sm:$0xff] }
 0x117   :  { %v1454_v44 = vpop.f32.mrb[2].mxu0 }
 0x118   :  { %v1455_v46 = vpop.f32.mrb[3].mxu0 }
 0x119   :  { %v1489_v47 = vpop.f32.mrb[2].mxu1  ;;  %v1456_v48 = vadd.f32 %v1455_v46, %v1454_v44  ;;  %v665_v44 = vld [vmem:[%s3141_s3 + $0x260] sm:$0xff]  ;;  %v674_v46 = vld [vmem:[%s3141_s3 + $0x2a8] sm:$0xff] }
 0x11a   :  { %v1490_v49 = vpop.f32.mrb[3].mxu1  ;;  %v1882_v55 = vpack.c.bf16 %v674_v46, %v665_v44  ;;  %v1218_v44 = vld [vmem:[%s3143_s5 + $0x20] sm:$0xff]  ;;  %v1219_v46 = vld [vmem:[%s3143_s5 + $0x28] sm:$0xff] }
 0x11b   :  { %v1491_v50 = vadd.f32 %v1490_v49, %v1489_v47  ;;  %v445_v51 = vadd.f32 %v1456_v48, %v375_v43  ;;  %v1910_v43 = vpack.c.bf16 %v658_v37, %v649_v36  ;;  %v1880_v47 = vpack.c.bf16 %v675_v39, %v666_v38  ;;  %v667_v49 = vld [vmem:[%s3141_s3 + $0x270] sm:$0xff]  ;;  %v624_v37 = vld [vmem:[%s3141_s3 + $0x118] sm:$0xff] }
 0x11c   :  { %v1912_v48 = vpack.c.bf16 %v677_v41, %v668_v40  ;;  %v615_v36 = vld [vmem:[%s3141_s3 + $0xd0] sm:$0xff]  ;;  %v1217_v39 = vld [vmem:[%s3143_s5 + $0x18] sm:$0xff] }
 0x11d   :  { %v515_v52 = vadd.f32 %v1491_v50, %v445_v51  ;;  %v676_v50 = vld [vmem:[%s3141_s3 + $0x2b8] sm:$0xff]  ;;  %v1216_v38 = vld [vmem:[%s3143_s5 + $0x10] sm:$0xff]  ;;  %v1932_v40 = vpack.c.bf16 %v624_v37, %v615_v36 }
 0x11e   :  { %v684_v51 = vld [vmem:[%s3141_s3 + $0x2f8] sm:$0xff]  ;;  %v1914_v56 = vpack.c.bf16 %v676_v50, %v667_v49  ;;  %v1956_v41 = vpack.c.bf16 %v1217_v39, %v1216_v38  ;;  %v651_v49 = vld [vmem:[%s3141_s3 + $0x1f0] sm:$0xff] }
 0x11f   :  { %v660_v50 = vld [vmem:[%s3141_s3 + $0x238] sm:$0xff] }
 0x137   :  { %v584_v62 = vpop.f32.mrb[4].mxu0 }
 0x138   :  { %v2802_v3 = vadd.f32 %v584_v62, %v515_v52  ;;  %v1577_v4 = vpop.f32.mrb[5].mxu0  ;;  %v693_v52 = vld [vmem:[%s3141_s3 + $0x340] sm:$0xff] }
 0x139   :  { %v1884_v59 = vpack.c.bf16 %v693_v52, %v684_v51  ;;  %v685_v62 = vld [vmem:[%s3141_s3 + $0x300] sm:$0xff]  ;;  %v1221_v51 = vld [vmem:[%s3143_s5 + $0x38] sm:$0xff]  ;;  %v1938_v52 = vpack.c.bf16 %v660_v50, %v651_v49 }
 0x13a   :  { %588 = vst [vmem:[#allocation2] sm:$0x3] %v2802_v3  ;;  %847 = vmatmul.mubr.f32.vlgmr.msra.gmra.mrb[4].mxu1 %v2802_v3  ;;  %918 = vmatmul.mubr.f32.vlgmr.msra.gmra.mrb[6].mxu0 %v2802_v3  ;;  %v1201_v14 = vmul.f32 %v2802_v3, %v2802_v3  ;;  %v713_v4 = vld [vmem:[%s3141_s3 + $0x3e0] sm:$0xff] }
 0x13b   :  { %1867 = vmatpush1.bf16.msra.mxu1 %v1866_v63  ;;  %1899 = vmatpush1.bf16.msra.mxu0 %v1898_v0  ;;  %v694_v63 = vld [vmem:[%s3141_s3 + $0x348] sm:$0xff]  ;;  %v1920_v11 = vpack.c.bf16 %v713_v4, %v704_v2  ;;  %v705_v4 = vld [vmem:[%s3141_s3 + $0x3a0] sm:$0xff] }
 0x13c   :  { %v1203_v19 = vsel %vm1202_vm1, %v1201_v14, 0.0  ;;  %1869 = vmatprep.subr.bf16.mxu1 %v1868_v5  ;;  %1901 = vmatprep.subr.bf16.mxu0 %v1900_v6  ;;  %v702_v0 = vld [vmem:[%s3141_s3 + $0x388] sm:$0xff]  ;;  %v1886_v5 = vpack.c.bf16 %v692_v58, %v683_v57  ;;  %v1918_v6 = vpack.c.bf16 %v694_v63, %v685_v62  ;;  %v720_v14 = vld [vmem:[%s3141_s3 + $0x418] sm:$0xff]  ;;  %v1224_v63 = vld [vmem:[%s3143_s5 + $0x50] sm:$0xff] }
 0x13d   :  { %1204 = vadd.xlane.f32.xlu0 %v1203_v19  ;;  %988 = vmatprep.mubr.f32.mxu1 %v2039_v33  ;;  %v1888_v9 = vpack.c.bf16 %v711_v1, %v702_v0  ;;  %v1922_v19 = vpack.c.bf16 %v712_v13, %v703_v12  ;;  %v1223_v57 = vld [vmem:[%s3143_s5 + $0x48] sm:$0xff]  ;;  %v696_v62 = vld [vmem:[%s3141_s3 + $0x358] sm:$0xff]  ;;  %v1228_v13 = vld [vmem:[%s3143_s5 + $0x70] sm:$0xff] }
 0x13e   :  { %1059 = vmatprep.mubr.f32.mxu0 %v2039_v33  ;;  %v1225_v0 = vld [vmem:[%s3143_s5 + $0x58] sm:$0xff] }
 0x13f   :  { %1871 = vmatpush1.bf16.msra.mxu1 %v1870_v15  ;;  %1903 = vmatpush1.bf16.msra.mxu0 %v1902_v16  ;;  %v729_v15 = vld [vmem:[%s3141_s3 + $0x460] sm:$0xff]  ;;  %v722_v16 = vld [vmem:[%s3141_s3 + $0x428] sm:$0xff]  ;;  %v1968_v2 = vpack.c.bf16 %v1225_v0, %v1224_v63  ;;  %v732_v12 = vld [vmem:[%s3141_s3 + $0x478] sm:$0xff] }
 0x140   :  { %1873 = vmatprep.subr.bf16.mxu1 %v1872_v20  ;;  %1905 = vmatprep.subr.bf16.mxu0 %v1904_v21  ;;  %v719_v20 = vld [vmem:[%s3141_s3 + $0x410] sm:$0xff]  ;;  %v1892_v21 = vpack.c.bf16 %v729_v15, %v720_v14  ;;  %v1924_v22 = vpack.c.bf16 %v731_v17, %v722_v16  ;;  %v1229_v14 = vld [vmem:[%s3143_s5 + $0x78] sm:$0xff]  ;;  %v739_v17 = vsub.s32 0, %v2210_v60 }
 0x141   :  { %v1894_v26 = vpack.c.bf16 %v728_v23, %v719_v20  ;;  %v1974_v16 = vpack.c.bf16 %v1229_v14, %v1228_v13  ;;  %v743_v20 = vsub.s32 1, %v2210_v60 }
 0x143   :  { %1875 = vmatpush1.bf16.msra.mxu1 %v1874_v29  ;;  %1907 = vmatpush1.bf16.msra.mxu0 %v1906_v30  ;;  %v597_v29 = vld [vmem:[%s3141_s3 + $0x40] sm:$0xff]  ;;  %v606_v30 = vld [vmem:[%s3141_s3 + $0x88] sm:$0xff] }
 0x144   :  { %1877 = vmatprep.subr.bf16.mxu1 %v1876_v34  ;;  %1909 = vmatprep.subr.bf16.mxu0 %v1908_v35  ;;  %v1929_v34 = vpack.c.bf16 %v606_v30, %v597_v29  ;;  %v1953_v35 = vpack.c.bf16 %v1215_v32, %v1214_v31 }
 0x147   :  { %1879 = vmatpush1.bf16.msra.mxu1 %v1878_v42  ;;  %1911 = vmatpush1.bf16.msra.mxu0 %v1910_v43  ;;  %v633_v42 = vld [vmem:[%s3141_s3 + $0x160] sm:$0xff]  ;;  %v642_v43 = vld [vmem:[%s3141_s3 + $0x1a8] sm:$0xff] }
 0x148   :  { %1881 = vmatprep.subr.bf16.mxu1 %v1880_v47  ;;  %1913 = vmatprep.subr.bf16.mxu0 %v1912_v48  ;;  %v1935_v47 = vpack.c.bf16 %v642_v43, %v633_v42  ;;  %v1959_v48 = vpack.c.bf16 %v1219_v46, %v1218_v44  ;;  %v755_v43 = vsub.s32 4, %v2210_v60  ;;  %v763_v44 = vsub.s32 6, %v2210_v60 }
 0x149   :  { %v759_v46 = vsub.s32 5, %v2210_v60 }
 0x14b   :  { %1883 = vmatpush1.bf16.msra.mxu1 %v1882_v55  ;;  %1915 = vmatpush1.bf16.msra.mxu0 %v1914_v56  ;;  %v678_v55 = vld [vmem:[%s3141_s3 + $0x2c8] sm:$0xff]  ;;  %v1222_v56 = vld [vmem:[%s3143_s5 + $0x40] sm:$0xff] }
 0x14c   :  { %1885 = vmatprep.subr.bf16.mxu1 %v1884_v59  ;;  %1917 = vmatprep.subr.bf16.mxu0 %v1916_v61  ;;  %v1941_v58 = vpack.c.bf16 %v678_v55, %v669_v54  ;;  %v1965_v59 = vpack.c.bf16 %v1223_v57, %v1222_v56  ;;  %v687_v61 = vld [vmem:[%s3141_s3 + $0x310] sm:$0xff] }
 0x14d   :  { %v1944_v1 = vpack.c.bf16 %v696_v62, %v687_v61 }
 0x14f   :  { %1887 = vmatpush1.bf16.msra.mxu1 %v1886_v5  ;;  %1919 = vmatpush1.bf16.msra.mxu0 %v1918_v6  ;;  %v714_v5 = vld [vmem:[%s3141_s3 + $0x3e8] sm:$0xff]  ;;  %v1226_v6 = vld [vmem:[%s3143_s5 + $0x60] sm:$0xff] }
 0x150   :  { %1889 = vmatprep.subr.bf16.mxu1 %v1888_v9  ;;  %1921 = vmatprep.subr.bf16.mxu0 %v1920_v11  ;;  %v1947_v8 = vpack.c.bf16 %v714_v5, %v705_v4  ;;  %v1971_v9 = vpack.c.bf16 %v1227_v7, %v1226_v6  ;;  %v723_v11 = vld [vmem:[%s3141_s3 + $0x430] sm:$0xff]  ;;  %v1351_v5 = vld [vmem:[%s3144_s6] ss:$0 sm:$0xff]  ;;  %v1349_v7 = vld [vmem:[%s3142_s4 + $0x8] ss:$0 sm:$0xff] }
 0x151   :  { %v1950_v15 = vpack.c.bf16 %v732_v12, %v723_v11 }
 0x153   :  { %1891 = vmatpush1.bf16.msra.mxu1 %v1890_v18  ;;  %1923 = vmatpush1.bf16.msra.mxu0 %v1922_v19  ;;  %v747_v18 = vsub.s32 2, %v2210_v60  ;;  %v733_v19 = vld [vmem:[%s3142_s4] sm:$0xff]  ;;  %s2040_s4 = smov [#allocation2]  }
 0x154   :  { %1893 = vmatprep.subr.bf16.mxu1 %v1892_v21  ;;  %1925 = vmatprep.subr.bf16.mxu0 %v1924_v22  ;;  %v751_v21 = vsub.s32 3, %v2210_v60  ;;  %v740_v22 = vrot.slane %v733_v19, %v739_v17  ;;  %v744_v23 = vrot.slane %v733_v19, %v743_v20  ;;  %v764_v49 = vrot.slane %v733_v19, %v763_v44  ;;  %s1321_s6 = sshll.u32 %s2040_s4, 4  ;;  %s1322_s6 = int_to_ptr.vmem [resolvable:$true] %s1321_s6 }
 0x155   :  { %v760_v50 = vrot.slane %v733_v19, %v759_v46  ;;  %s1988_s2 = scalar_lea.vmem %s1322_s6, 32  ;;  %p1993_p1 = scmp.lt.s32.totalorder %s1322_s6, %s1322_s6 }
 0x156   :  { %v752_v24 = vrot.slane %v733_v19, %v751_v21  ;;  %p1989_p0 = scmp.ne.s32.totalorder %s1322_s6, %s1988_s2  ;;  %p1994_p2 = scmp.lt.s32.totalorder %s1988_s2, %s1988_s2 }
 0x157   :  { %1895 = vmatpush1.bf16.msra.mxu1 %v1894_v26  ;;  %1927 = vmatpush1.bf16.msra.mxu0 %v1926_v28 }
 0x158   :  { %1928 = vmatprep.subr.bf16.mxu1 %v2037_v27  ;;  %1952 = vmatprep.subr.bf16.mxu0 %v2037_v27  ;;  %p1995_p3 = por %p1994_p2, %p1993_p1 }
 0x15a   :  { %989 = vmatmul.mubr.f32.vlgmr.msra.gmra.mrb[6].mxu1 %v2802_v3  ;;  %1060 = vmatmul.mubr.f32.vlgmr.msra.gmra.mrb[8].mxu0 %v2802_v3  ;;  %p1996_p4 = pnand %p1995_p3, %p1989_p0 }
 0x15b   :  { %1930 = vmatpush3.bf16.msra.mxu1 %v1929_v34  ;;  %1954 = vmatpush3.bf16.msra.mxu0 %v1953_v35 }
 0x15c   :  { %1931 = vmatprep.subr.bf16.mxu1 %v2037_v27  ;;  %1955 = vmatprep.subr.bf16.mxu0 %v2037_v27 }
 0x15d   :  { %1610 = vmatprep.mubr.msk.f32.mxu1 %vm2038_vm0, %v2039_v33  ;;  %1645 = vmatprep.mubr.msk.f32.mxu0 %vm2038_vm0, %v2039_v33  ;;  %v1220_v33 = vld [vmem:[%s3143_s5 + $0x30] sm:$0xff] }
 0x15e   :  { %v1962_v53 = vpack.c.bf16 %v1221_v51, %v1220_v33 }
 0x15f   :  { %1933 = vmatpush3.bf16.msra.mxu1 %v1932_v40  ;;  %1957 = vmatpush3.bf16.msra.mxu0 %v1956_v41 }
 0x160   :  { %1934 = vmatprep.subr.bf16.mxu1 %v2037_v27  ;;  %1958 = vmatprep.subr.bf16.mxu0 %v2037_v27 }
 0x163   :  { %1936 = vmatpush3.bf16.msra.mxu1 %v1935_v47  ;;  %1960 = vmatpush3.bf16.msra.mxu0 %v1959_v48  ;;  %v767_v47 = vsub.s32 7, %v2210_v60  ;;  %v756_v48 = vrot.slane %v733_v19, %v755_v43 }
 0x164   :  { %1937 = vmatprep.subr.bf16.mxu1 %v2037_v27  ;;  %1961 = vmatprep.subr.bf16.mxu0 %v2037_v27 }
 0x165   :  { %v768_v33 = vrot.slane %v733_v19, %v767_v47 }
 0x167   :  { %1939 = vmatpush3.bf16.msra.mxu1 %v1938_v52  ;;  %1963 = vmatpush3.bf16.msra.mxu0 %v1962_v53 }
 0x168   :  { %1940 = vmatprep.subr.bf16.mxu1 %v2037_v27  ;;  %1964 = vmatprep.subr.bf16.mxu0 %v2037_v27 }
 0x16b   :  { %1942 = vmatpush3.bf16.msra.mxu1 %v1941_v58  ;;  %1966 = vmatpush3.bf16.msra.mxu0 %v1965_v59 }
 0x16c   :  { %1943 = vmatprep.subr.bf16.mxu1 %v2037_v27  ;;  %1967 = vmatprep.subr.bf16.mxu0 %v2037_v27 }
 0x16f   :  { %1945 = vmatpush3.bf16.msra.mxu1 %v1944_v1  ;;  %1969 = vmatpush3.bf16.msra.mxu0 %v1968_v2 }
 0x170   :  { %1946 = vmatprep.subr.bf16.mxu1 %v2037_v27  ;;  %1970 = vmatprep.subr.bf16.mxu0 %v2037_v27 }
 0x173   :  { %1948 = vmatpush3.bf16.msra.mxu1 %v1947_v8  ;;  %1972 = vmatpush3.bf16.msra.mxu0 %v1971_v9 }
 0x174   :  { %1949 = vmatprep.subr.bf16.mxu1 %v2037_v27  ;;  %1973 = vmatprep.subr.bf16.mxu0 %v2037_v27  ;;  %v748_v27 = vrot.slane %v733_v19, %v747_v18  ;;  %v1306_v18 = vand.u32 127, %v192_v45 }
 0x176   :  { %vm1307_vm2 = vcmp.lt.s32.totalorder %v1306_v18, 10 }
 0x177   :  { %1951 = vmatpush3.bf16.msra.mxu1 %v1950_v15  ;;  %1975 = vmatpush3.bf16.msra.mxu0 %v1974_v16 }
 0x17a   :  { %1611 = vmatmul.mubr.f32.vlgmr.msra.gmra.mrb[8].mxu1 %v2802_v3  ;;  %1646 = vmatmul.mubr.f32.vlgmr.msra.gmra.mrb[10].mxu0 %v2802_v3 }
 0x1ca   :  { %v1205_v6 = vpop.xlane.xlu0 %1204 }
 0x1cb   :  { %v1213_v11 = vadd.f32 %v1351_v5, %v1205_v6 }
 0x20d   :  { %v848_v25 = vpop.f32.mrb[4].mxu1  ;;  %v919_v26 = vpop.f32.mrb[6].mxu0 }
 0x20e   :  { %v849_v28 = vadd.f32 %v848_v25, %v740_v22  ;;  %v920_v3 = vadd.f32 %v919_v26, %v748_v27  ;;  %v850_v29 = vpop.f32.mrb[5].mxu1  ;;  %v921_v30 = vpop.f32.mrb[7].mxu0 }
 0x20f   :  { %v851_v31 = vadd.f32 %v850_v29, %v744_v23  ;;  %v922_v32 = vadd.f32 %v921_v30, %v752_v24 }
 0x210   :  { %v1136_v34 = vmax.f32 %v849_v28, 0.0  ;;  %v1138_v35 = vmax.f32 %v920_v3, 0.0 }
 0x211   :  { %v1137_v36 = vmax.f32 %v851_v31, 0.0  ;;  %v1139_v37 = vmax.f32 %v922_v32, 0.0 }
 0x213   :  { %v1154_v38 = vcombine.low %v1136_v34, %v1137_v36  ;;  %v1155_v39 = vcombine.low %v1138_v35, %v1139_v37 }
 0x215   :  { %v1162_v40 = vrot.slane %v1154_v38, %v2240_v10  ;;  %v1169_v41 = vrot.slane %v1155_v39, %v2240_v10 }
 0x217   :  { %v1170_v42 = vcombine.low %v1162_v40, %v1169_v41 }
 0x219   :  { %1198 = vst [vmem:[%s3146_s8] sm:$0xff] %v1170_v42 }
 0x22d   :  { %v990_v51 = vpop.f32.mrb[6].mxu1  ;;  %v1061_v52 = vpop.f32.mrb[8].mxu0 }
 0x22e   :  { %v991_v53 = vadd.f32 %v990_v51, %v756_v48  ;;  %v1062_v54 = vadd.f32 %v1061_v52, %v764_v49  ;;  %v992_v55 = vpop.f32.mrb[7].mxu1  ;;  %v1063_v56 = vpop.f32.mrb[9].mxu0 }
 0x22f   :  { %v993_v57 = vadd.f32 %v992_v55, %v760_v50  ;;  %v1064_v58 = vadd.f32 %v1063_v56, %v768_v33 }
 0x230   :  { %v1140_v59 = vmax.f32 %v991_v53, 0.0  ;;  %v1142_v61 = vmax.f32 %v1062_v54, 0.0 }
 0x231   :  { %v1141_v62 = vmax.f32 %v993_v57, 0.0  ;;  %v1143_v63 = vmax.f32 %v1064_v58, 0.0 }
 0x233   :  { %v1171_v0 = vcombine.low %v1140_v59, %v1141_v62  ;;  %v1172_v1 = vcombine.low %v1142_v61, %v1143_v63 }
 0x235   :  { %v1179_v60 = vrot.slane %v1171_v0, %v2240_v10  ;;  %v1186_v2 = vrot.slane %v1172_v1, %v2240_v10 }
 0x237   :  { %v1187_v4 = vcombine.low %v1179_v60, %v1186_v2 }
 0x239   :  { %1199 = vst [vmem:[%s3146_s8 + $0x8] sm:$0xff] %v1187_v4 }
 0x24d   :  { %v1132_v8 = vpop.f32.mrb[8].mxu1  ;;  %v1296_v9 = vpop.f32.mrb[10].mxu0 }
 0x24e   :  { %v1133_v12 = vadd.f32 %v1349_v7, %v1132_v8  ;;  %v1300_v13 = vmul.f32 2.0, %v1296_v9  ;;  %v1612_v10 = vpop.f32.mrb[9].mxu1  ;;  %v1647_v14 = vpop.f32.mrb[11].mxu0 }
 0x250   :  { %v1144_v15 = vmax.f32 %v1133_v12, 0.0  ;;  %v1301_v16 = vsub.f32 %v1213_v11, %v1300_v13 }
 0x252   :  { %1350 = vst.sshfl [vmem:[%s3146_s8 + $0x10] sm:$0x3 pattern:$0x76325410] %v1144_v15  ;;  %v1302_v17 = vadd.f32 1.0, %v1301_v16 }
 0x254   :  { %1984 = vrcp.f32 %v1302_v17 }
 0x25e   :  { %v1985_v19 = vpop.eup %1984 }
 0x25f   :  { %v1308_v20 = vsel %vm1307_vm2, %v1985_v19, 0.0 }
 0x260   :  { %v1309_v21 = vsel %vm1202_vm1, %v1308_v20, 0.0 }
 0x261   :  { %1310 = vadd.xlane.f32.xlu0 %v1309_v21 }
 0x262   :  { %1999 = shalt.err (!%p1996_p4)
}
 0x263   :  { %s2000_s12 = scalar_lea.hbm %s3145_s7, 32 }
 0x264   :  { %p2001_p5 = scmp.ne.s32.totalorder %s3145_s7, %s2000_s12  ;;  %p2004_p6 = scmp.lt.u32.totalorder %s2000_s12, %s3145_s7 }
 0x266   :  { %p2006_p7 = pnand %p2004_p6, %p2001_p5 }
 0x268   :  { %2009 = shalt.err (!%p2006_p7)
}
 0x269   :  { %1324 = dma.vmem_to_hbm [thread:$0]  %s1322_s6, 32, %s3145_s7, [#allocation3]  }
 0x26a   :  { %s2041_s17 = smov [#allocation4]  }
 0x26b   :  { %s1333_s18 = sshll.u32 %s2041_s17, 4  ;;  %s1334_s18 = int_to_ptr.vmem [resolvable:$true] %s1333_s18 }
 0x26c   :  { %s2010_s19 = scalar_lea.vmem %s1334_s18, 32  ;;  %p2015_p9 = scmp.lt.s32.totalorder %s1334_s18, %s1334_s18 }
 0x26d   :  { %p2011_p8 = scmp.ne.s32.totalorder %s1334_s18, %s2010_s19  ;;  %p2016_p10 = scmp.lt.s32.totalorder %s2010_s19, %s2010_s19 }
 0x26f   :  { %p2017_p11 = por %p2016_p10, %p2015_p9 }
 0x271   :  { %p2018_p12 = pnand %p2017_p11, %p2011_p8 }
 0x2ee   :  { %v1311_v45 = vpop.xlane.xlu0 %1310 }
 0x2ef   :  { %1986 = vrcp.f32 %v1311_v45 }
 0x2f9   :  { %v1987_v22 = vpop.eup %1986 }
 0x2fa   :  { %v1313_v27 = vmul.f32 %v1987_v22, %v1308_v20 }
 0x2fc   :  { %1314 = vst [vmem:[#allocation4] sm:$0x3] %v1313_v27 }
 0x2fd   :  { %2021 = shalt.err (!%p2018_p12)
}
 0x2fe   :  { %s2022_s3 = scalar_lea.hbm %s3147_s9, 32 }
 0x2ff   :  { %p2023_p13 = scmp.ne.s32.totalorder %s3147_s9, %s2022_s3  ;;  %p2026_p0 = scmp.lt.u32.totalorder %s2022_s3, %s3147_s9 }
 0x301   :  { %p2028_p1 = pnand %p2026_p0, %p2023_p13 }
 0x303   :  { %2031 = shalt.err (!%p2028_p1)
}
 0x304   :  { %1336 = dma.vmem_to_hbm [thread:$0]  %s1334_s18, 32, %s3147_s9, [#allocation5]  }
 0x305   :  { %2032 = dma.done.wait [#allocation3], 32  }
 0x306   :  { %2033 = vsyncadd [#allocation3], 4294967264 }
 0x307   :  { %2034 = dma.done.wait [#allocation5], 32  }
 0x308   :  { %2035 = vsyncadd [#allocation5], 4294967264 }
 0x309   :  { %1345 = vsyncpa [#allocation3], 1 }
 0x30a   :  { %1346 = vsyncpa [#allocation5], 1 }

// kernel: _lambda_.11
= control target key start
LH: loop header
LB: loop body
LE: loop exit
PB: predicated region body
PF: predicated region fallthrough
CT: control target
= control target key end

     0   :  { %vm2046_vm0 = vmmov 0   ;;  %s2599_s1 = inlined_call_operand.vmem [shape: bf16[1152,128], index: 1, kind: input, shape index: {}]   ;;  %s2600_s0 = inlined_call_operand.vmem [shape: bf16[104,1152], index: 0, kind: input, shape index: {}]   ;;  %s2601_s2 = inlined_call_operand.vmem [shape: f32[1,128], index: 2, kind: input, shape index: {}]   ;;  %s2602_s3 = inlined_call_operand.vmem [shape: f32[104,128], index: 3, kind: output, shape index: {}]  }
   0x1   :  { %v1886_v0 = vld [vmem:[%s2599_s1 + $0x40] sm:$0xff]   ;;  %v1888_v2 = vld [vmem:[%s2599_s1 + $0x48] sm:$0xff]   ;;  %v1890_v4 = vld [vmem:[%s2599_s1 + $0x50] sm:$0xff]  }
   0x2   :  { %v1887_v1 = vld [vmem:[%s2599_s1] sm:$0xff]   ;;  %1868 = vmatprep.subr.bf16.mxu1 %v1886_v0  ;;  %1577 = vmatprep.subr.bf16.mxu0 %v1886_v0  ;;  %v1889_v3 = vld [vmem:[%s2599_s1 + $0x8] sm:$0xff]   ;;  %v1891_v5 = vld [vmem:[%s2599_s1 + $0x10] sm:$0xff]  }
   0x3   :  { %1876 = vmatpush3.bf16.msra.mxu1 %v1887_v1  ;;  %1578 = vmatpush3.bf16.msra.mxu0 %v1887_v1  ;;  %v1892_v6 = vld [vmem:[%s2599_s1 + $0x58] sm:$0xff]   ;;  %v1894_v8 = vld [vmem:[%s2599_s1 + $0x60] sm:$0xff]   ;;  %v1896_v10 = vld [vmem:[%s2599_s1 + $0x68] sm:$0xff]  }
   0x4   :  { %1869 = vmatprep.subr.bf16.mxu1 %v1888_v2  ;;  %1579 = vmatprep.subr.bf16.mxu0 %v1888_v2  ;;  %v1893_v7 = vld [vmem:[%s2599_s1 + $0x18] sm:$0xff]   ;;  %v1895_v9 = vld [vmem:[%s2599_s1 + $0x20] sm:$0xff]   ;;  %v1897_v12 = vld [vmem:[%s2599_s1 + $0x28] sm:$0xff]  }
   0x5   :  { %v1904_v11 = vld [vmem:[%s2600_s0 + $0x124] ss:$36 sps:$4 sm:$0xff]   ;;  %v1898_v14 = vld [vmem:[%s2599_s1 + $0x70] sm:$0xff]   ;;  %v1900_v16 = vld [vmem:[%s2599_s1 + $0x78] sm:$0xff]  }
   0x6   :  { %v1908_v13 = vld [vmem:[%s2600_s0 + $0x4] ss:$36 sps:$4 sm:$0xff]   ;;  %1035 = vmatprep.mubr.bf16.mxu1 %v1904_v11  ;;  %v1899_v15 = vld [vmem:[%s2599_s1 + $0x30] sm:$0xff]   ;;  %v1901_v17 = vld [vmem:[%s2599_s1 + $0x38] sm:$0xff]  }
   0x7   :  { %1877 = vmatpush3.bf16.msra.mxu1 %v1889_v3  ;;  %1580 = vmatpush3.bf16.msra.mxu0 %v1889_v3  ;;  %v1905_v18 = vld [vmem:[%s2599_s1 + $0xc0] sm:$0xff]   ;;  %v1912_v24 = vld [vmem:[%s2599_s1 + $0xc8] sm:$0xff]   ;;  %v1916_v30 = vld [vmem:[%s2599_s1 + $0xd0] sm:$0xff]  }
   0x8   :  { %1870 = vmatprep.subr.bf16.mxu1 %v1890_v4  ;;  %1581 = vmatprep.subr.bf16.mxu0 %v1890_v4  ;;  %v1902_v19 = vld [vmem:[%s2600_s0 + $0x120] ss:$36 sps:$4 sm:$0xff]   ;;  %v1914_v25 = vld [vmem:[%s2599_s1 + $0x148] sm:$0xff]   ;;  %v1921_v31 = vld [vmem:[%s2599_s1 + $0x150] sm:$0xff]  }
   0x9   :  { %1003 = vmatprep.mubr.bf16.mxu0 %v1908_v13  ;;  %v1906_v20 = vld [vmem:[%s2600_s0] ss:$36 sps:$4 sm:$0xff]   ;;  %v1917_v26 = vld [vmem:[%s2600_s0 + $0x4c] ss:$36 sps:$4 sm:$0xff]   ;;  %v1923_v36 = vld [vmem:[%s2599_s1 + $0xd8] sm:$0xff]  }
   0xa   :  { %v1910_v21 = vld [vmem:[%s2599_s1 + $0x140] sm:$0xff]   ;;  %v1913_v27 = vld [vmem:[%s2599_s1 + $0x88] sm:$0xff]   ;;  %v1919_v32 = vld [vmem:[%s2599_s1 + $0x90] sm:$0xff]  }
   0xb   :  { %1878 = vmatpush3.bf16.msra.mxu1 %v1891_v5  ;;  %1582 = vmatpush3.bf16.msra.mxu0 %v1891_v5  ;;  %v1909_v22 = vld [vmem:[%s2599_s1 + $0x80] sm:$0xff]   ;;  %v1924_v28 = vld [vmem:[%s2600_s0 + $0x16c] ss:$36 sps:$4 sm:$0xff]   ;;  %v1928_v37 = vld [vmem:[%s2599_s1 + $0x158] sm:$0xff]  }
   0xc   :  { %1871 = vmatprep.subr.bf16.mxu1 %v1892_v6  ;;  %1583 = vmatprep.subr.bf16.mxu0 %v1892_v6  ;;  %v1911_v23 = vld [vmem:[%s2599_s1 + $0x100] sm:$0xff]   ;;  %v1915_v29 = vld [vmem:[%s2599_s1 + $0x108] sm:$0xff]   ;;  %v1922_v35 = vld [vmem:[%s2599_s1 + $0x110] sm:$0xff]  }
   0xd   :  { %v1920_v33 = vld [vmem:[%s2600_s0 + $0x48] ss:$36 sps:$4 sm:$0xff]   ;;  %v1926_v38 = vld [vmem:[%s2599_s1 + $0x98] sm:$0xff]   ;;  %v1930_v41 = vld [vmem:[%s2599_s1 + $0xe0] sm:$0xff]  }
   0xe   :  { %v1927_v34 = vld [vmem:[%s2600_s0 + $0x168] ss:$36 sps:$4 sm:$0xff]   ;;  %v1931_v39 = vld [vmem:[%s2600_s0 + $0x94] ss:$36 sps:$4 sm:$0xff]   ;;  %v1935_v43 = vld [vmem:[%s2599_s1 + $0x160] sm:$0xff]  }
   0xf   :  { %1879 = vmatpush3.bf16.msra.mxu1 %v1893_v7  ;;  %1584 = vmatpush3.bf16.msra.mxu0 %v1893_v7  ;;  %v1929_v40 = vld [vmem:[%s2599_s1 + $0x118] sm:$0xff]   ;;  %v75_v42 = vld [vmem:[%s2600_s0 + $0x1b0] sm:$0xff]  ;;  %v1933_v45 = vld [vmem:[%s2599_s1 + $0xa0] sm:$0xff]   ;;  %v2045_v7 = vmov 0.0  }
  0x10   :  { %1872 = vmatprep.subr.bf16.mxu1 %v1894_v8  ;;  %1585 = vmatprep.subr.bf16.mxu0 %v1894_v8  ;;  %v1497_v44 = vcombine.high %v75_v42, %v75_v42  ;;  %v1934_v46 = vld [vmem:[%s2600_s0 + $0x90] ss:$36 sps:$4 sm:$0xff]   ;;  %v1936_v47 = vld [vmem:[%s2599_s1 + $0x120] sm:$0xff]   ;;  %v1496_v48 = vcombine.low %v75_v42, %v75_v42  ;;  %v1937_v49 = vld [vmem:[%s2599_s1 + $0xe8] sm:$0xff]  }
  0x11   :  { %v1941_v50 = vld [vmem:[%s2599_s1 + $0x168] sm:$0xff]   ;;  %v1944_v52 = vld [vmem:[%s2600_s0 + $0xdc] ss:$36 sps:$4 sm:$0xff]   ;;  %v1943_v54 = vld [vmem:[%s2599_s1 + $0xf0] sm:$0xff]  }
  0x12   :  { %v1939_v51 = vld [vmem:[%s2599_s1 + $0xa8] sm:$0xff]   ;;  %v1948_v55 = vld [vmem:[%s2599_s1 + $0x170] sm:$0xff]   ;;  %v1947_v57 = vld [vmem:[%s2600_s0 + $0xd8] ss:$36 sps:$4 sm:$0xff]  }
  0x13   :  { %1880 = vmatpush3.bf16.msra.mxu1 %v1895_v9  ;;  %1586 = vmatpush3.bf16.msra.mxu0 %v1895_v9  ;;  %v1942_v53 = vld [vmem:[%s2599_s1 + $0x128] sm:$0xff]   ;;  %v1946_v56 = vld [vmem:[%s2599_s1 + $0xb0] sm:$0xff]   ;;  %v1950_v59 = vld [vmem:[%s2599_s1 + $0xf8] sm:$0xff]  }
  0x14   :  { %1873 = vmatprep.subr.bf16.mxu1 %v1896_v10  ;;  %1587 = vmatprep.subr.bf16.mxu0 %v1896_v10  ;;  %v1949_v58 = vld [vmem:[%s2599_s1 + $0x130] sm:$0xff]   ;;  %v1952_v60 = vld [vmem:[%s2599_s1 + $0x178] sm:$0xff]   ;;  %v1957_v0 = vld [vmem:[%s2599_s1 + $0x1c0] sm:$0xff]  }
  0x15   :  { %v1955_v61 = vld [vmem:[%s2600_s0 + $0xc] ss:$36 sps:$4 sm:$0xff]   ;;  %v1951_v62 = vld [vmem:[%s2599_s1 + $0xb8] sm:$0xff]   ;;  %v1961_v4 = vld [vmem:[%s2599_s1 + $0x180] sm:$0xff]  }
  0x16   :  { %v1956_v63 = vld [vmem:[%s2599_s1 + $0x138] sm:$0xff]   ;;  %v1953_v2 = vld [vmem:[%s2600_s0 + $0x8] ss:$36 sps:$4 sm:$0xff]   ;;  %v1958_v3 = vld [vmem:[%s2600_s0 + $0x10] ss:$36 sps:$4 sm:$0xff]  }
  0x17   :  { %1881 = vmatpush3.bf16.msra.mxu1 %v1897_v12  ;;  %1588 = vmatpush3.bf16.msra.mxu0 %v1897_v12  ;;  %v1960_v1 = vld [vmem:[%s2600_s0 + $0x14] ss:$36 sps:$4 sm:$0xff]   ;;  %v1962_v5 = vld [vmem:[%s2599_s1 + $0x200] sm:$0xff]   ;;  %v1965_v8 = vld [vmem:[%s2599_s1 + $0x1c8] sm:$0xff]  }
  0x18   :  { %1874 = vmatprep.subr.bf16.mxu1 %v1898_v14  ;;  %1589 = vmatprep.subr.bf16.mxu0 %v1898_v14  ;;  %v1963_v6 = vld [vmem:[%s2600_s0 + $0x54] ss:$36 sps:$4 sm:$0xff]   ;;  %v1967_v9 = vld [vmem:[%s2599_s1 + $0x188] sm:$0xff]   ;;  %v1968_v10 = vld [vmem:[%s2600_s0 + $0x5c] ss:$36 sps:$4 sm:$0xff]  }
  0x19   :  { %v1971_v11 = vld [vmem:[%s2599_s1 + $0x208] sm:$0xff]   ;;  %v1972_v12 = vld [vmem:[%s2599_s1 + $0x1d0] sm:$0xff]   ;;  %v1970_v14 = vld [vmem:[%s2600_s0 + $0x58] ss:$36 sps:$4 sm:$0xff]  }
  0x1a   :  { %v1966_v13 = vld [vmem:[%s2600_s0 + $0x50] ss:$36 sps:$4 sm:$0xff]   ;;  %v2014_v42 = vld [vmem:[%s2599_s1 + $0x1f8] sm:$0xff]  }
  0x1b   :  { %1882 = vmatpush3.bf16.msra.mxu1 %v1899_v15  ;;  %1590 = vmatpush3.bf16.msra.mxu0 %v1899_v15  ;;  %v1973_v15 = vld [vmem:[%s2600_s0 + $0x9c] ss:$36 sps:$4 sm:$0xff]  }
  0x1c   :  { %1875 = vmatprep.subr.bf16.mxu1 %v1900_v16  ;;  %1591 = vmatprep.subr.bf16.mxu0 %v1900_v16  ;;  %v1975_v16 = vld [vmem:[%s2599_s1 + $0x190] sm:$0xff]  }
  0x1f   :  { %1883 = vmatpush3.bf16.msra.mxu1 %v1901_v17  ;;  %1592 = vmatpush3.bf16.msra.mxu0 %v1901_v17  ;;  %v1977_v17 = vld [vmem:[%s2600_s0 + $0xa4] ss:$36 sps:$4 sm:$0xff]  }
  0x20   :  { %1635 = vmatprep.subr.bf16.mxu1 %v1905_v18  ;;  %1693 = vmatprep.subr.bf16.mxu0 %v1910_v21  ;;  %v1980_v18 = vld [vmem:[%s2599_s1 + $0x210] sm:$0xff]   ;;  %v1976_v21 = vld [vmem:[%s2600_s0 + $0x98] ss:$36 sps:$4 sm:$0xff]  }
  0x22   :  { %1036 = vmatmul.mubr.bf16.vlgmr.msra.gmra.mrb[0].mxu1 %v1902_v19  ;;  %1004 = vmatmul.mubr.bf16.vlgmr.msra.gmra.mrb[0].mxu0 %v1906_v20  ;;  %v1981_v19 = vld [vmem:[%s2599_s1 + $0x1d8] sm:$0xff]  }
  0x23   :  { %1636 = vmatpush3.bf16.msra.mxu1 %v1909_v22  ;;  %1694 = vmatpush3.bf16.msra.mxu0 %v1911_v23  ;;  %v1982_v20 = vld [vmem:[%s2599_s1 + $0x198] sm:$0xff]   ;;  %v1979_v22 = vld [vmem:[%s2600_s0 + $0xa0] ss:$36 sps:$4 sm:$0xff]  }
  0x24   :  { %1637 = vmatprep.subr.bf16.mxu1 %v1912_v24  ;;  %1695 = vmatprep.subr.bf16.mxu0 %v1914_v25  ;;  %v1983_v23 = vld [vmem:[%s2600_s0 + $0xe4] ss:$36 sps:$4 sm:$0xff]   ;;  %v1986_v24 = vld [vmem:[%s2600_s0 + $0xec] ss:$36 sps:$4 sm:$0xff]   ;;  %v1989_v25 = vld [vmem:[%s2599_s1 + $0x218] sm:$0xff]  }
  0x25   :  { %1011 = vmatprep.mubr.bf16.mxu0 %v1917_v26  ;;  %1043 = vmatprep.mubr.bf16.mxu1 %v1924_v28  ;;  %v1990_v26 = vld [vmem:[%s2599_s1 + $0x1e0] sm:$0xff]  }
  0x26   :  { %v1985_v28 = vld [vmem:[%s2600_s0 + $0xe0] ss:$36 sps:$4 sm:$0xff]  }
  0x27   :  { %1638 = vmatpush3.bf16.msra.mxu1 %v1913_v27  ;;  %1696 = vmatpush3.bf16.msra.mxu0 %v1915_v29  ;;  %v1991_v27 = vld [vmem:[%s2599_s1 + $0x1a0] sm:$0xff]   ;;  %v1988_v29 = vld [vmem:[%s2600_s0 + $0xe8] ss:$36 sps:$4 sm:$0xff]  }
  0x28   :  { %1639 = vmatprep.subr.bf16.mxu1 %v1916_v30  ;;  %1697 = vmatprep.subr.bf16.mxu0 %v1921_v31  ;;  %v1998_v30 = vld [vmem:[%s2599_s1 + $0x220] sm:$0xff]   ;;  %v1999_v31 = vld [vmem:[%s2599_s1 + $0x1e8] sm:$0xff]  }
  0x2a   :  { %1012 = vmatmul.mubr.bf16.gmra.mrb[4].mxu0 %v1920_v33  ;;  %1044 = vmatmul.mubr.bf16.gmra.mrb[4].mxu1 %v1927_v34  ;;  %v1992_v33 = vld [vmem:[%s2600_s0 + $0x12c] ss:$36 sps:$4 sm:$0xff]   ;;  %v1995_v34 = vld [vmem:[%s2600_s0 + $0x134] ss:$36 sps:$4 sm:$0xff]  }
  0x2b   :  { %1640 = vmatpush3.bf16.msra.mxu1 %v1919_v32  ;;  %1698 = vmatpush3.bf16.msra.mxu0 %v1922_v35  ;;  %v2000_v32 = vld [vmem:[%s2599_s1 + $0x1a8] sm:$0xff]  }
  0x2c   :  { %1641 = vmatprep.subr.bf16.mxu1 %v1923_v36  ;;  %1699 = vmatprep.subr.bf16.mxu0 %v1928_v37  ;;  %v2006_v35 = vld [vmem:[%s2599_s1 + $0x228] sm:$0xff]   ;;  %v2008_v36 = vld [vmem:[%s2599_s1 + $0x1f0] sm:$0xff]  }
  0x2d   :  { %1019 = vmatprep.mubr.bf16.mxu0 %v1931_v39  ;;  %1051 = vmatprep.mubr.bf16.mxu1 %v1497_v44  ;;  %v1994_v37 = vld [vmem:[%s2600_s0 + $0x128] ss:$36 sps:$4 sm:$0xff]   ;;  %v2009_v39 = vld [vmem:[%s2599_s1 + $0x1b0] sm:$0xff]   ;;  %v2016_v44 = vld [vmem:[%s2599_s1 + $0x1b8] sm:$0xff]  }
  0x2f   :  { %1642 = vmatpush3.bf16.msra.mxu1 %v1926_v38  ;;  %1700 = vmatpush3.bf16.msra.mxu0 %v1929_v40  ;;  %v1997_v38 = vld [vmem:[%s2600_s0 + $0x130] ss:$36 sps:$4 sm:$0xff]  }
  0x30   :  { %1643 = vmatprep.subr.bf16.mxu1 %v1930_v41  ;;  %1701 = vmatprep.subr.bf16.mxu0 %v1935_v43  ;;  %v2001_v40 = vld [vmem:[%s2600_s0 + $0x174] ss:$36 sps:$4 sm:$0xff]   ;;  %v2004_v43 = vld [vmem:[%s2600_s0 + $0x17c] ss:$36 sps:$4 sm:$0xff]  }
  0x31   :  { %v2012_v41 = vld [vmem:[%s2599_s1 + $0x230] sm:$0xff]  }
  0x32   :  { %1020 = vmatmul.mubr.bf16.gmra.mrb[8].mxu0 %v1934_v46  ;;  %1052 = vmatmul.mubr.bf16.gmra.mrb[8].mxu1 %v1496_v48  ;;  %v76_v46 = vld [vmem:[%s2600_s0 + $0x1b8] sm:$0xff]  ;;  %v2003_v48 = vld [vmem:[%s2600_s0 + $0x170] ss:$36 sps:$4 sm:$0xff]  }
  0x33   :  { %1644 = vmatpush3.bf16.msra.mxu1 %v1933_v45  ;;  %1702 = vmatpush3.bf16.msra.mxu0 %v1936_v47  ;;  %v2020_v45 = vld [vmem:[%s2599_s1 + $0x238] sm:$0xff]   ;;  %v77_v47 = vld [vmem:[%s2600_s0 + $0x1c0] sm:$0xff] }
  0x34   :  { %1645 = vmatprep.subr.bf16.mxu1 %v1937_v49  ;;  %1703 = vmatprep.subr.bf16.mxu0 %v1941_v50  ;;  %v2007_v49 = vld [vmem:[%s2600_s0 + $0x178] ss:$36 sps:$4 sm:$0xff]   ;;  %v1499_v50 = vcombine.high %v76_v46, %v76_v46 }
  0x35   :  { %1027 = vmatprep.mubr.bf16.mxu0 %v1944_v52  ;;  %1091 = vmatprep.mubr.bf16.mxu1 %v1955_v61  ;;  %v1498_v52 = vcombine.low %v76_v46, %v76_v46  ;;  %v2028_v61 = vld [vmem:[%s2600_s0 + $0xa8] ss:$36 sps:$4 sm:$0xff]  }
  0x37   :  { %1646 = vmatpush3.bf16.msra.mxu1 %v1939_v51  ;;  %1704 = vmatpush3.bf16.msra.mxu0 %v1942_v53  ;;  %v1501_v51 = vcombine.high %v77_v47, %v77_v47  ;;  %v1500_v53 = vcombine.low %v77_v47, %v77_v47 }
  0x38   :  { %1647 = vmatprep.subr.bf16.mxu1 %v1943_v54  ;;  %1705 = vmatprep.subr.bf16.mxu0 %v1948_v55  ;;  %v2019_v54 = vld [vmem:[%s2600_s0 + $0x1c] ss:$36 sps:$4 sm:$0xff]  }
  0x39   :  { %v2017_v55 = vld [vmem:[%s2600_s0 + $0x18] ss:$36 sps:$4 sm:$0xff]  }
  0x3a   :  { %1028 = vmatmul.mubr.bf16.gmra.mrb[12].mxu0 %v1947_v57  ;;  %v2022_v57 = vld [vmem:[%s2600_s0 + $0x64] ss:$36 sps:$4 sm:$0xff]  }
  0x3b   :  { %1648 = vmatpush3.bf16.msra.mxu1 %v1946_v56  ;;  %1706 = vmatpush3.bf16.msra.mxu0 %v1949_v58  ;;  %v2021_v56 = vld [vmem:[%s2600_s0 + $0x20] ss:$36 sps:$4 sm:$0xff]  }
  0x3c   :  { %1649 = vmatprep.subr.bf16.mxu1 %v1950_v59  ;;  %1707 = vmatprep.subr.bf16.mxu0 %v1952_v60  ;;  %v2024_v58 = vld [vmem:[%s2600_s0 + $0x60] ss:$36 sps:$4 sm:$0xff]   ;;  %v2025_v59 = vld [vmem:[%s2600_s0 + $0x68] ss:$36 sps:$4 sm:$0xff]  }
  0x3d   :  { %1179 = vmatprep.mubr.bf16.mxu0 %v1960_v1  ;;  %v2026_v60 = vld [vmem:[%s2600_s0 + $0xac] ss:$36 sps:$4 sm:$0xff]   ;;  %v2033_v1 = vld [vmem:[%s2600_s0 + $0xf8] ss:$36 sps:$4 sm:$0xff]  }
  0x3f   :  { %1650 = vmatpush3.bf16.msra.mxu1 %v1951_v62  ;;  %1708 = vmatpush3.bf16.msra.mxu0 %v1956_v63  ;;  %v2029_v62 = vld [vmem:[%s2600_s0 + $0xb0] ss:$36 sps:$4 sm:$0xff]  }
  0x40   :  { %1751 = vmatprep.subr.bf16.mxu1 %v1957_v0  ;;  %1824 = vmatprep.subr.bf16.mxu0 %v2045_v7  ;;  %v2030_v63 = vld [vmem:[%s2600_s0 + $0xf4] ss:$36 sps:$4 sm:$0xff]  }
  0x41   :  { %v2032_v0 = vld [vmem:[%s2600_s0 + $0xf0] ss:$36 sps:$4 sm:$0xff]  }
  0x42   :  { %1092 = vmatmul.mubr.bf16.vlgmr.msra.gmra.mrb[12].mxu1 %v1953_v2  ;;  %1180 = vmatmul.mubr.bf16.vlgmr.msra.gmra.mrb[16].mxu0 %v1958_v3  ;;  %v2034_v2 = vld [vmem:[%s2600_s0 + $0x13c] ss:$36 sps:$4 sm:$0xff]  }
  0x43   :  { %1752 = vmatpush3.bf16.msra.mxu1 %v1961_v4  ;;  %1825 = vmatpush3.bf16.msra.mxu0 %v1962_v5  ;;  %v2036_v3 = vld [vmem:[%s2600_s0 + $0x138] ss:$36 sps:$4 sm:$0xff]   ;;  %v2037_v4 = vld [vmem:[%s2600_s0 + $0x140] ss:$36 sps:$4 sm:$0xff]  }
  0x44   :  { %1099 = vmatprep.mubr.bf16.mxu1 %v1963_v6  ;;  %1753 = vmatprep.subr.bf16.mxu1 %v1965_v8  ;;  %v2038_v5 = vld [vmem:[%s2600_s0 + $0x184] ss:$36 sps:$4 sm:$0xff]  }
  0x45   :  { %1187 = vmatprep.mubr.bf16.mxu0 %v1968_v10  ;;  %1826 = vmatprep.subr.bf16.mxu0 %v2045_v7  ;;  %v78_v6 = vld [vmem:[%s2600_s0 + $0x1c8] sm:$0xff]  ;;  %v2040_v8 = vld [vmem:[%s2600_s0 + $0x180] ss:$36 sps:$4 sm:$0xff]  }
  0x46   :  { %v1503_v10 = vcombine.high %v78_v6, %v78_v6 }
  0x47   :  { %1754 = vmatpush3.bf16.msra.mxu1 %v1967_v9  ;;  %1827 = vmatpush3.bf16.msra.mxu0 %v1971_v11  ;;  %v2041_v9 = vld [vmem:[%s2600_s0 + $0x188] ss:$36 sps:$4 sm:$0xff]   ;;  %v1502_v11 = vcombine.low %v78_v6, %v78_v6 }
  0x48   :  { %1755 = vmatprep.subr.bf16.mxu1 %v1972_v12  ;;  %1828 = vmatprep.subr.bf16.mxu0 %v2045_v7  ;;  %v2044_v12 = vld [vmem:[%s2600_s0 + $0x1d0] ss:$0 sps:$4 sm:$0xff]  }
  0x4a   :  { %1100 = vmatmul.mubr.bf16.gmra.mrb[16].mxu1 %v1966_v13  ;;  %1188 = vmatmul.mubr.bf16.gmra.mrb[20].mxu0 %v1970_v14 }
  0x4b   :  { %1107 = vmatprep.mubr.bf16.mxu1 %v1973_v15  ;;  %1756 = vmatpush3.bf16.msra.mxu1 %v1975_v16 }
  0x4c   :  { %1195 = vmatprep.mubr.bf16.mxu0 %v1977_v17  ;;  %1829 = vmatpush3.bf16.msra.mxu0 %v1980_v18 }
  0x4d   :  { %1757 = vmatprep.subr.bf16.mxu1 %v1981_v19  ;;  %1830 = vmatprep.subr.bf16.mxu0 %v2045_v7 }
  0x4f   :  { %1758 = vmatpush3.bf16.msra.mxu1 %v1982_v20 }
  0x50   :  { %1831 = vmatpush3.bf16.msra.mxu0 %v1989_v25  ;;  %1759 = vmatprep.subr.bf16.mxu1 %v1990_v26 }
  0x51   :  { %1832 = vmatprep.subr.bf16.mxu0 %v2045_v7 }
  0x52   :  { %1108 = vmatmul.mubr.bf16.gmra.mrb[20].mxu1 %v1976_v21  ;;  %1196 = vmatmul.mubr.bf16.gmra.mrb[24].mxu0 %v1979_v22 }
  0x53   :  { %1115 = vmatprep.mubr.bf16.mxu1 %v1983_v23  ;;  %1203 = vmatprep.mubr.bf16.mxu0 %v1986_v24 }
  0x54   :  { %1760 = vmatpush3.bf16.msra.mxu1 %v1991_v27  ;;  %1833 = vmatpush3.bf16.msra.mxu0 %v1998_v30 }
  0x55   :  { %1761 = vmatprep.subr.bf16.mxu1 %v1999_v31  ;;  %1834 = vmatprep.subr.bf16.mxu0 %v2045_v7 }
  0x58   :  { %1762 = vmatpush3.bf16.msra.mxu1 %v2000_v32  ;;  %1835 = vmatpush3.bf16.msra.mxu0 %v2006_v35 }
  0x59   :  { %1763 = vmatprep.subr.bf16.mxu1 %v2008_v36  ;;  %1836 = vmatprep.subr.bf16.mxu0 %v2045_v7 }
  0x5a   :  { %1116 = vmatmul.mubr.bf16.gmra.mrb[24].mxu1 %v1985_v28  ;;  %1204 = vmatmul.mubr.bf16.gmra.mrb[28].mxu0 %v1988_v29 }
  0x5b   :  { %1123 = vmatprep.mubr.bf16.mxu1 %v1992_v33  ;;  %1211 = vmatprep.mubr.bf16.mxu0 %v1995_v34 }
  0x5c   :  { %1764 = vmatpush3.bf16.msra.mxu1 %v2009_v39  ;;  %1837 = vmatpush3.bf16.msra.mxu0 %v2012_v41 }
  0x5d   :  { %1765 = vmatprep.subr.bf16.mxu1 %v2014_v42  ;;  %1838 = vmatprep.subr.bf16.mxu0 %v2045_v7 }
  0x60   :  { %1766 = vmatpush3.bf16.msra.mxu1 %v2016_v44  ;;  %1839 = vmatpush3.bf16.msra.mxu0 %v2020_v45 }
  0x62   :  { %1124 = vmatmul.mubr.bf16.gmra.mrb[28].mxu1 %v1994_v37  ;;  %1212 = vmatmul.mubr.bf16.gmra.mrb[32].mxu0 %v1997_v38 }
  0x63   :  { %1131 = vmatprep.mubr.bf16.mxu1 %v2001_v40  ;;  %1219 = vmatprep.mubr.bf16.mxu0 %v2004_v43 }
  0x6a   :  { %1132 = vmatmul.mubr.bf16.gmra.mrb[32].mxu1 %v2003_v48  ;;  %1220 = vmatmul.mubr.bf16.gmra.mrb[36].mxu0 %v2007_v49 }
  0x6b   :  { %1139 = vmatprep.mubr.bf16.mxu1 %v1499_v50  ;;  %1227 = vmatprep.mubr.bf16.mxu0 %v1501_v51 }
  0x72   :  { %1140 = vmatmul.mubr.bf16.gmra.mrb[36].mxu1 %v1498_v52  ;;  %1228 = vmatmul.mubr.bf16.gmra.mrb[40].mxu0 %v1500_v53 }
  0x73   :  { %1267 = vmatprep.mubr.bf16.mxu1 %v2019_v54  ;;  %1840 = vmatprep.mubr.msk.bf16.mxu0 %vm2046_vm0, %v2045_v7 }
  0x7a   :  { %1268 = vmatmul.mubr.bf16.vlgmr.msra.gmra.mrb[40].mxu1 %v2017_v55  ;;  %1841 = vmatmul.mubr.bf16.vlgmr.msra.gmra.mrb[44].mxu0 %v2021_v56  ;;  %v2499_v55 = vld [vmem:[%s2601_s2] ss:$0 sm:$0xff] }
  0x7b   :  { %1275 = vmatprep.mubr.bf16.mxu1 %v2022_v57  ;;  %1844 = vmatprep.mubr.msk.bf16.mxu0 %vm2046_vm0, %v2045_v7 }
  0x82   :  { %1276 = vmatmul.mubr.bf16.gmra.mrb[44].mxu1 %v2024_v58  ;;  %1845 = vmatmul.mubr.bf16.gmra.mrb[48].mxu0 %v2025_v59 }
  0x83   :  { %1283 = vmatprep.mubr.bf16.mxu1 %v2026_v60  ;;  %1848 = vmatprep.mubr.msk.bf16.mxu0 %vm2046_vm0, %v2045_v7 }
  0x8a   :  { %1284 = vmatmul.mubr.bf16.gmra.mrb[48].mxu1 %v2028_v61  ;;  %1849 = vmatmul.mubr.bf16.gmra.mrb[52].mxu0 %v2029_v62 }
  0x8b   :  { %1291 = vmatprep.mubr.bf16.mxu1 %v2030_v63  ;;  %1852 = vmatprep.mubr.msk.bf16.mxu0 %vm2046_vm0, %v2045_v7 }
  0x92   :  { %1292 = vmatmul.mubr.bf16.gmra.mrb[52].mxu1 %v2032_v0  ;;  %1853 = vmatmul.mubr.bf16.gmra.mrb[56].mxu0 %v2033_v1 }
  0x93   :  { %1299 = vmatprep.mubr.bf16.mxu1 %v2034_v2  ;;  %1856 = vmatprep.mubr.msk.bf16.mxu0 %vm2046_vm0, %v2045_v7 }
  0x9a   :  { %1300 = vmatmul.mubr.bf16.gmra.mrb[56].mxu1 %v2036_v3  ;;  %1857 = vmatmul.mubr.bf16.gmra.mrb[60].mxu0 %v2037_v4 }
  0x9b   :  { %1307 = vmatprep.mubr.bf16.mxu1 %v2038_v5  ;;  %1860 = vmatprep.mubr.msk.bf16.mxu0 %vm2046_vm0, %v2045_v7 }
  0xa2   :  { %1308 = vmatmul.mubr.bf16.gmra.mrb[60].mxu1 %v2040_v8  ;;  %1861 = vmatmul.mubr.bf16.gmra.mrb[64].mxu0 %v2041_v9 }
  0xa3   :  { %1315 = vmatprep.mubr.bf16.mxu1 %v1503_v10  ;;  %1864 = vmatprep.mubr.msk.bf16.mxu0 %vm2046_vm0, %v2045_v7 }
  0xaa   :  { %1316 = vmatmul.mubr.bf16.gmra.mrb[64].mxu1 %v1502_v11  ;;  %1865 = vmatmul.mubr.bf16.gmra.mrb[68].mxu0 %v2044_v12 }
  0xf5   :  { %v1617_v13 = vpop.f32.mrb[0].mxu1  ;;  %v1593_v14 = vpop.f32.mrb[0].mxu0 }
  0xf6   :  { %v1618_v15 = vpop.f32.mrb[1].mxu1  ;;  %v1594_v16 = vpop.f32.mrb[1].mxu0 }
  0xf7   :  { %v2482_v17 = vadd.f32 %v1618_v15, %v1617_v13  ;;  %v1620_v18 = vpop.f32.mrb[2].mxu1  ;;  %v1595_v19 = vadd.f32 %v1594_v16, %v1593_v14  ;;  %v1596_v20 = vpop.f32.mrb[2].mxu0 }
  0xf8   :  { %v1621_v21 = vpop.f32.mrb[3].mxu1  ;;  %v1597_v22 = vpop.f32.mrb[3].mxu0 }
  0xf9   :  { %v2484_v23 = vadd.f32 %v1621_v21, %v1620_v18  ;;  %v1598_v7 = vadd.f32 %v1597_v22, %v1596_v20  ;;  %v1006_v58 = vadd.f32 %v1595_v19, %v2499_v55 }
  0xfb   :  { %v1009_v1 = vadd.f32 %v1598_v7, %v2499_v55 }
  0xfd   :  { %v1599_v24 = vpop.f32.mrb[4].mxu0  ;;  %v1623_v25 = vpop.f32.mrb[4].mxu1 }
  0xfe   :  { %v1600_v26 = vpop.f32.mrb[5].mxu0  ;;  %v1624_v27 = vpop.f32.mrb[5].mxu1 }
  0xff   :  { %v1601_v28 = vadd.f32 %v1600_v26, %v1599_v24  ;;  %v1602_v29 = vpop.f32.mrb[6].mxu0  ;;  %v2486_v30 = vadd.f32 %v1624_v27, %v1623_v25  ;;  %v1626_v31 = vpop.f32.mrb[6].mxu1 }
 0x100   :  { %v1603_v32 = vpop.f32.mrb[7].mxu0  ;;  %v1627_v33 = vpop.f32.mrb[7].mxu1 }
 0x101   :  { %v1604_v34 = vadd.f32 %v1603_v32, %v1602_v29  ;;  %v2488_v35 = vadd.f32 %v1627_v33, %v1626_v31  ;;  %v1014_v13 = vadd.f32 %v1601_v28, %v2499_v55 }
 0x103   :  { %v1017_v21 = vadd.f32 %v1604_v34, %v2499_v55 }
 0x105   :  { %v1605_v36 = vpop.f32.mrb[8].mxu0  ;;  %v1629_v37 = vpop.f32.mrb[8].mxu1 }
 0x106   :  { %v1606_v38 = vpop.f32.mrb[9].mxu0  ;;  %v1630_v39 = vpop.f32.mrb[9].mxu1 }
 0x107   :  { %v1607_v40 = vadd.f32 %v1606_v38, %v1605_v36  ;;  %v1608_v41 = vpop.f32.mrb[10].mxu0  ;;  %v2490_v42 = vadd.f32 %v1630_v39, %v1629_v37  ;;  %v1632_v43 = vpop.f32.mrb[10].mxu1 }
 0x108   :  { %v1609_v44 = vpop.f32.mrb[11].mxu0  ;;  %v1633_v45 = vpop.f32.mrb[11].mxu1 }
 0x109   :  { %v1610_v46 = vadd.f32 %v1609_v44, %v1608_v41  ;;  %v1022_v33 = vadd.f32 %v1607_v40, %v2499_v55 }
 0x10b   :  { %v1025_v43 = vadd.f32 %v1610_v46, %v2499_v55 }
 0x10d   :  { %v1611_v47 = vpop.f32.mrb[12].mxu0 }
 0x10e   :  { %v1612_v48 = vpop.f32.mrb[13].mxu0 }
 0x10f   :  { %v2492_v49 = vadd.f32 %v1612_v48, %v1611_v47  ;;  %v1614_v50 = vpop.f32.mrb[14].mxu0 }
 0x110   :  { %v1615_v51 = vpop.f32.mrb[15].mxu0 }
 0x111   :  { %v2494_v52 = vadd.f32 %v1615_v51, %v1614_v50 }
 0x115   :  { %v1651_v53 = vpop.f32.mrb[12].mxu1  ;;  %v1709_v54 = vpop.f32.mrb[16].mxu0 }
 0x116   :  { %v1652_v56 = vpop.f32.mrb[13].mxu1  ;;  %v1710_v57 = vpop.f32.mrb[17].mxu0 }
 0x117   :  { %v1653_v59 = vadd.f32 %v1652_v56, %v1651_v53  ;;  %v1654_v60 = vpop.f32.mrb[14].mxu1  ;;  %v1711_v61 = vadd.f32 %v1710_v57, %v1709_v54  ;;  %v1712_v62 = vpop.f32.mrb[18].mxu0  ;;  %v1030_v57 = vadd.f32 %v2492_v49, %v2499_v55 }
 0x118   :  { %v1655_v63 = vpop.f32.mrb[15].mxu1  ;;  %v1713_v0 = vpop.f32.mrb[19].mxu0 }
 0x119   :  { %v1094_v2 = vadd.f32 %v1653_v59, %v1006_v58  ;;  %v1656_v3 = vadd.f32 %v1655_v63, %v1654_v60  ;;  %v1714_v4 = vadd.f32 %v1713_v0, %v1712_v62  ;;  %v1033_v63 = vadd.f32 %v2494_v52, %v2499_v55 }
 0x11b   :  { %v1097_v5 = vadd.f32 %v1656_v3, %v1009_v1  ;;  %v2503_v6 = vadd.f32 %v1711_v61, %v1094_v2 }
 0x11d   :  { %v2505_v8 = vadd.f32 %v1714_v4, %v1097_v5  ;;  %v1657_v9 = vpop.f32.mrb[16].mxu1  ;;  %v1715_v10 = vpop.f32.mrb[20].mxu0 }
 0x11e   :  { %v1658_v11 = vpop.f32.mrb[17].mxu1  ;;  %v1716_v12 = vpop.f32.mrb[21].mxu0 }
 0x11f   :  { %v1659_v14 = vadd.f32 %v1658_v11, %v1657_v9  ;;  %v1660_v15 = vpop.f32.mrb[18].mxu1  ;;  %v1717_v16 = vadd.f32 %v1716_v12, %v1715_v10  ;;  %v1718_v18 = vpop.f32.mrb[22].mxu0  ;;  %v1038_v12 = vadd.f32 %v2482_v17, %v2499_v55 }
 0x120   :  { %v1661_v19 = vpop.f32.mrb[19].mxu1  ;;  %v1719_v20 = vpop.f32.mrb[23].mxu0 }
 0x121   :  { %v1102_v22 = vadd.f32 %v1659_v14, %v1014_v13  ;;  %v1662_v7 = vadd.f32 %v1661_v19, %v1660_v15  ;;  %v1720_v24 = vadd.f32 %v1719_v20, %v1718_v18  ;;  %v1041_v19 = vadd.f32 %v2484_v23, %v2499_v55 }
 0x123   :  { %v1105_v25 = vadd.f32 %v1662_v7, %v1017_v21  ;;  %v2509_v26 = vadd.f32 %v1717_v16, %v1102_v22 }
 0x125   :  { %v2511_v27 = vadd.f32 %v1720_v24, %v1105_v25  ;;  %v1663_v29 = vpop.f32.mrb[20].mxu1  ;;  %v1721_v31 = vpop.f32.mrb[24].mxu0 }
 0x126   :  { %v1664_v32 = vpop.f32.mrb[21].mxu1  ;;  %v1722_v28 = vpop.f32.mrb[25].mxu0 }
 0x127   :  { %v1665_v36 = vadd.f32 %v1664_v32, %v1663_v29  ;;  %v1666_v37 = vpop.f32.mrb[22].mxu1  ;;  %v1723_v38 = vadd.f32 %v1722_v28, %v1721_v31  ;;  %v1724_v39 = vpop.f32.mrb[26].mxu0  ;;  %v1046_v28 = vadd.f32 %v2486_v30, %v2499_v55 }
 0x128   :  { %v1667_v41 = vpop.f32.mrb[23].mxu1  ;;  %v1725_v34 = vpop.f32.mrb[27].mxu0 }
 0x129   :  { %v1110_v44 = vadd.f32 %v1665_v36, %v1022_v33  ;;  %v1668_v45 = vadd.f32 %v1667_v41, %v1666_v37  ;;  %v1726_v47 = vadd.f32 %v1725_v34, %v1724_v39  ;;  %v1049_v41 = vadd.f32 %v2488_v35, %v2499_v55 }
 0x12b   :  { %v1113_v48 = vadd.f32 %v1668_v45, %v1025_v43  ;;  %v2515_v50 = vadd.f32 %v1723_v38, %v1110_v44 }
 0x12d   :  { %v2517_v51 = vadd.f32 %v1726_v47, %v1113_v48  ;;  %v1669_v53 = vpop.f32.mrb[24].mxu1  ;;  %v1727_v54 = vpop.f32.mrb[28].mxu0 }
 0x12e   :  { %v1670_v56 = vpop.f32.mrb[25].mxu1  ;;  %v1728_v40 = vpop.f32.mrb[29].mxu0 }
 0x12f   :  { %v1671_v58 = vadd.f32 %v1670_v56, %v1669_v53  ;;  %v1672_v59 = vpop.f32.mrb[26].mxu1  ;;  %v1729_v60 = vadd.f32 %v1728_v40, %v1727_v54  ;;  %v1730_v61 = vpop.f32.mrb[30].mxu0  ;;  %v1054_v40 = vadd.f32 %v2490_v42, %v2499_v55 }
 0x130   :  { %v1673_v46 = vpop.f32.mrb[27].mxu1  ;;  %v1731_v62 = vpop.f32.mrb[31].mxu0 }
 0x131   :  { %v1118_v0 = vadd.f32 %v1671_v58, %v1030_v57  ;;  %v1674_v1 = vadd.f32 %v1673_v46, %v1672_v59  ;;  %v1732_v2 = vadd.f32 %v1731_v62, %v1730_v61 }
 0x133   :  { %v1121_v3 = vadd.f32 %v1674_v1, %v1033_v63  ;;  %v2523_v4 = vadd.f32 %v1729_v60, %v1118_v0 }
 0x135   :  { %v2525_v5 = vadd.f32 %v1732_v2, %v1121_v3  ;;  %v1675_v9 = vpop.f32.mrb[28].mxu1  ;;  %v1733_v10 = vpop.f32.mrb[32].mxu0 }
 0x136   :  { %v1676_v49 = vpop.f32.mrb[29].mxu1  ;;  %v1734_v11 = vpop.f32.mrb[33].mxu0 }
 0x137   :  { %v1677_v13 = vadd.f32 %v1676_v49, %v1675_v9  ;;  %v1678_v14 = vpop.f32.mrb[30].mxu1  ;;  %v1735_v15 = vadd.f32 %v1734_v11, %v1733_v10  ;;  %v1736_v16 = vpop.f32.mrb[34].mxu0 }
 0x138   :  { %v1679_v52 = vpop.f32.mrb[31].mxu1  ;;  %v1737_v18 = vpop.f32.mrb[35].mxu0 }
 0x139   :  { %v1126_v20 = vadd.f32 %v1677_v13, %v1038_v12  ;;  %v1680_v21 = vadd.f32 %v1679_v52, %v1678_v14  ;;  %v1738_v22 = vadd.f32 %v1737_v18, %v1736_v16 }
 0x13b   :  { %v1129_v7 = vadd.f32 %v1680_v21, %v1041_v19  ;;  %v2531_v24 = vadd.f32 %v1735_v15, %v1126_v20 }
 0x13d   :  { %v2533_v25 = vadd.f32 %v1738_v22, %v1129_v7  ;;  %v1681_v29 = vpop.f32.mrb[32].mxu1  ;;  %v1739_v31 = vpop.f32.mrb[36].mxu0 }
 0x13e   :  { %v1682_v17 = vpop.f32.mrb[33].mxu1  ;;  %v1740_v32 = vpop.f32.mrb[37].mxu0 }
 0x13f   :  { %v1683_v33 = vadd.f32 %v1682_v17, %v1681_v29  ;;  %v1684_v36 = vpop.f32.mrb[34].mxu1  ;;  %v1741_v37 = vadd.f32 %v1740_v32, %v1739_v31  ;;  %v1742_v38 = vpop.f32.mrb[38].mxu0 }
 0x140   :  { %v1685_v23 = vpop.f32.mrb[35].mxu1  ;;  %v1743_v39 = vpop.f32.mrb[39].mxu0 }
 0x141   :  { %v1134_v34 = vadd.f32 %v1683_v33, %v1046_v28  ;;  %v1686_v43 = vadd.f32 %v1685_v23, %v1684_v36  ;;  %v1744_v44 = vadd.f32 %v1743_v39, %v1742_v38 }
 0x143   :  { %v1137_v45 = vadd.f32 %v1686_v43, %v1049_v41  ;;  %v2539_v47 = vadd.f32 %v1741_v37, %v1134_v34 }
 0x145   :  { %v2541_v48 = vadd.f32 %v1744_v44, %v1137_v45  ;;  %v1687_v53 = vpop.f32.mrb[36].mxu1  ;;  %v1745_v54 = vpop.f32.mrb[40].mxu0 }
 0x146   :  { %v1688_v30 = vpop.f32.mrb[37].mxu1  ;;  %v1746_v56 = vpop.f32.mrb[41].mxu0 }
 0x147   :  { %v1689_v57 = vadd.f32 %v1688_v30, %v1687_v53  ;;  %v1690_v58 = vpop.f32.mrb[38].mxu1  ;;  %v1747_v59 = vadd.f32 %v1746_v56, %v1745_v54  ;;  %v1748_v60 = vpop.f32.mrb[42].mxu0 }
 0x148   :  { %v1691_v35 = vpop.f32.mrb[39].mxu1  ;;  %v1749_v61 = vpop.f32.mrb[43].mxu0 }
 0x149   :  { %v1142_v46 = vadd.f32 %v1689_v57, %v1054_v40 }
 0x14b   :  { %v2545_v62 = vadd.f32 %v1747_v59, %v1142_v46 }
 0x14d   :  { %v1767_v63 = vpop.f32.mrb[40].mxu1  ;;  %v1357_v0 = vpop.f32.mrb[44].mxu0 }
 0x14e   :  { %v1768_v1 = vpop.f32.mrb[41].mxu1  ;;  %v1842_v2 = vpop.f32.mrb[45].mxu0 }
 0x14f   :  { %v1769_v3 = vadd.f32 %v1768_v1, %v1767_v63  ;;  %v1770_v9 = vpop.f32.mrb[42].mxu1  ;;  %v1360_v10 = vpop.f32.mrb[46].mxu0 }
 0x150   :  { %v1771_v49 = vpop.f32.mrb[43].mxu1  ;;  %v1843_v11 = vpop.f32.mrb[47].mxu0 }
 0x151   :  { %v1772_v12 = vadd.f32 %v1771_v49, %v1770_v9  ;;  %v1270_v42 = vadd.f32 %v1769_v3, %v2503_v6 }
 0x153   :  { %v1358_v55 = vadd.f32 %v1357_v0, %v1270_v42  ;;  %v1273_v13 = vadd.f32 %v1772_v12, %v2505_v8 }
 0x155   :  { %v1411_v14 = vmax.f32 %v1358_v55, 0.0  ;;  %v1361_v15 = vadd.f32 %v1360_v10, %v1273_v13  ;;  %v1773_v16 = vpop.f32.mrb[44].mxu1  ;;  %v1365_v52 = vpop.f32.mrb[48].mxu0 }
 0x156   :  { %v1774_v18 = vpop.f32.mrb[45].mxu1  ;;  %v1846_v19 = vpop.f32.mrb[49].mxu0 }
 0x157   :  { %1424 = vst [vmem:[%s2602_s3] sm:$0xff] %v1411_v14  ;;  %v1412_v20 = vmax.f32 %v1361_v15, 0.0  ;;  %v1775_v21 = vadd.f32 %v1774_v18, %v1773_v16  ;;  %v1776_v22 = vpop.f32.mrb[46].mxu1  ;;  %v1368_v7 = vpop.f32.mrb[50].mxu0 }
 0x158   :  { %v1777_v29 = vpop.f32.mrb[47].mxu1  ;;  %v1847_v31 = vpop.f32.mrb[51].mxu0 }
 0x159   :  { %1425 = vst [vmem:[%s2602_s3 + $0x8] sm:$0xff] %v1412_v20  ;;  %v1778_v6 = vadd.f32 %v1777_v29, %v1776_v22  ;;  %v1278_v8 = vadd.f32 %v1775_v21, %v2509_v26 }
 0x15b   :  { %v1366_v17 = vadd.f32 %v1365_v52, %v1278_v8  ;;  %v1281_v32 = vadd.f32 %v1778_v6, %v2511_v27 }
 0x15d   :  { %v1413_v28 = vmax.f32 %v1366_v17, 0.0  ;;  %v1369_v33 = vadd.f32 %v1368_v7, %v1281_v32  ;;  %v1779_v36 = vpop.f32.mrb[48].mxu1  ;;  %v1373_v37 = vpop.f32.mrb[52].mxu0 }
 0x15e   :  { %v1780_v38 = vpop.f32.mrb[49].mxu1  ;;  %v1850_v23 = vpop.f32.mrb[53].mxu0 }
 0x15f   :  { %1426 = vst [vmem:[%s2602_s3 + $0x10] sm:$0xff] %v1413_v28  ;;  %v1414_v39 = vmax.f32 %v1369_v33, 0.0  ;;  %v1781_v41 = vadd.f32 %v1780_v38, %v1779_v36  ;;  %v1782_v34 = vpop.f32.mrb[50].mxu1  ;;  %v1376_v43 = vpop.f32.mrb[54].mxu0 }
 0x160   :  { %v1783_v44 = vpop.f32.mrb[51].mxu1  ;;  %v1851_v45 = vpop.f32.mrb[55].mxu0 }
 0x161   :  { %1427 = vst [vmem:[%s2602_s3 + $0x18] sm:$0xff] %v1414_v39  ;;  %v1784_v26 = vadd.f32 %v1783_v44, %v1782_v34  ;;  %v1286_v27 = vadd.f32 %v1781_v41, %v2515_v50 }
 0x163   :  { %v1374_v53 = vadd.f32 %v1373_v37, %v1286_v27  ;;  %v1289_v54 = vadd.f32 %v1784_v26, %v2517_v51 }
 0x165   :  { %v1415_v30 = vmax.f32 %v1374_v53, 0.0  ;;  %v1377_v56 = vadd.f32 %v1376_v43, %v1289_v54  ;;  %v1785_v40 = vpop.f32.mrb[52].mxu1  ;;  %v1381_v57 = vpop.f32.mrb[56].mxu0 }
 0x166   :  { %v1786_v58 = vpop.f32.mrb[53].mxu1  ;;  %v1854_v59 = vpop.f32.mrb[57].mxu0 }
 0x167   :  { %1428 = vst [vmem:[%s2602_s3 + $0x20] sm:$0xff] %v1415_v30  ;;  %v1416_v60 = vmax.f32 %v1377_v56, 0.0  ;;  %v1787_v35 = vadd.f32 %v1786_v58, %v1785_v40  ;;  %v1788_v61 = vpop.f32.mrb[54].mxu1  ;;  %v1384_v46 = vpop.f32.mrb[58].mxu0 }
 0x168   :  { %v1789_v63 = vpop.f32.mrb[55].mxu1  ;;  %v1855_v0 = vpop.f32.mrb[59].mxu0 }
 0x169   :  { %1429 = vst [vmem:[%s2602_s3 + $0x28] sm:$0xff] %v1416_v60  ;;  %v1790_v50 = vadd.f32 %v1789_v63, %v1788_v61  ;;  %v1294_v51 = vadd.f32 %v1787_v35, %v2523_v4 }
 0x16b   :  { %v1382_v1 = vadd.f32 %v1381_v57, %v1294_v51  ;;  %v1297_v2 = vadd.f32 %v1790_v50, %v2525_v5 }
 0x16d   :  { %v1417_v3 = vmax.f32 %v1382_v1, 0.0  ;;  %v1385_v9 = vadd.f32 %v1384_v46, %v1297_v2  ;;  %v1791_v10 = vpop.f32.mrb[56].mxu1  ;;  %v1389_v49 = vpop.f32.mrb[60].mxu0 }
 0x16e   :  { %v1792_v11 = vpop.f32.mrb[57].mxu1  ;;  %v1858_v12 = vpop.f32.mrb[61].mxu0 }
 0x16f   :  { %1430 = vst [vmem:[%s2602_s3 + $0x30] sm:$0xff] %v1417_v3  ;;  %v1418_v42 = vmax.f32 %v1385_v9, 0.0  ;;  %v1793_v55 = vadd.f32 %v1792_v11, %v1791_v10  ;;  %v1794_v13 = vpop.f32.mrb[58].mxu1  ;;  %v1392_v14 = vpop.f32.mrb[62].mxu0 }
 0x170   :  { %v1795_v15 = vpop.f32.mrb[59].mxu1  ;;  %v1859_v16 = vpop.f32.mrb[63].mxu0 }
 0x171   :  { %1431 = vst [vmem:[%s2602_s3 + $0x38] sm:$0xff] %v1418_v42  ;;  %v1796_v4 = vadd.f32 %v1795_v15, %v1794_v13  ;;  %v1302_v5 = vadd.f32 %v1793_v55, %v2531_v24 }
 0x173   :  { %v1390_v52 = vadd.f32 %v1389_v49, %v1302_v5  ;;  %v1305_v18 = vadd.f32 %v1796_v4, %v2533_v25 }
 0x175   :  { %v1419_v19 = vmax.f32 %v1390_v52, 0.0  ;;  %v1393_v20 = vadd.f32 %v1392_v14, %v1305_v18  ;;  %v1797_v21 = vpop.f32.mrb[60].mxu1  ;;  %v1397_v22 = vpop.f32.mrb[64].mxu0 }
 0x176   :  { %v1798_v7 = vpop.f32.mrb[61].mxu1  ;;  %v1862_v29 = vpop.f32.mrb[65].mxu0 }
 0x177   :  { %1432 = vst [vmem:[%s2602_s3 + $0x40] sm:$0xff] %v1419_v19  ;;  %v1420_v31 = vmax.f32 %v1393_v20, 0.0  ;;  %v1799_v6 = vadd.f32 %v1798_v7, %v1797_v21  ;;  %v1800_v8 = vpop.f32.mrb[62].mxu1  ;;  %v1400_v17 = vpop.f32.mrb[66].mxu0 }
 0x178   :  { %v1801_v32 = vpop.f32.mrb[63].mxu1  ;;  %v1863_v28 = vpop.f32.mrb[67].mxu0 }
 0x179   :  { %1433 = vst [vmem:[%s2602_s3 + $0x48] sm:$0xff] %v1420_v31  ;;  %v1802_v24 = vadd.f32 %v1801_v32, %v1800_v8  ;;  %v1310_v25 = vadd.f32 %v1799_v6, %v2539_v47 }
 0x17b   :  { %v1398_v33 = vadd.f32 %v1397_v22, %v1310_v25  ;;  %v1313_v36 = vadd.f32 %v1802_v24, %v2541_v48 }
 0x17d   :  { %v1421_v37 = vmax.f32 %v1398_v33, 0.0  ;;  %v1401_v38 = vadd.f32 %v1400_v17, %v1313_v36  ;;  %v1803_v23 = vpop.f32.mrb[64].mxu1  ;;  %v1405_v39 = vpop.f32.mrb[68].mxu0 }
 0x17e   :  { %v1804_v41 = vpop.f32.mrb[65].mxu1  ;;  %v1866_v34 = vpop.f32.mrb[69].mxu0 }
 0x17f   :  { %1434 = vst [vmem:[%s2602_s3 + $0x50] sm:$0xff] %v1421_v37  ;;  %v1422_v43 = vmax.f32 %v1401_v38, 0.0  ;;  %v1805_v44 = vadd.f32 %v1804_v41, %v1803_v23  ;;  %v1806_v45 = vpop.f32.mrb[66].mxu1  ;;  %v1408_v26 = vpop.f32.mrb[70].mxu0 }
 0x180   :  { %v1807_v27 = vpop.f32.mrb[67].mxu1  ;;  %v1867_v53 = vpop.f32.mrb[71].mxu0 }
 0x181   :  { %1435 = vst [vmem:[%s2602_s3 + $0x58] sm:$0xff] %v1422_v43  ;;  %v1318_v47 = vadd.f32 %v1805_v44, %v2545_v62 }
 0x183   :  { %v1406_v48 = vadd.f32 %v1405_v39, %v1318_v47 }
 0x185   :  { %v1423_v54 = vmax.f32 %v1406_v48, 0.0 }
 0x187   :  { %1436 = vst [vmem:[%s2602_s3 + $0x60] sm:$0xff] %v1423_v54 }

// kernel: _lambda_.12
= control target key start
LH: loop header
LB: loop body
LE: loop exit
PB: predicated region body
PF: predicated region fallthrough
CT: control target
= control target key end

     0   :  { %s6716_s12 = smov 0   ;;  %s7915_s0 = inlined_call_operand.vmem [shape: bf16[512,2304], index: 0, kind: input, shape index: {}]   ;;  %s7916_s1 = inlined_call_operand.vmem [shape: bf16[2304,128], index: 1, kind: input, shape index: {}]   ;;  %s7917_s2 = inlined_call_operand.vmem [shape: f32[1,128], index: 2, kind: input, shape index: {}]   ;;  %s7918_s3 = inlined_call_operand.vmem [shape: f32[512,128], index: 3, kind: output, shape index: {}]  }
   0x1 LB: > { %s4634_s13 = sadd.s32 4294967295, %s6694_s12   ;;  %p4638_p0 = scmp.ge.s32.totalorder %s6694_s12, 1  ;;  %s6694_s12 = sphi %s6716_s12, %s13_s12  }
   0x2   : > { %p139_p1 = scmp.lt.s32.totalorder %s6694_s12, 3 }
   0x4   : > { %p140_p2 = pnand %p4638_p0, %p139_p1 }
   0x5   : > { %v6111_v0 = vld [vmem:[%s7916_s1 + $0x40] sm:$0xff] (!%p140_p2)   ;;  %s4639_s16 = sshll.u32 (!%p140_p2), %s4634_s13, 5  ;;  %v6113_v2 = vld [vmem:[%s7916_s1 + $0x48] sm:$0xff] (!%p140_p2)   ;;  %v6115_v4 = vld [vmem:[%s7916_s1 + $0x50] sm:$0xff] (!%p140_p2)  }
   0x6   : > { %143 = sbr.rel (%p140_p2) target bundleno = 830 (0x33e), region = 32  ;;  %v6112_v1 = vld [vmem:[%s7916_s1] sm:$0xff] (!%p140_p2)   ;;  %5078 = vmatprep.subr.bf16.mxu0 (!%p140_p2), %v6111_v0  ;;  %6086 = vmatprep.subr.bf16.mxu1 (!%p140_p2), %v6111_v0  ;;  %p165_p3 = scmp.lt.s32.totalorder (!%p140_p2), %s4639_s16, 63  ;;  %v6114_v3 = vld [vmem:[%s7916_s1 + $0x8] sm:$0xff] (!%p140_p2)   ;;  %v6116_v5 = vld [vmem:[%s7916_s1 + $0x10] sm:$0xff] (!%p140_p2)  }
   0x7   : > { %5079 = vmatpush3.bf16.msra.mxu0 (!%p140_p2), %v6112_v1  ;;  %6094 = vmatpush3.bf16.msra.mxu1 (!%p140_p2), %v6112_v1  ;;  %v6117_v6 = vld [vmem:[%s7916_s1 + $0x58] sm:$0xff] (!%p140_p2)   ;;  %v6119_v8 = vld [vmem:[%s7916_s1 + $0x60] sm:$0xff] (!%p140_p2)   ;;  %v6121_v10 = vld [vmem:[%s7916_s1 + $0x68] sm:$0xff] (!%p140_p2)  }
   0x8   : > { %5080 = vmatprep.subr.bf16.mxu0 (!%p140_p2), %v6113_v2  ;;  %6087 = vmatprep.subr.bf16.mxu1 (!%p140_p2), %v6113_v2  ;;  %v6118_v7 = vld [vmem:[%s7916_s1 + $0x18] sm:$0xff] (!%p140_p2)   ;;  %v6120_v9 = vld [vmem:[%s7916_s1 + $0x20] sm:$0xff] (!%p140_p2)   ;;  %v6122_v13 = vld [vmem:[%s7916_s1 + $0x28] sm:$0xff] (!%p140_p2)  }
   0x9   : > { %v6123_v14 = vld [vmem:[%s7916_s1 + $0x70] sm:$0xff] (!%p140_p2)   ;;  %v6125_v16 = vld [vmem:[%s7916_s1 + $0x78] sm:$0xff] (!%p140_p2)   ;;  %v6133_v18 = vld [vmem:[%s7916_s1 + $0xc0] sm:$0xff] (!%p140_p2)  }
   0xa   : > { %v6124_v15 = vld [vmem:[%s7916_s1 + $0x30] sm:$0xff] (!%p140_p2)   ;;  %v6126_v17 = vld [vmem:[%s7916_s1 + $0x38] sm:$0xff] (!%p140_p2)   ;;  %v6135_v20 = vld [vmem:[%s7916_s1 + $0x140] sm:$0xff] (!%p140_p2)  }
   0xb   : > { %5081 = vmatpush3.bf16.msra.mxu0 (!%p140_p2), %v6114_v3  ;;  %6095 = vmatpush3.bf16.msra.mxu1 (!%p140_p2), %v6114_v3  ;;  %v6134_v22 = vld [vmem:[%s7916_s1 + $0x80] sm:$0xff] (!%p140_p2)   ;;  %v6143_v26 = vld [vmem:[%s7916_s1 + $0xc8] sm:$0xff] (!%p140_p2)   ;;  %v6153_v30 = vld [vmem:[%s7916_s1 + $0xd0] sm:$0xff] (!%p140_p2)  }
   0xc   : > { %5082 = vmatprep.subr.bf16.mxu0 (!%p140_p2), %v6115_v4  ;;  %6088 = vmatprep.subr.bf16.mxu1 (!%p140_p2), %v6115_v4  ;;  %v6136_v23 = vld [vmem:[%s7916_s1 + $0x100] sm:$0xff] (!%p140_p2)   ;;  %v6144_v27 = vld [vmem:[%s7916_s1 + $0x88] sm:$0xff] (!%p140_p2)   ;;  %v6155_v33 = vld [vmem:[%s7916_s1 + $0x150] sm:$0xff] (!%p140_p2)  }
   0xd   : > { %s7920_s16 = smov (!%p165_p3, %s4639_s16), 63  ;;  %v6145_v28 = vld [vmem:[%s7916_s1 + $0x148] sm:$0xff]   ;;  %v6154_v36 = vld [vmem:[%s7916_s1 + $0x90] sm:$0xff]   ;;  %v6163_v38 = vld [vmem:[%s7916_s1 + $0xd8] sm:$0xff]  }
   0xe   : > { %s6102_s29 = smul.u32 72, %s7920_s16  ;;  %v6146_v29 = vld [vmem:[%s7916_s1 + $0x108] sm:$0xff]   ;;  %v6156_v37 = vld [vmem:[%s7916_s1 + $0x110] sm:$0xff]   ;;  %v6165_v39 = vld [vmem:[%s7916_s1 + $0x158] sm:$0xff]  }
   0xf   : > { %5083 = vmatpush3.bf16.msra.mxu0 %v6116_v5  ;;  %6096 = vmatpush3.bf16.msra.mxu1 %v6116_v5  ;;  %v6164_v42 = vld [vmem:[%s7916_s1 + $0x98] sm:$0xff]   ;;  %v6173_v46 = vld [vmem:[%s7916_s1 + $0xe0] sm:$0xff]   ;;  %v6183_v52 = vld [vmem:[%s7916_s1 + $0xe8] sm:$0xff]  }
  0x10   : > { %5084 = vmatprep.subr.bf16.mxu0 %v6117_v6  ;;  %6089 = vmatprep.subr.bf16.mxu1 %v6117_v6  ;;  %s6757_s9 = scalar_lea.vmem %s7915_s0, %s6102_s29  ;;  %v6166_v43 = vld [vmem:[%s7916_s1 + $0x118] sm:$0xff]   ;;  %v6174_v47 = vld [vmem:[%s7916_s1 + $0xa0] sm:$0xff]   ;;  %v6184_v55 = vld [vmem:[%s7916_s1 + $0xa8] sm:$0xff]  }
  0x11   : > { %v6129_v11 = vld [vmem:[%s6757_s9 + $0x4] ss:$72 sps:$4 sm:$0xff]   ;;  %v6127_v19 = vld [vmem:[%s6757_s9] ss:$72 sps:$4 sm:$0xff]   ;;  %v6137_v24 = vld [vmem:[%s6757_s9 + $0x94] ss:$72 sps:$4 sm:$0xff]  }
  0x12   : > { %v6132_v12 = vld [vmem:[%s6757_s9 + $0x484] ss:$72 sps:$4 sm:$0xff]   ;;  %3097 = vmatprep.mubr.bf16.mxu0 %v6129_v11  ;;  %v6130_v21 = vld [vmem:[%s6757_s9 + $0x480] ss:$72 sps:$4 sm:$0xff]   ;;  %v6139_v25 = vld [vmem:[%s6757_s9 + $0x514] ss:$72 sps:$4 sm:$0xff]  }
  0x13   : > { %5085 = vmatpush3.bf16.msra.mxu0 %v6118_v7  ;;  %6097 = vmatpush3.bf16.msra.mxu1 %v6118_v7  ;;  %v6141_v31 = vld [vmem:[%s6757_s9 + $0x90] ss:$72 sps:$4 sm:$0xff]   ;;  %v6147_v34 = vld [vmem:[%s6757_s9 + $0x124] ss:$72 sps:$4 sm:$0xff]   ;;  %v6151_v40 = vld [vmem:[%s6757_s9 + $0x120] ss:$72 sps:$4 sm:$0xff]  }
  0x14   : > { %5086 = vmatprep.subr.bf16.mxu0 %v6119_v8  ;;  %6090 = vmatprep.subr.bf16.mxu1 %v6119_v8  ;;  %v6142_v32 = vld [vmem:[%s6757_s9 + $0x510] ss:$72 sps:$4 sm:$0xff]   ;;  %v6149_v35 = vld [vmem:[%s6757_s9 + $0x5a4] ss:$72 sps:$4 sm:$0xff]   ;;  %v6152_v41 = vld [vmem:[%s6757_s9 + $0x5a0] ss:$72 sps:$4 sm:$0xff]  }
  0x15   : > { %3161 = vmatprep.mubr.bf16.mxu1 %v6132_v12  ;;  %v6157_v44 = vld [vmem:[%s6757_s9 + $0x1b4] ss:$72 sps:$4 sm:$0xff]   ;;  %v6175_v48 = vld [vmem:[%s7916_s1 + $0x160] sm:$0xff]   ;;  %v6161_v50 = vld [vmem:[%s6757_s9 + $0x1b0] ss:$72 sps:$4 sm:$0xff]  }
  0x16   : > { %v6159_v45 = vld [vmem:[%s6757_s9 + $0x634] ss:$72 sps:$4 sm:$0xff]   ;;  %v6176_v49 = vld [vmem:[%s7916_s1 + $0x120] sm:$0xff]   ;;  %v6162_v51 = vld [vmem:[%s6757_s9 + $0x630] ss:$72 sps:$4 sm:$0xff]  }
  0x17   : > { %5087 = vmatpush3.bf16.msra.mxu0 %v6120_v9  ;;  %6098 = vmatpush3.bf16.msra.mxu1 %v6120_v9  ;;  %v6167_v53 = vld [vmem:[%s6757_s9 + $0x244] ss:$72 sps:$4 sm:$0xff]   ;;  %v6193_v58 = vld [vmem:[%s7916_s1 + $0xf0] sm:$0xff]   ;;  %v6171_v59 = vld [vmem:[%s6757_s9 + $0x240] ss:$72 sps:$4 sm:$0xff]  }
  0x18   : > { %5088 = vmatprep.subr.bf16.mxu0 %v6121_v10  ;;  %6091 = vmatprep.subr.bf16.mxu1 %v6121_v10  ;;  %v6169_v54 = vld [vmem:[%s6757_s9 + $0x6c4] ss:$72 sps:$4 sm:$0xff]   ;;  %v6172_v60 = vld [vmem:[%s6757_s9 + $0x6c0] ss:$72 sps:$4 sm:$0xff]   ;;  %v6194_v61 = vld [vmem:[%s7916_s1 + $0xb0] sm:$0xff]  }
  0x19   : > { %v6185_v56 = vld [vmem:[%s7916_s1 + $0x168] sm:$0xff]   ;;  %v6177_v62 = vld [vmem:[%s6757_s9 + $0x2d4] ss:$72 sps:$4 sm:$0xff]   ;;  %v6181_v6 = vld [vmem:[%s6757_s9 + $0x2d0] ss:$72 sps:$4 sm:$0xff]  }
  0x1a   : > { %v6186_v57 = vld [vmem:[%s7916_s1 + $0x128] sm:$0xff]   ;;  %v6195_v63 = vld [vmem:[%s7916_s1 + $0x170] sm:$0xff]   ;;  %v6203_v2 = vld [vmem:[%s7916_s1 + $0xf8] sm:$0xff]  }
  0x1b   : > { %5089 = vmatpush3.bf16.msra.mxu0 %v6122_v13  ;;  %6099 = vmatpush3.bf16.msra.mxu1 %v6122_v13  ;;  %v6196_v0 = vld [vmem:[%s7916_s1 + $0x130] sm:$0xff]   ;;  %v6204_v3 = vld [vmem:[%s7916_s1 + $0xb8] sm:$0xff]   ;;  %v6187_v8 = vld [vmem:[%s6757_s9 + $0x364] ss:$72 sps:$4 sm:$0xff]  }
  0x1c   : > { %5090 = vmatprep.subr.bf16.mxu0 %v6123_v14  ;;  %6092 = vmatprep.subr.bf16.mxu1 %v6123_v14  ;;  %v6179_v1 = vld [vmem:[%s6757_s9 + $0x754] ss:$72 sps:$4 sm:$0xff]   ;;  %v6182_v7 = vld [vmem:[%s6757_s9 + $0x750] ss:$72 sps:$4 sm:$0xff]   ;;  %v6189_v9 = vld [vmem:[%s6757_s9 + $0x7e4] ss:$72 sps:$4 sm:$0xff]  }
  0x1d   : > { %v6205_v4 = vld [vmem:[%s7916_s1 + $0x178] sm:$0xff]   ;;  %v6213_v10 = vld [vmem:[%s7916_s1 + $0x1c0] sm:$0xff]  }
  0x1e   : > { %v6206_v5 = vld [vmem:[%s7916_s1 + $0x138] sm:$0xff]   ;;  %v6215_v11 = vld [vmem:[%s7916_s1 + $0x240] sm:$0xff]  }
  0x1f   : > { %5091 = vmatpush3.bf16.msra.mxu0 %v6124_v15  ;;  %6100 = vmatpush3.bf16.msra.mxu1 %v6124_v15  ;;  %v6191_v12 = vld [vmem:[%s6757_s9 + $0x360] ss:$72 sps:$4 sm:$0xff]   ;;  %v6197_v14 = vld [vmem:[%s6757_s9 + $0x3f4] ss:$72 sps:$4 sm:$0xff]  }
  0x20   : > { %5092 = vmatprep.subr.bf16.mxu0 %v6125_v16  ;;  %6093 = vmatprep.subr.bf16.mxu1 %v6125_v16  ;;  %v6192_v13 = vld [vmem:[%s6757_s9 + $0x7e0] ss:$72 sps:$4 sm:$0xff]   ;;  %v6199_v15 = vld [vmem:[%s6757_s9 + $0x874] ss:$72 sps:$4 sm:$0xff]   ;;  %v6201_v16 = vld [vmem:[%s6757_s9 + $0x3f0] ss:$72 sps:$4 sm:$0xff]  }
  0x23   : > { %5093 = vmatpush3.bf16.msra.mxu0 %v6126_v17  ;;  %6101 = vmatpush3.bf16.msra.mxu1 %v6126_v17  ;;  %v6202_v17 = vld [vmem:[%s6757_s9 + $0x870] ss:$72 sps:$4 sm:$0xff]  }
  0x24   : > { %5190 = vmatprep.subr.bf16.mxu1 %v6133_v18  ;;  %5302 = vmatprep.subr.bf16.mxu0 %v6135_v20  ;;  %v6209_v18 = vld [vmem:[%s6757_s9 + $0xc] ss:$72 sps:$4 sm:$0xff]   ;;  %v6207_v20 = vld [vmem:[%s6757_s9 + $0x8] ss:$72 sps:$4 sm:$0xff]  }
  0x26   : > { %3098 = vmatmul.mubr.bf16.vlgmr.msra.gmra.mrb[0].mxu0 %v6127_v19  ;;  %3162 = vmatmul.mubr.bf16.vlgmr.msra.gmra.mrb[0].mxu1 %v6130_v21  ;;  %v6212_v19 = vld [vmem:[%s6757_s9 + $0x14] ss:$72 sps:$4 sm:$0xff]   ;;  %v6210_v21 = vld [vmem:[%s6757_s9 + $0x10] ss:$72 sps:$4 sm:$0xff]  }
  0x27   : > { %5191 = vmatpush3.bf16.msra.mxu1 %v6134_v22  ;;  %5303 = vmatpush3.bf16.msra.mxu0 %v6136_v23  ;;  %v6214_v22 = vld [vmem:[%s7916_s1 + $0x180] sm:$0xff]  }
  0x28   : > { %3105 = vmatprep.mubr.bf16.mxu0 %v6137_v24  ;;  %3169 = vmatprep.mubr.bf16.mxu1 %v6139_v25  ;;  %v6216_v23 = vld [vmem:[%s7916_s1 + $0x200] sm:$0xff]  }
  0x29   : > { %5192 = vmatprep.subr.bf16.mxu1 %v6143_v26  ;;  %5304 = vmatprep.subr.bf16.mxu0 %v6145_v28  ;;  %v6217_v24 = vld [vmem:[%s6757_s9 + $0x9c] ss:$72 sps:$4 sm:$0xff]   ;;  %v6229_v26 = vld [vmem:[%s7916_s1 + $0x1c8] sm:$0xff]  }
  0x2a   : > { %v6219_v25 = vld [vmem:[%s6757_s9 + $0xa4] ss:$72 sps:$4 sm:$0xff]  }
  0x2b   : > { %5193 = vmatpush3.bf16.msra.mxu1 %v6144_v27  ;;  %5305 = vmatpush3.bf16.msra.mxu0 %v6146_v29  ;;  %v6231_v27 = vld [vmem:[%s7916_s1 + $0x248] sm:$0xff]  }
  0x2c   : > { %5194 = vmatprep.subr.bf16.mxu1 %v6153_v30  ;;  %5306 = vmatprep.subr.bf16.mxu0 %v6155_v33  ;;  %v6230_v28 = vld [vmem:[%s7916_s1 + $0x188] sm:$0xff]   ;;  %v6245_v30 = vld [vmem:[%s7916_s1 + $0x1d0] sm:$0xff]  }
  0x2d   : > { %v6232_v29 = vld [vmem:[%s7916_s1 + $0x208] sm:$0xff]   ;;  %v6247_v33 = vld [vmem:[%s7916_s1 + $0x250] sm:$0xff]  }
  0x2e   : > { %3106 = vmatmul.mubr.bf16.gmra.mrb[4].mxu0 %v6141_v31  ;;  %3170 = vmatmul.mubr.bf16.gmra.mrb[4].mxu1 %v6142_v32  ;;  %v6221_v31 = vld [vmem:[%s6757_s9 + $0x98] ss:$72 sps:$4 sm:$0xff]  }
  0x2f   : > { %3113 = vmatprep.mubr.bf16.mxu0 %v6147_v34  ;;  %3177 = vmatprep.mubr.bf16.mxu1 %v6149_v35  ;;  %v6222_v32 = vld [vmem:[%s6757_s9 + $0xa0] ss:$72 sps:$4 sm:$0xff]   ;;  %v6223_v34 = vld [vmem:[%s6757_s9 + $0x12c] ss:$72 sps:$4 sm:$0xff]  }
  0x30   : > { %5195 = vmatpush3.bf16.msra.mxu1 %v6154_v36  ;;  %5307 = vmatpush3.bf16.msra.mxu0 %v6156_v37  ;;  %v6225_v35 = vld [vmem:[%s6757_s9 + $0x134] ss:$72 sps:$4 sm:$0xff]  }
  0x31   : > { %5196 = vmatprep.subr.bf16.mxu1 %v6163_v38  ;;  %5308 = vmatprep.subr.bf16.mxu0 %v6165_v39  ;;  %v6246_v36 = vld [vmem:[%s7916_s1 + $0x190] sm:$0xff]   ;;  %v6261_v38 = vld [vmem:[%s7916_s1 + $0x1d8] sm:$0xff]  }
  0x32   : > { %v6248_v37 = vld [vmem:[%s7916_s1 + $0x210] sm:$0xff]   ;;  %v6263_v39 = vld [vmem:[%s7916_s1 + $0x258] sm:$0xff]  }
  0x34   : > { %5197 = vmatpush3.bf16.msra.mxu1 %v6164_v42  ;;  %5309 = vmatpush3.bf16.msra.mxu0 %v6166_v43  ;;  %v6262_v42 = vld [vmem:[%s7916_s1 + $0x198] sm:$0xff]  }
  0x35   : > { %5198 = vmatprep.subr.bf16.mxu1 %v6173_v46  ;;  %5310 = vmatprep.subr.bf16.mxu0 %v6175_v48  ;;  %v6264_v43 = vld [vmem:[%s7916_s1 + $0x218] sm:$0xff]   ;;  %v6277_v46 = vld [vmem:[%s7916_s1 + $0x1e0] sm:$0xff]  }
  0x36   : > { %3114 = vmatmul.mubr.bf16.gmra.mrb[8].mxu0 %v6151_v40  ;;  %3178 = vmatmul.mubr.bf16.gmra.mrb[8].mxu1 %v6152_v41  ;;  %v6227_v40 = vld [vmem:[%s6757_s9 + $0x128] ss:$72 sps:$4 sm:$0xff]   ;;  %v6279_v48 = vld [vmem:[%s7916_s1 + $0x260] sm:$0xff]  }
  0x37   : > { %3121 = vmatprep.mubr.bf16.mxu0 %v6157_v44  ;;  %3185 = vmatprep.mubr.bf16.mxu1 %v6159_v45  ;;  %v6228_v41 = vld [vmem:[%s6757_s9 + $0x130] ss:$72 sps:$4 sm:$0xff]   ;;  %v6233_v44 = vld [vmem:[%s6757_s9 + $0x1bc] ss:$72 sps:$4 sm:$0xff]  }
  0x38   : > { %5199 = vmatpush3.bf16.msra.mxu1 %v6174_v47  ;;  %5311 = vmatpush3.bf16.msra.mxu0 %v6176_v49  ;;  %v6235_v45 = vld [vmem:[%s6757_s9 + $0x1c4] ss:$72 sps:$4 sm:$0xff]  }
  0x39   : > { %5200 = vmatprep.subr.bf16.mxu1 %v6183_v52  ;;  %5312 = vmatprep.subr.bf16.mxu0 %v6185_v56  ;;  %v6278_v47 = vld [vmem:[%s7916_s1 + $0x1a0] sm:$0xff]   ;;  %v6239_v52 = vld [vmem:[%s6757_s9 + $0x24c] ss:$72 sps:$4 sm:$0xff]  }
  0x3a   : > { %v6280_v49 = vld [vmem:[%s7916_s1 + $0x220] sm:$0xff]   ;;  %v6295_v56 = vld [vmem:[%s7916_s1 + $0x268] sm:$0xff]  }
  0x3c   : > { %5201 = vmatpush3.bf16.msra.mxu1 %v6184_v55  ;;  %5313 = vmatpush3.bf16.msra.mxu0 %v6186_v57  ;;  %v6294_v55 = vld [vmem:[%s7916_s1 + $0x1a8] sm:$0xff]  }
  0x3d   : > { %5202 = vmatprep.subr.bf16.mxu1 %v6193_v58  ;;  %5314 = vmatprep.subr.bf16.mxu0 %v6195_v63  ;;  %v6296_v57 = vld [vmem:[%s7916_s1 + $0x228] sm:$0xff]   ;;  %v6310_v63 = vld [vmem:[%s7916_s1 + $0x1b0] sm:$0xff]  }
  0x3e   : > { %3122 = vmatmul.mubr.bf16.gmra.mrb[12].mxu0 %v6161_v50  ;;  %3186 = vmatmul.mubr.bf16.gmra.mrb[12].mxu1 %v6162_v51  ;;  %v6237_v50 = vld [vmem:[%s6757_s9 + $0x1b8] ss:$72 sps:$4 sm:$0xff]   ;;  %v6243_v58 = vld [vmem:[%s6757_s9 + $0x248] ss:$72 sps:$4 sm:$0xff]  }
  0x3f   : > { %3129 = vmatprep.mubr.bf16.mxu0 %v6167_v53  ;;  %3193 = vmatprep.mubr.bf16.mxu1 %v6169_v54  ;;  %v6238_v51 = vld [vmem:[%s6757_s9 + $0x1c0] ss:$72 sps:$4 sm:$0xff]   ;;  %v6241_v53 = vld [vmem:[%s6757_s9 + $0x254] ss:$72 sps:$4 sm:$0xff]  }
  0x40   : > { %5203 = vmatpush3.bf16.msra.mxu1 %v6194_v61  ;;  %5315 = vmatpush3.bf16.msra.mxu0 %v6196_v0  ;;  %v6293_v54 = vld [vmem:[%s7916_s1 + $0x1e8] sm:$0xff]   ;;  %v6311_v0 = vld [vmem:[%s7916_s1 + $0x270] sm:$0xff]  }
  0x41   : > { %5204 = vmatprep.subr.bf16.mxu1 %v6203_v2  ;;  %5316 = vmatprep.subr.bf16.mxu0 %v6205_v4  ;;  %v6251_v61 = vld [vmem:[%s6757_s9 + $0x2e4] ss:$72 sps:$4 sm:$0xff]   ;;  %v6253_v2 = vld [vmem:[%s6757_s9 + $0x2d8] ss:$72 sps:$4 sm:$0xff]  }
  0x42   : > { %v6255_v4 = vld [vmem:[%s6757_s9 + $0x36c] ss:$72 sps:$4 sm:$0xff]  }
  0x44   : > { %5205 = vmatpush3.bf16.msra.mxu1 %v6204_v3  ;;  %5317 = vmatpush3.bf16.msra.mxu0 %v6206_v5  ;;  %v6254_v3 = vld [vmem:[%s6757_s9 + $0x2e0] ss:$72 sps:$4 sm:$0xff]   ;;  %v6257_v5 = vld [vmem:[%s6757_s9 + $0x374] ss:$72 sps:$4 sm:$0xff]  }
  0x45   : > { %5414 = vmatprep.subr.bf16.mxu1 %v6213_v10  ;;  %5526 = vmatprep.subr.bf16.mxu0 %v6215_v11  ;;  %v6328_v10 = vld [vmem:[%s7916_s1 + $0x238] sm:$0xff]  }
  0x46   : > { %3130 = vmatmul.mubr.bf16.gmra.mrb[16].mxu0 %v6171_v59  ;;  %3194 = vmatmul.mubr.bf16.gmra.mrb[16].mxu1 %v6172_v60  ;;  %v6244_v59 = vld [vmem:[%s6757_s9 + $0x250] ss:$72 sps:$4 sm:$0xff]   ;;  %v6249_v60 = vld [vmem:[%s6757_s9 + $0x2dc] ss:$72 sps:$4 sm:$0xff]  }
  0x47   : > { %3137 = vmatprep.mubr.bf16.mxu0 %v6177_v62  ;;  %3201 = vmatprep.mubr.bf16.mxu1 %v6179_v1  ;;  %v6309_v62 = vld [vmem:[%s7916_s1 + $0x1f0] sm:$0xff]  }
  0x48   : > { %v6312_v1 = vld [vmem:[%s7916_s1 + $0x230] sm:$0xff]  }
  0x49   : > { %v6260_v11 = vld [vmem:[%s6757_s9 + $0x370] ss:$72 sps:$4 sm:$0xff]  }
  0x4e   : > { %3138 = vmatmul.mubr.bf16.gmra.mrb[20].mxu0 %v6181_v6  ;;  %3202 = vmatmul.mubr.bf16.gmra.mrb[20].mxu1 %v6182_v7  ;;  %v6325_v6 = vld [vmem:[%s7916_s1 + $0x1f8] sm:$0xff]  }
  0x4f   : > { %3145 = vmatprep.mubr.bf16.mxu0 %v6187_v8  ;;  %3209 = vmatprep.mubr.bf16.mxu1 %v6189_v9  ;;  %v6326_v7 = vld [vmem:[%s7916_s1 + $0x1b8] sm:$0xff]   ;;  %v6259_v8 = vld [vmem:[%s6757_s9 + $0x368] ss:$72 sps:$4 sm:$0xff]  }
  0x50   : > { %v6327_v9 = vld [vmem:[%s7916_s1 + $0x278] sm:$0xff]  }
  0x56   : > { %3146 = vmatmul.mubr.bf16.gmra.mrb[24].mxu0 %v6191_v12  ;;  %3210 = vmatmul.mubr.bf16.gmra.mrb[24].mxu1 %v6192_v13  ;;  %v6265_v12 = vld [vmem:[%s6757_s9 + $0x3fc] ss:$72 sps:$4 sm:$0xff]  }
  0x57   : > { %3153 = vmatprep.mubr.bf16.mxu0 %v6197_v14  ;;  %3217 = vmatprep.mubr.bf16.mxu1 %v6199_v15  ;;  %v6267_v13 = vld [vmem:[%s6757_s9 + $0x404] ss:$72 sps:$4 sm:$0xff]   ;;  %v6269_v15 = vld [vmem:[%s6757_s9 + $0x3f8] ss:$72 sps:$4 sm:$0xff]  }
  0x58   : > { %v6341_v14 = vld [vmem:[%s7916_s1 + $0x2c0] sm:$0xff]  }
  0x5e   : > { %3154 = vmatmul.mubr.bf16.gmra.mrb[28].mxu0 %v6201_v16  ;;  %3218 = vmatmul.mubr.bf16.gmra.mrb[28].mxu1 %v6202_v17  ;;  %v6270_v16 = vld [vmem:[%s6757_s9 + $0x400] ss:$72 sps:$4 sm:$0xff]  }
  0x5f   : > { %3258 = vmatprep.mubr.bf16.mxu1 %v6209_v18  ;;  %3419 = vmatprep.mubr.bf16.mxu0 %v6212_v19  ;;  %v6343_v17 = vld [vmem:[%s7916_s1 + $0x340] sm:$0xff]   ;;  %v6271_v18 = vld [vmem:[%s6757_s9 + $0x48c] ss:$72 sps:$4 sm:$0xff]  }
  0x60   : > { %v6273_v19 = vld [vmem:[%s6757_s9 + $0x494] ss:$72 sps:$4 sm:$0xff]  }
  0x66   : > { %3259 = vmatmul.mubr.bf16.vlgmr.msra.gmra.mrb[32].mxu1 %v6207_v20  ;;  %3420 = vmatmul.mubr.bf16.vlgmr.msra.gmra.mrb[32].mxu0 %v6210_v21  ;;  %v6275_v20 = vld [vmem:[%s6757_s9 + $0x488] ss:$72 sps:$4 sm:$0xff]  }
  0x67   : > { %5415 = vmatpush3.bf16.msra.mxu1 %v6214_v22  ;;  %5527 = vmatpush3.bf16.msra.mxu0 %v6216_v23  ;;  %v6276_v21 = vld [vmem:[%s6757_s9 + $0x490] ss:$72 sps:$4 sm:$0xff]   ;;  %v6281_v22 = vld [vmem:[%s6757_s9 + $0x51c] ss:$72 sps:$4 sm:$0xff]  }
  0x68   : > { %3266 = vmatprep.mubr.bf16.mxu1 %v6217_v24  ;;  %3427 = vmatprep.mubr.bf16.mxu0 %v6219_v25  ;;  %v6283_v23 = vld [vmem:[%s6757_s9 + $0x524] ss:$72 sps:$4 sm:$0xff]   ;;  %v6285_v24 = vld [vmem:[%s6757_s9 + $0x518] ss:$72 sps:$4 sm:$0xff]  }
  0x69   : > { %5416 = vmatprep.subr.bf16.mxu1 %v6229_v26  ;;  %5528 = vmatprep.subr.bf16.mxu0 %v6231_v27  ;;  %v6286_v25 = vld [vmem:[%s6757_s9 + $0x520] ss:$72 sps:$4 sm:$0xff]   ;;  %v6287_v26 = vld [vmem:[%s6757_s9 + $0x5ac] ss:$72 sps:$4 sm:$0xff]  }
  0x6a   : > { %v6289_v27 = vld [vmem:[%s6757_s9 + $0x5b4] ss:$72 sps:$4 sm:$0xff]  }
  0x6b   : > { %5417 = vmatpush3.bf16.msra.mxu1 %v6230_v28  ;;  %5529 = vmatpush3.bf16.msra.mxu0 %v6232_v29  ;;  %v6291_v28 = vld [vmem:[%s6757_s9 + $0x5a8] ss:$72 sps:$4 sm:$0xff]  }
  0x6c   : > { %5418 = vmatprep.subr.bf16.mxu1 %v6245_v30  ;;  %5530 = vmatprep.subr.bf16.mxu0 %v6247_v33  ;;  %v6292_v29 = vld [vmem:[%s6757_s9 + $0x5b0] ss:$72 sps:$4 sm:$0xff]   ;;  %v6297_v30 = vld [vmem:[%s6757_s9 + $0x63c] ss:$72 sps:$4 sm:$0xff]   ;;  %v6302_v33 = vld [vmem:[%s6757_s9 + $0x640] ss:$72 sps:$4 sm:$0xff]  }
  0x6e   : > { %3267 = vmatmul.mubr.bf16.gmra.mrb[36].mxu1 %v6221_v31  ;;  %3428 = vmatmul.mubr.bf16.gmra.mrb[36].mxu0 %v6222_v32  ;;  %v6299_v31 = vld [vmem:[%s6757_s9 + $0x644] ss:$72 sps:$4 sm:$0xff]   ;;  %v6301_v32 = vld [vmem:[%s6757_s9 + $0x638] ss:$72 sps:$4 sm:$0xff]  }
  0x6f   : > { %3274 = vmatprep.mubr.bf16.mxu1 %v6223_v34  ;;  %3435 = vmatprep.mubr.bf16.mxu0 %v6225_v35  ;;  %v6303_v34 = vld [vmem:[%s6757_s9 + $0x6cc] ss:$72 sps:$4 sm:$0xff]  }
  0x70   : > { %5419 = vmatpush3.bf16.msra.mxu1 %v6246_v36  ;;  %5531 = vmatpush3.bf16.msra.mxu0 %v6248_v37  ;;  %v6305_v35 = vld [vmem:[%s6757_s9 + $0x6d4] ss:$72 sps:$4 sm:$0xff]   ;;  %v6307_v36 = vld [vmem:[%s6757_s9 + $0x6c8] ss:$72 sps:$4 sm:$0xff]  }
  0x71   : > { %5420 = vmatprep.subr.bf16.mxu1 %v6261_v38  ;;  %5532 = vmatprep.subr.bf16.mxu0 %v6263_v39  ;;  %v6308_v37 = vld [vmem:[%s6757_s9 + $0x6d0] ss:$72 sps:$4 sm:$0xff]   ;;  %v6313_v38 = vld [vmem:[%s6757_s9 + $0x75c] ss:$72 sps:$4 sm:$0xff]  }
  0x72   : > { %v6315_v39 = vld [vmem:[%s6757_s9 + $0x764] ss:$72 sps:$4 sm:$0xff]  }
  0x74   : > { %5421 = vmatpush3.bf16.msra.mxu1 %v6262_v42  ;;  %5533 = vmatpush3.bf16.msra.mxu0 %v6264_v43  ;;  %v6319_v42 = vld [vmem:[%s6757_s9 + $0x7ec] ss:$72 sps:$4 sm:$0xff]  }
  0x75   : > { %5422 = vmatprep.subr.bf16.mxu1 %v6277_v46  ;;  %5534 = vmatprep.subr.bf16.mxu0 %v6279_v48  ;;  %v6321_v43 = vld [vmem:[%s6757_s9 + $0x7f4] ss:$72 sps:$4 sm:$0xff]   ;;  %v6333_v48 = vld [vmem:[%s6757_s9 + $0x878] ss:$72 sps:$4 sm:$0xff]  }
  0x76   : > { %3275 = vmatmul.mubr.bf16.gmra.mrb[40].mxu1 %v6227_v40  ;;  %3436 = vmatmul.mubr.bf16.gmra.mrb[40].mxu0 %v6228_v41  ;;  %v6317_v40 = vld [vmem:[%s6757_s9 + $0x758] ss:$72 sps:$4 sm:$0xff]   ;;  %v6329_v46 = vld [vmem:[%s6757_s9 + $0x87c] ss:$72 sps:$4 sm:$0xff]  }
  0x77   : > { %3282 = vmatprep.mubr.bf16.mxu1 %v6233_v44  ;;  %3443 = vmatprep.mubr.bf16.mxu0 %v6235_v45  ;;  %v6318_v41 = vld [vmem:[%s6757_s9 + $0x760] ss:$72 sps:$4 sm:$0xff]   ;;  %v6324_v45 = vld [vmem:[%s6757_s9 + $0x7f0] ss:$72 sps:$4 sm:$0xff]  }
  0x78   : > { %5423 = vmatpush3.bf16.msra.mxu1 %v6278_v47  ;;  %5535 = vmatpush3.bf16.msra.mxu0 %v6280_v49  ;;  %v6323_v44 = vld [vmem:[%s6757_s9 + $0x7e8] ss:$72 sps:$4 sm:$0xff]   ;;  %v6331_v47 = vld [vmem:[%s6757_s9 + $0x884] ss:$72 sps:$4 sm:$0xff]  }
  0x79   : > { %5424 = vmatprep.subr.bf16.mxu1 %v6293_v54  ;;  %5536 = vmatprep.subr.bf16.mxu0 %v6295_v56  ;;  %v6334_v49 = vld [vmem:[%s6757_s9 + $0x880] ss:$72 sps:$4 sm:$0xff]   ;;  %v6345_v56 = vld [vmem:[%s6757_s9 + $0xac] ss:$72 sps:$4 sm:$0xff]  }
  0x7a   : > { %v6342_v54 = vld [vmem:[%s7916_s1 + $0x280] sm:$0xff]  }
  0x7c   : > { %5425 = vmatpush3.bf16.msra.mxu1 %v6294_v55  ;;  %5537 = vmatpush3.bf16.msra.mxu0 %v6296_v57  ;;  %v6344_v55 = vld [vmem:[%s7916_s1 + $0x300] sm:$0xff]   ;;  %v6347_v57 = vld [vmem:[%s6757_s9 + $0xb4] ss:$72 sps:$4 sm:$0xff]  }
  0x7d   : > { %5426 = vmatprep.subr.bf16.mxu1 %v6309_v62  ;;  %5538 = vmatprep.subr.bf16.mxu0 %v6311_v0  ;;  %v6373_v62 = vld [vmem:[%s7916_s1 + $0x2d0] sm:$0xff]  }
  0x7e   : > { %3283 = vmatmul.mubr.bf16.gmra.mrb[44].mxu1 %v6237_v50  ;;  %3444 = vmatmul.mubr.bf16.gmra.mrb[44].mxu0 %v6238_v51  ;;  %v6337_v50 = vld [vmem:[%s6757_s9 + $0x1c] ss:$72 sps:$4 sm:$0xff]   ;;  %v6349_v0 = vld [vmem:[%s6757_s9 + $0xa8] ss:$72 sps:$4 sm:$0xff]  }
  0x7f   : > { %3290 = vmatprep.mubr.bf16.mxu1 %v6239_v52  ;;  %3451 = vmatprep.mubr.bf16.mxu0 %v6241_v53  ;;  %v6340_v51 = vld [vmem:[%s6757_s9 + $0x24] ss:$72 sps:$4 sm:$0xff]   ;;  %v6335_v52 = vld [vmem:[%s6757_s9 + $0x18] ss:$72 sps:$4 sm:$0xff]  }
  0x80   : > { %5427 = vmatpush3.bf16.msra.mxu1 %v6310_v63  ;;  %5539 = vmatpush3.bf16.msra.mxu0 %v6312_v1  ;;  %v6338_v53 = vld [vmem:[%s6757_s9 + $0x20] ss:$72 sps:$4 sm:$0xff]   ;;  %v6375_v63 = vld [vmem:[%s7916_s1 + $0x350] sm:$0xff]  }
  0x81   : > { %5428 = vmatprep.subr.bf16.mxu1 %v6325_v6  ;;  %5540 = vmatprep.subr.bf16.mxu0 %v6327_v9  ;;  %v6350_v1 = vld [vmem:[%s6757_s9 + $0xb0] ss:$72 sps:$4 sm:$0xff]  }
  0x82   : > { %v6389_v6 = vld [vmem:[%s7916_s1 + $0x2d8] sm:$0xff]  }
  0x83   : > { %v6392_v9 = vld [vmem:[%s7916_s1 + $0x318] sm:$0xff]  }
  0x84   : > { %5429 = vmatpush3.bf16.msra.mxu1 %v6326_v7  ;;  %5541 = vmatpush3.bf16.msra.mxu0 %v6328_v10  ;;  %v6391_v7 = vld [vmem:[%s7916_s1 + $0x358] sm:$0xff]   ;;  %v6405_v10 = vld [vmem:[%s7916_s1 + $0x2e0] sm:$0xff]  }
  0x85   : > { %5638 = vmatprep.subr.bf16.mxu1 %v6341_v14  ;;  %5750 = vmatprep.subr.bf16.mxu0 %v6343_v17  ;;  %v6361_v14 = vld [vmem:[%s6757_s9 + $0x1cc] ss:$72 sps:$4 sm:$0xff]   ;;  %v6408_v17 = vld [vmem:[%s7916_s1 + $0x320] sm:$0xff]  }
  0x86   : > { %3291 = vmatmul.mubr.bf16.gmra.mrb[48].mxu1 %v6243_v58  ;;  %3452 = vmatmul.mubr.bf16.gmra.mrb[48].mxu0 %v6244_v59  ;;  %v6357_v58 = vld [vmem:[%s7916_s1 + $0x2c8] sm:$0xff]  }
  0x87   : > { %3298 = vmatprep.mubr.bf16.mxu1 %v6249_v60  ;;  %3459 = vmatprep.mubr.bf16.mxu0 %v6251_v61  ;;  %v6359_v59 = vld [vmem:[%s7916_s1 + $0x348] sm:$0xff]  }
  0x88   : > { %v6358_v60 = vld [vmem:[%s7916_s1 + $0x288] sm:$0xff]  }
  0x89   : > { %v6360_v61 = vld [vmem:[%s7916_s1 + $0x308] sm:$0xff]  }
  0x8e   : > { %3299 = vmatmul.mubr.bf16.gmra.mrb[52].mxu1 %v6253_v2  ;;  %3460 = vmatmul.mubr.bf16.gmra.mrb[52].mxu0 %v6254_v3  ;;  %v6351_v2 = vld [vmem:[%s6757_s9 + $0x13c] ss:$72 sps:$4 sm:$0xff]  }
  0x8f   : > { %3306 = vmatprep.mubr.bf16.mxu1 %v6255_v4  ;;  %3467 = vmatprep.mubr.bf16.mxu0 %v6257_v5  ;;  %v6353_v3 = vld [vmem:[%s6757_s9 + $0x144] ss:$72 sps:$4 sm:$0xff]   ;;  %v6374_v4 = vld [vmem:[%s7916_s1 + $0x290] sm:$0xff]  }
  0x90   : > { %v6376_v5 = vld [vmem:[%s7916_s1 + $0x310] sm:$0xff]  }
  0x96   : > { %3307 = vmatmul.mubr.bf16.gmra.mrb[56].mxu1 %v6259_v8  ;;  %3468 = vmatmul.mubr.bf16.gmra.mrb[56].mxu0 %v6260_v11  ;;  %v6390_v8 = vld [vmem:[%s7916_s1 + $0x298] sm:$0xff]   ;;  %v6407_v11 = vld [vmem:[%s7916_s1 + $0x360] sm:$0xff]  }
  0x97   : > { %3314 = vmatprep.mubr.bf16.mxu1 %v6265_v12  ;;  %3475 = vmatprep.mubr.bf16.mxu0 %v6267_v13  ;;  %v6355_v12 = vld [vmem:[%s6757_s9 + $0x138] ss:$72 sps:$4 sm:$0xff]  }
  0x98   : > { %v6356_v13 = vld [vmem:[%s6757_s9 + $0x140] ss:$72 sps:$4 sm:$0xff]  }
  0x9e   : > { %3315 = vmatmul.mubr.bf16.gmra.mrb[60].mxu1 %v6269_v15  ;;  %3476 = vmatmul.mubr.bf16.gmra.mrb[60].mxu0 %v6270_v16  ;;  %v6363_v15 = vld [vmem:[%s6757_s9 + $0x1d4] ss:$72 sps:$4 sm:$0xff]   ;;  %v6406_v16 = vld [vmem:[%s7916_s1 + $0x2a0] sm:$0xff]  }
  0x9f   : > { %3322 = vmatprep.mubr.bf16.mxu1 %v6271_v18  ;;  %3483 = vmatprep.mubr.bf16.mxu0 %v6273_v19  ;;  %v6421_v18 = vld [vmem:[%s7916_s1 + $0x2e8] sm:$0xff]  }
  0xa0   : > { %v6423_v19 = vld [vmem:[%s7916_s1 + $0x368] sm:$0xff]  }
  0xa6   : > { %3323 = vmatmul.mubr.bf16.gmra.mrb[64].mxu1 %v6275_v20  ;;  %3484 = vmatmul.mubr.bf16.gmra.mrb[64].mxu0 %v6276_v21  ;;  %v6422_v20 = vld [vmem:[%s7916_s1 + $0x2a8] sm:$0xff]  }
  0xa7   : > { %3330 = vmatprep.mubr.bf16.mxu1 %v6281_v22  ;;  %3491 = vmatprep.mubr.bf16.mxu0 %v6283_v23  ;;  %v6424_v21 = vld [vmem:[%s7916_s1 + $0x328] sm:$0xff]   ;;  %v6366_v23 = vld [vmem:[%s6757_s9 + $0x1d0] ss:$72 sps:$4 sm:$0xff]  }
  0xa8   : > { %v6365_v22 = vld [vmem:[%s6757_s9 + $0x1c8] ss:$72 sps:$4 sm:$0xff]  }
  0xae   : > { %3331 = vmatmul.mubr.bf16.gmra.mrb[68].mxu1 %v6285_v24  ;;  %3492 = vmatmul.mubr.bf16.gmra.mrb[68].mxu0 %v6286_v25 }
  0xaf   : > { %3338 = vmatprep.mubr.bf16.mxu1 %v6287_v26  ;;  %3499 = vmatprep.mubr.bf16.mxu0 %v6289_v27  ;;  %v6367_v26 = vld [vmem:[%s6757_s9 + $0x25c] ss:$72 sps:$4 sm:$0xff]  }
  0xb0   : > { %v6369_v27 = vld [vmem:[%s6757_s9 + $0x264] ss:$72 sps:$4 sm:$0xff]  }
  0xb6   : > { %3339 = vmatmul.mubr.bf16.gmra.mrb[72].mxu1 %v6291_v28  ;;  %3500 = vmatmul.mubr.bf16.gmra.mrb[72].mxu0 %v6292_v29  ;;  %v6437_v28 = vld [vmem:[%s7916_s1 + $0x2f0] sm:$0xff]  }
  0xb7   : > { %3346 = vmatprep.mubr.bf16.mxu1 %v6297_v30  ;;  %3507 = vmatprep.mubr.bf16.mxu0 %v6299_v31  ;;  %v6439_v29 = vld [vmem:[%s7916_s1 + $0x370] sm:$0xff]  }
  0xbe   : > { %3347 = vmatmul.mubr.bf16.gmra.mrb[76].mxu1 %v6301_v32  ;;  %3508 = vmatmul.mubr.bf16.gmra.mrb[76].mxu0 %v6302_v33  ;;  %v7167_v32 = vld [vmem:[%s7917_s2] ss:$0 sm:$0xff] }
  0xbf   : > { %3354 = vmatprep.mubr.bf16.mxu1 %v6303_v34  ;;  %3515 = vmatprep.mubr.bf16.mxu0 %v6305_v35 }
  0xc6   : > { %3355 = vmatmul.mubr.bf16.gmra.mrb[80].mxu1 %v6307_v36  ;;  %3516 = vmatmul.mubr.bf16.gmra.mrb[80].mxu0 %v6308_v37 }
  0xc7   : > { %3362 = vmatprep.mubr.bf16.mxu1 %v6313_v38  ;;  %3523 = vmatprep.mubr.bf16.mxu0 %v6315_v39  ;;  %v6438_v39 = vld [vmem:[%s7916_s1 + $0x2b0] sm:$0xff]  }
  0xce   : > { %3363 = vmatmul.mubr.bf16.gmra.mrb[84].mxu1 %v6317_v40  ;;  %3524 = vmatmul.mubr.bf16.gmra.mrb[84].mxu0 %v6318_v41  ;;  %v6440_v40 = vld [vmem:[%s7916_s1 + $0x330] sm:$0xff]  }
  0xcf   : > { %3370 = vmatprep.mubr.bf16.mxu1 %v6319_v42  ;;  %3531 = vmatprep.mubr.bf16.mxu0 %v6321_v43  ;;  %v6453_v43 = vld [vmem:[%s7916_s1 + $0x2f8] sm:$0xff]  }
  0xd6   : > { %3371 = vmatmul.mubr.bf16.gmra.mrb[88].mxu1 %v6323_v44  ;;  %3532 = vmatmul.mubr.bf16.gmra.mrb[88].mxu0 %v6324_v45  ;;  %v6455_v44 = vld [vmem:[%s7916_s1 + $0x378] sm:$0xff]  }
  0xd7   : > { %3378 = vmatprep.mubr.bf16.mxu1 %v6329_v46  ;;  %3539 = vmatprep.mubr.bf16.mxu0 %v6331_v47  ;;  %v6454_v45 = vld [vmem:[%s7916_s1 + $0x2b8] sm:$0xff]  }
  0xd8   : > { %v6456_v46 = vld [vmem:[%s7916_s1 + $0x338] sm:$0xff]  }
  0xde   : > { %3379 = vmatmul.mubr.bf16.gmra.mrb[92].mxu1 %v6333_v48  ;;  %3540 = vmatmul.mubr.bf16.gmra.mrb[92].mxu0 %v6334_v49  ;;  %v6469_v48 = vld [vmem:[%s7916_s1 + $0x3c0] sm:$0xff]  }
  0xdf   : > { %3580 = vmatprep.mubr.bf16.mxu1 %v6337_v50  ;;  %3741 = vmatprep.mubr.bf16.mxu0 %v6340_v51  ;;  %v6471_v49 = vld [vmem:[%s7916_s1 + $0x440] sm:$0xff]  }
  0xe0   : > { %v6371_v51 = vld [vmem:[%s6757_s9 + $0x258] ss:$72 sps:$4 sm:$0xff]  }
  0xe6   : > { %3581 = vmatmul.mubr.bf16.vlgmr.msra.gmra.mrb[96].mxu1 %v6335_v52  ;;  %3742 = vmatmul.mubr.bf16.vlgmr.msra.gmra.mrb[96].mxu0 %v6338_v53  ;;  %v6372_v52 = vld [vmem:[%s6757_s9 + $0x260] ss:$72 sps:$4 sm:$0xff]  }
  0xe7   : > { %5639 = vmatpush3.bf16.msra.mxu1 %v6342_v54  ;;  %5751 = vmatpush3.bf16.msra.mxu0 %v6344_v55  ;;  %v6377_v55 = vld [vmem:[%s6757_s9 + $0x2ec] ss:$72 sps:$4 sm:$0xff]  }
  0xe8   : > { %3588 = vmatprep.mubr.bf16.mxu1 %v6345_v56  ;;  %3749 = vmatprep.mubr.bf16.mxu0 %v6347_v57  ;;  %v6379_v56 = vld [vmem:[%s6757_s9 + $0x2f4] ss:$72 sps:$4 sm:$0xff]  }
  0xe9   : > { %5640 = vmatprep.subr.bf16.mxu1 %v6357_v58  ;;  %5752 = vmatprep.subr.bf16.mxu0 %v6359_v59 }
  0xeb   : > { %5641 = vmatpush3.bf16.msra.mxu1 %v6358_v60  ;;  %5753 = vmatpush3.bf16.msra.mxu0 %v6360_v61 }
  0xec   : > { %5642 = vmatprep.subr.bf16.mxu1 %v6373_v62  ;;  %5754 = vmatprep.subr.bf16.mxu0 %v6375_v63 }
  0xee   : > { %3589 = vmatmul.mubr.bf16.gmra.mrb[100].mxu1 %v6349_v0  ;;  %3750 = vmatmul.mubr.bf16.gmra.mrb[100].mxu0 %v6350_v1 }
  0xef   : > { %3596 = vmatprep.mubr.bf16.mxu1 %v6351_v2  ;;  %3757 = vmatprep.mubr.bf16.mxu0 %v6353_v3 }
  0xf0   : > { %5643 = vmatpush3.bf16.msra.mxu1 %v6374_v4  ;;  %5755 = vmatpush3.bf16.msra.mxu0 %v6376_v5  ;;  %v6381_v5 = vld [vmem:[%s6757_s9 + $0x2e8] ss:$72 sps:$4 sm:$0xff]  }
  0xf1   : > { %5644 = vmatprep.subr.bf16.mxu1 %v6389_v6  ;;  %5756 = vmatprep.subr.bf16.mxu0 %v6391_v7 }
  0xf4   : > { %5645 = vmatpush3.bf16.msra.mxu1 %v6390_v8  ;;  %5757 = vmatpush3.bf16.msra.mxu0 %v6392_v9  ;;  %v6382_v8 = vld [vmem:[%s6757_s9 + $0x2f0] ss:$72 sps:$4 sm:$0xff]   ;;  %v6383_v9 = vld [vmem:[%s6757_s9 + $0x37c] ss:$72 sps:$4 sm:$0xff]  }
  0xf5   : > { %5646 = vmatprep.subr.bf16.mxu1 %v6405_v10  ;;  %5758 = vmatprep.subr.bf16.mxu0 %v6407_v11 }
  0xf6   : > { %3597 = vmatmul.mubr.bf16.gmra.mrb[104].mxu1 %v6355_v12  ;;  %3758 = vmatmul.mubr.bf16.gmra.mrb[104].mxu0 %v6356_v13  ;;  %v6385_v12 = vld [vmem:[%s6757_s9 + $0x384] ss:$72 sps:$4 sm:$0xff]  }
  0xf7   : > { %3604 = vmatprep.mubr.bf16.mxu1 %v6361_v14  ;;  %3765 = vmatprep.mubr.bf16.mxu0 %v6363_v15 }
  0xf8   : > { %5647 = vmatpush3.bf16.msra.mxu1 %v6406_v16  ;;  %5759 = vmatpush3.bf16.msra.mxu0 %v6408_v17 }
  0xf9   : > { %v5094_v24 = vpop.f32.mrb[0].mxu0  ;;  %v5142_v25 = vpop.f32.mrb[0].mxu1  ;;  %5648 = vmatprep.subr.bf16.mxu1 %v6421_v18  ;;  %5760 = vmatprep.subr.bf16.mxu0 %v6423_v19 }
  0xfa   : > { %v5095_v30 = vpop.f32.mrb[1].mxu0  ;;  %v5143_v31 = vpop.f32.mrb[1].mxu1 }
  0xfb   : > { %v7169_v33 = vadd.f32 %v5095_v30, %v5094_v24  ;;  %v5144_v34 = vadd.f32 %v5143_v31, %v5142_v25  ;;  %v5097_v35 = vpop.f32.mrb[2].mxu0  ;;  %v5145_v36 = vpop.f32.mrb[2].mxu1  ;;  %v6388_v24 = vld [vmem:[%s6757_s9 + $0x380] ss:$72 sps:$4 sm:$0xff]  }
  0xfc   : > { %v5098_v37 = vpop.f32.mrb[3].mxu0  ;;  %v5146_v38 = vpop.f32.mrb[3].mxu1  ;;  %5649 = vmatpush3.bf16.msra.mxu1 %v6422_v20  ;;  %5761 = vmatpush3.bf16.msra.mxu0 %v6424_v21 }
  0xfd   : > { %v7177_v41 = vadd.f32 %v5098_v37, %v5097_v35  ;;  %v5147_v42 = vadd.f32 %v5146_v38, %v5145_v36  ;;  %5650 = vmatprep.subr.bf16.mxu1 %v6437_v28  ;;  %5762 = vmatprep.subr.bf16.mxu0 %v6439_v29  ;;  %v7192_v47 = vadd.f32 %v5144_v34, %v7167_v32  ;;  %v6395_v28 = vld [vmem:[%s6757_s9 + $0x414] ss:$72 sps:$4 sm:$0xff]  }
  0xfe   : > { %3605 = vmatmul.mubr.bf16.gmra.mrb[108].mxu1 %v6365_v22  ;;  %3766 = vmatmul.mubr.bf16.gmra.mrb[108].mxu0 %v6366_v23  ;;  %v6387_v23 = vld [vmem:[%s6757_s9 + $0x378] ss:$72 sps:$4 sm:$0xff]  }
  0xff   : > { %3612 = vmatprep.mubr.bf16.mxu1 %v6367_v26  ;;  %3773 = vmatprep.mubr.bf16.mxu0 %v6369_v27  ;;  %v7201_v50 = vadd.f32 %v5147_v42, %v7167_v32  ;;  %v6393_v27 = vld [vmem:[%s6757_s9 + $0x40c] ss:$72 sps:$4 sm:$0xff]  }
 0x100   : > { %5651 = vmatpush3.bf16.msra.mxu1 %v6438_v39  ;;  %5763 = vmatpush3.bf16.msra.mxu0 %v6440_v40 }
 0x101   : > { %v5100_v53 = vpop.f32.mrb[4].mxu0  ;;  %v5148_v54 = vpop.f32.mrb[4].mxu1  ;;  %5652 = vmatprep.subr.bf16.mxu1 %v6453_v43  ;;  %5764 = vmatprep.subr.bf16.mxu0 %v6455_v44  ;;  %v6397_v44 = vld [vmem:[%s6757_s9 + $0x408] ss:$72 sps:$4 sm:$0xff]  }
 0x102   : > { %v5101_v57 = vpop.f32.mrb[5].mxu0  ;;  %v5149_v58 = vpop.f32.mrb[5].mxu1 }
 0x103   : > { %v7207_v59 = vadd.f32 %v5101_v57, %v5100_v53  ;;  %v5150_v60 = vadd.f32 %v5149_v58, %v5148_v54  ;;  %v5103_v61 = vpop.f32.mrb[6].mxu0  ;;  %v5151_v62 = vpop.f32.mrb[6].mxu1  ;;  %v6401_v53 = vld [vmem:[%s6757_s9 + $0x4a4] ss:$72 sps:$4 sm:$0xff]  }
 0x104   : > { %v5104_v63 = vpop.f32.mrb[7].mxu0  ;;  %v5152_v0 = vpop.f32.mrb[7].mxu1  ;;  %5653 = vmatpush3.bf16.msra.mxu1 %v6454_v45  ;;  %5765 = vmatpush3.bf16.msra.mxu0 %v6456_v46 }
 0x105   : > { %v7209_v1 = vadd.f32 %v5104_v63, %v5103_v61  ;;  %v5153_v2 = vadd.f32 %v5152_v0, %v5151_v62  ;;  %5862 = vmatprep.subr.bf16.mxu1 %v6469_v48  ;;  %5974 = vmatprep.subr.bf16.mxu0 %v6471_v49  ;;  %v7212_v3 = vadd.f32 %v5150_v60, %v7167_v32  ;;  %v6398_v48 = vld [vmem:[%s6757_s9 + $0x410] ss:$72 sps:$4 sm:$0xff]   ;;  %v6399_v49 = vld [vmem:[%s6757_s9 + $0x49c] ss:$72 sps:$4 sm:$0xff]  }
 0x106   : > { %3613 = vmatmul.mubr.bf16.gmra.mrb[112].mxu1 %v6371_v51  ;;  %3774 = vmatmul.mubr.bf16.gmra.mrb[112].mxu0 %v6372_v52 }
 0x107   : > { %3620 = vmatprep.mubr.bf16.mxu1 %v6377_v55  ;;  %3781 = vmatprep.mubr.bf16.mxu0 %v6379_v56  ;;  %v7215_v4 = vadd.f32 %v5153_v2, %v7167_v32  ;;  %v6403_v2 = vld [vmem:[%s6757_s9 + $0x498] ss:$72 sps:$4 sm:$0xff]  }
 0x109   : > { %v5106_v6 = vpop.f32.mrb[8].mxu0  ;;  %v5154_v7 = vpop.f32.mrb[8].mxu1 }
 0x10a   : > { %v5107_v10 = vpop.f32.mrb[9].mxu0  ;;  %v5155_v11 = vpop.f32.mrb[9].mxu1 }
 0x10b   : > { %v7221_v13 = vadd.f32 %v5107_v10, %v5106_v6  ;;  %v5156_v14 = vadd.f32 %v5155_v11, %v5154_v7  ;;  %v5109_v15 = vpop.f32.mrb[10].mxu0  ;;  %v5157_v16 = vpop.f32.mrb[10].mxu1 }
 0x10c   : > { %v5110_v17 = vpop.f32.mrb[11].mxu0  ;;  %v5158_v18 = vpop.f32.mrb[11].mxu1 }
 0x10d   : > { %v7223_v19 = vadd.f32 %v5110_v17, %v5109_v15  ;;  %v5159_v20 = vadd.f32 %v5158_v18, %v5157_v16  ;;  %v7226_v21 = vadd.f32 %v5156_v14, %v7167_v32 }
 0x10e   : > { %3621 = vmatmul.mubr.bf16.gmra.mrb[116].mxu1 %v6381_v5  ;;  %3782 = vmatmul.mubr.bf16.gmra.mrb[116].mxu0 %v6382_v8  ;;  %v6404_v5 = vld [vmem:[%s6757_s9 + $0x4a0] ss:$72 sps:$4 sm:$0xff]   ;;  %v6409_v8 = vld [vmem:[%s6757_s9 + $0x52c] ss:$72 sps:$4 sm:$0xff]  }
 0x10f   : > { %3628 = vmatprep.mubr.bf16.mxu1 %v6383_v9  ;;  %3789 = vmatprep.mubr.bf16.mxu0 %v6385_v12  ;;  %v7229_v22 = vadd.f32 %v5159_v20, %v7167_v32  ;;  %v6411_v9 = vld [vmem:[%s6757_s9 + $0x534] ss:$72 sps:$4 sm:$0xff]  }
 0x111   : > { %v5112_v25 = vpop.f32.mrb[12].mxu0  ;;  %v5160_v26 = vpop.f32.mrb[12].mxu1 }
 0x112   : > { %v5113_v29 = vpop.f32.mrb[13].mxu0  ;;  %v5161_v30 = vpop.f32.mrb[13].mxu1 }
 0x113   : > { %v7235_v31 = vadd.f32 %v5113_v29, %v5112_v25  ;;  %v5162_v34 = vadd.f32 %v5161_v30, %v5160_v26  ;;  %v5115_v35 = vpop.f32.mrb[14].mxu0  ;;  %v5163_v36 = vpop.f32.mrb[14].mxu1  ;;  %v6413_v26 = vld [vmem:[%s6757_s9 + $0x528] ss:$72 sps:$4 sm:$0xff]   ;;  %v6415_v30 = vld [vmem:[%s6757_s9 + $0x5bc] ss:$72 sps:$4 sm:$0xff]  }
 0x114   : > { %v5116_v37 = vpop.f32.mrb[15].mxu0  ;;  %v5164_v38 = vpop.f32.mrb[15].mxu1  ;;  %v6414_v29 = vld [vmem:[%s6757_s9 + $0x530] ss:$72 sps:$4 sm:$0xff]  }
 0x115   : > { %v7237_v39 = vadd.f32 %v5116_v37, %v5115_v35  ;;  %v5165_v40 = vadd.f32 %v5164_v38, %v5163_v36  ;;  %v7240_v42 = vadd.f32 %v5162_v34, %v7167_v32  ;;  %v6417_v36 = vld [vmem:[%s6757_s9 + $0x5c4] ss:$72 sps:$4 sm:$0xff]  }
 0x116   : > { %3629 = vmatmul.mubr.bf16.gmra.mrb[120].mxu1 %v6387_v23  ;;  %3790 = vmatmul.mubr.bf16.gmra.mrb[120].mxu0 %v6388_v24 }
 0x117   : > { %3636 = vmatprep.mubr.bf16.mxu1 %v6393_v27  ;;  %3797 = vmatprep.mubr.bf16.mxu0 %v6395_v28  ;;  %v7243_v43 = vadd.f32 %v5165_v40, %v7167_v32 }
 0x119   : > { %v5118_v45 = vpop.f32.mrb[16].mxu0  ;;  %v5166_v46 = vpop.f32.mrb[16].mxu1 }
 0x11a   : > { %v5119_v51 = vpop.f32.mrb[17].mxu0  ;;  %v5167_v52 = vpop.f32.mrb[17].mxu1 }
 0x11b   : > { %v7249_v54 = vadd.f32 %v5119_v51, %v5118_v45  ;;  %v5168_v55 = vadd.f32 %v5167_v52, %v5166_v46  ;;  %v5121_v56 = vpop.f32.mrb[18].mxu0  ;;  %v5169_v57 = vpop.f32.mrb[18].mxu1 }
 0x11c   : > { %v5122_v58 = vpop.f32.mrb[19].mxu0  ;;  %v5170_v60 = vpop.f32.mrb[19].mxu1 }
 0x11d   : > { %v7251_v61 = vadd.f32 %v5122_v58, %v5121_v56  ;;  %v5171_v62 = vadd.f32 %v5170_v60, %v5169_v57  ;;  %v7254_v63 = vadd.f32 %v5168_v55, %v7167_v32  ;;  %v6420_v55 = vld [vmem:[%s6757_s9 + $0x5c0] ss:$72 sps:$4 sm:$0xff]   ;;  %v6425_v58 = vld [vmem:[%s6757_s9 + $0x64c] ss:$72 sps:$4 sm:$0xff]  }
 0x11e   : > { %3637 = vmatmul.mubr.bf16.gmra.mrb[124].mxu1 %v6397_v44  ;;  %3798 = vmatmul.mubr.bf16.gmra.mrb[124].mxu0 %v6398_v48  ;;  %v6427_v60 = vld [vmem:[%s6757_s9 + $0x654] ss:$72 sps:$4 sm:$0xff]  }
 0x11f   : > { %3644 = vmatprep.mubr.bf16.mxu1 %v6399_v49  ;;  %3805 = vmatprep.mubr.bf16.mxu0 %v6401_v53  ;;  %v7257_v0 = vadd.f32 %v5171_v62, %v7167_v32  ;;  %v6419_v53 = vld [vmem:[%s6757_s9 + $0x5b8] ss:$72 sps:$4 sm:$0xff]  }
 0x121   : > { %v5124_v6 = vpop.f32.mrb[20].mxu0  ;;  %v5172_v7 = vpop.f32.mrb[20].mxu1 }
 0x122   : > { %v5125_v10 = vpop.f32.mrb[21].mxu0  ;;  %v5173_v11 = vpop.f32.mrb[21].mxu1 }
 0x123   : > { %v7263_v12 = vadd.f32 %v5125_v10, %v5124_v6  ;;  %v5174_v14 = vadd.f32 %v5173_v11, %v5172_v7  ;;  %v5127_v15 = vpop.f32.mrb[22].mxu0  ;;  %v5175_v16 = vpop.f32.mrb[22].mxu1 }
 0x124   : > { %v5128_v17 = vpop.f32.mrb[23].mxu0  ;;  %v5176_v18 = vpop.f32.mrb[23].mxu1 }
 0x125   : > { %v7265_v20 = vadd.f32 %v5128_v17, %v5127_v15  ;;  %v5177_v23 = vadd.f32 %v5176_v18, %v5175_v16  ;;  %v7268_v24 = vadd.f32 %v5174_v14, %v7167_v32 }
 0x126   : > { %3645 = vmatmul.mubr.bf16.gmra.mrb[128].mxu1 %v6403_v2  ;;  %3806 = vmatmul.mubr.bf16.gmra.mrb[128].mxu0 %v6404_v5 }
 0x127   : > { %3652 = vmatprep.mubr.bf16.mxu1 %v6409_v8  ;;  %3813 = vmatprep.mubr.bf16.mxu0 %v6411_v9  ;;  %v7271_v25 = vadd.f32 %v5177_v23, %v7167_v32 }
 0x129   : > { %v5130_v27 = vpop.f32.mrb[24].mxu0  ;;  %v5178_v28 = vpop.f32.mrb[24].mxu1 }
 0x12a   : > { %v5131_v34 = vpop.f32.mrb[25].mxu0  ;;  %v5179_v35 = vpop.f32.mrb[25].mxu1 }
 0x12b   : > { %v7277_v37 = vadd.f32 %v5131_v34, %v5130_v27  ;;  %v5180_v38 = vadd.f32 %v5179_v35, %v5178_v28  ;;  %v5133_v40 = vpop.f32.mrb[26].mxu0  ;;  %v5181_v44 = vpop.f32.mrb[26].mxu1  ;;  %v6429_v27 = vld [vmem:[%s6757_s9 + $0x648] ss:$72 sps:$4 sm:$0xff]  }
 0x12c   : > { %v5134_v45 = vpop.f32.mrb[27].mxu0  ;;  %v5182_v46 = vpop.f32.mrb[27].mxu1  ;;  %v6430_v28 = vld [vmem:[%s6757_s9 + $0x650] ss:$72 sps:$4 sm:$0xff]  }
 0x12d   : > { %v7279_v48 = vadd.f32 %v5134_v45, %v5133_v40  ;;  %v5183_v49 = vadd.f32 %v5182_v46, %v5181_v44  ;;  %v7282_v51 = vadd.f32 %v5180_v38, %v7167_v32  ;;  %v6431_v38 = vld [vmem:[%s6757_s9 + $0x6dc] ss:$72 sps:$4 sm:$0xff]  }
 0x12e   : > { %3653 = vmatmul.mubr.bf16.gmra.mrb[132].mxu1 %v6413_v26  ;;  %3814 = vmatmul.mubr.bf16.gmra.mrb[132].mxu0 %v6414_v29  ;;  %v3100_v29 = vadd.f32 %v7169_v33, %v7167_v32  ;;  %v6433_v40 = vld [vmem:[%s6757_s9 + $0x6e4] ss:$72 sps:$4 sm:$0xff]  }
 0x12f   : > { %3660 = vmatprep.mubr.bf16.mxu1 %v6415_v30  ;;  %3821 = vmatprep.mubr.bf16.mxu0 %v6417_v36  ;;  %v7285_v52 = vadd.f32 %v5183_v49, %v7167_v32  ;;  %v3103_v49 = vadd.f32 %v7177_v41, %v7167_v32  ;;  %v3108_v41 = vadd.f32 %v7207_v59, %v7167_v32 }
 0x131   : > { %v5136_v56 = vpop.f32.mrb[28].mxu0  ;;  %v5184_v57 = vpop.f32.mrb[28].mxu1 }
 0x132   : > { %v5137_v62 = vpop.f32.mrb[29].mxu0  ;;  %v5185_v2 = vpop.f32.mrb[29].mxu1 }
 0x133   : > { %v7291_v5 = vadd.f32 %v5137_v62, %v5136_v56  ;;  %v5186_v6 = vadd.f32 %v5185_v2, %v5184_v57  ;;  %v5139_v7 = vpop.f32.mrb[30].mxu0  ;;  %v5187_v8 = vpop.f32.mrb[30].mxu1 }
 0x134   : > { %v5140_v9 = vpop.f32.mrb[31].mxu0  ;;  %v5188_v10 = vpop.f32.mrb[31].mxu1 }
 0x135   : > { %v7293_v11 = vadd.f32 %v5140_v9, %v5139_v7  ;;  %v5189_v14 = vadd.f32 %v5188_v10, %v5187_v8  ;;  %v7296_v15 = vadd.f32 %v5186_v6, %v7167_v32  ;;  %v6435_v6 = vld [vmem:[%s6757_s9 + $0x6d8] ss:$72 sps:$4 sm:$0xff]  }
 0x136   : > { %3661 = vmatmul.mubr.bf16.gmra.mrb[136].mxu1 %v6419_v53  ;;  %3822 = vmatmul.mubr.bf16.gmra.mrb[136].mxu0 %v6420_v55  ;;  %v6436_v7 = vld [vmem:[%s6757_s9 + $0x6e0] ss:$72 sps:$4 sm:$0xff]  }
 0x137   : > { %3668 = vmatprep.mubr.bf16.mxu1 %v6425_v58  ;;  %3829 = vmatprep.mubr.bf16.mxu0 %v6427_v60  ;;  %v7299_v16 = vadd.f32 %v5189_v14, %v7167_v32 }
 0x139   : > { %v5206_v17 = vpop.f32.mrb[32].mxu1  ;;  %v5318_v18 = vpop.f32.mrb[32].mxu0 }
 0x13a   : > { %v5207_v23 = vpop.f32.mrb[33].mxu1  ;;  %v5319_v26 = vpop.f32.mrb[33].mxu0 }
 0x13b   : > { %v5208_v30 = vadd.f32 %v5207_v23, %v5206_v17  ;;  %v5320_v34 = vadd.f32 %v5319_v26, %v5318_v18  ;;  %v5209_v35 = vpop.f32.mrb[34].mxu1  ;;  %v5321_v36 = vpop.f32.mrb[34].mxu0  ;;  %v6441_v17 = vld [vmem:[%s6757_s9 + $0x76c] ss:$72 sps:$4 sm:$0xff]  }
 0x13c   : > { %v5210_v44 = vpop.f32.mrb[35].mxu1  ;;  %v5322_v45 = vpop.f32.mrb[35].mxu0  ;;  %v6443_v18 = vld [vmem:[%s6757_s9 + $0x774] ss:$72 sps:$4 sm:$0xff]  }
 0x13d   : > { %v3261_v46 = vadd.f32 %v5208_v30, %v3100_v29  ;;  %v5211_v53 = vadd.f32 %v5210_v44, %v5209_v35  ;;  %v5323_v55 = vadd.f32 %v5322_v45, %v5321_v36  ;;  %v6445_v45 = vld [vmem:[%s6757_s9 + $0x768] ss:$72 sps:$4 sm:$0xff]  }
 0x13e   : > { %3669 = vmatmul.mubr.bf16.gmra.mrb[140].mxu1 %v6429_v27  ;;  %3830 = vmatmul.mubr.bf16.gmra.mrb[140].mxu0 %v6430_v28  ;;  %v3111_v28 = vadd.f32 %v7209_v1, %v7167_v32  ;;  %v3116_v1 = vadd.f32 %v7221_v13, %v7167_v32 }
 0x13f   : > { %v7309_v56 = vadd.f32 %v5320_v34, %v3261_v46  ;;  %v3264_v33 = vadd.f32 %v5211_v53, %v3103_v49  ;;  %3676 = vmatprep.mubr.bf16.mxu1 %v6431_v38  ;;  %3837 = vmatprep.mubr.bf16.mxu0 %v6433_v40  ;;  %v6446_v46 = vld [vmem:[%s6757_s9 + $0x770] ss:$72 sps:$4 sm:$0xff]  }
 0x141   : > { %v7311_v57 = vadd.f32 %v5323_v55, %v3264_v33  ;;  %v5212_v58 = vpop.f32.mrb[36].mxu1  ;;  %v5324_v60 = vpop.f32.mrb[36].mxu0 }
 0x142   : > { %v5213_v62 = vpop.f32.mrb[37].mxu1  ;;  %v5325_v2 = vpop.f32.mrb[37].mxu0 }
 0x143   : > { %v5214_v8 = vadd.f32 %v5213_v62, %v5212_v58  ;;  %v5326_v9 = vadd.f32 %v5325_v2, %v5324_v60  ;;  %v5215_v10 = vpop.f32.mrb[38].mxu1  ;;  %v5327_v14 = vpop.f32.mrb[38].mxu0  ;;  %v6447_v58 = vld [vmem:[%s6757_s9 + $0x7fc] ss:$72 sps:$4 sm:$0xff]  }
 0x144   : > { %v5216_v23 = vpop.f32.mrb[39].mxu1  ;;  %v5328_v26 = vpop.f32.mrb[39].mxu0  ;;  %v6449_v60 = vld [vmem:[%s6757_s9 + $0x804] ss:$72 sps:$4 sm:$0xff]  }
 0x145   : > { %v3269_v27 = vadd.f32 %v5214_v8, %v3108_v41  ;;  %v5217_v29 = vadd.f32 %v5216_v23, %v5215_v10  ;;  %v5329_v30 = vadd.f32 %v5328_v26, %v5327_v14  ;;  %v6451_v26 = vld [vmem:[%s6757_s9 + $0x7f8] ss:$72 sps:$4 sm:$0xff]  }
 0x146   : > { %3677 = vmatmul.mubr.bf16.gmra.mrb[144].mxu1 %v6435_v6  ;;  %3838 = vmatmul.mubr.bf16.gmra.mrb[144].mxu0 %v6436_v7  ;;  %v3119_v7 = vadd.f32 %v7223_v19, %v7167_v32  ;;  %v3124_v19 = vadd.f32 %v7235_v31, %v7167_v32 }
 0x147   : > { %v7321_v34 = vadd.f32 %v5326_v9, %v3269_v27  ;;  %v3272_v59 = vadd.f32 %v5217_v29, %v3111_v28  ;;  %3684 = vmatprep.mubr.bf16.mxu1 %v6441_v17  ;;  %3845 = vmatprep.mubr.bf16.mxu0 %v6443_v18  ;;  %v6452_v27 = vld [vmem:[%s6757_s9 + $0x800] ss:$72 sps:$4 sm:$0xff]  }
 0x149   : > { %v7323_v35 = vadd.f32 %v5329_v30, %v3272_v59  ;;  %v5218_v36 = vpop.f32.mrb[40].mxu1  ;;  %v5330_v38 = vpop.f32.mrb[40].mxu0 }
 0x14a   : > { %v5219_v40 = vpop.f32.mrb[41].mxu1  ;;  %v5331_v44 = vpop.f32.mrb[41].mxu0 }
 0x14b   : > { %v5220_v49 = vadd.f32 %v5219_v40, %v5218_v36  ;;  %v5332_v53 = vadd.f32 %v5331_v44, %v5330_v38  ;;  %v5221_v55 = vpop.f32.mrb[42].mxu1  ;;  %v5333_v33 = vpop.f32.mrb[42].mxu0  ;;  %v6457_v36 = vld [vmem:[%s6757_s9 + $0x88c] ss:$72 sps:$4 sm:$0xff]  }
 0x14c   : > { %v5222_v62 = vpop.f32.mrb[43].mxu1  ;;  %v5334_v2 = vpop.f32.mrb[43].mxu0  ;;  %v6459_v38 = vld [vmem:[%s6757_s9 + $0x894] ss:$72 sps:$4 sm:$0xff]  }
 0x14d   : > { %v3277_v6 = vadd.f32 %v5220_v49, %v3116_v1  ;;  %v5223_v41 = vadd.f32 %v5222_v62, %v5221_v55  ;;  %v5335_v8 = vadd.f32 %v5334_v2, %v5333_v33  ;;  %v6461_v2 = vld [vmem:[%s6757_s9 + $0x888] ss:$72 sps:$4 sm:$0xff]  }
 0x14e   : > { %3685 = vmatmul.mubr.bf16.gmra.mrb[148].mxu1 %v6445_v45  ;;  %3846 = vmatmul.mubr.bf16.gmra.mrb[148].mxu0 %v6446_v46  ;;  %v3127_v46 = vadd.f32 %v7237_v39, %v7167_v32  ;;  %v3132_v39 = vadd.f32 %v7249_v54, %v7167_v32 }
 0x14f   : > { %v7333_v9 = vadd.f32 %v5332_v53, %v3277_v6  ;;  %v3280_v13 = vadd.f32 %v5223_v41, %v3119_v7  ;;  %3692 = vmatprep.mubr.bf16.mxu1 %v6447_v58  ;;  %3853 = vmatprep.mubr.bf16.mxu0 %v6449_v60  ;;  %v6462_v6 = vld [vmem:[%s6757_s9 + $0x890] ss:$72 sps:$4 sm:$0xff]  }
 0x151   : > { %v7335_v10 = vadd.f32 %v5335_v8, %v3280_v13  ;;  %v5224_v14 = vpop.f32.mrb[44].mxu1  ;;  %v5336_v17 = vpop.f32.mrb[44].mxu0 }
 0x152   : > { %v5225_v18 = vpop.f32.mrb[45].mxu1  ;;  %v5337_v23 = vpop.f32.mrb[45].mxu0 }
 0x153   : > { %v5226_v28 = vadd.f32 %v5225_v18, %v5224_v14  ;;  %v5338_v29 = vadd.f32 %v5337_v23, %v5336_v17  ;;  %v5227_v30 = vpop.f32.mrb[46].mxu1  ;;  %v5339_v59 = vpop.f32.mrb[46].mxu0  ;;  %v6465_v14 = vld [vmem:[%s6757_s9 + $0x2c] ss:$72 sps:$4 sm:$0xff]  }
 0x154   : > { %v5228_v40 = vpop.f32.mrb[47].mxu1  ;;  %v5340_v44 = vpop.f32.mrb[47].mxu0  ;;  %v6468_v17 = vld [vmem:[%s6757_s9 + $0x34] ss:$72 sps:$4 sm:$0xff]  }
 0x155   : > { %v3285_v45 = vadd.f32 %v5226_v28, %v3124_v19  ;;  %v5229_v1 = vadd.f32 %v5228_v40, %v5227_v30  ;;  %v5341_v49 = vadd.f32 %v5340_v44, %v5339_v59  ;;  %v6463_v44 = vld [vmem:[%s6757_s9 + $0x28] ss:$72 sps:$4 sm:$0xff]  }
 0x156   : > { %3693 = vmatmul.mubr.bf16.gmra.mrb[152].mxu1 %v6451_v26  ;;  %3854 = vmatmul.mubr.bf16.gmra.mrb[152].mxu0 %v6452_v27  ;;  %v3135_v27 = vadd.f32 %v7251_v61, %v7167_v32  ;;  %v3140_v61 = vadd.f32 %v7263_v12, %v7167_v32  ;;  %v3143_v12 = vadd.f32 %v7265_v20, %v7167_v32  ;;  %v6486_v20 = vld [vmem:[%s7916_s1 + $0x388] sm:$0xff]  }
 0x157   : > { %v7345_v53 = vadd.f32 %v5338_v29, %v3285_v45  ;;  %v3288_v31 = vadd.f32 %v5229_v1, %v3127_v46  ;;  %3700 = vmatprep.mubr.bf16.mxu1 %v6457_v36  ;;  %3861 = vmatprep.mubr.bf16.mxu0 %v6459_v38  ;;  %v6466_v45 = vld [vmem:[%s6757_s9 + $0x30] ss:$72 sps:$4 sm:$0xff]  }
 0x159   : > { %v7347_v55 = vadd.f32 %v5341_v49, %v3288_v31  ;;  %v5230_v33 = vpop.f32.mrb[48].mxu1  ;;  %v5342_v58 = vpop.f32.mrb[48].mxu0 }
 0x15a   : > { %v5231_v60 = vpop.f32.mrb[49].mxu1  ;;  %v5343_v62 = vpop.f32.mrb[49].mxu0 }
 0x15b   : > { %v5232_v7 = vadd.f32 %v5231_v60, %v5230_v33  ;;  %v5344_v41 = vadd.f32 %v5343_v62, %v5342_v58  ;;  %v5233_v8 = vpop.f32.mrb[50].mxu1  ;;  %v5345_v13 = vpop.f32.mrb[50].mxu0  ;;  %v6470_v33 = vld [vmem:[%s7916_s1 + $0x380] sm:$0xff]  }
 0x15c   : > { %v5234_v18 = vpop.f32.mrb[51].mxu1  ;;  %v5346_v23 = vpop.f32.mrb[51].mxu0  ;;  %v6472_v58 = vld [vmem:[%s7916_s1 + $0x400] sm:$0xff]  }
 0x15d   : > { %v3293_v26 = vadd.f32 %v5232_v7, %v3132_v39  ;;  %v5235_v19 = vadd.f32 %v5234_v18, %v5233_v8  ;;  %v5347_v28 = vadd.f32 %v5346_v23, %v5345_v13  ;;  %v6485_v8 = vld [vmem:[%s7916_s1 + $0x3c8] sm:$0xff]   ;;  %v6501_v23 = vld [vmem:[%s7916_s1 + $0x3d0] sm:$0xff]  }
 0x15e   : > { %3701 = vmatmul.mubr.bf16.gmra.mrb[156].mxu1 %v6461_v2  ;;  %3862 = vmatmul.mubr.bf16.gmra.mrb[156].mxu0 %v6462_v6  ;;  %v6473_v2 = vld [vmem:[%s6757_s9 + $0xbc] ss:$72 sps:$4 sm:$0xff]   ;;  %v6487_v13 = vld [vmem:[%s7916_s1 + $0x448] sm:$0xff]  }
 0x15f   : > { %v7357_v29 = vadd.f32 %v5344_v41, %v3293_v26  ;;  %v3296_v54 = vadd.f32 %v5235_v19, %v3135_v27  ;;  %3902 = vmatprep.mubr.bf16.mxu1 %v6465_v14  ;;  %4063 = vmatprep.mubr.bf16.mxu0 %v6468_v17  ;;  %v6475_v6 = vld [vmem:[%s6757_s9 + $0xc4] ss:$72 sps:$4 sm:$0xff]   ;;  %v6503_v26 = vld [vmem:[%s7916_s1 + $0x450] sm:$0xff]  }
 0x160   : > { %v6488_v18 = vld [vmem:[%s7916_s1 + $0x408] sm:$0xff]  }
 0x161   : > { %v7359_v30 = vadd.f32 %v5347_v28, %v3296_v54  ;;  %v5236_v59 = vpop.f32.mrb[52].mxu1  ;;  %v5348_v36 = vpop.f32.mrb[52].mxu0 }
 0x162   : > { %v5237_v38 = vpop.f32.mrb[53].mxu1  ;;  %v5349_v40 = vpop.f32.mrb[53].mxu0 }
 0x163   : > { %v5238_v46 = vadd.f32 %v5237_v38, %v5236_v59  ;;  %v5350_v1 = vadd.f32 %v5349_v40, %v5348_v36  ;;  %v5239_v49 = vpop.f32.mrb[54].mxu1  ;;  %v5351_v31 = vpop.f32.mrb[54].mxu0  ;;  %v6477_v36 = vld [vmem:[%s6757_s9 + $0xb8] ss:$72 sps:$4 sm:$0xff]   ;;  %v3148_v40 = vadd.f32 %v7277_v37, %v7167_v32  ;;  %v6504_v37 = vld [vmem:[%s7916_s1 + $0x410] sm:$0xff]  }
 0x164   : > { %v5240_v60 = vpop.f32.mrb[55].mxu1  ;;  %v5352_v62 = vpop.f32.mrb[55].mxu0  ;;  %v6478_v38 = vld [vmem:[%s6757_s9 + $0xc0] ss:$72 sps:$4 sm:$0xff]  }
 0x165   : > { %v3301_v39 = vadd.f32 %v5238_v46, %v3140_v61  ;;  %v5241_v7 = vadd.f32 %v5240_v60, %v5239_v49  ;;  %v5353_v41 = vadd.f32 %v5352_v62, %v5351_v31  ;;  %v6481_v49 = vld [vmem:[%s6757_s9 + $0x154] ss:$72 sps:$4 sm:$0xff]   ;;  %v3151_v62 = vadd.f32 %v7279_v48, %v7167_v32 }
 0x166   : > { %3903 = vmatmul.mubr.bf16.vlgmr.msra.gmra.mrb[160].mxu1 %v6463_v44  ;;  %4064 = vmatmul.mubr.bf16.vlgmr.msra.gmra.mrb[160].mxu0 %v6466_v45  ;;  %v6518_v32 = vld [vmem:[%s7916_s1 + $0x398] sm:$0xff]  }
 0x167   : > { %v7381_v14 = vadd.f32 %v5350_v1, %v3301_v39  ;;  %v3304_v17 = vadd.f32 %v5241_v7, %v3143_v12  ;;  %5863 = vmatpush3.bf16.msra.mxu1 %v6470_v33  ;;  %5975 = vmatpush3.bf16.msra.mxu0 %v6472_v58  ;;  %v6479_v1 = vld [vmem:[%s6757_s9 + $0x14c] ss:$72 sps:$4 sm:$0xff]   ;;  %v6517_v39 = vld [vmem:[%s7916_s1 + $0x3d8] sm:$0xff]  }
 0x168   : > { %3910 = vmatprep.mubr.bf16.mxu1 %v6473_v2  ;;  %4071 = vmatprep.mubr.bf16.mxu0 %v6475_v6  ;;  %v6502_v58 = vld [vmem:[%s7916_s1 + $0x390] sm:$0xff]   ;;  %v6519_v12 = vld [vmem:[%s7916_s1 + $0x458] sm:$0xff]  }
 0x169   : > { %v7395_v27 = vadd.f32 %v5353_v41, %v3304_v17  ;;  %v5242_v19 = vpop.f32.mrb[56].mxu1  ;;  %v5354_v28 = vpop.f32.mrb[56].mxu0  ;;  %5864 = vmatprep.subr.bf16.mxu1 %v6485_v8  ;;  %5976 = vmatprep.subr.bf16.mxu0 %v6487_v13  ;;  %v6520_v48 = vld [vmem:[%s7916_s1 + $0x418] sm:$0xff]  }
 0x16a   : > { %v5243_v54 = vpop.f32.mrb[57].mxu1  ;;  %v5355_v59 = vpop.f32.mrb[57].mxu0 }
 0x16b   : > { %v5244_v44 = vadd.f32 %v5243_v54, %v5242_v19  ;;  %v5356_v45 = vadd.f32 %v5355_v59, %v5354_v28  ;;  %v5245_v61 = vpop.f32.mrb[58].mxu1  ;;  %v5357_v46 = vpop.f32.mrb[58].mxu0  ;;  %5865 = vmatpush3.bf16.msra.mxu1 %v6486_v20  ;;  %5977 = vmatpush3.bf16.msra.mxu0 %v6488_v18  ;;  %v6533_v20 = vld [vmem:[%s7916_s1 + $0x3e0] sm:$0xff]   ;;  %v6483_v19 = vld [vmem:[%s6757_s9 + $0x148] ss:$72 sps:$4 sm:$0xff]  }
 0x16c   : > { %v5246_v31 = vpop.f32.mrb[59].mxu1  ;;  %v5358_v33 = vpop.f32.mrb[59].mxu0  ;;  %5866 = vmatprep.subr.bf16.mxu1 %v6501_v23  ;;  %5978 = vmatprep.subr.bf16.mxu0 %v6503_v26  ;;  %v6535_v18 = vld [vmem:[%s7916_s1 + $0x460] sm:$0xff]   ;;  %v6484_v28 = vld [vmem:[%s6757_s9 + $0x150] ss:$72 sps:$4 sm:$0xff]  }
 0x16d   : > { %v3309_v60 = vadd.f32 %v5244_v44, %v3148_v40  ;;  %v5247_v2 = vadd.f32 %v5246_v31, %v5245_v61  ;;  %v5359_v6 = vadd.f32 %v5358_v33, %v5357_v46  ;;  %v6687_v54 = vld [vmem:[%s7917_s2] ss:$0 sm:$0xff]  ;;  %v6491_v61 = vld [vmem:[%s6757_s9 + $0x1e4] ss:$72 sps:$4 sm:$0xff]  }
 0x16e   : > { %3911 = vmatmul.mubr.bf16.gmra.mrb[164].mxu1 %v6477_v36  ;;  %4072 = vmatmul.mubr.bf16.gmra.mrb[164].mxu0 %v6478_v38  ;;  %v3156_v59 = vadd.f32 %v6687_v54, %v7291_v5  ;;  %v3159_v46 = vadd.f32 %v6687_v54, %v7293_v11  ;;  %v6534_v31 = vld [vmem:[%s7916_s1 + $0x3a0] sm:$0xff]   ;;  %v6549_v11 = vld [vmem:[%s7916_s1 + $0x3e8] sm:$0xff]  }
 0x16f   : > { %v7417_v7 = vadd.f32 %v5356_v45, %v3309_v60  ;;  %v3312_v41 = vadd.f32 %v5247_v2, %v3151_v62  ;;  %3918 = vmatprep.mubr.bf16.mxu1 %v6479_v1  ;;  %4079 = vmatprep.mubr.bf16.mxu0 %v6481_v49  ;;  %v6489_v45 = vld [vmem:[%s6757_s9 + $0x1dc] ss:$72 sps:$4 sm:$0xff]   ;;  %v6551_v60 = vld [vmem:[%s7916_s1 + $0x468] sm:$0xff]  }
 0x170   : > { %5867 = vmatpush3.bf16.msra.mxu1 %v6502_v58  ;;  %5979 = vmatpush3.bf16.msra.mxu0 %v6504_v37  ;;  %v6536_v5 = vld [vmem:[%s7916_s1 + $0x420] sm:$0xff]  }
 0x171   : > { %v7425_v8 = vadd.f32 %v5359_v6, %v3312_v41  ;;  %v5248_v13 = vpop.f32.mrb[60].mxu1  ;;  %v5360_v17 = vpop.f32.mrb[60].mxu0  ;;  %5868 = vmatprep.subr.bf16.mxu1 %v6517_v39  ;;  %5980 = vmatprep.subr.bf16.mxu0 %v6519_v12  ;;  %v6550_v6 = vld [vmem:[%s7916_s1 + $0x3a8] sm:$0xff]  }
 0x172   : > { %v5249_v23 = vpop.f32.mrb[61].mxu1  ;;  %v5361_v26 = vpop.f32.mrb[61].mxu0  ;;  %v6552_v39 = vld [vmem:[%s7916_s1 + $0x428] sm:$0xff]  }
 0x173   : > { %v5250_v36 = vadd.f32 %v5249_v23, %v5248_v13  ;;  %v5362_v38 = vadd.f32 %v5361_v26, %v5360_v17  ;;  %v5251_v40 = vpop.f32.mrb[62].mxu1  ;;  %v5363_v44 = vpop.f32.mrb[62].mxu0  ;;  %v6567_v13 = vld [vmem:[%s7916_s1 + $0x470] sm:$0xff]   ;;  %v6494_v23 = vld [vmem:[%s6757_s9 + $0x1e0] ss:$72 sps:$4 sm:$0xff]  }
 0x174   : > { %v5252_v1 = vpop.f32.mrb[63].mxu1  ;;  %v5364_v49 = vpop.f32.mrb[63].mxu0  ;;  %5869 = vmatpush3.bf16.msra.mxu1 %v6518_v32  ;;  %5981 = vmatpush3.bf16.msra.mxu0 %v6520_v48  ;;  %v6565_v48 = vld [vmem:[%s7916_s1 + $0x3f0] sm:$0xff]  }
 0x175   : > { %v3317_v33 = vadd.f32 %v5250_v36, %v3156_v59  ;;  %v5253_v58 = vadd.f32 %v5252_v1, %v5251_v40  ;;  %v5365_v37 = vadd.f32 %v5364_v49, %v5363_v44  ;;  %5870 = vmatprep.subr.bf16.mxu1 %v6533_v20  ;;  %5982 = vmatprep.subr.bf16.mxu0 %v6535_v18  ;;  %v6493_v18 = vld [vmem:[%s6757_s9 + $0x1d8] ss:$72 sps:$4 sm:$0xff]   ;;  %v6495_v59 = vld [vmem:[%s6757_s9 + $0x26c] ss:$72 sps:$4 sm:$0xff]  }
 0x176   : > { %3919 = vmatmul.mubr.bf16.gmra.mrb[168].mxu1 %v6483_v19  ;;  %4080 = vmatmul.mubr.bf16.gmra.mrb[168].mxu0 %v6484_v28  ;;  %v6497_v36 = vld [vmem:[%s6757_s9 + $0x274] ss:$72 sps:$4 sm:$0xff]  }
 0x177   : > { %v7454_v62 = vadd.f32 %v5362_v38, %v3317_v33  ;;  %v3320_v2 = vadd.f32 %v5253_v58, %v3159_v46  ;;  %3926 = vmatprep.mubr.bf16.mxu1 %v6489_v45  ;;  %4087 = vmatprep.mubr.bf16.mxu0 %v6491_v61  ;;  %v6566_v44 = vld [vmem:[%s7916_s1 + $0x3b0] sm:$0xff]   ;;  %v6581_v49 = vld [vmem:[%s7916_s1 + $0x3f8] sm:$0xff]  }
 0x178   : > { %5871 = vmatpush3.bf16.msra.mxu1 %v6534_v31  ;;  %5983 = vmatpush3.bf16.msra.mxu0 %v6536_v5  ;;  %v6568_v45 = vld [vmem:[%s7916_s1 + $0x430] sm:$0xff]   ;;  %v6583_v31 = vld [vmem:[%s7916_s1 + $0x478] sm:$0xff]  }
 0x179   : > { %v7462_v12 = vadd.f32 %v5365_v37, %v3320_v2  ;;  %v5254_v41 = vpop.f32.mrb[64].mxu1  ;;  %v5366_v32 = vpop.f32.mrb[64].mxu0  ;;  %5872 = vmatprep.subr.bf16.mxu1 %v6549_v11  ;;  %5984 = vmatprep.subr.bf16.mxu0 %v6551_v60  ;;  %v6582_v33 = vld [vmem:[%s7916_s1 + $0x3b8] sm:$0xff]  }
 0x17a   : > { %v5255_v17 = vpop.f32.mrb[65].mxu1  ;;  %v5367_v20 = vpop.f32.mrb[65].mxu0  ;;  %v6584_v58 = vld [vmem:[%s7916_s1 + $0x438] sm:$0xff]  }
 0x17b   : > { %v5256_v26 = vadd.f32 %v5255_v17, %v5254_v41  ;;  %v5368_v19 = vadd.f32 %v5367_v20, %v5366_v32  ;;  %v5257_v28 = vpop.f32.mrb[66].mxu1  ;;  %v5369_v54 = vpop.f32.mrb[66].mxu0  ;;  %v6505_v17 = vld [vmem:[%s6757_s9 + $0x2fc] ss:$72 sps:$4 sm:$0xff]  }
 0x17c   : > { %v5258_v38 = vpop.f32.mrb[67].mxu1  ;;  %v5370_v40 = vpop.f32.mrb[67].mxu0  ;;  %5873 = vmatpush3.bf16.msra.mxu1 %v6550_v6  ;;  %5985 = vmatpush3.bf16.msra.mxu0 %v6552_v39  ;;  %v6499_v6 = vld [vmem:[%s6757_s9 + $0x268] ss:$72 sps:$4 sm:$0xff]   ;;  %v6507_v20 = vld [vmem:[%s6757_s9 + $0x304] ss:$72 sps:$4 sm:$0xff]  }
 0x17d   : > { %v3325_v61 = vadd.f32 %v5256_v26, %v7192_v47  ;;  %v5259_v46 = vadd.f32 %v5258_v38, %v5257_v28  ;;  %v5371_v1 = vadd.f32 %v5370_v40, %v5369_v54  ;;  %5874 = vmatprep.subr.bf16.mxu1 %v6565_v48  ;;  %5986 = vmatprep.subr.bf16.mxu0 %v6567_v13  ;;  %v6500_v39 = vld [vmem:[%s6757_s9 + $0x270] ss:$72 sps:$4 sm:$0xff]  }
 0x17e   : > { %3927 = vmatmul.mubr.bf16.gmra.mrb[172].mxu1 %v6493_v18  ;;  %4088 = vmatmul.mubr.bf16.gmra.mrb[172].mxu0 %v6494_v23 }
 0x17f   : > { %v7487_v5 = vadd.f32 %v5368_v19, %v3325_v61  ;;  %v3328_v47 = vadd.f32 %v5259_v46, %v7201_v50  ;;  %3934 = vmatprep.mubr.bf16.mxu1 %v6495_v59  ;;  %4095 = vmatprep.mubr.bf16.mxu0 %v6497_v36  ;;  %v6509_v61 = vld [vmem:[%s6757_s9 + $0x2f8] ss:$72 sps:$4 sm:$0xff]  }
 0x180   : > { %5875 = vmatpush3.bf16.msra.mxu1 %v6566_v44  ;;  %5987 = vmatpush3.bf16.msra.mxu0 %v6568_v45 }
 0x181   : > { %v7496_v37 = vadd.f32 %v5371_v1, %v3328_v47  ;;  %v5260_v11 = vpop.f32.mrb[68].mxu1  ;;  %v5372_v60 = vpop.f32.mrb[68].mxu0  ;;  %5876 = vmatprep.subr.bf16.mxu1 %v6581_v49  ;;  %5988 = vmatprep.subr.bf16.mxu0 %v6583_v31  ;;  %v6511_v47 = vld [vmem:[%s6757_s9 + $0x38c] ss:$72 sps:$4 sm:$0xff]  }
 0x182   : > { %v5261_v50 = vpop.f32.mrb[69].mxu1  ;;  %v5373_v2 = vpop.f32.mrb[69].mxu0 }
 0x183   : > { %v5262_v41 = vadd.f32 %v5261_v50, %v5260_v11  ;;  %v5374_v32 = vadd.f32 %v5373_v2, %v5372_v60  ;;  %v5263_v48 = vpop.f32.mrb[70].mxu1  ;;  %v5375_v13 = vpop.f32.mrb[70].mxu0 }
 0x184   : > { %v5264_v18 = vpop.f32.mrb[71].mxu1  ;;  %v5376_v23 = vpop.f32.mrb[71].mxu0  ;;  %5877 = vmatpush3.bf16.msra.mxu1 %v6582_v33  ;;  %5989 = vmatpush3.bf16.msra.mxu0 %v6584_v58  ;;  %v6513_v33 = vld [vmem:[%s6757_s9 + $0x394] ss:$72 sps:$4 sm:$0xff]  }
 0x185   : > { %v3333_v26 = vadd.f32 %v5262_v41, %v7212_v3  ;;  %v5265_v19 = vadd.f32 %v5264_v18, %v5263_v48  ;;  %v5377_v28 = vadd.f32 %v5376_v23, %v5375_v13  ;;  %v6510_v3 = vld [vmem:[%s6757_s9 + $0x300] ss:$72 sps:$4 sm:$0xff]  }
 0x186   : > { %3935 = vmatmul.mubr.bf16.gmra.mrb[176].mxu1 %v6499_v6  ;;  %4096 = vmatmul.mubr.bf16.gmra.mrb[176].mxu0 %v6500_v39 }
 0x187   : > { %v7503_v54 = vadd.f32 %v5374_v32, %v3333_v26  ;;  %v3336_v59 = vadd.f32 %v5265_v19, %v7215_v4  ;;  %3942 = vmatprep.mubr.bf16.mxu1 %v6505_v17  ;;  %4103 = vmatprep.mubr.bf16.mxu0 %v6507_v20  ;;  %v6515_v17 = vld [vmem:[%s6757_s9 + $0x388] ss:$72 sps:$4 sm:$0xff]   ;;  %v6521_v19 = vld [vmem:[%s6757_s9 + $0x41c] ss:$72 sps:$4 sm:$0xff]  }
 0x189   : > { %v7506_v36 = vadd.f32 %v5377_v28, %v3336_v59  ;;  %v5266_v38 = vpop.f32.mrb[72].mxu1  ;;  %v5378_v40 = vpop.f32.mrb[72].mxu0  ;;  %v6523_v28 = vld [vmem:[%s6757_s9 + $0x424] ss:$72 sps:$4 sm:$0xff]  }
 0x18a   : > { %v5267_v44 = vpop.f32.mrb[73].mxu1  ;;  %v5379_v45 = vpop.f32.mrb[73].mxu0 }
 0x18b   : > { %v5268_v46 = vadd.f32 %v5267_v44, %v5266_v38  ;;  %v5380_v1 = vadd.f32 %v5379_v45, %v5378_v40  ;;  %v5269_v49 = vpop.f32.mrb[74].mxu1  ;;  %v5381_v31 = vpop.f32.mrb[74].mxu0 }
 0x18c   : > { %v5270_v58 = vpop.f32.mrb[75].mxu1  ;;  %v5382_v11 = vpop.f32.mrb[75].mxu0 }
 0x18d   : > { %v3341_v4 = vadd.f32 %v5268_v46, %v7226_v21  ;;  %v5271_v60 = vadd.f32 %v5270_v58, %v5269_v49  ;;  %v5383_v50 = vadd.f32 %v5382_v11, %v5381_v31  ;;  %v6516_v21 = vld [vmem:[%s6757_s9 + $0x390] ss:$72 sps:$4 sm:$0xff]  }
 0x18e   : > { %3943 = vmatmul.mubr.bf16.gmra.mrb[180].mxu1 %v6509_v61  ;;  %4104 = vmatmul.mubr.bf16.gmra.mrb[180].mxu0 %v6510_v3 }
 0x18f   : > { %v7513_v2 = vadd.f32 %v5380_v1, %v3341_v4  ;;  %v3344_v6 = vadd.f32 %v5271_v60, %v7229_v22  ;;  %3950 = vmatprep.mubr.bf16.mxu1 %v6511_v47  ;;  %4111 = vmatprep.mubr.bf16.mxu0 %v6513_v33  ;;  %v6525_v47 = vld [vmem:[%s6757_s9 + $0x418] ss:$72 sps:$4 sm:$0xff]   ;;  %v6527_v60 = vld [vmem:[%s6757_s9 + $0x4ac] ss:$72 sps:$4 sm:$0xff]  }
 0x191   : > { %v7516_v39 = vadd.f32 %v5383_v50, %v3344_v6  ;;  %v5272_v41 = vpop.f32.mrb[76].mxu1  ;;  %v5384_v32 = vpop.f32.mrb[76].mxu0  ;;  %v6529_v50 = vld [vmem:[%s6757_s9 + $0x4b4] ss:$72 sps:$4 sm:$0xff]  }
 0x192   : > { %v5273_v48 = vpop.f32.mrb[77].mxu1  ;;  %v5385_v13 = vpop.f32.mrb[77].mxu0 }
 0x193   : > { %v5274_v20 = vadd.f32 %v5273_v48, %v5272_v41  ;;  %v5386_v18 = vadd.f32 %v5385_v13, %v5384_v32  ;;  %v5275_v23 = vpop.f32.mrb[78].mxu1  ;;  %v5387_v26 = vpop.f32.mrb[78].mxu0 }
 0x194   : > { %v5276_v59 = vpop.f32.mrb[79].mxu1  ;;  %v5388_v38 = vpop.f32.mrb[79].mxu0 }
 0x195   : > { %v3349_v22 = vadd.f32 %v5274_v20, %v7240_v42  ;;  %v5277_v40 = vadd.f32 %v5276_v59, %v5275_v23  ;;  %v5389_v44 = vadd.f32 %v5388_v38, %v5387_v26  ;;  %v6526_v42 = vld [vmem:[%s6757_s9 + $0x420] ss:$72 sps:$4 sm:$0xff]  }
 0x196   : > { %3951 = vmatmul.mubr.bf16.gmra.mrb[184].mxu1 %v6515_v17  ;;  %4112 = vmatmul.mubr.bf16.gmra.mrb[184].mxu0 %v6516_v21 }
 0x197   : > { %v7523_v45 = vadd.f32 %v5386_v18, %v3349_v22  ;;  %v3352_v61 = vadd.f32 %v5277_v40, %v7243_v43  ;;  %3958 = vmatprep.mubr.bf16.mxu1 %v6521_v19  ;;  %4119 = vmatprep.mubr.bf16.mxu0 %v6523_v28  ;;  %v6531_v19 = vld [vmem:[%s6757_s9 + $0x4a8] ss:$72 sps:$4 sm:$0xff]   ;;  %v6537_v40 = vld [vmem:[%s6757_s9 + $0x53c] ss:$72 sps:$4 sm:$0xff]  }
 0x199   : > { %v7526_v3 = vadd.f32 %v5389_v44, %v3352_v61  ;;  %v5278_v46 = vpop.f32.mrb[80].mxu1  ;;  %v5390_v1 = vpop.f32.mrb[80].mxu0  ;;  %v6539_v44 = vld [vmem:[%s6757_s9 + $0x544] ss:$72 sps:$4 sm:$0xff]  }
 0x19a   : > { %v5279_v49 = vpop.f32.mrb[81].mxu1  ;;  %v5391_v31 = vpop.f32.mrb[81].mxu0 }
 0x19b   : > { %v5280_v33 = vadd.f32 %v5279_v49, %v5278_v46  ;;  %v5392_v58 = vadd.f32 %v5391_v31, %v5390_v1  ;;  %v5281_v11 = vpop.f32.mrb[82].mxu1  ;;  %v5393_v4 = vpop.f32.mrb[82].mxu0 }
 0x19c   : > { %v5282_v6 = vpop.f32.mrb[83].mxu1  ;;  %v5394_v41 = vpop.f32.mrb[83].mxu0 }
 0x19d   : > { %v3357_v43 = vadd.f32 %v5280_v33, %v7254_v63  ;;  %v5283_v32 = vadd.f32 %v5282_v6, %v5281_v11  ;;  %v5395_v48 = vadd.f32 %v5394_v41, %v5393_v4  ;;  %v6532_v63 = vld [vmem:[%s6757_s9 + $0x4b0] ss:$72 sps:$4 sm:$0xff]  }
 0x19e   : > { %3959 = vmatmul.mubr.bf16.gmra.mrb[188].mxu1 %v6525_v47  ;;  %4120 = vmatmul.mubr.bf16.gmra.mrb[188].mxu0 %v6526_v42 }
 0x19f   : > { %v7533_v13 = vadd.f32 %v5392_v58, %v3357_v43  ;;  %v3360_v17 = vadd.f32 %v5283_v32, %v7257_v0  ;;  %3966 = vmatprep.mubr.bf16.mxu1 %v6527_v60  ;;  %4127 = vmatprep.mubr.bf16.mxu0 %v6529_v50  ;;  %v6541_v60 = vld [vmem:[%s6757_s9 + $0x538] ss:$72 sps:$4 sm:$0xff]   ;;  %v6543_v32 = vld [vmem:[%s6757_s9 + $0x5cc] ss:$72 sps:$4 sm:$0xff]  }
 0x1a1   : > { %v7536_v21 = vadd.f32 %v5395_v48, %v3360_v17  ;;  %v5284_v20 = vpop.f32.mrb[84].mxu1  ;;  %v5396_v18 = vpop.f32.mrb[84].mxu0  ;;  %v6545_v48 = vld [vmem:[%s6757_s9 + $0x5d4] ss:$72 sps:$4 sm:$0xff]  }
 0x1a2   : > { %v5285_v23 = vpop.f32.mrb[85].mxu1  ;;  %v5397_v26 = vpop.f32.mrb[85].mxu0 }
 0x1a3   : > { %v5286_v28 = vadd.f32 %v5285_v23, %v5284_v20  ;;  %v5398_v59 = vadd.f32 %v5397_v26, %v5396_v18  ;;  %v5287_v38 = vpop.f32.mrb[86].mxu1  ;;  %v5399_v22 = vpop.f32.mrb[86].mxu0 }
 0x1a4   : > { %v5288_v61 = vpop.f32.mrb[87].mxu1  ;;  %v5400_v46 = vpop.f32.mrb[87].mxu0 }
 0x1a5   : > { %v3365_v0 = vadd.f32 %v5286_v28, %v7268_v24  ;;  %v5289_v1 = vadd.f32 %v5288_v61, %v5287_v38  ;;  %v5401_v49 = vadd.f32 %v5400_v46, %v5399_v22  ;;  %v6542_v24 = vld [vmem:[%s6757_s9 + $0x540] ss:$72 sps:$4 sm:$0xff]  }
 0x1a6   : > { %3967 = vmatmul.mubr.bf16.gmra.mrb[192].mxu1 %v6531_v19  ;;  %4128 = vmatmul.mubr.bf16.gmra.mrb[192].mxu0 %v6532_v63 }
 0x1a7   : > { %v7543_v31 = vadd.f32 %v5398_v59, %v3365_v0  ;;  %v3368_v47 = vadd.f32 %v5289_v1, %v7271_v25  ;;  %3974 = vmatprep.mubr.bf16.mxu1 %v6537_v40  ;;  %4135 = vmatprep.mubr.bf16.mxu0 %v6539_v44  ;;  %v6547_v40 = vld [vmem:[%s6757_s9 + $0x5c8] ss:$72 sps:$4 sm:$0xff]   ;;  %v6553_v1 = vld [vmem:[%s6757_s9 + $0x65c] ss:$72 sps:$4 sm:$0xff]  }
 0x1a9   : > { %v7546_v42 = vadd.f32 %v5401_v49, %v3368_v47  ;;  %v5290_v33 = vpop.f32.mrb[88].mxu1  ;;  %v5402_v58 = vpop.f32.mrb[88].mxu0  ;;  %v6555_v49 = vld [vmem:[%s6757_s9 + $0x664] ss:$72 sps:$4 sm:$0xff]  }
 0x1aa   : > { %v5291_v11 = vpop.f32.mrb[89].mxu1  ;;  %v5403_v4 = vpop.f32.mrb[89].mxu0 }
 0x1ab   : > { %v5292_v50 = vadd.f32 %v5291_v11, %v5290_v33  ;;  %v5404_v6 = vadd.f32 %v5403_v4, %v5402_v58  ;;  %v5293_v41 = vpop.f32.mrb[90].mxu1  ;;  %v5405_v43 = vpop.f32.mrb[90].mxu0 }
 0x1ac   : > { %v5294_v17 = vpop.f32.mrb[91].mxu1  ;;  %v5406_v20 = vpop.f32.mrb[91].mxu0 }
 0x1ad   : > { %v3373_v25 = vadd.f32 %v5292_v50, %v7282_v51  ;;  %v5295_v18 = vadd.f32 %v5294_v17, %v5293_v41  ;;  %v5407_v23 = vadd.f32 %v5406_v20, %v5405_v43  ;;  %v6548_v51 = vld [vmem:[%s6757_s9 + $0x5d0] ss:$72 sps:$4 sm:$0xff]  }
 0x1ae   : > { %3975 = vmatmul.mubr.bf16.gmra.mrb[196].mxu1 %v6541_v60  ;;  %4136 = vmatmul.mubr.bf16.gmra.mrb[196].mxu0 %v6542_v24 }
 0x1af   : > { %v7553_v26 = vadd.f32 %v5404_v6, %v3373_v25  ;;  %v3376_v19 = vadd.f32 %v5295_v18, %v7285_v52  ;;  %3982 = vmatprep.mubr.bf16.mxu1 %v6543_v32  ;;  %4143 = vmatprep.mubr.bf16.mxu0 %v6545_v48  ;;  %v6557_v32 = vld [vmem:[%s6757_s9 + $0x658] ss:$72 sps:$4 sm:$0xff]   ;;  %v6559_v18 = vld [vmem:[%s6757_s9 + $0x6ec] ss:$72 sps:$4 sm:$0xff]  }
 0x1b1   : > { %v7556_v63 = vadd.f32 %v5407_v23, %v3376_v19  ;;  %v5296_v28 = vpop.f32.mrb[92].mxu1  ;;  %v5408_v59 = vpop.f32.mrb[92].mxu0  ;;  %v6561_v23 = vld [vmem:[%s6757_s9 + $0x6f4] ss:$72 sps:$4 sm:$0xff]  }
 0x1b2   : > { %v5297_v38 = vpop.f32.mrb[93].mxu1  ;;  %v5409_v22 = vpop.f32.mrb[93].mxu0 }
 0x1b3   : > { %v5298_v44 = vadd.f32 %v5297_v38, %v5296_v28  ;;  %v5410_v61 = vadd.f32 %v5409_v22, %v5408_v59  ;;  %v5299_v46 = vpop.f32.mrb[94].mxu1  ;;  %v5411_v0 = vpop.f32.mrb[94].mxu0 }
 0x1b4   : > { %v5300_v47 = vpop.f32.mrb[95].mxu1  ;;  %v5412_v33 = vpop.f32.mrb[95].mxu0 }
 0x1b5   : > { %v3381_v52 = vadd.f32 %v5298_v44, %v7296_v15  ;;  %v5301_v58 = vadd.f32 %v5300_v47, %v5299_v46  ;;  %v5413_v11 = vadd.f32 %v5412_v33, %v5411_v0  ;;  %v6558_v15 = vld [vmem:[%s6757_s9 + $0x660] ss:$72 sps:$4 sm:$0xff]  }
 0x1b6   : > { %3983 = vmatmul.mubr.bf16.gmra.mrb[200].mxu1 %v6547_v40  ;;  %4144 = vmatmul.mubr.bf16.gmra.mrb[200].mxu0 %v6548_v51 }
 0x1b7   : > { %v7563_v4 = vadd.f32 %v5410_v61, %v3381_v52  ;;  %v3384_v60 = vadd.f32 %v5301_v58, %v7299_v16  ;;  %3990 = vmatprep.mubr.bf16.mxu1 %v6553_v1  ;;  %4151 = vmatprep.mubr.bf16.mxu0 %v6555_v49  ;;  %v6563_v1 = vld [vmem:[%s6757_s9 + $0x6e8] ss:$72 sps:$4 sm:$0xff]   ;;  %v6569_v58 = vld [vmem:[%s6757_s9 + $0x77c] ss:$72 sps:$4 sm:$0xff]  }
 0x1b9   : > { %v7566_v24 = vadd.f32 %v5413_v11, %v3384_v60  ;;  %v5430_v50 = vpop.f32.mrb[96].mxu1  ;;  %v5542_v6 = vpop.f32.mrb[96].mxu0  ;;  %v6571_v11 = vld [vmem:[%s6757_s9 + $0x784] ss:$72 sps:$4 sm:$0xff]  }
 0x1ba   : > { %v5431_v41 = vpop.f32.mrb[97].mxu1  ;;  %v5543_v43 = vpop.f32.mrb[97].mxu0 }
 0x1bb   : > { %v5432_v48 = vadd.f32 %v5431_v41, %v5430_v50  ;;  %v5544_v17 = vadd.f32 %v5543_v43, %v5542_v6  ;;  %v5433_v20 = vpop.f32.mrb[98].mxu1  ;;  %v5545_v25 = vpop.f32.mrb[98].mxu0 }
 0x1bc   : > { %v5434_v19 = vpop.f32.mrb[99].mxu1  ;;  %v5546_v28 = vpop.f32.mrb[99].mxu0 }
 0x1bd   : > { %v3583_v16 = vadd.f32 %v5432_v48, %v7309_v56  ;;  %v5435_v59 = vadd.f32 %v5434_v19, %v5433_v20  ;;  %v5547_v38 = vadd.f32 %v5546_v28, %v5545_v25  ;;  %v6564_v56 = vld [vmem:[%s6757_s9 + $0x6f0] ss:$72 sps:$4 sm:$0xff]  }
 0x1be   : > { %3991 = vmatmul.mubr.bf16.gmra.mrb[204].mxu1 %v6557_v32  ;;  %4152 = vmatmul.mubr.bf16.gmra.mrb[204].mxu0 %v6558_v15 }
 0x1bf   : > { %v7573_v22 = vadd.f32 %v5544_v17, %v3583_v16  ;;  %v3586_v40 = vadd.f32 %v5435_v59, %v7311_v57  ;;  %3998 = vmatprep.mubr.bf16.mxu1 %v6559_v18  ;;  %4159 = vmatprep.mubr.bf16.mxu0 %v6561_v23  ;;  %v6573_v18 = vld [vmem:[%s6757_s9 + $0x778] ss:$72 sps:$4 sm:$0xff]   ;;  %v6575_v59 = vld [vmem:[%s6757_s9 + $0x80c] ss:$72 sps:$4 sm:$0xff]  }
 0x1c1   : > { %v7576_v51 = vadd.f32 %v5547_v38, %v3586_v40  ;;  %v5436_v44 = vpop.f32.mrb[100].mxu1  ;;  %v5548_v61 = vpop.f32.mrb[100].mxu0  ;;  %v6577_v38 = vld [vmem:[%s6757_s9 + $0x814] ss:$72 sps:$4 sm:$0xff]  }
 0x1c2   : > { %v5437_v46 = vpop.f32.mrb[101].mxu1  ;;  %v5549_v0 = vpop.f32.mrb[101].mxu0 }
 0x1c3   : > { %v5438_v49 = vadd.f32 %v5437_v46, %v5436_v44  ;;  %v5550_v47 = vadd.f32 %v5549_v0, %v5548_v61  ;;  %v5439_v33 = vpop.f32.mrb[102].mxu1  ;;  %v5551_v52 = vpop.f32.mrb[102].mxu0 }
 0x1c4   : > { %v5440_v60 = vpop.f32.mrb[103].mxu1  ;;  %v5552_v50 = vpop.f32.mrb[103].mxu0 }
 0x1c5   : > { %v3591_v57 = vadd.f32 %v5438_v49, %v7321_v34  ;;  %v5441_v6 = vadd.f32 %v5440_v60, %v5439_v33  ;;  %v5553_v41 = vadd.f32 %v5552_v50, %v5551_v52  ;;  %v6574_v34 = vld [vmem:[%s6757_s9 + $0x780] ss:$72 sps:$4 sm:$0xff]  }
 0x1c6   : > { %3999 = vmatmul.mubr.bf16.gmra.mrb[208].mxu1 %v6563_v1  ;;  %4160 = vmatmul.mubr.bf16.gmra.mrb[208].mxu0 %v6564_v56 }
 0x1c7   : > { %v7583_v43 = vadd.f32 %v5550_v47, %v3591_v57  ;;  %v3594_v32 = vadd.f32 %v5441_v6, %v7323_v35  ;;  %4006 = vmatprep.mubr.bf16.mxu1 %v6569_v58  ;;  %4167 = vmatprep.mubr.bf16.mxu0 %v6571_v11  ;;  %v6579_v58 = vld [vmem:[%s6757_s9 + $0x808] ss:$72 sps:$4 sm:$0xff]   ;;  %v6585_v6 = vld [vmem:[%s6757_s9 + $0x89c] ss:$72 sps:$4 sm:$0xff]  }
 0x1c9   : > { %v7586_v15 = vadd.f32 %v5553_v41, %v3594_v32  ;;  %v5442_v48 = vpop.f32.mrb[104].mxu1  ;;  %v5554_v17 = vpop.f32.mrb[104].mxu0  ;;  %v6587_v41 = vld [vmem:[%s6757_s9 + $0x8a4] ss:$72 sps:$4 sm:$0xff]  }
 0x1ca   : > { %v5443_v20 = vpop.f32.mrb[105].mxu1  ;;  %v5555_v25 = vpop.f32.mrb[105].mxu0 }
 0x1cb   : > { %v5444_v23 = vadd.f32 %v5443_v20, %v5442_v48  ;;  %v5556_v19 = vadd.f32 %v5555_v25, %v5554_v17  ;;  %v5445_v28 = vpop.f32.mrb[106].mxu1  ;;  %v5557_v16 = vpop.f32.mrb[106].mxu0 }
 0x1cc   : > { %v5446_v40 = vpop.f32.mrb[107].mxu1  ;;  %v5558_v44 = vpop.f32.mrb[107].mxu0 }
 0x1cd   : > { %v3599_v35 = vadd.f32 %v5444_v23, %v7333_v9  ;;  %v5447_v61 = vadd.f32 %v5446_v40, %v5445_v28  ;;  %v5559_v46 = vadd.f32 %v5558_v44, %v5557_v16  ;;  %v6580_v9 = vld [vmem:[%s6757_s9 + $0x810] ss:$72 sps:$4 sm:$0xff]  }
 0x1ce   : > { %4007 = vmatmul.mubr.bf16.gmra.mrb[212].mxu1 %v6573_v18  ;;  %4168 = vmatmul.mubr.bf16.gmra.mrb[212].mxu0 %v6574_v34 }
 0x1cf   : > { %v7593_v0 = vadd.f32 %v5556_v19, %v3599_v35  ;;  %v3602_v1 = vadd.f32 %v5447_v61, %v7335_v10  ;;  %4014 = vmatprep.mubr.bf16.mxu1 %v6575_v59  ;;  %4175 = vmatprep.mubr.bf16.mxu0 %v6577_v38  ;;  %v6589_v59 = vld [vmem:[%s6757_s9 + $0x898] ss:$72 sps:$4 sm:$0xff]   ;;  %v6593_v61 = vld [vmem:[%s6757_s9 + $0x3c] ss:$72 sps:$4 sm:$0xff]  }
 0x1d1   : > { %v7596_v56 = vadd.f32 %v5559_v46, %v3602_v1  ;;  %v5448_v49 = vpop.f32.mrb[108].mxu1  ;;  %v5560_v47 = vpop.f32.mrb[108].mxu0  ;;  %v6596_v46 = vld [vmem:[%s6757_s9 + $0x44] ss:$72 sps:$4 sm:$0xff]  }
 0x1d2   : > { %v5449_v33 = vpop.f32.mrb[109].mxu1  ;;  %v5561_v52 = vpop.f32.mrb[109].mxu0 }
 0x1d3   : > { %v5450_v11 = vadd.f32 %v5449_v33, %v5448_v49  ;;  %v5562_v60 = vadd.f32 %v5561_v52, %v5560_v47  ;;  %v5451_v50 = vpop.f32.mrb[110].mxu1  ;;  %v5563_v57 = vpop.f32.mrb[110].mxu0 }
 0x1d4   : > { %v5452_v32 = vpop.f32.mrb[111].mxu1  ;;  %v5564_v48 = vpop.f32.mrb[111].mxu0 }
 0x1d5   : > { %v3607_v10 = vadd.f32 %v5450_v11, %v7345_v53  ;;  %v5453_v17 = vadd.f32 %v5452_v32, %v5451_v50  ;;  %v5565_v20 = vadd.f32 %v5564_v48, %v5563_v57  ;;  %v6590_v53 = vld [vmem:[%s6757_s9 + $0x8a0] ss:$72 sps:$4 sm:$0xff]  }
 0x1d6   : > { %4015 = vmatmul.mubr.bf16.gmra.mrb[216].mxu1 %v6579_v58  ;;  %4176 = vmatmul.mubr.bf16.gmra.mrb[216].mxu0 %v6580_v9 }
 0x1d7   : > { %v7603_v25 = vadd.f32 %v5562_v60, %v3607_v10  ;;  %v3610_v18 = vadd.f32 %v5453_v17, %v7347_v55  ;;  %4022 = vmatprep.mubr.bf16.mxu1 %v6585_v6  ;;  %4183 = vmatprep.mubr.bf16.mxu0 %v6587_v41  ;;  %v6591_v6 = vld [vmem:[%s6757_s9 + $0x38] ss:$72 sps:$4 sm:$0xff]   ;;  %v6597_v17 = vld [vmem:[%s6757_s9 + $0xcc] ss:$72 sps:$4 sm:$0xff]  }
 0x1d9   : > { %v7606_v34 = vadd.f32 %v5565_v20, %v3610_v18  ;;  %v5454_v23 = vpop.f32.mrb[112].mxu1  ;;  %v5566_v19 = vpop.f32.mrb[112].mxu0  ;;  %v6599_v20 = vld [vmem:[%s6757_s9 + $0xd4] ss:$72 sps:$4 sm:$0xff]  }
 0x1da   : > { %v5455_v28 = vpop.f32.mrb[113].mxu1  ;;  %v5567_v16 = vpop.f32.mrb[113].mxu0 }
 0x1db   : > { %v5456_v38 = vadd.f32 %v5455_v28, %v5454_v23  ;;  %v5568_v40 = vadd.f32 %v5567_v16, %v5566_v19  ;;  %v5457_v44 = vpop.f32.mrb[114].mxu1  ;;  %v5569_v35 = vpop.f32.mrb[114].mxu0 }
 0x1dc   : > { %v5458_v1 = vpop.f32.mrb[115].mxu1  ;;  %v5570_v49 = vpop.f32.mrb[115].mxu0 }
 0x1dd   : > { %v3615_v55 = vadd.f32 %v5456_v38, %v7357_v29  ;;  %v5459_v47 = vadd.f32 %v5458_v1, %v5457_v44  ;;  %v5571_v33 = vadd.f32 %v5570_v49, %v5569_v35  ;;  %v6594_v29 = vld [vmem:[%s6757_s9 + $0x40] ss:$72 sps:$4 sm:$0xff]  }
 0x1de   : > { %4023 = vmatmul.mubr.bf16.gmra.mrb[220].mxu1 %v6589_v59  ;;  %4184 = vmatmul.mubr.bf16.gmra.mrb[220].mxu0 %v6590_v53 }
 0x1df   : > { %v7613_v52 = vadd.f32 %v5568_v40, %v3615_v55  ;;  %v3618_v58 = vadd.f32 %v5459_v47, %v7359_v30  ;;  %4224 = vmatprep.mubr.bf16.mxu1 %v6593_v61  ;;  %4385 = vmatprep.mubr.bf16.mxu0 %v6596_v46  ;;  %v6601_v61 = vld [vmem:[%s6757_s9 + $0xc8] ss:$72 sps:$4 sm:$0xff]   ;;  %v6603_v47 = vld [vmem:[%s6757_s9 + $0x15c] ss:$72 sps:$4 sm:$0xff]  }
 0x1e1   : > { %v7616_v9 = vadd.f32 %v5571_v33, %v3618_v58  ;;  %v5460_v11 = vpop.f32.mrb[116].mxu1  ;;  %v5572_v60 = vpop.f32.mrb[116].mxu0  ;;  %v6605_v33 = vld [vmem:[%s6757_s9 + $0x164] ss:$72 sps:$4 sm:$0xff]  }
 0x1e2   : > { %v5461_v50 = vpop.f32.mrb[117].mxu1  ;;  %v5573_v57 = vpop.f32.mrb[117].mxu0 }
 0x1e3   : > { %v5462_v41 = vadd.f32 %v5461_v50, %v5460_v11  ;;  %v5574_v32 = vadd.f32 %v5573_v57, %v5572_v60  ;;  %v5463_v48 = vpop.f32.mrb[118].mxu1  ;;  %v5575_v10 = vpop.f32.mrb[118].mxu0 }
 0x1e4   : > { %v5464_v18 = vpop.f32.mrb[119].mxu1  ;;  %v5576_v23 = vpop.f32.mrb[119].mxu0 }
 0x1e5   : > { %v3623_v30 = vadd.f32 %v5462_v41, %v7381_v14  ;;  %v5465_v19 = vadd.f32 %v5464_v18, %v5463_v48  ;;  %v5577_v28 = vadd.f32 %v5576_v23, %v5575_v10  ;;  %v6602_v14 = vld [vmem:[%s6757_s9 + $0xd0] ss:$72 sps:$4 sm:$0xff]  }
 0x1e6   : > { %4225 = vmatmul.mubr.bf16.vlgmr.msra.gmra.mrb[224].mxu1 %v6591_v6  ;;  %4386 = vmatmul.mubr.bf16.vlgmr.msra.gmra.mrb[224].mxu0 %v6594_v29 }
 0x1e7   : > { %v7623_v16 = vadd.f32 %v5574_v32, %v3623_v30  ;;  %v3626_v59 = vadd.f32 %v5465_v19, %v7395_v27  ;;  %4232 = vmatprep.mubr.bf16.mxu1 %v6597_v17  ;;  %4393 = vmatprep.mubr.bf16.mxu0 %v6599_v20  ;;  %v6607_v17 = vld [vmem:[%s6757_s9 + $0x158] ss:$72 sps:$4 sm:$0xff]   ;;  %v6609_v19 = vld [vmem:[%s6757_s9 + $0x1ec] ss:$72 sps:$4 sm:$0xff]  }
 0x1e9   : > { %v7626_v53 = vadd.f32 %v5577_v28, %v3626_v59  ;;  %v5466_v38 = vpop.f32.mrb[120].mxu1  ;;  %v5578_v40 = vpop.f32.mrb[120].mxu0  ;;  %v6611_v28 = vld [vmem:[%s6757_s9 + $0x1f4] ss:$72 sps:$4 sm:$0xff]  }
 0x1ea   : > { %v5467_v44 = vpop.f32.mrb[121].mxu1  ;;  %v5579_v35 = vpop.f32.mrb[121].mxu0 }
 0x1eb   : > { %v5468_v46 = vadd.f32 %v5467_v44, %v5466_v38  ;;  %v5580_v1 = vadd.f32 %v5579_v35, %v5578_v40  ;;  %v5469_v49 = vpop.f32.mrb[122].mxu1  ;;  %v5581_v55 = vpop.f32.mrb[122].mxu0 }
 0x1ec   : > { %v5470_v58 = vpop.f32.mrb[123].mxu1  ;;  %v5582_v11 = vpop.f32.mrb[123].mxu0 }
 0x1ed   : > { %v3631_v27 = vadd.f32 %v5468_v46, %v7417_v7  ;;  %v5471_v60 = vadd.f32 %v5470_v58, %v5469_v49  ;;  %v5583_v50 = vadd.f32 %v5582_v11, %v5581_v55  ;;  %v6608_v7 = vld [vmem:[%s6757_s9 + $0x160] ss:$72 sps:$4 sm:$0xff]  }
 0x1ee   : > { %4233 = vmatmul.mubr.bf16.gmra.mrb[228].mxu1 %v6601_v61  ;;  %4394 = vmatmul.mubr.bf16.gmra.mrb[228].mxu0 %v6602_v14 }
 0x1ef   : > { %v7633_v57 = vadd.f32 %v5580_v1, %v3631_v27  ;;  %v3634_v6 = vadd.f32 %v5471_v60, %v7425_v8  ;;  %4240 = vmatprep.mubr.bf16.mxu1 %v6603_v47  ;;  %4401 = vmatprep.mubr.bf16.mxu0 %v6605_v33  ;;  %v6613_v47 = vld [vmem:[%s6757_s9 + $0x1e8] ss:$72 sps:$4 sm:$0xff]   ;;  %v6615_v60 = vld [vmem:[%s6757_s9 + $0x27c] ss:$72 sps:$4 sm:$0xff]  }
 0x1f1   : > { %v7636_v29 = vadd.f32 %v5583_v50, %v3634_v6  ;;  %v5472_v41 = vpop.f32.mrb[124].mxu1  ;;  %v5584_v32 = vpop.f32.mrb[124].mxu0  ;;  %v6617_v50 = vld [vmem:[%s6757_s9 + $0x284] ss:$72 sps:$4 sm:$0xff]  }
 0x1f2   : > { %v5473_v48 = vpop.f32.mrb[125].mxu1  ;;  %v5585_v10 = vpop.f32.mrb[125].mxu0 }
 0x1f3   : > { %v5474_v20 = vadd.f32 %v5473_v48, %v5472_v41  ;;  %v5586_v18 = vadd.f32 %v5585_v10, %v5584_v32  ;;  %v5475_v23 = vpop.f32.mrb[126].mxu1  ;;  %v5587_v30 = vpop.f32.mrb[126].mxu0 }
 0x1f4   : > { %v5476_v59 = vpop.f32.mrb[127].mxu1  ;;  %v5588_v38 = vpop.f32.mrb[127].mxu0 }
 0x1f5   : > { %v3639_v8 = vadd.f32 %v5474_v20, %v7454_v62  ;;  %v5477_v40 = vadd.f32 %v5476_v59, %v5475_v23  ;;  %v5589_v44 = vadd.f32 %v5588_v38, %v5587_v30  ;;  %v6614_v62 = vld [vmem:[%s6757_s9 + $0x1f0] ss:$72 sps:$4 sm:$0xff]  }
 0x1f6   : > { %4241 = vmatmul.mubr.bf16.gmra.mrb[232].mxu1 %v6607_v17  ;;  %4402 = vmatmul.mubr.bf16.gmra.mrb[232].mxu0 %v6608_v7 }
 0x1f7   : > { %v7643_v35 = vadd.f32 %v5586_v18, %v3639_v8  ;;  %v3642_v61 = vadd.f32 %v5477_v40, %v7462_v12  ;;  %4248 = vmatprep.mubr.bf16.mxu1 %v6609_v19  ;;  %4409 = vmatprep.mubr.bf16.mxu0 %v6611_v28  ;;  %v6619_v19 = vld [vmem:[%s6757_s9 + $0x278] ss:$72 sps:$4 sm:$0xff]   ;;  %v6621_v40 = vld [vmem:[%s6757_s9 + $0x30c] ss:$72 sps:$4 sm:$0xff]  }
 0x1f9   : > { %v7646_v14 = vadd.f32 %v5589_v44, %v3642_v61  ;;  %v5478_v46 = vpop.f32.mrb[128].mxu1  ;;  %v5590_v1 = vpop.f32.mrb[128].mxu0  ;;  %v6623_v44 = vld [vmem:[%s6757_s9 + $0x314] ss:$72 sps:$4 sm:$0xff]  }
 0x1fa   : > { %v5479_v49 = vpop.f32.mrb[129].mxu1  ;;  %v5591_v55 = vpop.f32.mrb[129].mxu0 }
 0x1fb   : > { %v5480_v33 = vadd.f32 %v5479_v49, %v5478_v46  ;;  %v5592_v58 = vadd.f32 %v5591_v55, %v5590_v1  ;;  %v5481_v11 = vpop.f32.mrb[130].mxu1  ;;  %v5593_v27 = vpop.f32.mrb[130].mxu0 }
 0x1fc   : > { %v5482_v6 = vpop.f32.mrb[131].mxu1  ;;  %v5594_v41 = vpop.f32.mrb[131].mxu0 }
 0x1fd   : > { %v3647_v12 = vadd.f32 %v5480_v33, %v7487_v5  ;;  %v5483_v32 = vadd.f32 %v5482_v6, %v5481_v11  ;;  %v5595_v48 = vadd.f32 %v5594_v41, %v5593_v27  ;;  %v6620_v5 = vld [vmem:[%s6757_s9 + $0x280] ss:$72 sps:$4 sm:$0xff]  }
 0x1fe   : > { %4249 = vmatmul.mubr.bf16.gmra.mrb[236].mxu1 %v6613_v47  ;;  %4410 = vmatmul.mubr.bf16.gmra.mrb[236].mxu0 %v6614_v62 }
 0x1ff   : > { %v7653_v10 = vadd.f32 %v5592_v58, %v3647_v12  ;;  %v3650_v17 = vadd.f32 %v5483_v32, %v7496_v37  ;;  %4256 = vmatprep.mubr.bf16.mxu1 %v6615_v60  ;;  %4417 = vmatprep.mubr.bf16.mxu0 %v6617_v50  ;;  %v6625_v60 = vld [vmem:[%s6757_s9 + $0x308] ss:$72 sps:$4 sm:$0xff]   ;;  %v6627_v32 = vld [vmem:[%s6757_s9 + $0x39c] ss:$72 sps:$4 sm:$0xff]  }
 0x201   : > { %v7656_v7 = vadd.f32 %v5595_v48, %v3650_v17  ;;  %v5484_v20 = vpop.f32.mrb[132].mxu1  ;;  %v5596_v18 = vpop.f32.mrb[132].mxu0  ;;  %v6629_v48 = vld [vmem:[%s6757_s9 + $0x3a4] ss:$72 sps:$4 sm:$0xff]  }
 0x202   : > { %v5485_v23 = vpop.f32.mrb[133].mxu1  ;;  %v5597_v30 = vpop.f32.mrb[133].mxu0 }
 0x203   : > { %v5486_v28 = vadd.f32 %v5485_v23, %v5484_v20  ;;  %v5598_v59 = vadd.f32 %v5597_v30, %v5596_v18  ;;  %v5487_v38 = vpop.f32.mrb[134].mxu1  ;;  %v5599_v8 = vpop.f32.mrb[134].mxu0 }
 0x204   : > { %v5488_v61 = vpop.f32.mrb[135].mxu1  ;;  %v5600_v46 = vpop.f32.mrb[135].mxu0 }
 0x205   : > { %v3655_v37 = vadd.f32 %v5486_v28, %v7503_v54  ;;  %v5489_v1 = vadd.f32 %v5488_v61, %v5487_v38  ;;  %v5601_v49 = vadd.f32 %v5600_v46, %v5599_v8  ;;  %v6626_v54 = vld [vmem:[%s6757_s9 + $0x310] ss:$72 sps:$4 sm:$0xff]  }
 0x206   : > { %4257 = vmatmul.mubr.bf16.gmra.mrb[240].mxu1 %v6619_v19  ;;  %4418 = vmatmul.mubr.bf16.gmra.mrb[240].mxu0 %v6620_v5 }
 0x207   : > { %v7663_v55 = vadd.f32 %v5598_v59, %v3655_v37  ;;  %v3658_v47 = vadd.f32 %v5489_v1, %v7506_v36  ;;  %4264 = vmatprep.mubr.bf16.mxu1 %v6621_v40  ;;  %4425 = vmatprep.mubr.bf16.mxu0 %v6623_v44  ;;  %v6631_v40 = vld [vmem:[%s6757_s9 + $0x398] ss:$72 sps:$4 sm:$0xff]   ;;  %v6633_v1 = vld [vmem:[%s6757_s9 + $0x42c] ss:$72 sps:$4 sm:$0xff]  }
 0x209   : > { %v7666_v62 = vadd.f32 %v5601_v49, %v3658_v47  ;;  %v5490_v33 = vpop.f32.mrb[136].mxu1  ;;  %v5602_v58 = vpop.f32.mrb[136].mxu0  ;;  %v6635_v49 = vld [vmem:[%s6757_s9 + $0x434] ss:$72 sps:$4 sm:$0xff]  }
 0x20a   : > { %v5491_v11 = vpop.f32.mrb[137].mxu1  ;;  %v5603_v27 = vpop.f32.mrb[137].mxu0 }
 0x20b   : > { %v5492_v50 = vadd.f32 %v5491_v11, %v5490_v33  ;;  %v5604_v6 = vadd.f32 %v5603_v27, %v5602_v58  ;;  %v5493_v41 = vpop.f32.mrb[138].mxu1  ;;  %v5605_v12 = vpop.f32.mrb[138].mxu0 }
 0x20c   : > { %v5494_v17 = vpop.f32.mrb[139].mxu1  ;;  %v5606_v20 = vpop.f32.mrb[139].mxu0 }
 0x20d   : > { %v3663_v36 = vadd.f32 %v5492_v50, %v7513_v2  ;;  %v5495_v18 = vadd.f32 %v5494_v17, %v5493_v41  ;;  %v5607_v23 = vadd.f32 %v5606_v20, %v5605_v12  ;;  %v6632_v2 = vld [vmem:[%s6757_s9 + $0x3a0] ss:$72 sps:$4 sm:$0xff]  }
 0x20e   : > { %4265 = vmatmul.mubr.bf16.gmra.mrb[244].mxu1 %v6625_v60  ;;  %4426 = vmatmul.mubr.bf16.gmra.mrb[244].mxu0 %v6626_v54 }
 0x20f   : > { %v7673_v30 = vadd.f32 %v5604_v6, %v3663_v36  ;;  %v3666_v19 = vadd.f32 %v5495_v18, %v7516_v39  ;;  %4272 = vmatprep.mubr.bf16.mxu1 %v6627_v32  ;;  %4433 = vmatprep.mubr.bf16.mxu0 %v6629_v48  ;;  %v6637_v32 = vld [vmem:[%s6757_s9 + $0x428] ss:$72 sps:$4 sm:$0xff]   ;;  %v6641_v18 = vld [vmem:[%s6757_s9 + $0x4bc] ss:$72 sps:$4 sm:$0xff]  }
 0x211   : > { %v7676_v5 = vadd.f32 %v5607_v23, %v3666_v19  ;;  %v5496_v28 = vpop.f32.mrb[140].mxu1  ;;  %v5608_v59 = vpop.f32.mrb[140].mxu0  ;;  %v6644_v23 = vld [vmem:[%s6757_s9 + $0x4c4] ss:$72 sps:$4 sm:$0xff]  }
 0x212   : > { %v5497_v38 = vpop.f32.mrb[141].mxu1  ;;  %v5609_v8 = vpop.f32.mrb[141].mxu0 }
 0x213   : > { %v5498_v44 = vadd.f32 %v5497_v38, %v5496_v28  ;;  %v5610_v61 = vadd.f32 %v5609_v8, %v5608_v59  ;;  %v5499_v46 = vpop.f32.mrb[142].mxu1  ;;  %v5611_v37 = vpop.f32.mrb[142].mxu0 }
 0x214   : > { %v5500_v47 = vpop.f32.mrb[143].mxu1  ;;  %v5612_v33 = vpop.f32.mrb[143].mxu0 }
 0x215   : > { %v3671_v39 = vadd.f32 %v5498_v44, %v7523_v45  ;;  %v5501_v58 = vadd.f32 %v5500_v47, %v5499_v46  ;;  %v5613_v11 = vadd.f32 %v5612_v33, %v5611_v37  ;;  %v6638_v45 = vld [vmem:[%s6757_s9 + $0x430] ss:$72 sps:$4 sm:$0xff]  }
 0x216   : > { %4273 = vmatmul.mubr.bf16.gmra.mrb[248].mxu1 %v6631_v40  ;;  %4434 = vmatmul.mubr.bf16.gmra.mrb[248].mxu0 %v6632_v2 }
 0x217   : > { %v7683_v27 = vadd.f32 %v5610_v61, %v3671_v39  ;;  %v3674_v60 = vadd.f32 %v5501_v58, %v7526_v3  ;;  %4280 = vmatprep.mubr.bf16.mxu1 %v6633_v1  ;;  %4441 = vmatprep.mubr.bf16.mxu0 %v6635_v49  ;;  %v6639_v1 = vld [vmem:[%s6757_s9 + $0x4b8] ss:$72 sps:$4 sm:$0xff]   ;;  %v6647_v58 = vld [vmem:[%s6757_s9 + $0x54c] ss:$72 sps:$4 sm:$0xff]  }
 0x219   : > { %v7686_v54 = vadd.f32 %v5613_v11, %v3674_v60  ;;  %v5502_v50 = vpop.f32.mrb[144].mxu1  ;;  %v5614_v6 = vpop.f32.mrb[144].mxu0  ;;  %v6650_v11 = vld [vmem:[%s6757_s9 + $0x554] ss:$72 sps:$4 sm:$0xff]  }
 0x21a   : > { %v5503_v41 = vpop.f32.mrb[145].mxu1  ;;  %v5615_v12 = vpop.f32.mrb[145].mxu0 }
 0x21b   : > { %v5504_v48 = vadd.f32 %v5503_v41, %v5502_v50  ;;  %v5616_v17 = vadd.f32 %v5615_v12, %v5614_v6  ;;  %v5505_v20 = vpop.f32.mrb[146].mxu1  ;;  %v5617_v36 = vpop.f32.mrb[146].mxu0 }
 0x21c   : > { %v5506_v19 = vpop.f32.mrb[147].mxu1  ;;  %v5618_v28 = vpop.f32.mrb[147].mxu0 }
 0x21d   : > { %v3679_v3 = vadd.f32 %v5504_v48, %v7533_v13  ;;  %v5507_v59 = vadd.f32 %v5506_v19, %v5505_v20  ;;  %v5619_v38 = vadd.f32 %v5618_v28, %v5617_v36  ;;  %v6642_v13 = vld [vmem:[%s6757_s9 + $0x4c0] ss:$72 sps:$4 sm:$0xff]  }
 0x21e   : > { %4281 = vmatmul.mubr.bf16.gmra.mrb[252].mxu1 %v6637_v32  ;;  %4442 = vmatmul.mubr.bf16.gmra.mrb[252].mxu0 %v6638_v45 }
 0x21f   : > { %v7693_v8 = vadd.f32 %v5616_v17, %v3679_v3  ;;  %v3682_v40 = vadd.f32 %v5507_v59, %v7536_v21  ;;  %4288 = vmatprep.mubr.bf16.mxu1 %v6641_v18  ;;  %4449 = vmatprep.mubr.bf16.mxu0 %v6644_v23  ;;  %v6645_v18 = vld [vmem:[%s6757_s9 + $0x548] ss:$72 sps:$4 sm:$0xff]   ;;  %v6653_v59 = vld [vmem:[%s6757_s9 + $0x5dc] ss:$72 sps:$4 sm:$0xff]  }
 0x221   : > { %v7696_v2 = vadd.f32 %v5619_v38, %v3682_v40  ;;  %v5508_v44 = vpop.f32.mrb[148].mxu1  ;;  %v5620_v61 = vpop.f32.mrb[148].mxu0  ;;  %v6656_v38 = vld [vmem:[%s6757_s9 + $0x5e4] ss:$72 sps:$4 sm:$0xff]  }
 0x222   : > { %v5509_v46 = vpop.f32.mrb[149].mxu1  ;;  %v5621_v37 = vpop.f32.mrb[149].mxu0 }
 0x223   : > { %v5510_v49 = vadd.f32 %v5509_v46, %v5508_v44  ;;  %v5622_v47 = vadd.f32 %v5621_v37, %v5620_v61  ;;  %v5511_v33 = vpop.f32.mrb[150].mxu1  ;;  %v5623_v39 = vpop.f32.mrb[150].mxu0 }
 0x224   : > { %v5512_v60 = vpop.f32.mrb[151].mxu1  ;;  %v5624_v50 = vpop.f32.mrb[151].mxu0 }
 0x225   : > { %v3687_v21 = vadd.f32 %v5510_v49, %v7543_v31  ;;  %v5513_v6 = vadd.f32 %v5512_v60, %v5511_v33  ;;  %v5625_v41 = vadd.f32 %v5624_v50, %v5623_v39  ;;  %v6648_v31 = vld [vmem:[%s6757_s9 + $0x550] ss:$72 sps:$4 sm:$0xff]  }
 0x226   : > { %4289 = vmatmul.mubr.bf16.gmra.mrb[0].mxu1 %v6639_v1  ;;  %4450 = vmatmul.mubr.bf16.gmra.mrb[0].mxu0 %v6642_v13 }
 0x227   : > { %v7703_v12 = vadd.f32 %v5622_v47, %v3687_v21  ;;  %v3690_v32 = vadd.f32 %v5513_v6, %v7546_v42  ;;  %4296 = vmatprep.mubr.bf16.mxu1 %v6647_v58  ;;  %4457 = vmatprep.mubr.bf16.mxu0 %v6650_v11  ;;  %v6651_v58 = vld [vmem:[%s6757_s9 + $0x5d8] ss:$72 sps:$4 sm:$0xff]   ;;  %v6659_v6 = vld [vmem:[%s6757_s9 + $0x66c] ss:$72 sps:$4 sm:$0xff]  }
 0x229   : > { %v7706_v45 = vadd.f32 %v5625_v41, %v3690_v32  ;;  %v5514_v48 = vpop.f32.mrb[152].mxu1  ;;  %v5626_v17 = vpop.f32.mrb[152].mxu0  ;;  %v6662_v41 = vld [vmem:[%s6757_s9 + $0x674] ss:$72 sps:$4 sm:$0xff]  }
 0x22a   : > { %v5515_v20 = vpop.f32.mrb[153].mxu1  ;;  %v5627_v36 = vpop.f32.mrb[153].mxu0 }
 0x22b   : > { %v5516_v23 = vadd.f32 %v5515_v20, %v5514_v48  ;;  %v5628_v19 = vadd.f32 %v5627_v36, %v5626_v17  ;;  %v5517_v28 = vpop.f32.mrb[154].mxu1  ;;  %v5629_v3 = vpop.f32.mrb[154].mxu0 }
 0x22c   : > { %v5518_v40 = vpop.f32.mrb[155].mxu1  ;;  %v5630_v44 = vpop.f32.mrb[155].mxu0 }
 0x22d   : > { %v3695_v42 = vadd.f32 %v5516_v23, %v7553_v26  ;;  %v5519_v61 = vadd.f32 %v5518_v40, %v5517_v28  ;;  %v5631_v46 = vadd.f32 %v5630_v44, %v5629_v3  ;;  %v6654_v26 = vld [vmem:[%s6757_s9 + $0x5e0] ss:$72 sps:$4 sm:$0xff]  }
 0x22e   : > { %4297 = vmatmul.mubr.bf16.gmra.mrb[4].mxu1 %v6645_v18  ;;  %4458 = vmatmul.mubr.bf16.gmra.mrb[4].mxu0 %v6648_v31 }
 0x22f   : > { %v7713_v37 = vadd.f32 %v5628_v19, %v3695_v42  ;;  %v3698_v1 = vadd.f32 %v5519_v61, %v7556_v63  ;;  %4304 = vmatprep.mubr.bf16.mxu1 %v6653_v59  ;;  %4465 = vmatprep.mubr.bf16.mxu0 %v6656_v38  ;;  %v6657_v59 = vld [vmem:[%s6757_s9 + $0x668] ss:$72 sps:$4 sm:$0xff]   ;;  %v6665_v61 = vld [vmem:[%s6757_s9 + $0x6fc] ss:$72 sps:$4 sm:$0xff]  }
 0x231   : > { %v7716_v13 = vadd.f32 %v5631_v46, %v3698_v1  ;;  %v5520_v49 = vpop.f32.mrb[156].mxu1  ;;  %v5632_v47 = vpop.f32.mrb[156].mxu0  ;;  %v6668_v46 = vld [vmem:[%s6757_s9 + $0x704] ss:$72 sps:$4 sm:$0xff]  }
 0x232   : > { %v5521_v33 = vpop.f32.mrb[157].mxu1  ;;  %v5633_v39 = vpop.f32.mrb[157].mxu0 }
 0x233   : > { %v5522_v11 = vadd.f32 %v5521_v33, %v5520_v49  ;;  %v5634_v60 = vadd.f32 %v5633_v39, %v5632_v47  ;;  %v5523_v50 = vpop.f32.mrb[158].mxu1  ;;  %v5635_v21 = vpop.f32.mrb[158].mxu0 }
 0x234   : > { %v5524_v32 = vpop.f32.mrb[159].mxu1  ;;  %v5636_v48 = vpop.f32.mrb[159].mxu0 }
 0x235   : > { %v3703_v63 = vadd.f32 %v5522_v11, %v7563_v4  ;;  %v5525_v17 = vadd.f32 %v5524_v32, %v5523_v50  ;;  %v5637_v20 = vadd.f32 %v5636_v48, %v5635_v21  ;;  %v6660_v4 = vld [vmem:[%s6757_s9 + $0x670] ss:$72 sps:$4 sm:$0xff]  }
 0x236   : > { %4305 = vmatmul.mubr.bf16.gmra.mrb[8].mxu1 %v6651_v58  ;;  %4466 = vmatmul.mubr.bf16.gmra.mrb[8].mxu0 %v6654_v26 }
 0x237   : > { %v7723_v36 = vadd.f32 %v5634_v60, %v3703_v63  ;;  %v3706_v18 = vadd.f32 %v5525_v17, %v7566_v24  ;;  %4312 = vmatprep.mubr.bf16.mxu1 %v6659_v6  ;;  %4473 = vmatprep.mubr.bf16.mxu0 %v6662_v41  ;;  %v6663_v6 = vld [vmem:[%s6757_s9 + $0x6f8] ss:$72 sps:$4 sm:$0xff]   ;;  %v6671_v17 = vld [vmem:[%s6757_s9 + $0x78c] ss:$72 sps:$4 sm:$0xff]  }
 0x239   : > { %v7726_v31 = vadd.f32 %v5637_v20, %v3706_v18  ;;  %v5654_v23 = vpop.f32.mrb[160].mxu1  ;;  %v5766_v19 = vpop.f32.mrb[160].mxu0  ;;  %v6674_v20 = vld [vmem:[%s6757_s9 + $0x794] ss:$72 sps:$4 sm:$0xff]  }
 0x23a   : > { %v5655_v28 = vpop.f32.mrb[161].mxu1  ;;  %v5767_v3 = vpop.f32.mrb[161].mxu0 }
 0x23b   : > { %v5656_v38 = vadd.f32 %v5655_v28, %v5654_v23  ;;  %v5768_v40 = vadd.f32 %v5767_v3, %v5766_v19  ;;  %v5657_v44 = vpop.f32.mrb[162].mxu1  ;;  %v5769_v42 = vpop.f32.mrb[162].mxu0 }
 0x23c   : > { %v5658_v1 = vpop.f32.mrb[163].mxu1  ;;  %v5770_v49 = vpop.f32.mrb[163].mxu0 }
 0x23d   : > { %v3905_v24 = vadd.f32 %v5656_v38, %v7573_v22  ;;  %v5659_v47 = vadd.f32 %v5658_v1, %v5657_v44  ;;  %v5771_v33 = vadd.f32 %v5770_v49, %v5769_v42  ;;  %v6666_v22 = vld [vmem:[%s6757_s9 + $0x700] ss:$72 sps:$4 sm:$0xff]  }
 0x23e   : > { %4313 = vmatmul.mubr.bf16.gmra.mrb[12].mxu1 %v6657_v59  ;;  %4474 = vmatmul.mubr.bf16.gmra.mrb[12].mxu0 %v6660_v4 }
 0x23f   : > { %v7733_v39 = vadd.f32 %v5768_v40, %v3905_v24  ;;  %v3908_v58 = vadd.f32 %v5659_v47, %v7576_v51  ;;  %4320 = vmatprep.mubr.bf16.mxu1 %v6665_v61  ;;  %4481 = vmatprep.mubr.bf16.mxu0 %v6668_v46  ;;  %v6669_v61 = vld [vmem:[%s6757_s9 + $0x788] ss:$72 sps:$4 sm:$0xff]   ;;  %v6677_v47 = vld [vmem:[%s6757_s9 + $0x81c] ss:$72 sps:$4 sm:$0xff]  }
 0x241   : > { %v7736_v26 = vadd.f32 %v5771_v33, %v3908_v58  ;;  %v5660_v11 = vpop.f32.mrb[164].mxu1  ;;  %v5772_v60 = vpop.f32.mrb[164].mxu0  ;;  %v6680_v33 = vld [vmem:[%s6757_s9 + $0x824] ss:$72 sps:$4 sm:$0xff]  }
 0x242   : > { %v5661_v50 = vpop.f32.mrb[165].mxu1  ;;  %v5773_v21 = vpop.f32.mrb[165].mxu0 }
 0x243   : > { %v5662_v41 = vadd.f32 %v5661_v50, %v5660_v11  ;;  %v5774_v32 = vadd.f32 %v5773_v21, %v5772_v60  ;;  %v5663_v48 = vpop.f32.mrb[166].mxu1  ;;  %v5775_v63 = vpop.f32.mrb[166].mxu0 }
 0x244   : > { %v5664_v18 = vpop.f32.mrb[167].mxu1  ;;  %v5776_v23 = vpop.f32.mrb[167].mxu0 }
 0x245   : > { %v3913_v51 = vadd.f32 %v5662_v41, %v7583_v43  ;;  %v5665_v19 = vadd.f32 %v5664_v18, %v5663_v48  ;;  %v5777_v28 = vadd.f32 %v5776_v23, %v5775_v63  ;;  %v6672_v43 = vld [vmem:[%s6757_s9 + $0x790] ss:$72 sps:$4 sm:$0xff]  }
 0x246   : > { %4321 = vmatmul.mubr.bf16.gmra.mrb[16].mxu1 %v6663_v6  ;;  %4482 = vmatmul.mubr.bf16.gmra.mrb[16].mxu0 %v6666_v22 }
 0x247   : > { %v7743_v3 = vadd.f32 %v5774_v32, %v3913_v51  ;;  %v3916_v59 = vadd.f32 %v5665_v19, %v7586_v15  ;;  %4328 = vmatprep.mubr.bf16.mxu1 %v6671_v17  ;;  %4489 = vmatprep.mubr.bf16.mxu0 %v6674_v20  ;;  %v6675_v17 = vld [vmem:[%s6757_s9 + $0x818] ss:$72 sps:$4 sm:$0xff]   ;;  %v6683_v19 = vld [vmem:[%s6757_s9 + $0x8ac] ss:$72 sps:$4 sm:$0xff]  }
 0x249   : > { %v7746_v4 = vadd.f32 %v5777_v28, %v3916_v59  ;;  %v5666_v38 = vpop.f32.mrb[168].mxu1  ;;  %v5778_v40 = vpop.f32.mrb[168].mxu0  ;;  %v6686_v28 = vld [vmem:[%s6757_s9 + $0x8b4] ss:$72 sps:$4 sm:$0xff]  }
 0x24a   : > { %v5667_v44 = vpop.f32.mrb[169].mxu1  ;;  %v5779_v42 = vpop.f32.mrb[169].mxu0 }
 0x24b   : > { %v5668_v46 = vadd.f32 %v5667_v44, %v5666_v38  ;;  %v5780_v1 = vadd.f32 %v5779_v42, %v5778_v40  ;;  %v5669_v49 = vpop.f32.mrb[170].mxu1  ;;  %v5781_v24 = vpop.f32.mrb[170].mxu0 }
 0x24c   : > { %v5670_v58 = vpop.f32.mrb[171].mxu1  ;;  %v5782_v11 = vpop.f32.mrb[171].mxu0 }
 0x24d   : > { %v3921_v15 = vadd.f32 %v5668_v46, %v7593_v0  ;;  %v5671_v60 = vadd.f32 %v5670_v58, %v5669_v49  ;;  %v5783_v50 = vadd.f32 %v5782_v11, %v5781_v24  ;;  %v6678_v0 = vld [vmem:[%s6757_s9 + $0x820] ss:$72 sps:$4 sm:$0xff]  }
 0x24e   : > { %4329 = vmatmul.mubr.bf16.gmra.mrb[20].mxu1 %v6669_v61  ;;  %4490 = vmatmul.mubr.bf16.gmra.mrb[20].mxu0 %v6672_v43 }
 0x24f   : > { %v7753_v21 = vadd.f32 %v5780_v1, %v3921_v15  ;;  %v3924_v6 = vadd.f32 %v5671_v60, %v7596_v56  ;;  %4336 = vmatprep.mubr.bf16.mxu1 %v6677_v47  ;;  %4497 = vmatprep.mubr.bf16.mxu0 %v6680_v33  ;;  %v6681_v47 = vld [vmem:[%s6757_s9 + $0x8a8] ss:$72 sps:$4 sm:$0xff]  }
 0x250   : > { %v6684_v33 = vld [vmem:[%s6757_s9 + $0x8b0] ss:$72 sps:$4 sm:$0xff]   ;;  %s4642_s9 = sshll.u32 %s7920_s16, 3 }
 0x251   : > { %v7756_v22 = vadd.f32 %v5783_v50, %v3924_v6  ;;  %v5672_v41 = vpop.f32.mrb[172].mxu1  ;;  %v5784_v32 = vpop.f32.mrb[172].mxu0  ;;  %s7848_s24 = scalar_lea.vmem %s7918_s3, %s4642_s9 }
 0x252   : > { %v5673_v48 = vpop.f32.mrb[173].mxu1  ;;  %v5785_v63 = vpop.f32.mrb[173].mxu0 }
 0x253   : > { %v5674_v20 = vadd.f32 %v5673_v48, %v5672_v41  ;;  %v5786_v18 = vadd.f32 %v5785_v63, %v5784_v32  ;;  %v5675_v23 = vpop.f32.mrb[174].mxu1  ;;  %v5787_v51 = vpop.f32.mrb[174].mxu0 }
 0x254   : > { %v5676_v59 = vpop.f32.mrb[175].mxu1  ;;  %v5788_v38 = vpop.f32.mrb[175].mxu0 }
 0x255   : > { %v3929_v56 = vadd.f32 %v5674_v20, %v7603_v25  ;;  %v5677_v40 = vadd.f32 %v5676_v59, %v5675_v23  ;;  %v5789_v44 = vadd.f32 %v5788_v38, %v5787_v51 }
 0x256   : > { %4337 = vmatmul.mubr.bf16.gmra.mrb[24].mxu1 %v6675_v17  ;;  %4498 = vmatmul.mubr.bf16.gmra.mrb[24].mxu0 %v6678_v0 }
 0x257   : > { %v7763_v42 = vadd.f32 %v5786_v18, %v3929_v56  ;;  %v3932_v61 = vadd.f32 %v5677_v40, %v7606_v34  ;;  %4344 = vmatprep.mubr.bf16.mxu1 %v6683_v19  ;;  %4505 = vmatprep.mubr.bf16.mxu0 %v6686_v28 }
 0x259   : > { %v7766_v43 = vadd.f32 %v5789_v44, %v3932_v61  ;;  %v5678_v46 = vpop.f32.mrb[176].mxu1  ;;  %v5790_v1 = vpop.f32.mrb[176].mxu0 }
 0x25a   : > { %v5679_v49 = vpop.f32.mrb[177].mxu1  ;;  %v5791_v24 = vpop.f32.mrb[177].mxu0 }
 0x25b   : > { %v5680_v58 = vadd.f32 %v5679_v49, %v5678_v46  ;;  %v5792_v25 = vadd.f32 %v5791_v24, %v5790_v1  ;;  %v5681_v11 = vpop.f32.mrb[178].mxu1  ;;  %v5793_v15 = vpop.f32.mrb[178].mxu0 }
 0x25c   : > { %v5682_v60 = vpop.f32.mrb[179].mxu1  ;;  %v5794_v50 = vpop.f32.mrb[179].mxu0 }
 0x25d   : > { %v3937_v6 = vadd.f32 %v5680_v58, %v7613_v52  ;;  %v5683_v41 = vadd.f32 %v5682_v60, %v5681_v11  ;;  %v5795_v34 = vadd.f32 %v5794_v50, %v5793_v15 }
 0x25e   : > { %4345 = vmatmul.mubr.bf16.gmra.mrb[28].mxu1 %v6681_v47  ;;  %4506 = vmatmul.mubr.bf16.gmra.mrb[28].mxu0 %v6684_v33 }
 0x25f   : > { %v7771_v32 = vadd.f32 %v5792_v25, %v3937_v6  ;;  %v3940_v48 = vadd.f32 %v5683_v41, %v7616_v9 }
 0x261   : > { %v7774_v63 = vadd.f32 %v5795_v34, %v3940_v48  ;;  %v5684_v17 = vpop.f32.mrb[180].mxu1  ;;  %v5796_v0 = vpop.f32.mrb[180].mxu0 }
 0x262   : > { %v5685_v20 = vpop.f32.mrb[181].mxu1  ;;  %v5797_v18 = vpop.f32.mrb[181].mxu0 }
 0x263   : > { %v5686_v23 = vadd.f32 %v5685_v20, %v5684_v17  ;;  %v5798_v51 = vadd.f32 %v5797_v18, %v5796_v0  ;;  %v5687_v19 = vpop.f32.mrb[182].mxu1  ;;  %v5799_v28 = vpop.f32.mrb[182].mxu0 }
 0x264   : > { %v5688_v59 = vpop.f32.mrb[183].mxu1  ;;  %v5800_v52 = vpop.f32.mrb[183].mxu0 }
 0x265   : > { %v3945_v38 = vadd.f32 %v5686_v23, %v7623_v16  ;;  %v5689_v56 = vadd.f32 %v5688_v59, %v5687_v19  ;;  %v5801_v40 = vadd.f32 %v5800_v52, %v5799_v28 }
 0x267   : > { %v7777_v44 = vadd.f32 %v5798_v51, %v3945_v38  ;;  %v3948_v9 = vadd.f32 %v5689_v56, %v7626_v53 }
 0x269   : > { %v7780_v61 = vadd.f32 %v5801_v40, %v3948_v9  ;;  %v5690_v46 = vpop.f32.mrb[184].mxu1  ;;  %v5802_v1 = vpop.f32.mrb[184].mxu0 }
 0x26a   : > { %v5691_v49 = vpop.f32.mrb[185].mxu1  ;;  %v5803_v24 = vpop.f32.mrb[185].mxu0 }
 0x26b   : > { %v5692_v47 = vadd.f32 %v5691_v49, %v5690_v46  ;;  %v5804_v33 = vadd.f32 %v5803_v24, %v5802_v1  ;;  %v5693_v58 = vpop.f32.mrb[186].mxu1  ;;  %v5805_v25 = vpop.f32.mrb[186].mxu0 }
 0x26c   : > { %v5694_v11 = vpop.f32.mrb[187].mxu1  ;;  %v5806_v15 = vpop.f32.mrb[187].mxu0 }
 0x26d   : > { %v3953_v16 = vadd.f32 %v5692_v47, %v7633_v57  ;;  %v5695_v60 = vadd.f32 %v5694_v11, %v5693_v58  ;;  %v5807_v50 = vadd.f32 %v5806_v15, %v5805_v25 }
 0x26f   : > { %v7783_v6 = vadd.f32 %v5804_v33, %v3953_v16  ;;  %v3956_v53 = vadd.f32 %v5695_v60, %v7636_v29 }
 0x271   : > { %v7786_v41 = vadd.f32 %v5807_v50, %v3956_v53  ;;  %v5696_v34 = vpop.f32.mrb[188].mxu1  ;;  %v5808_v48 = vpop.f32.mrb[188].mxu0 }
 0x272   : > { %v5697_v17 = vpop.f32.mrb[189].mxu1  ;;  %v5809_v0 = vpop.f32.mrb[189].mxu0 }
 0x273   : > { %v5698_v20 = vadd.f32 %v5697_v17, %v5696_v34  ;;  %v5810_v18 = vadd.f32 %v5809_v0, %v5808_v48  ;;  %v5699_v23 = vpop.f32.mrb[190].mxu1  ;;  %v5811_v51 = vpop.f32.mrb[190].mxu0 }
 0x274   : > { %v5700_v19 = vpop.f32.mrb[191].mxu1  ;;  %v5812_v28 = vpop.f32.mrb[191].mxu0 }
 0x275   : > { %v3961_v57 = vadd.f32 %v5698_v20, %v7643_v35  ;;  %v5701_v59 = vadd.f32 %v5700_v19, %v5699_v23  ;;  %v5813_v52 = vadd.f32 %v5812_v28, %v5811_v51 }
 0x277   : > { %v7789_v38 = vadd.f32 %v5810_v18, %v3961_v57  ;;  %v3964_v29 = vadd.f32 %v5701_v59, %v7646_v14 }
 0x279   : > { %v7792_v56 = vadd.f32 %v5813_v52, %v3964_v29  ;;  %v5702_v40 = vpop.f32.mrb[192].mxu1  ;;  %v5814_v9 = vpop.f32.mrb[192].mxu0 }
 0x27a   : > { %v5703_v46 = vpop.f32.mrb[193].mxu1  ;;  %v5815_v1 = vpop.f32.mrb[193].mxu0 }
 0x27b   : > { %v5704_v49 = vadd.f32 %v5703_v46, %v5702_v40  ;;  %v5816_v24 = vadd.f32 %v5815_v1, %v5814_v9  ;;  %v5705_v47 = vpop.f32.mrb[194].mxu1  ;;  %v5817_v33 = vpop.f32.mrb[194].mxu0 }
 0x27c   : > { %v5706_v58 = vpop.f32.mrb[195].mxu1  ;;  %v5818_v25 = vpop.f32.mrb[195].mxu0 }
 0x27d   : > { %v3969_v35 = vadd.f32 %v5704_v49, %v7653_v10  ;;  %v5707_v11 = vadd.f32 %v5706_v58, %v5705_v47  ;;  %v5819_v15 = vadd.f32 %v5818_v25, %v5817_v33 }
 0x27f   : > { %v7795_v16 = vadd.f32 %v5816_v24, %v3969_v35  ;;  %v3972_v14 = vadd.f32 %v5707_v11, %v7656_v7 }
 0x281   : > { %v7798_v60 = vadd.f32 %v5819_v15, %v3972_v14  ;;  %v5708_v50 = vpop.f32.mrb[196].mxu1  ;;  %v5820_v53 = vpop.f32.mrb[196].mxu0 }
 0x282   : > { %v5709_v34 = vpop.f32.mrb[197].mxu1  ;;  %v5821_v48 = vpop.f32.mrb[197].mxu0 }
 0x283   : > { %v5710_v17 = vadd.f32 %v5709_v34, %v5708_v50  ;;  %v5822_v0 = vadd.f32 %v5821_v48, %v5820_v53  ;;  %v5711_v20 = vpop.f32.mrb[198].mxu1  ;;  %v5823_v18 = vpop.f32.mrb[198].mxu0 }
 0x284   : > { %v5712_v23 = vpop.f32.mrb[199].mxu1  ;;  %v5824_v51 = vpop.f32.mrb[199].mxu0 }
 0x285   : > { %v3977_v10 = vadd.f32 %v5710_v17, %v7663_v55  ;;  %v5713_v19 = vadd.f32 %v5712_v23, %v5711_v20  ;;  %v5825_v28 = vadd.f32 %v5824_v51, %v5823_v18 }
 0x287   : > { %v7801_v57 = vadd.f32 %v5822_v0, %v3977_v10  ;;  %v3980_v7 = vadd.f32 %v5713_v19, %v7666_v62 }
 0x289   : > { %v7804_v59 = vadd.f32 %v5825_v28, %v3980_v7  ;;  %v5714_v52 = vpop.f32.mrb[200].mxu1  ;;  %v5826_v29 = vpop.f32.mrb[200].mxu0 }
 0x28a   : > { %v5715_v40 = vpop.f32.mrb[201].mxu1  ;;  %v5827_v9 = vpop.f32.mrb[201].mxu0 }
 0x28b   : > { %v5716_v46 = vadd.f32 %v5715_v40, %v5714_v52  ;;  %v5828_v1 = vadd.f32 %v5827_v9, %v5826_v29  ;;  %v5717_v49 = vpop.f32.mrb[202].mxu1  ;;  %v5829_v24 = vpop.f32.mrb[202].mxu0 }
 0x28c   : > { %v5718_v47 = vpop.f32.mrb[203].mxu1  ;;  %v5830_v33 = vpop.f32.mrb[203].mxu0 }
 0x28d   : > { %v3985_v55 = vadd.f32 %v5716_v46, %v7673_v30  ;;  %v5719_v58 = vadd.f32 %v5718_v47, %v5717_v49  ;;  %v5831_v25 = vadd.f32 %v5830_v33, %v5829_v24 }
 0x28f   : > { %v7807_v35 = vadd.f32 %v5828_v1, %v3985_v55  ;;  %v3988_v62 = vadd.f32 %v5719_v58, %v7676_v5 }
 0x291   : > { %v7810_v11 = vadd.f32 %v5831_v25, %v3988_v62  ;;  %v5720_v15 = vpop.f32.mrb[204].mxu1  ;;  %v5832_v14 = vpop.f32.mrb[204].mxu0 }
 0x292   : > { %v5721_v50 = vpop.f32.mrb[205].mxu1  ;;  %v5833_v53 = vpop.f32.mrb[205].mxu0 }
 0x293   : > { %v5722_v34 = vadd.f32 %v5721_v50, %v5720_v15  ;;  %v5834_v48 = vadd.f32 %v5833_v53, %v5832_v14  ;;  %v5723_v17 = vpop.f32.mrb[206].mxu1  ;;  %v5835_v0 = vpop.f32.mrb[206].mxu0 }
 0x294   : > { %v5724_v20 = vpop.f32.mrb[207].mxu1  ;;  %v5836_v18 = vpop.f32.mrb[207].mxu0 }
 0x295   : > { %v3993_v30 = vadd.f32 %v5722_v34, %v7683_v27  ;;  %v5725_v23 = vadd.f32 %v5724_v20, %v5723_v17  ;;  %v5837_v51 = vadd.f32 %v5836_v18, %v5835_v0 }
 0x297   : > { %v7813_v10 = vadd.f32 %v5834_v48, %v3993_v30  ;;  %v3996_v5 = vadd.f32 %v5725_v23, %v7686_v54 }
 0x299   : > { %v7816_v19 = vadd.f32 %v5837_v51, %v3996_v5  ;;  %v5726_v28 = vpop.f32.mrb[208].mxu1  ;;  %v5838_v7 = vpop.f32.mrb[208].mxu0 }
 0x29a   : > { %v5727_v52 = vpop.f32.mrb[209].mxu1  ;;  %v5839_v29 = vpop.f32.mrb[209].mxu0 }
 0x29b   : > { %v5728_v40 = vadd.f32 %v5727_v52, %v5726_v28  ;;  %v5840_v9 = vadd.f32 %v5839_v29, %v5838_v7  ;;  %v5729_v46 = vpop.f32.mrb[210].mxu1  ;;  %v5841_v1 = vpop.f32.mrb[210].mxu0 }
 0x29c   : > { %v5730_v49 = vpop.f32.mrb[211].mxu1  ;;  %v5842_v24 = vpop.f32.mrb[211].mxu0 }
 0x29d   : > { %v4001_v27 = vadd.f32 %v5728_v40, %v7693_v8  ;;  %v5731_v47 = vadd.f32 %v5730_v49, %v5729_v46  ;;  %v5843_v33 = vadd.f32 %v5842_v24, %v5841_v1 }
 0x29f   : > { %v7819_v55 = vadd.f32 %v5840_v9, %v4001_v27  ;;  %v4004_v54 = vadd.f32 %v5731_v47, %v7696_v2 }
 0x2a1   : > { %v7822_v58 = vadd.f32 %v5843_v33, %v4004_v54  ;;  %v5732_v25 = vpop.f32.mrb[212].mxu1  ;;  %v5844_v62 = vpop.f32.mrb[212].mxu0 }
 0x2a2   : > { %v5733_v15 = vpop.f32.mrb[213].mxu1  ;;  %v5845_v14 = vpop.f32.mrb[213].mxu0 }
 0x2a3   : > { %v5734_v50 = vadd.f32 %v5733_v15, %v5732_v25  ;;  %v5846_v53 = vadd.f32 %v5845_v14, %v5844_v62  ;;  %v5735_v34 = vpop.f32.mrb[214].mxu1  ;;  %v5847_v48 = vpop.f32.mrb[214].mxu0 }
 0x2a4   : > { %v5736_v17 = vpop.f32.mrb[215].mxu1  ;;  %v5848_v0 = vpop.f32.mrb[215].mxu0 }
 0x2a5   : > { %v4009_v8 = vadd.f32 %v5734_v50, %v7703_v12  ;;  %v5737_v20 = vadd.f32 %v5736_v17, %v5735_v34  ;;  %v5849_v18 = vadd.f32 %v5848_v0, %v5847_v48 }
 0x2a7   : > { %v7825_v30 = vadd.f32 %v5846_v53, %v4009_v8  ;;  %v4012_v2 = vadd.f32 %v5737_v20, %v7706_v45 }
 0x2a9   : > { %v7828_v23 = vadd.f32 %v5849_v18, %v4012_v2  ;;  %v5738_v51 = vpop.f32.mrb[216].mxu1  ;;  %v5850_v5 = vpop.f32.mrb[216].mxu0 }
 0x2aa   : > { %v5739_v28 = vpop.f32.mrb[217].mxu1  ;;  %v5851_v7 = vpop.f32.mrb[217].mxu0 }
 0x2ab   : > { %v5740_v52 = vadd.f32 %v5739_v28, %v5738_v51  ;;  %v5852_v29 = vadd.f32 %v5851_v7, %v5850_v5  ;;  %v5741_v40 = vpop.f32.mrb[218].mxu1  ;;  %v5853_v9 = vpop.f32.mrb[218].mxu0 }
 0x2ac   : > { %v5742_v46 = vpop.f32.mrb[219].mxu1  ;;  %v5854_v1 = vpop.f32.mrb[219].mxu0 }
 0x2ad   : > { %v4017_v12 = vadd.f32 %v5740_v52, %v7713_v37  ;;  %v5743_v49 = vadd.f32 %v5742_v46, %v5741_v40  ;;  %v5855_v24 = vadd.f32 %v5854_v1, %v5853_v9 }
 0x2af   : > { %v7831_v27 = vadd.f32 %v5852_v29, %v4017_v12  ;;  %v4020_v45 = vadd.f32 %v5743_v49, %v7716_v13 }
 0x2b1   : > { %v7834_v47 = vadd.f32 %v5855_v24, %v4020_v45  ;;  %v5744_v33 = vpop.f32.mrb[220].mxu1  ;;  %v5856_v54 = vpop.f32.mrb[220].mxu0 }
 0x2b2   : > { %v5745_v25 = vpop.f32.mrb[221].mxu1  ;;  %v5857_v62 = vpop.f32.mrb[221].mxu0 }
 0x2b3   : > { %v5746_v15 = vadd.f32 %v5745_v25, %v5744_v33  ;;  %v5858_v14 = vadd.f32 %v5857_v62, %v5856_v54  ;;  %v5747_v50 = vpop.f32.mrb[222].mxu1  ;;  %v5859_v53 = vpop.f32.mrb[222].mxu0 }
 0x2b4   : > { %v5748_v34 = vpop.f32.mrb[223].mxu1  ;;  %v5860_v48 = vpop.f32.mrb[223].mxu0 }
 0x2b5   : > { %v4025_v37 = vadd.f32 %v5746_v15, %v7723_v36  ;;  %v5749_v17 = vadd.f32 %v5748_v34, %v5747_v50  ;;  %v5861_v0 = vadd.f32 %v5860_v48, %v5859_v53 }
 0x2b7   : > { %v7837_v8 = vadd.f32 %v5858_v14, %v4025_v37  ;;  %v4028_v13 = vadd.f32 %v5749_v17, %v7726_v31 }
 0x2b9   : > { %v7840_v20 = vadd.f32 %v5861_v0, %v4028_v13  ;;  %v5878_v18 = vpop.f32.mrb[224].mxu1  ;;  %v5990_v2 = vpop.f32.mrb[224].mxu0 }
 0x2ba   : > { %v5879_v51 = vpop.f32.mrb[225].mxu1  ;;  %v5991_v5 = vpop.f32.mrb[225].mxu0 }
 0x2bb   : > { %v5880_v28 = vadd.f32 %v5879_v51, %v5878_v18  ;;  %v5992_v7 = vadd.f32 %v5991_v5, %v5990_v2  ;;  %v5881_v52 = vpop.f32.mrb[226].mxu1  ;;  %v5993_v29 = vpop.f32.mrb[226].mxu0 }
 0x2bc   : > { %v5882_v40 = vpop.f32.mrb[227].mxu1  ;;  %v5994_v9 = vpop.f32.mrb[227].mxu0 }
 0x2bd   : > { %v4227_v36 = vadd.f32 %v5880_v28, %v7733_v39  ;;  %v5883_v46 = vadd.f32 %v5882_v40, %v5881_v52  ;;  %v5995_v1 = vadd.f32 %v5994_v9, %v5993_v29 }
 0x2bf   : > { %v4388_v12 = vadd.f32 %v5992_v7, %v4227_v36  ;;  %v4230_v31 = vadd.f32 %v5883_v46, %v7736_v26 }
 0x2c1   : > { %v4514_v49 = vmax.f32 %v4388_v12, 0.0  ;;  %v4391_v24 = vadd.f32 %v5995_v1, %v4230_v31  ;;  %v5884_v45 = vpop.f32.mrb[228].mxu1  ;;  %v5996_v33 = vpop.f32.mrb[228].mxu0 }
 0x2c2   : > { %v5885_v54 = vpop.f32.mrb[229].mxu1  ;;  %v5997_v25 = vpop.f32.mrb[229].mxu0 }
 0x2c3   : > { %4546 = vst [vmem:[%s7848_s24] sm:$0xff] %v4514_v49  ;;  %v4515_v39 = vmax.f32 %v4391_v24, 0.0  ;;  %v5886_v62 = vadd.f32 %v5885_v54, %v5884_v45  ;;  %v5998_v15 = vadd.f32 %v5997_v25, %v5996_v33  ;;  %v5887_v14 = vpop.f32.mrb[230].mxu1  ;;  %v5999_v26 = vpop.f32.mrb[230].mxu0 }
 0x2c4   : > { %v5888_v50 = vpop.f32.mrb[231].mxu1  ;;  %v6000_v53 = vpop.f32.mrb[231].mxu0 }
 0x2c5   : > { %4547 = vst [vmem:[%s7848_s24 + $0x8] sm:$0xff] %v4515_v39  ;;  %v4235_v34 = vadd.f32 %v5886_v62, %v7743_v3  ;;  %v5889_v48 = vadd.f32 %v5888_v50, %v5887_v14  ;;  %v6001_v37 = vadd.f32 %v6000_v53, %v5999_v26 }
 0x2c7   : > { %v4396_v17 = vadd.f32 %v5998_v15, %v4235_v34  ;;  %v4238_v0 = vadd.f32 %v5889_v48, %v7746_v4 }
 0x2c9   : > { %v4516_v13 = vmax.f32 %v4396_v17, 0.0  ;;  %v4399_v18 = vadd.f32 %v6001_v37, %v4238_v0  ;;  %v5890_v2 = vpop.f32.mrb[232].mxu1  ;;  %v6002_v51 = vpop.f32.mrb[232].mxu0 }
 0x2ca   : > { %v5891_v5 = vpop.f32.mrb[233].mxu1  ;;  %v6003_v28 = vpop.f32.mrb[233].mxu0 }
 0x2cb   : > { %4548 = vst [vmem:[%s7848_s24 + $0x10] sm:$0xff] %v4516_v13  ;;  %v4517_v7 = vmax.f32 %v4399_v18, 0.0  ;;  %v5892_v52 = vadd.f32 %v5891_v5, %v5890_v2  ;;  %v6004_v29 = vadd.f32 %v6003_v28, %v6002_v51  ;;  %v5893_v40 = vpop.f32.mrb[234].mxu1  ;;  %v6005_v9 = vpop.f32.mrb[234].mxu0 }
 0x2cc   : > { %v5894_v3 = vpop.f32.mrb[235].mxu1  ;;  %v6006_v36 = vpop.f32.mrb[235].mxu0 }
 0x2cd   : > { %4549 = vst [vmem:[%s7848_s24 + $0x18] sm:$0xff] %v4517_v7  ;;  %v4243_v46 = vadd.f32 %v5892_v52, %v7753_v21  ;;  %v5895_v1 = vadd.f32 %v5894_v3, %v5893_v40  ;;  %v6007_v4 = vadd.f32 %v6006_v36, %v6005_v9 }
 0x2cf   : > { %v4404_v12 = vadd.f32 %v6004_v29, %v4243_v46  ;;  %v4246_v31 = vadd.f32 %v5895_v1, %v7756_v22 }
 0x2d1   : > { %v4518_v49 = vmax.f32 %v4404_v12, 0.0  ;;  %v4407_v24 = vadd.f32 %v6007_v4, %v4246_v31  ;;  %v5896_v45 = vpop.f32.mrb[236].mxu1  ;;  %v6008_v33 = vpop.f32.mrb[236].mxu0 }
 0x2d2   : > { %v5897_v54 = vpop.f32.mrb[237].mxu1  ;;  %v6009_v25 = vpop.f32.mrb[237].mxu0 }
 0x2d3   : > { %4550 = vst [vmem:[%s7848_s24 + $0x20] sm:$0xff] %v4518_v49  ;;  %v4519_v39 = vmax.f32 %v4407_v24, 0.0  ;;  %v5898_v62 = vadd.f32 %v5897_v54, %v5896_v45  ;;  %v6010_v15 = vadd.f32 %v6009_v25, %v6008_v33  ;;  %v5899_v14 = vpop.f32.mrb[238].mxu1  ;;  %v6011_v26 = vpop.f32.mrb[238].mxu0 }
 0x2d4   : > { %v5900_v21 = vpop.f32.mrb[239].mxu1  ;;  %v6012_v50 = vpop.f32.mrb[239].mxu0 }
 0x2d5   : > { %4551 = vst [vmem:[%s7848_s24 + $0x28] sm:$0xff] %v4519_v39  ;;  %v4251_v53 = vadd.f32 %v5898_v62, %v7763_v42  ;;  %v5901_v34 = vadd.f32 %v5900_v21, %v5899_v14  ;;  %v6013_v22 = vadd.f32 %v6012_v50, %v6011_v26 }
 0x2d7   : > { %v4412_v48 = vadd.f32 %v6010_v15, %v4251_v53  ;;  %v4254_v37 = vadd.f32 %v5901_v34, %v7766_v43 }
 0x2d9   : > { %v4520_v17 = vmax.f32 %v4412_v48, 0.0  ;;  %v4415_v0 = vadd.f32 %v6013_v22, %v4254_v37  ;;  %v5902_v13 = vpop.f32.mrb[240].mxu1  ;;  %v6014_v18 = vpop.f32.mrb[240].mxu0 }
 0x2da   : > { %v5903_v2 = vpop.f32.mrb[241].mxu1  ;;  %v6015_v51 = vpop.f32.mrb[241].mxu0 }
 0x2db   : > { %4552 = vst [vmem:[%s7848_s24 + $0x30] sm:$0xff] %v4520_v17  ;;  %v4521_v5 = vmax.f32 %v4415_v0, 0.0  ;;  %v5904_v28 = vadd.f32 %v5903_v2, %v5902_v13  ;;  %v6016_v7 = vadd.f32 %v6015_v51, %v6014_v18  ;;  %v5905_v52 = vpop.f32.mrb[242].mxu1  ;;  %v6017_v29 = vpop.f32.mrb[242].mxu0 }
 0x2dc   : > { %v5906_v42 = vpop.f32.mrb[243].mxu1  ;;  %v6018_v40 = vpop.f32.mrb[243].mxu0 }
 0x2dd   : > { %4553 = vst [vmem:[%s7848_s24 + $0x38] sm:$0xff] %v4521_v5  ;;  %v4259_v9 = vadd.f32 %v5904_v28, %v7771_v32  ;;  %v5907_v3 = vadd.f32 %v5906_v42, %v5905_v52  ;;  %v6019_v43 = vadd.f32 %v6018_v40, %v6017_v29 }
 0x2df   : > { %v4420_v36 = vadd.f32 %v6016_v7, %v4259_v9  ;;  %v4262_v46 = vadd.f32 %v5907_v3, %v7774_v63 }
 0x2e1   : > { %v4522_v1 = vmax.f32 %v4420_v36, 0.0  ;;  %v4423_v4 = vadd.f32 %v6019_v43, %v4262_v46  ;;  %v5908_v12 = vpop.f32.mrb[244].mxu1  ;;  %v6020_v31 = vpop.f32.mrb[244].mxu0 }
 0x2e2   : > { %v5909_v49 = vpop.f32.mrb[245].mxu1  ;;  %v6021_v24 = vpop.f32.mrb[245].mxu0 }
 0x2e3   : > { %4554 = vst [vmem:[%s7848_s24 + $0x40] sm:$0xff] %v4522_v1  ;;  %v4523_v45 = vmax.f32 %v4423_v4, 0.0  ;;  %v5910_v33 = vadd.f32 %v5909_v49, %v5908_v12  ;;  %v6022_v54 = vadd.f32 %v6021_v24, %v6020_v31  ;;  %v5911_v25 = vpop.f32.mrb[246].mxu1  ;;  %v6023_v39 = vpop.f32.mrb[246].mxu0 }
 0x2e4   : > { %v5912_v32 = vpop.f32.mrb[247].mxu1  ;;  %v6024_v62 = vpop.f32.mrb[247].mxu0 }
 0x2e5   : > { %4555 = vst [vmem:[%s7848_s24 + $0x48] sm:$0xff] %v4523_v45  ;;  %v4267_v15 = vadd.f32 %v5910_v33, %v7777_v44  ;;  %v5913_v14 = vadd.f32 %v5912_v32, %v5911_v25  ;;  %v6025_v63 = vadd.f32 %v6024_v62, %v6023_v39 }
 0x2e7   : > { %v4428_v26 = vadd.f32 %v6022_v54, %v4267_v15  ;;  %v4270_v21 = vadd.f32 %v5913_v14, %v7780_v61 }
 0x2e9   : > { %v4524_v50 = vmax.f32 %v4428_v26, 0.0  ;;  %v4431_v53 = vadd.f32 %v6025_v63, %v4270_v21  ;;  %v5914_v34 = vpop.f32.mrb[248].mxu1  ;;  %v6026_v22 = vpop.f32.mrb[248].mxu0 }
 0x2ea   : > { %v5915_v48 = vpop.f32.mrb[249].mxu1  ;;  %v6027_v37 = vpop.f32.mrb[249].mxu0 }
 0x2eb   : > { %4556 = vst [vmem:[%s7848_s24 + $0x50] sm:$0xff] %v4524_v50  ;;  %v4525_v17 = vmax.f32 %v4431_v53, 0.0  ;;  %v5916_v0 = vadd.f32 %v5915_v48, %v5914_v34  ;;  %v6028_v13 = vadd.f32 %v6027_v37, %v6026_v22  ;;  %v5917_v18 = vpop.f32.mrb[250].mxu1  ;;  %v6029_v2 = vpop.f32.mrb[250].mxu0 }
 0x2ec   : > { %v5918_v44 = vpop.f32.mrb[251].mxu1  ;;  %v6030_v51 = vpop.f32.mrb[251].mxu0 }
 0x2ed   : > { %4557 = vst [vmem:[%s7848_s24 + $0x58] sm:$0xff] %v4525_v17  ;;  %v4275_v5 = vadd.f32 %v5916_v0, %v7783_v6  ;;  %v5919_v28 = vadd.f32 %v5918_v44, %v5917_v18  ;;  %v6031_v61 = vadd.f32 %v6030_v51, %v6029_v2 }
 0x2ef   : > { %v4436_v7 = vadd.f32 %v6028_v13, %v4275_v5  ;;  %v4278_v52 = vadd.f32 %v5919_v28, %v7786_v41 }
 0x2f1   : > { %v4526_v29 = vmax.f32 %v4436_v7, 0.0  ;;  %v4439_v42 = vadd.f32 %v6031_v61, %v4278_v52  ;;  %v5920_v40 = vpop.f32.mrb[252].mxu1  ;;  %v6032_v9 = vpop.f32.mrb[252].mxu0 }
 0x2f2   : > { %v5921_v3 = vpop.f32.mrb[253].mxu1  ;;  %v6033_v43 = vpop.f32.mrb[253].mxu0 }
 0x2f3   : > { %4558 = vst [vmem:[%s7848_s24 + $0x60] sm:$0xff] %v4526_v29  ;;  %v4527_v36 = vmax.f32 %v4439_v42, 0.0  ;;  %v5922_v46 = vadd.f32 %v5921_v3, %v5920_v40  ;;  %v6034_v1 = vadd.f32 %v6033_v43, %v6032_v9  ;;  %v5923_v4 = vpop.f32.mrb[254].mxu1  ;;  %v6035_v12 = vpop.f32.mrb[254].mxu0 }
 0x2f4   : > { %v5924_v6 = vpop.f32.mrb[255].mxu1  ;;  %v6036_v31 = vpop.f32.mrb[255].mxu0 }
 0x2f5   : > { %4559 = vst [vmem:[%s7848_s24 + $0x68] sm:$0xff] %v4527_v36  ;;  %v4283_v49 = vadd.f32 %v5922_v46, %v7789_v38  ;;  %v5925_v24 = vadd.f32 %v5924_v6, %v5923_v4  ;;  %v6037_v41 = vadd.f32 %v6036_v31, %v6035_v12 }
 0x2f7   : > { %v4444_v45 = vadd.f32 %v6034_v1, %v4283_v49  ;;  %v4286_v33 = vadd.f32 %v5925_v24, %v7792_v56 }
 0x2f9   : > { %v4528_v54 = vmax.f32 %v4444_v45, 0.0  ;;  %v4447_v25 = vadd.f32 %v6037_v41, %v4286_v33  ;;  %v5926_v39 = vpop.f32.mrb[0].mxu1  ;;  %v6038_v32 = vpop.f32.mrb[0].mxu0 }
 0x2fa   : > { %v5927_v62 = vpop.f32.mrb[1].mxu1  ;;  %v6039_v15 = vpop.f32.mrb[1].mxu0 }
 0x2fb   : > { %4560 = vst [vmem:[%s7848_s24 + $0x70] sm:$0xff] %v4528_v54  ;;  %v4529_v14 = vmax.f32 %v4447_v25, 0.0  ;;  %v5928_v63 = vadd.f32 %v5927_v62, %v5926_v39  ;;  %v6040_v26 = vadd.f32 %v6039_v15, %v6038_v32  ;;  %v5929_v21 = vpop.f32.mrb[2].mxu1  ;;  %v6041_v50 = vpop.f32.mrb[2].mxu0 }
 0x2fc   : > { %v5930_v38 = vpop.f32.mrb[3].mxu1  ;;  %v6042_v53 = vpop.f32.mrb[3].mxu0 }
 0x2fd   : > { %4561 = vst [vmem:[%s7848_s24 + $0x78] sm:$0xff] %v4529_v14  ;;  %v4291_v34 = vadd.f32 %v5928_v63, %v7795_v16  ;;  %v5931_v22 = vadd.f32 %v5930_v38, %v5929_v21  ;;  %v6043_v56 = vadd.f32 %v6042_v53, %v6041_v50 }
 0x2ff   : > { %v4452_v48 = vadd.f32 %v6040_v26, %v4291_v34  ;;  %v4294_v37 = vadd.f32 %v5931_v22, %v7798_v60 }
 0x301   : > { %v4530_v17 = vmax.f32 %v4452_v48, 0.0  ;;  %v4455_v0 = vadd.f32 %v6043_v56, %v4294_v37  ;;  %v5932_v13 = vpop.f32.mrb[4].mxu1  ;;  %v6044_v18 = vpop.f32.mrb[4].mxu0 }
 0x302   : > { %v5933_v2 = vpop.f32.mrb[5].mxu1  ;;  %v6045_v44 = vpop.f32.mrb[5].mxu0 }
 0x303   : > { %4562 = vst [vmem:[%s7848_s24 + $0x80] sm:$0xff] %v4530_v17  ;;  %v4531_v51 = vmax.f32 %v4455_v0, 0.0  ;;  %v5934_v5 = vadd.f32 %v5933_v2, %v5932_v13  ;;  %v6046_v28 = vadd.f32 %v6045_v44, %v6044_v18  ;;  %v5935_v61 = vpop.f32.mrb[6].mxu1  ;;  %v6047_v7 = vpop.f32.mrb[6].mxu0 }
 0x304   : > { %v5936_v16 = vpop.f32.mrb[7].mxu1  ;;  %v6048_v52 = vpop.f32.mrb[7].mxu0 }
 0x305   : > { %4563 = vst [vmem:[%s7848_s24 + $0x88] sm:$0xff] %v4531_v51  ;;  %v4299_v29 = vadd.f32 %v5934_v5, %v7801_v57  ;;  %v5937_v42 = vadd.f32 %v5936_v16, %v5935_v61  ;;  %v6049_v60 = vadd.f32 %v6048_v52, %v6047_v7 }
 0x307   : > { %v4460_v40 = vadd.f32 %v6046_v28, %v4299_v29  ;;  %v4302_v9 = vadd.f32 %v5937_v42, %v7804_v59 }
 0x309   : > { %v4532_v3 = vmax.f32 %v4460_v40, 0.0  ;;  %v4463_v43 = vadd.f32 %v6049_v60, %v4302_v9  ;;  %v5938_v36 = vpop.f32.mrb[8].mxu1  ;;  %v6050_v46 = vpop.f32.mrb[8].mxu0 }
 0x30a   : > { %v5939_v1 = vpop.f32.mrb[9].mxu1  ;;  %v6051_v4 = vpop.f32.mrb[9].mxu0 }
 0x30b   : > { %4564 = vst [vmem:[%s7848_s24 + $0x90] sm:$0xff] %v4532_v3  ;;  %v4533_v12 = vmax.f32 %v4463_v43, 0.0  ;;  %v5940_v6 = vadd.f32 %v5939_v1, %v5938_v36  ;;  %v6052_v31 = vadd.f32 %v6051_v4, %v6050_v46  ;;  %v5941_v49 = vpop.f32.mrb[10].mxu1  ;;  %v6053_v24 = vpop.f32.mrb[10].mxu0 }
 0x30c   : > { %v5942_v57 = vpop.f32.mrb[11].mxu1  ;;  %v6054_v41 = vpop.f32.mrb[11].mxu0 }
 0x30d   : > { %4565 = vst [vmem:[%s7848_s24 + $0x98] sm:$0xff] %v4533_v12  ;;  %v4307_v45 = vadd.f32 %v5940_v6, %v7807_v35  ;;  %v5943_v33 = vadd.f32 %v5942_v57, %v5941_v49  ;;  %v6055_v59 = vadd.f32 %v6054_v41, %v6053_v24 }
 0x30f   : > { %v4468_v54 = vadd.f32 %v6052_v31, %v4307_v45  ;;  %v4310_v25 = vadd.f32 %v5943_v33, %v7810_v11 }
 0x311   : > { %v4534_v39 = vmax.f32 %v4468_v54, 0.0  ;;  %v4471_v32 = vadd.f32 %v6055_v59, %v4310_v25  ;;  %v5944_v62 = vpop.f32.mrb[12].mxu1  ;;  %v6056_v15 = vpop.f32.mrb[12].mxu0 }
 0x312   : > { %v5945_v14 = vpop.f32.mrb[13].mxu1  ;;  %v6057_v63 = vpop.f32.mrb[13].mxu0 }
 0x313   : > { %4566 = vst [vmem:[%s7848_s24 + $0xa0] sm:$0xff] %v4534_v39  ;;  %v4535_v26 = vmax.f32 %v4471_v32, 0.0  ;;  %v5946_v21 = vadd.f32 %v5945_v14, %v5944_v62  ;;  %v6058_v50 = vadd.f32 %v6057_v63, %v6056_v15  ;;  %v5947_v38 = vpop.f32.mrb[14].mxu1  ;;  %v6059_v53 = vpop.f32.mrb[14].mxu0 }
 0x314   : > { %v5948_v35 = vpop.f32.mrb[15].mxu1  ;;  %v6060_v34 = vpop.f32.mrb[15].mxu0 }
 0x315   : > { %4567 = vst [vmem:[%s7848_s24 + $0xa8] sm:$0xff] %v4535_v26  ;;  %v4315_v22 = vadd.f32 %v5946_v21, %v7813_v10  ;;  %v5949_v56 = vadd.f32 %v5948_v35, %v5947_v38  ;;  %v6061_v11 = vadd.f32 %v6060_v34, %v6059_v53 }
 0x317   : > { %v4476_v48 = vadd.f32 %v6058_v50, %v4315_v22  ;;  %v4318_v37 = vadd.f32 %v5949_v56, %v7816_v19 }
 0x319   : > { %v4536_v17 = vmax.f32 %v4476_v48, 0.0  ;;  %v4479_v0 = vadd.f32 %v6061_v11, %v4318_v37  ;;  %v5950_v13 = vpop.f32.mrb[16].mxu1  ;;  %v6062_v18 = vpop.f32.mrb[16].mxu0 }
 0x31a   : > { %v5951_v2 = vpop.f32.mrb[17].mxu1  ;;  %v6063_v44 = vpop.f32.mrb[17].mxu0 }
 0x31b   : > { %4568 = vst [vmem:[%s7848_s24 + $0xb0] sm:$0xff] %v4536_v17  ;;  %v4537_v51 = vmax.f32 %v4479_v0, 0.0  ;;  %v5952_v5 = vadd.f32 %v5951_v2, %v5950_v13  ;;  %v6064_v28 = vadd.f32 %v6063_v44, %v6062_v18  ;;  %v5953_v61 = vpop.f32.mrb[18].mxu1  ;;  %v6065_v7 = vpop.f32.mrb[18].mxu0 }
 0x31c   : > { %v5954_v10 = vpop.f32.mrb[19].mxu1  ;;  %v6066_v16 = vpop.f32.mrb[19].mxu0 }
 0x31d   : > { %4569 = vst [vmem:[%s7848_s24 + $0xb8] sm:$0xff] %v4537_v51  ;;  %v4323_v52 = vadd.f32 %v5952_v5, %v7819_v55  ;;  %v5955_v29 = vadd.f32 %v5954_v10, %v5953_v61  ;;  %v6067_v19 = vadd.f32 %v6066_v16, %v6065_v7 }
 0x31f   : > { %v4484_v42 = vadd.f32 %v6064_v28, %v4323_v52  ;;  %v4326_v60 = vadd.f32 %v5955_v29, %v7822_v58 }
 0x321   : > { %v4538_v40 = vmax.f32 %v4484_v42, 0.0  ;;  %v4487_v9 = vadd.f32 %v6067_v19, %v4326_v60  ;;  %v5956_v3 = vpop.f32.mrb[20].mxu1  ;;  %v6068_v43 = vpop.f32.mrb[20].mxu0 }
 0x322   : > { %v5957_v36 = vpop.f32.mrb[21].mxu1  ;;  %v6069_v46 = vpop.f32.mrb[21].mxu0 }
 0x323   : > { %4570 = vst [vmem:[%s7848_s24 + $0xc0] sm:$0xff] %v4538_v40  ;;  %v4539_v1 = vmax.f32 %v4487_v9, 0.0  ;;  %v5958_v4 = vadd.f32 %v5957_v36, %v5956_v3  ;;  %v6070_v12 = vadd.f32 %v6069_v46, %v6068_v43  ;;  %v5959_v6 = vpop.f32.mrb[22].mxu1  ;;  %v6071_v31 = vpop.f32.mrb[22].mxu0 }
 0x324   : > { %v5960_v55 = vpop.f32.mrb[23].mxu1  ;;  %v6072_v49 = vpop.f32.mrb[23].mxu0 }
 0x325   : > { %4571 = vst [vmem:[%s7848_s24 + $0xc8] sm:$0xff] %v4539_v1  ;;  %v4331_v24 = vadd.f32 %v5958_v4, %v7825_v30  ;;  %v5961_v57 = vadd.f32 %v5960_v55, %v5959_v6  ;;  %v6073_v58 = vadd.f32 %v6072_v49, %v6071_v31 }
 0x327   : > { %v4492_v41 = vadd.f32 %v6070_v12, %v4331_v24  ;;  %v4334_v45 = vadd.f32 %v5961_v57, %v7828_v23 }
 0x329   : > { %v4540_v33 = vmax.f32 %v4492_v41, 0.0  ;;  %v4495_v59 = vadd.f32 %v6073_v58, %v4334_v45  ;;  %v5962_v54 = vpop.f32.mrb[24].mxu1  ;;  %v6074_v25 = vpop.f32.mrb[24].mxu0 }
 0x32a   : > { %v5963_v39 = vpop.f32.mrb[25].mxu1  ;;  %v6075_v32 = vpop.f32.mrb[25].mxu0 }
 0x32b   : > { %4572 = vst [vmem:[%s7848_s24 + $0xd0] sm:$0xff] %v4540_v33  ;;  %v4541_v62 = vmax.f32 %v4495_v59, 0.0  ;;  %v5964_v15 = vadd.f32 %v5963_v39, %v5962_v54  ;;  %v6076_v14 = vadd.f32 %v6075_v32, %v6074_v25  ;;  %v5965_v63 = vpop.f32.mrb[26].mxu1  ;;  %v6077_v26 = vpop.f32.mrb[26].mxu0 }
 0x32c   : > { %v5966_v30 = vpop.f32.mrb[27].mxu1  ;;  %v6078_v21 = vpop.f32.mrb[27].mxu0 }
 0x32d   : > { %4573 = vst [vmem:[%s7848_s24 + $0xd8] sm:$0xff] %v4541_v62  ;;  %v4339_v50 = vadd.f32 %v5964_v15, %v7831_v27  ;;  %v5967_v38 = vadd.f32 %v5966_v30, %v5965_v63  ;;  %v6079_v23 = vadd.f32 %v6078_v21, %v6077_v26 }
 0x32f   : > { %v4500_v53 = vadd.f32 %v6076_v14, %v4339_v50  ;;  %v4342_v35 = vadd.f32 %v5967_v38, %v7834_v47 }
 0x331   : > { %v4542_v34 = vmax.f32 %v4500_v53, 0.0  ;;  %v4503_v22 = vadd.f32 %v6079_v23, %v4342_v35  ;;  %v5968_v56 = vpop.f32.mrb[28].mxu1  ;;  %v6080_v11 = vpop.f32.mrb[28].mxu0 }
 0x332   : > { %v5969_v48 = vpop.f32.mrb[29].mxu1  ;;  %v6081_v37 = vpop.f32.mrb[29].mxu0 }
 0x333   : > { %4574 = vst [vmem:[%s7848_s24 + $0xe0] sm:$0xff] %v4542_v34  ;;  %v4543_v17 = vmax.f32 %v4503_v22, 0.0  ;;  %v5970_v0 = vadd.f32 %v5969_v48, %v5968_v56  ;;  %v6082_v13 = vadd.f32 %v6081_v37, %v6080_v11  ;;  %v5971_v18 = vpop.f32.mrb[30].mxu1  ;;  %v6083_v27 = vpop.f32.mrb[30].mxu0 }
 0x334   : > { %v5972_v2 = vpop.f32.mrb[31].mxu1  ;;  %v6084_v44 = vpop.f32.mrb[31].mxu0 }
 0x335   : > { %4575 = vst [vmem:[%s7848_s24 + $0xe8] sm:$0xff] %v4543_v17  ;;  %v4347_v51 = vadd.f32 %v5970_v0, %v7837_v8  ;;  %v5973_v47 = vadd.f32 %v5972_v2, %v5971_v18  ;;  %v6085_v5 = vadd.f32 %v6084_v44, %v6083_v27 }
 0x337   : > { %v4508_v28 = vadd.f32 %v6082_v13, %v4347_v51  ;;  %v4350_v61 = vadd.f32 %v5973_v47, %v7840_v20 }
 0x339   : > { %v4544_v7 = vmax.f32 %v4508_v28, 0.0  ;;  %v4511_v10 = vadd.f32 %v6085_v5, %v4350_v61 }
 0x33b   : > { %4576 = vst [vmem:[%s7848_s24 + $0xf0] sm:$0xff] %v4544_v7  ;;  %v4545_v16 = vmax.f32 %v4511_v10, 0.0 }
 0x33d   : > { %4577 = vst [vmem:[%s7848_s24 + $0xf8] sm:$0xff] %v4545_v16 }
 0x33e PF: > { %s13_s12 = sadd.s32 1, %s6694_s12  }
 0x33f   : > { %p10_p4 = scmp.ge.s32.totalorder %s13_s12, 4  }
 0x341   :  { %12 = sbr.rel (!%p10_p4) target bundleno = 1 (0x1), region = 62 }

// kernel: _lambda_.13
= control target key start
LH: loop header
LB: loop body
LE: loop exit
PB: predicated region body
PF: predicated region fallthrough
CT: control target
= control target key end

     0   :  { %s3631_s12 = smov 0   ;;  %s4421_s0 = inlined_call_operand.vmem [shape: bf16[1792,1152], index: 0, kind: input, shape index: {}]   ;;  %s4422_s1 = inlined_call_operand.vmem [shape: bf16[1152,128], index: 1, kind: input, shape index: {}]   ;;  %s4423_s2 = inlined_call_operand.vmem [shape: f32[1,128], index: 2, kind: input, shape index: {}]   ;;  %s4424_s3 = inlined_call_operand.vmem [shape: f32[1792,128], index: 3, kind: output, shape index: {}]  }
   0x1 LB: > { %s2550_s13 = sadd.s32 4294967295, %s3609_s12   ;;  %p2554_p0 = scmp.ge.s32.totalorder %s3609_s12, 1  ;;  %s3609_s12 = sphi %s3631_s12, %s13_s12  }
   0x2   : > { %p139_p1 = scmp.lt.s32.totalorder %s3609_s12, 8 }
   0x4   : > { %p140_p2 = pnand %p2554_p0, %p139_p1 }
   0x5   : > { %v3323_v0 = vld [vmem:[%s4422_s1 + $0x40] sm:$0xff] (!%p140_p2)   ;;  %s2555_s16 = sshll.u32 (!%p140_p2), %s2550_s13, 5  ;;  %v3325_v2 = vld [vmem:[%s4422_s1 + $0x48] sm:$0xff] (!%p140_p2)   ;;  %v3327_v4 = vld [vmem:[%s4422_s1 + $0x50] sm:$0xff] (!%p140_p2)  }
   0x6   : > { %143 = sbr.rel (%p140_p2) target bundleno = 540 (0x21c), region = 32  ;;  %v3324_v1 = vld [vmem:[%s4422_s1] sm:$0xff] (!%p140_p2)   ;;  %2778 = vmatprep.subr.bf16.mxu0 (!%p140_p2), %v3323_v0  ;;  %3298 = vmatprep.subr.bf16.mxu1 (!%p140_p2), %v3323_v0  ;;  %p165_p3 = scmp.lt.s32.totalorder (!%p140_p2), %s2555_s16, 223  ;;  %v3326_v3 = vld [vmem:[%s4422_s1 + $0x8] sm:$0xff] (!%p140_p2)   ;;  %v3328_v5 = vld [vmem:[%s4422_s1 + $0x10] sm:$0xff] (!%p140_p2)  }
   0x7   : > { %2779 = vmatpush3.bf16.msra.mxu0 (!%p140_p2), %v3324_v1  ;;  %3306 = vmatpush3.bf16.msra.mxu1 (!%p140_p2), %v3324_v1  ;;  %v3329_v6 = vld [vmem:[%s4422_s1 + $0x58] sm:$0xff] (!%p140_p2)   ;;  %v3331_v8 = vld [vmem:[%s4422_s1 + $0x60] sm:$0xff] (!%p140_p2)   ;;  %v3333_v10 = vld [vmem:[%s4422_s1 + $0x68] sm:$0xff] (!%p140_p2)  }
   0x8   : > { %2780 = vmatprep.subr.bf16.mxu0 (!%p140_p2), %v3325_v2  ;;  %3299 = vmatprep.subr.bf16.mxu1 (!%p140_p2), %v3325_v2  ;;  %v3330_v7 = vld [vmem:[%s4422_s1 + $0x18] sm:$0xff] (!%p140_p2)   ;;  %v3332_v9 = vld [vmem:[%s4422_s1 + $0x20] sm:$0xff] (!%p140_p2)   ;;  %v3334_v13 = vld [vmem:[%s4422_s1 + $0x28] sm:$0xff] (!%p140_p2)  }
   0x9   : > { %v3335_v14 = vld [vmem:[%s4422_s1 + $0x70] sm:$0xff] (!%p140_p2)   ;;  %v3337_v16 = vld [vmem:[%s4422_s1 + $0x78] sm:$0xff] (!%p140_p2)   ;;  %v3345_v18 = vld [vmem:[%s4422_s1 + $0xc0] sm:$0xff] (!%p140_p2)  }
   0xa   : > { %v3336_v15 = vld [vmem:[%s4422_s1 + $0x30] sm:$0xff] (!%p140_p2)   ;;  %v3338_v17 = vld [vmem:[%s4422_s1 + $0x38] sm:$0xff] (!%p140_p2)   ;;  %v3348_v21 = vld [vmem:[%s4422_s1 + $0x140] sm:$0xff] (!%p140_p2)  }
   0xb   : > { %2781 = vmatpush3.bf16.msra.mxu0 (!%p140_p2), %v3326_v3  ;;  %3307 = vmatpush3.bf16.msra.mxu1 (!%p140_p2), %v3326_v3  ;;  %v3346_v22 = vld [vmem:[%s4422_s1 + $0x80] sm:$0xff] (!%p140_p2)   ;;  %v3347_v23 = vld [vmem:[%s4422_s1 + $0xc8] sm:$0xff] (!%p140_p2)   ;;  %v3357_v31 = vld [vmem:[%s4422_s1 + $0xd0] sm:$0xff] (!%p140_p2)  }
   0xc   : > { %2782 = vmatprep.subr.bf16.mxu0 (!%p140_p2), %v3327_v4  ;;  %3300 = vmatprep.subr.bf16.mxu1 (!%p140_p2), %v3327_v4  ;;  %v3350_v24 = vld [vmem:[%s4422_s1 + $0x100] sm:$0xff] (!%p140_p2)   ;;  %v3349_v27 = vld [vmem:[%s4422_s1 + $0x88] sm:$0xff] (!%p140_p2)   ;;  %v3358_v32 = vld [vmem:[%s4422_s1 + $0x90] sm:$0xff] (!%p140_p2)  }
   0xd   : > { %s4426_s16 = smov (!%p165_p3, %s2555_s16), 223  ;;  %v3368_v28 = vld [vmem:[%s4422_s1 + $0x148] sm:$0xff]   ;;  %v3359_v34 = vld [vmem:[%s4422_s1 + $0xd8] sm:$0xff]   ;;  %v3367_v40 = vld [vmem:[%s4422_s1 + $0xe0] sm:$0xff]  }
   0xe   : > { %s3314_s29 = smul.u32 36, %s4426_s16  ;;  %v3370_v33 = vld [vmem:[%s4422_s1 + $0x108] sm:$0xff]   ;;  %v3360_v37 = vld [vmem:[%s4422_s1 + $0x98] sm:$0xff]   ;;  %v3369_v41 = vld [vmem:[%s4422_s1 + $0xa0] sm:$0xff]  }
   0xf   : > { %2783 = vmatpush3.bf16.msra.mxu0 %v3328_v5  ;;  %3308 = vmatpush3.bf16.msra.mxu1 %v3328_v5  ;;  %v3371_v42 = vld [vmem:[%s4422_s1 + $0xe8] sm:$0xff]   ;;  %v3382_v43 = vld [vmem:[%s4422_s1 + $0x150] sm:$0xff]   ;;  %v3381_v52 = vld [vmem:[%s4422_s1 + $0xf8] sm:$0xff]  }
  0x10   : > { %2784 = vmatprep.subr.bf16.mxu0 %v3329_v6  ;;  %3301 = vmatprep.subr.bf16.mxu1 %v3329_v6  ;;  %s3672_s9 = scalar_lea.vmem %s4421_s0, %s3314_s29  ;;  %v3384_v46 = vld [vmem:[%s4422_s1 + $0x110] sm:$0xff]   ;;  %v3372_v47 = vld [vmem:[%s4422_s1 + $0xa8] sm:$0xff]   ;;  %v3399_v55 = vld [vmem:[%s4422_s1 + $0x158] sm:$0xff]  }
  0x11   : > { %v3341_v11 = vld [vmem:[%s3672_s9 + $0x4] ss:$36 sps:$4 sm:$0xff]   ;;  %v3351_v25 = vld [vmem:[%s3672_s9 + $0x4c] ss:$36 sps:$4 sm:$0xff]   ;;  %v3361_v35 = vld [vmem:[%s3672_s9 + $0x94] ss:$36 sps:$4 sm:$0xff]  }
  0x12   : > { %v3344_v12 = vld [vmem:[%s3672_s9 + $0x364] ss:$36 sps:$4 sm:$0xff]   ;;  %1689 = vmatprep.mubr.bf16.mxu0 %v3341_v11  ;;  %v3353_v26 = vld [vmem:[%s3672_s9 + $0x3ac] ss:$36 sps:$4 sm:$0xff]   ;;  %v3363_v36 = vld [vmem:[%s3672_s9 + $0x3f4] ss:$36 sps:$4 sm:$0xff]  }
  0x13   : > { %2785 = vmatpush3.bf16.msra.mxu0 %v3330_v7  ;;  %3309 = vmatpush3.bf16.msra.mxu1 %v3330_v7  ;;  %v3339_v19 = vld [vmem:[%s3672_s9] ss:$36 sps:$4 sm:$0xff]   ;;  %v3355_v29 = vld [vmem:[%s3672_s9 + $0x48] ss:$36 sps:$4 sm:$0xff]   ;;  %v3365_v38 = vld [vmem:[%s3672_s9 + $0x90] ss:$36 sps:$4 sm:$0xff]  }
  0x14   : > { %2786 = vmatprep.subr.bf16.mxu0 %v3331_v8  ;;  %3302 = vmatprep.subr.bf16.mxu1 %v3331_v8  ;;  %v3342_v20 = vld [vmem:[%s3672_s9 + $0x360] ss:$36 sps:$4 sm:$0xff]   ;;  %v3356_v30 = vld [vmem:[%s3672_s9 + $0x3a8] ss:$36 sps:$4 sm:$0xff]   ;;  %v3366_v39 = vld [vmem:[%s3672_s9 + $0x3f0] ss:$36 sps:$4 sm:$0xff]  }
  0x15   : > { %1785 = vmatprep.mubr.bf16.mxu1 %v3344_v12  ;;  %v3373_v44 = vld [vmem:[%s3672_s9 + $0xdc] ss:$36 sps:$4 sm:$0xff]   ;;  %v3379_v48 = vld [vmem:[%s4422_s1 + $0xf0] sm:$0xff]   ;;  %v3385_v53 = vld [vmem:[%s3672_s9 + $0x124] ss:$36 sps:$4 sm:$0xff]  }
  0x16   : > { %v3375_v45 = vld [vmem:[%s3672_s9 + $0x43c] ss:$36 sps:$4 sm:$0xff]   ;;  %v3380_v51 = vld [vmem:[%s4422_s1 + $0xb0] sm:$0xff]   ;;  %v3387_v58 = vld [vmem:[%s3672_s9 + $0x8] ss:$36 sps:$4 sm:$0xff]  }
  0x17   : > { %2787 = vmatpush3.bf16.msra.mxu0 %v3332_v9  ;;  %3310 = vmatpush3.bf16.msra.mxu1 %v3332_v9  ;;  %v3377_v49 = vld [vmem:[%s3672_s9 + $0xd8] ss:$36 sps:$4 sm:$0xff]   ;;  %v3389_v54 = vld [vmem:[%s3672_s9 + $0xc] ss:$36 sps:$4 sm:$0xff]   ;;  %v3390_v59 = vld [vmem:[%s3672_s9 + $0x120] ss:$36 sps:$4 sm:$0xff]  }
  0x18   : > { %2788 = vmatprep.subr.bf16.mxu0 %v3333_v10  ;;  %3303 = vmatprep.subr.bf16.mxu1 %v3333_v10  ;;  %v3378_v50 = vld [vmem:[%s3672_s9 + $0x438] ss:$36 sps:$4 sm:$0xff]   ;;  %v3391_v60 = vld [vmem:[%s4422_s1 + $0x1c0] sm:$0xff]   ;;  %v3393_v62 = vld [vmem:[%s3672_s9 + $0x16c] ss:$36 sps:$4 sm:$0xff]  }
  0x19   : > { %v3400_v56 = vld [vmem:[%s4422_s1 + $0x118] sm:$0xff]   ;;  %v3392_v61 = vld [vmem:[%s4422_s1 + $0x180] sm:$0xff]   ;;  %v3407_v1 = vld [vmem:[%s4422_s1 + $0x1c8] sm:$0xff]  }
  0x1a   : > { %v3383_v57 = vld [vmem:[%s4422_s1 + $0xb8] sm:$0xff]   ;;  %v3409_v0 = vld [vmem:[%s4422_s1 + $0x160] sm:$0xff]   ;;  %v3408_v3 = vld [vmem:[%s4422_s1 + $0x188] sm:$0xff]  }
  0x1b   : > { %2789 = vmatpush3.bf16.msra.mxu0 %v3334_v13  ;;  %3311 = vmatpush3.bf16.msra.mxu1 %v3334_v13  ;;  %v3395_v63 = vld [vmem:[%s3672_s9 + $0x54] ss:$36 sps:$4 sm:$0xff]   ;;  %v3410_v2 = vld [vmem:[%s4422_s1 + $0x120] sm:$0xff]   ;;  %v3397_v4 = vld [vmem:[%s3672_s9 + $0x168] ss:$36 sps:$4 sm:$0xff]  }
  0x1c   : > { %2790 = vmatprep.subr.bf16.mxu0 %v3335_v14  ;;  %3304 = vmatprep.subr.bf16.mxu1 %v3335_v14  ;;  %v3398_v5 = vld [vmem:[%s3672_s9 + $0x50] ss:$36 sps:$4 sm:$0xff]   ;;  %v3403_v7 = vld [vmem:[%s3672_s9 + $0x9c] ss:$36 sps:$4 sm:$0xff]   ;;  %v3423_v8 = vld [vmem:[%s4422_s1 + $0x168] sm:$0xff]  }
  0x1d   : > { %v3401_v6 = vld [vmem:[%s3672_s9 + $0x1b4] ss:$36 sps:$4 sm:$0xff]   ;;  %v3425_v10 = vld [vmem:[%s4422_s1 + $0x128] sm:$0xff]   ;;  %v3411_v14 = vld [vmem:[%s3672_s9 + $0x1fc] ss:$36 sps:$4 sm:$0xff]  }
  0x1e   : > { %v3424_v9 = vld [vmem:[%s4422_s1 + $0x1d0] sm:$0xff]   ;;  %v3406_v13 = vld [vmem:[%s3672_s9 + $0x98] ss:$36 sps:$4 sm:$0xff]  }
  0x1f   : > { %2791 = vmatpush3.bf16.msra.mxu0 %v3336_v15  ;;  %3312 = vmatpush3.bf16.msra.mxu1 %v3336_v15  ;;  %v3426_v11 = vld [vmem:[%s4422_s1 + $0x190] sm:$0xff]  }
  0x20   : > { %2792 = vmatprep.subr.bf16.mxu0 %v3337_v16  ;;  %3305 = vmatprep.subr.bf16.mxu1 %v3337_v16  ;;  %v3405_v12 = vld [vmem:[%s3672_s9 + $0x1b0] ss:$36 sps:$4 sm:$0xff]  }
  0x21   : > { %v3433_v15 = vld [vmem:[%s4422_s1 + $0x170] sm:$0xff]  }
  0x22   : > { %v3434_v16 = vld [vmem:[%s4422_s1 + $0x130] sm:$0xff]  }
  0x23   : > { %2793 = vmatpush3.bf16.msra.mxu0 %v3338_v17  ;;  %3313 = vmatpush3.bf16.msra.mxu1 %v3338_v17  ;;  %v3413_v17 = vld [vmem:[%s3672_s9 + $0xe4] ss:$36 sps:$4 sm:$0xff]  }
  0x24   : > { %2890 = vmatprep.subr.bf16.mxu1 %v3345_v18  ;;  %3002 = vmatprep.subr.bf16.mxu0 %v3348_v21  ;;  %v3441_v18 = vld [vmem:[%s4422_s1 + $0x1d8] sm:$0xff]   ;;  %v3416_v21 = vld [vmem:[%s3672_s9 + $0xe0] ss:$36 sps:$4 sm:$0xff]  }
  0x26   : > { %1690 = vmatmul.mubr.bf16.vlgmr.msra.gmra.mrb[0].mxu0 %v3339_v19  ;;  %1786 = vmatmul.mubr.bf16.vlgmr.msra.gmra.mrb[0].mxu1 %v3342_v20  ;;  %v3442_v19 = vld [vmem:[%s4422_s1 + $0x198] sm:$0xff]  }
  0x27   : > { %2891 = vmatpush3.bf16.msra.mxu1 %v3346_v22  ;;  %3003 = vmatpush3.bf16.msra.mxu0 %v3350_v24  ;;  %v3415_v20 = vld [vmem:[%s3672_s9 + $0x1f8] ss:$36 sps:$4 sm:$0xff]   ;;  %v3417_v22 = vld [vmem:[%s3672_s9 + $0x244] ss:$36 sps:$4 sm:$0xff]  }
  0x28   : > { %2892 = vmatprep.subr.bf16.mxu1 %v3347_v23  ;;  %1697 = vmatprep.mubr.bf16.mxu0 %v3351_v25  ;;  %v3419_v23 = vld [vmem:[%s3672_s9 + $0x12c] ss:$36 sps:$4 sm:$0xff]   ;;  %v3449_v24 = vld [vmem:[%s4422_s1 + $0x178] sm:$0xff]  }
  0x29   : > { %1793 = vmatprep.mubr.bf16.mxu1 %v3353_v26  ;;  %3004 = vmatprep.subr.bf16.mxu0 %v3368_v28  ;;  %v3450_v25 = vld [vmem:[%s4422_s1 + $0x138] sm:$0xff]   ;;  %v3457_v26 = vld [vmem:[%s4422_s1 + $0x1e0] sm:$0xff]  }
  0x2a   : > { %v3458_v28 = vld [vmem:[%s4422_s1 + $0x1a0] sm:$0xff]  }
  0x2b   : > { %2893 = vmatpush3.bf16.msra.mxu1 %v3349_v27  ;;  %3005 = vmatpush3.bf16.msra.mxu0 %v3370_v33  ;;  %v3421_v27 = vld [vmem:[%s3672_s9 + $0x240] ss:$36 sps:$4 sm:$0xff]   ;;  %v3472_v33 = vld [vmem:[%s4422_s1 + $0x1e8] sm:$0xff]  }
  0x2c   : > { %2894 = vmatprep.subr.bf16.mxu1 %v3357_v31  ;;  %3006 = vmatprep.subr.bf16.mxu0 %v3382_v43  ;;  %v3427_v31 = vld [vmem:[%s3672_s9 + $0x28c] ss:$36 sps:$4 sm:$0xff]   ;;  %v3443_v43 = vld [vmem:[%s3672_s9 + $0x31c] ss:$36 sps:$4 sm:$0xff]  }
  0x2e   : > { %1698 = vmatmul.mubr.bf16.gmra.mrb[4].mxu0 %v3355_v29  ;;  %1794 = vmatmul.mubr.bf16.gmra.mrb[4].mxu1 %v3356_v30  ;;  %v3459_v29 = vld [vmem:[%s4422_s1 + $0x200] sm:$0xff]   ;;  %v3422_v30 = vld [vmem:[%s3672_s9 + $0x128] ss:$36 sps:$4 sm:$0xff]  }
  0x2f   : > { %2895 = vmatpush3.bf16.msra.mxu1 %v3358_v32  ;;  %1705 = vmatprep.mubr.bf16.mxu0 %v3361_v35  ;;  %v3429_v32 = vld [vmem:[%s3672_s9 + $0x174] ss:$36 sps:$4 sm:$0xff]   ;;  %v3473_v35 = vld [vmem:[%s4422_s1 + $0x1a8] sm:$0xff]  }
  0x30   : > { %2896 = vmatprep.subr.bf16.mxu1 %v3359_v34  ;;  %1801 = vmatprep.mubr.bf16.mxu1 %v3363_v36  ;;  %v3431_v34 = vld [vmem:[%s3672_s9 + $0x288] ss:$36 sps:$4 sm:$0xff]   ;;  %v3432_v36 = vld [vmem:[%s3672_s9 + $0x170] ss:$36 sps:$4 sm:$0xff]  }
  0x31   : > { %3007 = vmatpush3.bf16.msra.mxu0 %v3384_v46  ;;  %v3448_v46 = vld [vmem:[%s3672_s9 + $0x200] ss:$36 sps:$4 sm:$0xff]  }
  0x32   : > { %3008 = vmatprep.subr.bf16.mxu0 %v3399_v55  ;;  %v3474_v55 = vld [vmem:[%s4422_s1 + $0x208] sm:$0xff]  }
  0x33   : > { %2897 = vmatpush3.bf16.msra.mxu1 %v3360_v37  ;;  %v3435_v37 = vld [vmem:[%s3672_s9 + $0x2d4] ss:$36 sps:$4 sm:$0xff]  }
  0x34   : > { %2898 = vmatprep.subr.bf16.mxu1 %v3367_v40  ;;  %v3440_v40 = vld [vmem:[%s3672_s9 + $0x1b8] ss:$36 sps:$4 sm:$0xff]  }
  0x35   : > { %3009 = vmatpush3.bf16.msra.mxu0 %v3400_v56  ;;  %v3489_v56 = vld [vmem:[%s4422_s1 + $0x210] sm:$0xff]  }
  0x36   : > { %1706 = vmatmul.mubr.bf16.gmra.mrb[8].mxu0 %v3365_v38  ;;  %1802 = vmatmul.mubr.bf16.gmra.mrb[8].mxu1 %v3366_v39  ;;  %v3437_v38 = vld [vmem:[%s3672_s9 + $0x1bc] ss:$36 sps:$4 sm:$0xff]   ;;  %v3439_v39 = vld [vmem:[%s3672_s9 + $0x2d0] ss:$36 sps:$4 sm:$0xff]  }
  0x37   : > { %2899 = vmatpush3.bf16.msra.mxu1 %v3369_v41  ;;  %1713 = vmatprep.mubr.bf16.mxu0 %v3373_v44  ;;  %v3487_v41 = vld [vmem:[%s4422_s1 + $0x1f0] sm:$0xff]   ;;  %v3445_v44 = vld [vmem:[%s3672_s9 + $0x204] ss:$36 sps:$4 sm:$0xff]  }
  0x38   : > { %2900 = vmatprep.subr.bf16.mxu1 %v3371_v42  ;;  %1809 = vmatprep.mubr.bf16.mxu1 %v3375_v45  ;;  %v3488_v42 = vld [vmem:[%s4422_s1 + $0x1b0] sm:$0xff]   ;;  %v3447_v45 = vld [vmem:[%s3672_s9 + $0x318] ss:$36 sps:$4 sm:$0xff]  }
  0x39   : > { %3010 = vmatprep.subr.bf16.mxu0 %v3409_v0  ;;  %v3471_v0 = vld [vmem:[%s3672_s9 + $0xa0] ss:$36 sps:$4 sm:$0xff]  }
  0x3a   : > { %3011 = vmatpush3.bf16.msra.mxu0 %v3410_v2  ;;  %v3477_v2 = vld [vmem:[%s3672_s9 + $0xec] ss:$36 sps:$4 sm:$0xff]  }
  0x3b   : > { %2901 = vmatpush3.bf16.msra.mxu1 %v3372_v47  ;;  %3012 = vmatprep.subr.bf16.mxu0 %v3423_v8  ;;  %v3502_v47 = vld [vmem:[%s4422_s1 + $0x1f8] sm:$0xff]  }
  0x3c   : > { %2902 = vmatprep.subr.bf16.mxu1 %v3379_v48  ;;  %v3503_v48 = vld [vmem:[%s4422_s1 + $0x1b8] sm:$0xff]  }
  0x3d   : > { %v3483_v8 = vld [vmem:[%s3672_s9 + $0x134] ss:$36 sps:$4 sm:$0xff]  }
  0x3e   : > { %1714 = vmatmul.mubr.bf16.gmra.mrb[12].mxu0 %v3377_v49  ;;  %1810 = vmatmul.mubr.bf16.gmra.mrb[12].mxu1 %v3378_v50  ;;  %v3451_v49 = vld [vmem:[%s3672_s9 + $0x24c] ss:$36 sps:$4 sm:$0xff]   ;;  %v3455_v50 = vld [vmem:[%s3672_s9 + $0x14] ss:$36 sps:$4 sm:$0xff]  }
  0x3f   : > { %2903 = vmatpush3.bf16.msra.mxu1 %v3380_v51  ;;  %1721 = vmatprep.mubr.bf16.mxu0 %v3385_v53  ;;  %v3453_v51 = vld [vmem:[%s3672_s9 + $0x10] ss:$36 sps:$4 sm:$0xff]  }
  0x40   : > { %2904 = vmatprep.subr.bf16.mxu1 %v3381_v52  ;;  %1850 = vmatprep.mubr.bf16.mxu1 %v3389_v54  ;;  %v3456_v52 = vld [vmem:[%s3672_s9 + $0x248] ss:$36 sps:$4 sm:$0xff]   ;;  %v3460_v53 = vld [vmem:[%s3672_s9 + $0x294] ss:$36 sps:$4 sm:$0xff]   ;;  %v3462_v54 = vld [vmem:[%s3672_s9 + $0x5c] ss:$36 sps:$4 sm:$0xff]  }
  0x41   : > { %3013 = vmatpush3.bf16.msra.mxu0 %v3425_v10  ;;  %v3485_v10 = vld [vmem:[%s3672_s9 + $0x368] ss:$36 sps:$4 sm:$0xff]  }
  0x42   : > { %3014 = vmatprep.subr.bf16.mxu0 %v3433_v15  ;;  %v3495_v15 = vld [vmem:[%s3672_s9 + $0x178] ss:$36 sps:$4 sm:$0xff]  }
  0x43   : > { %2905 = vmatpush3.bf16.msra.mxu1 %v3383_v57  ;;  %v3464_v57 = vld [vmem:[%s3672_s9 + $0x290] ss:$36 sps:$4 sm:$0xff]  }
  0x44   : > { %3114 = vmatprep.subr.bf16.mxu1 %v3391_v60  ;;  %v3468_v60 = vld [vmem:[%s3672_s9 + $0xa4] ss:$36 sps:$4 sm:$0xff]  }
  0x45   : > { %3015 = vmatpush3.bf16.msra.mxu0 %v3434_v16  ;;  %v3496_v16 = vld [vmem:[%s3672_s9 + $0x3fc] ss:$36 sps:$4 sm:$0xff]  }
  0x46   : > { %1722 = vmatmul.mubr.bf16.gmra.mrb[16].mxu0 %v3390_v59  ;;  %1851 = vmatmul.mubr.bf16.vlgmr.msra.gmra.mrb[16].mxu1 %v3387_v58  ;;  %v3465_v58 = vld [vmem:[%s3672_s9 + $0x58] ss:$36 sps:$4 sm:$0xff]  }
  0x47   : > { %3115 = vmatpush3.bf16.msra.mxu1 %v3392_v61  ;;  %1729 = vmatprep.mubr.bf16.mxu0 %v3393_v62  ;;  %v3466_v59 = vld [vmem:[%s3672_s9 + $0x2dc] ss:$36 sps:$4 sm:$0xff]  }
  0x48   : > { %1858 = vmatprep.mubr.bf16.mxu1 %v3395_v63  ;;  %3116 = vmatprep.subr.bf16.mxu1 %v3407_v1  ;;  %v3504_v61 = vld [vmem:[%s4422_s1 + $0x218] sm:$0xff]   ;;  %v3517_v62 = vld [vmem:[%s4422_s1 + $0x220] sm:$0xff]  }
  0x49   : > { %3016 = vmatprep.subr.bf16.mxu0 %v3449_v24  ;;  %v3470_v63 = vld [vmem:[%s3672_s9 + $0x2d8] ss:$36 sps:$4 sm:$0xff]   ;;  %v3475_v1 = vld [vmem:[%s3672_s9 + $0x324] ss:$36 sps:$4 sm:$0xff]  }
  0x4a   : > { %3017 = vmatpush3.bf16.msra.mxu0 %v3450_v25  ;;  %v3511_v24 = vld [vmem:[%s3672_s9 + $0x254] ss:$36 sps:$4 sm:$0xff]   ;;  %v3515_v25 = vld [vmem:[%s3672_s9 + $0x1c] ss:$36 sps:$4 sm:$0xff]  }
  0x4b   : > { %3117 = vmatpush3.bf16.msra.mxu1 %v3408_v3  ;;  %3250 = vmatprep.subr.bf16.mxu0 %v3459_v29  ;;  %v3530_v3 = vld [vmem:[%s4422_s1 + $0x228] sm:$0xff]  }
  0x4c   : > { %3118 = vmatprep.subr.bf16.mxu1 %v3424_v9  ;;  %v3556_v9 = vld [vmem:[%s4422_s1 + $0x238] sm:$0xff]  }
  0x4e   : > { %1730 = vmatmul.mubr.bf16.gmra.mrb[20].mxu0 %v3397_v4  ;;  %1859 = vmatmul.mubr.bf16.gmra.mrb[20].mxu1 %v3398_v5  ;;  %v3479_v4 = vld [vmem:[%s3672_s9 + $0x320] ss:$36 sps:$4 sm:$0xff]   ;;  %v3480_v5 = vld [vmem:[%s3672_s9 + $0xe8] ss:$36 sps:$4 sm:$0xff]  }
  0x4f   : > { %1737 = vmatprep.mubr.bf16.mxu0 %v3401_v6  ;;  %1866 = vmatprep.mubr.bf16.mxu1 %v3403_v7  ;;  %v3543_v6 = vld [vmem:[%s4422_s1 + $0x230] sm:$0xff]  }
  0x50   : > { %3119 = vmatpush3.bf16.msra.mxu1 %v3426_v11  ;;  %v3481_v7 = vld [vmem:[%s3672_s9 + $0x36c] ss:$36 sps:$4 sm:$0xff]  }
  0x51   : > { %3120 = vmatprep.subr.bf16.mxu1 %v3441_v18  ;;  %v3486_v11 = vld [vmem:[%s3672_s9 + $0x130] ss:$36 sps:$4 sm:$0xff]   ;;  %v3500_v18 = vld [vmem:[%s3672_s9 + $0x3f8] ss:$36 sps:$4 sm:$0xff]  }
  0x54   : > { %3121 = vmatpush3.bf16.msra.mxu1 %v3442_v19  ;;  %v3501_v19 = vld [vmem:[%s3672_s9 + $0x1c0] ss:$36 sps:$4 sm:$0xff]  }
  0x55   : > { %3122 = vmatprep.subr.bf16.mxu1 %v3457_v26  ;;  %v3513_v26 = vld [vmem:[%s3672_s9 + $0x18] ss:$36 sps:$4 sm:$0xff]  }
  0x56   : > { %1738 = vmatmul.mubr.bf16.gmra.mrb[24].mxu0 %v3405_v12  ;;  %1867 = vmatmul.mubr.bf16.gmra.mrb[24].mxu1 %v3406_v13  ;;  %v3490_v12 = vld [vmem:[%s3672_s9 + $0x3b4] ss:$36 sps:$4 sm:$0xff]   ;;  %v3492_v13 = vld [vmem:[%s3672_s9 + $0x17c] ss:$36 sps:$4 sm:$0xff]  }
  0x57   : > { %1745 = vmatprep.mubr.bf16.mxu0 %v3411_v14  ;;  %1874 = vmatprep.mubr.bf16.mxu1 %v3413_v17  ;;  %v3494_v14 = vld [vmem:[%s3672_s9 + $0x3b0] ss:$36 sps:$4 sm:$0xff]   ;;  %v3498_v17 = vld [vmem:[%s3672_s9 + $0x1c4] ss:$36 sps:$4 sm:$0xff]  }
  0x58   : > { %3123 = vmatpush3.bf16.msra.mxu1 %v3458_v28  ;;  %v3518_v28 = vld [vmem:[%s3672_s9 + $0x29c] ss:$36 sps:$4 sm:$0xff]  }
  0x59   : > { %3124 = vmatprep.subr.bf16.mxu1 %v3472_v33  ;;  %v3526_v33 = vld [vmem:[%s3672_s9 + $0xac] ss:$36 sps:$4 sm:$0xff]  }
  0x5c   : > { %3125 = vmatpush3.bf16.msra.mxu1 %v3473_v35  ;;  %v3529_v35 = vld [vmem:[%s3672_s9 + $0xa8] ss:$36 sps:$4 sm:$0xff]  }
  0x5d   : > { %3126 = vmatprep.subr.bf16.mxu1 %v3487_v41  ;;  %v3539_v41 = vld [vmem:[%s3672_s9 + $0x13c] ss:$36 sps:$4 sm:$0xff]  }
  0x5e   : > { %1746 = vmatmul.mubr.bf16.gmra.mrb[28].mxu0 %v3415_v20  ;;  %1875 = vmatmul.mubr.bf16.gmra.mrb[28].mxu1 %v3416_v21  ;;  %v3505_v20 = vld [vmem:[%s3672_s9 + $0x444] ss:$36 sps:$4 sm:$0xff]   ;;  %v3507_v21 = vld [vmem:[%s3672_s9 + $0x20c] ss:$36 sps:$4 sm:$0xff]  }
  0x5f   : > { %1753 = vmatprep.mubr.bf16.mxu0 %v3417_v22  ;;  %1882 = vmatprep.mubr.bf16.mxu1 %v3419_v23  ;;  %v3509_v22 = vld [vmem:[%s3672_s9 + $0x440] ss:$36 sps:$4 sm:$0xff]   ;;  %v3510_v23 = vld [vmem:[%s3672_s9 + $0x208] ss:$36 sps:$4 sm:$0xff]  }
  0x60   : > { %3127 = vmatpush3.bf16.msra.mxu1 %v3488_v42  ;;  %v3541_v42 = vld [vmem:[%s3672_s9 + $0x370] ss:$36 sps:$4 sm:$0xff]  }
  0x61   : > { %3128 = vmatprep.subr.bf16.mxu1 %v3502_v47  ;;  %v3549_v47 = vld [vmem:[%s3672_s9 + $0x180] ss:$36 sps:$4 sm:$0xff]  }
  0x64   : > { %3129 = vmatpush3.bf16.msra.mxu1 %v3503_v48  ;;  %v3550_v48 = vld [vmem:[%s3672_s9 + $0x404] ss:$36 sps:$4 sm:$0xff]  }
  0x66   : > { %1754 = vmatmul.mubr.bf16.gmra.mrb[32].mxu0 %v3421_v27  ;;  %1883 = vmatmul.mubr.bf16.gmra.mrb[32].mxu1 %v3422_v30  ;;  %v3516_v27 = vld [vmem:[%s3672_s9 + $0x250] ss:$36 sps:$4 sm:$0xff]   ;;  %v3522_v30 = vld [vmem:[%s3672_s9 + $0x298] ss:$36 sps:$4 sm:$0xff]  }
  0x67   : > { %1761 = vmatprep.mubr.bf16.mxu0 %v3427_v31  ;;  %1890 = vmatprep.mubr.bf16.mxu1 %v3429_v32  ;;  %v3523_v31 = vld [vmem:[%s3672_s9 + $0x60] ss:$36 sps:$4 sm:$0xff]  }
  0x68   : > { %v3524_v32 = vld [vmem:[%s3672_s9 + $0x2e4] ss:$36 sps:$4 sm:$0xff]  }
  0x6e   : > { %1762 = vmatmul.mubr.bf16.gmra.mrb[36].mxu0 %v3431_v34  ;;  %1891 = vmatmul.mubr.bf16.gmra.mrb[36].mxu1 %v3432_v36  ;;  %v3528_v34 = vld [vmem:[%s3672_s9 + $0x2e0] ss:$36 sps:$4 sm:$0xff]   ;;  %v3531_v36 = vld [vmem:[%s3672_s9 + $0x32c] ss:$36 sps:$4 sm:$0xff]  }
  0x6f   : > { %1769 = vmatprep.mubr.bf16.mxu0 %v3435_v37  ;;  %1898 = vmatprep.mubr.bf16.mxu1 %v3437_v38  ;;  %v3533_v37 = vld [vmem:[%s3672_s9 + $0xf4] ss:$36 sps:$4 sm:$0xff]   ;;  %v3535_v38 = vld [vmem:[%s3672_s9 + $0x328] ss:$36 sps:$4 sm:$0xff]  }
  0x76   : > { %1770 = vmatmul.mubr.bf16.gmra.mrb[40].mxu0 %v3439_v39  ;;  %1899 = vmatmul.mubr.bf16.gmra.mrb[40].mxu1 %v3440_v40  ;;  %v3536_v39 = vld [vmem:[%s3672_s9 + $0xf0] ss:$36 sps:$4 sm:$0xff]  }
  0x77   : > { %1777 = vmatprep.mubr.bf16.mxu0 %v3443_v43  ;;  %1906 = vmatprep.mubr.bf16.mxu1 %v3445_v44  ;;  %v3537_v40 = vld [vmem:[%s3672_s9 + $0x374] ss:$36 sps:$4 sm:$0xff]   ;;  %v3544_v44 = vld [vmem:[%s3672_s9 + $0x3bc] ss:$36 sps:$4 sm:$0xff]  }
  0x78   : > { %v3542_v43 = vld [vmem:[%s3672_s9 + $0x138] ss:$36 sps:$4 sm:$0xff]  }
  0x7e   : > { %1778 = vmatmul.mubr.bf16.gmra.mrb[44].mxu0 %v3447_v45  ;;  %1907 = vmatmul.mubr.bf16.gmra.mrb[44].mxu1 %v3448_v46  ;;  %v3546_v45 = vld [vmem:[%s3672_s9 + $0x184] ss:$36 sps:$4 sm:$0xff]   ;;  %v3548_v46 = vld [vmem:[%s3672_s9 + $0x3b8] ss:$36 sps:$4 sm:$0xff]  }
  0x7f   : > { %1914 = vmatprep.mubr.bf16.mxu1 %v3451_v49  ;;  %2011 = vmatprep.mubr.bf16.mxu0 %v3455_v50  ;;  %v3552_v49 = vld [vmem:[%s3672_s9 + $0x1cc] ss:$36 sps:$4 sm:$0xff]   ;;  %v3554_v50 = vld [vmem:[%s3672_s9 + $0x400] ss:$36 sps:$4 sm:$0xff]  }
  0x86   : > { %1915 = vmatmul.mubr.bf16.gmra.mrb[48].mxu1 %v3456_v52  ;;  %2012 = vmatmul.mubr.bf16.vlgmr.msra.gmra.mrb[48].mxu0 %v3453_v51  ;;  %v3555_v51 = vld [vmem:[%s3672_s9 + $0x1c8] ss:$36 sps:$4 sm:$0xff]  }
  0x87   : > { %3251 = vmatpush3.bf16.msra.mxu0 %v3459_v29  ;;  %1922 = vmatprep.mubr.bf16.mxu1 %v3460_v53  ;;  %v3520_v29 = vld [vmem:[%s3672_s9 + $0x64] ss:$36 sps:$4 sm:$0xff]   ;;  %v3557_v52 = vld [vmem:[%s3672_s9 + $0x44c] ss:$36 sps:$4 sm:$0xff]   ;;  %v3559_v53 = vld [vmem:[%s3672_s9 + $0x214] ss:$36 sps:$4 sm:$0xff]  }
  0x88   : > { %2019 = vmatprep.mubr.bf16.mxu0 %v3462_v54  ;;  %3252 = vmatprep.subr.bf16.mxu0 %v3474_v55 }
  0x8b   : > { %3253 = vmatpush3.bf16.msra.mxu0 %v3474_v55 }
  0x8c   : > { %3254 = vmatprep.subr.bf16.mxu0 %v3489_v56 }
  0x8e   : > { %1923 = vmatmul.mubr.bf16.gmra.mrb[52].mxu1 %v3464_v57  ;;  %2020 = vmatmul.mubr.bf16.gmra.mrb[52].mxu0 %v3465_v58  ;;  %v3561_v58 = vld [vmem:[%s3672_s9 + $0x448] ss:$36 sps:$4 sm:$0xff]  }
  0x8f   : > { %1930 = vmatprep.mubr.bf16.mxu1 %v3466_v59  ;;  %2027 = vmatprep.mubr.bf16.mxu0 %v3468_v60  ;;  %v3562_v59 = vld [vmem:[%s3672_s9 + $0x210] ss:$36 sps:$4 sm:$0xff]  }
  0x90   : > { %3255 = vmatpush3.bf16.msra.mxu0 %v3489_v56 }
  0x91   : > { %3256 = vmatprep.subr.bf16.mxu0 %v3504_v61 }
  0x94   : > { %3257 = vmatpush3.bf16.msra.mxu0 %v3504_v61 }
  0x95   : > { %3258 = vmatprep.subr.bf16.mxu0 %v3517_v62 }
  0x96   : > { %1931 = vmatmul.mubr.bf16.gmra.mrb[56].mxu1 %v3470_v63  ;;  %2028 = vmatmul.mubr.bf16.gmra.mrb[56].mxu0 %v3471_v0  ;;  %v3563_v0 = vld [vmem:[%s3672_s9 + $0x25c] ss:$36 sps:$4 sm:$0xff]  }
  0x97   : > { %1938 = vmatprep.mubr.bf16.mxu1 %v3475_v1  ;;  %2035 = vmatprep.mubr.bf16.mxu0 %v3477_v2  ;;  %v3565_v1 = vld [vmem:[%s3672_s9 + $0x20] ss:$36 sps:$4 sm:$0xff]  }
  0x98   : > { %3259 = vmatpush3.bf16.msra.mxu0 %v3517_v62 }
  0x99   : > { %3260 = vmatprep.subr.bf16.mxu0 %v3530_v3 }
  0x9c   : > { %3261 = vmatpush3.bf16.msra.mxu0 %v3530_v3 }
  0x9d   : > { %3262 = vmatprep.subr.bf16.mxu0 %v3543_v6 }
  0x9e   : > { %1939 = vmatmul.mubr.bf16.gmra.mrb[60].mxu1 %v3479_v4  ;;  %2036 = vmatmul.mubr.bf16.gmra.mrb[60].mxu0 %v3480_v5 }
  0x9f   : > { %1946 = vmatprep.mubr.bf16.mxu1 %v3481_v7  ;;  %2043 = vmatprep.mubr.bf16.mxu0 %v3483_v8 }
  0xa0   : > { %3263 = vmatpush3.bf16.msra.mxu0 %v3543_v6 }
  0xa1   : > { %3264 = vmatprep.subr.bf16.mxu0 %v3556_v9 }
  0xa4   : > { %3265 = vmatpush3.bf16.msra.mxu0 %v3556_v9 }
  0xa6   : > { %1947 = vmatmul.mubr.bf16.gmra.mrb[64].mxu1 %v3485_v10  ;;  %2044 = vmatmul.mubr.bf16.gmra.mrb[64].mxu0 %v3486_v11  ;;  %v3566_v10 = vld [vmem:[%s3672_s9 + $0x258] ss:$36 sps:$4 sm:$0xff]   ;;  %v3567_v11 = vld [vmem:[%s3672_s9 + $0x68] ss:$36 sps:$4 sm:$0xff]  }
  0xa7   : > { %1954 = vmatprep.mubr.bf16.mxu1 %v3490_v12  ;;  %2051 = vmatprep.mubr.bf16.mxu0 %v3492_v13 }
  0xae   : > { %1955 = vmatmul.mubr.bf16.gmra.mrb[68].mxu1 %v3494_v14  ;;  %2052 = vmatmul.mubr.bf16.gmra.mrb[68].mxu0 %v3495_v15 }
  0xaf   : > { %1962 = vmatprep.mubr.bf16.mxu1 %v3496_v16  ;;  %2059 = vmatprep.mubr.bf16.mxu0 %v3498_v17  ;;  %v3568_v16 = vld [vmem:[%s3672_s9 + $0x2a4] ss:$36 sps:$4 sm:$0xff]   ;;  %v3570_v17 = vld [vmem:[%s3672_s9 + $0xb0] ss:$36 sps:$4 sm:$0xff]  }
  0xb6   : > { %1963 = vmatmul.mubr.bf16.gmra.mrb[72].mxu1 %v3500_v18  ;;  %2060 = vmatmul.mubr.bf16.gmra.mrb[72].mxu0 %v3501_v19 }
  0xb7   : > { %1970 = vmatprep.mubr.bf16.mxu1 %v3505_v20  ;;  %2067 = vmatprep.mubr.bf16.mxu0 %v3507_v21 }
  0xbe   : > { %1971 = vmatmul.mubr.bf16.gmra.mrb[76].mxu1 %v3509_v22  ;;  %2068 = vmatmul.mubr.bf16.gmra.mrb[76].mxu0 %v3510_v23 }
  0xbf   : > { %2075 = vmatprep.mubr.bf16.mxu0 %v3511_v24  ;;  %2172 = vmatprep.mubr.bf16.mxu1 %v3515_v25 }
  0xc6   : > { %2076 = vmatmul.mubr.bf16.gmra.mrb[80].mxu0 %v3516_v27  ;;  %2173 = vmatmul.mubr.bf16.vlgmr.msra.gmra.mrb[80].mxu1 %v3513_v26  ;;  %v3571_v26 = vld [vmem:[%s3672_s9 + $0x2a0] ss:$36 sps:$4 sm:$0xff]   ;;  %v3572_v27 = vld [vmem:[%s3672_s9 + $0xf8] ss:$36 sps:$4 sm:$0xff]  }
  0xc7   : > { %2083 = vmatprep.mubr.bf16.mxu0 %v3518_v28  ;;  %2180 = vmatprep.mubr.bf16.mxu1 %v3520_v29 }
  0xce   : > { %2084 = vmatmul.mubr.bf16.gmra.mrb[84].mxu0 %v3522_v30  ;;  %2181 = vmatmul.mubr.bf16.gmra.mrb[84].mxu1 %v3523_v31 }
  0xcf   : > { %2091 = vmatprep.mubr.bf16.mxu0 %v3524_v32  ;;  %2188 = vmatprep.mubr.bf16.mxu1 %v3526_v33  ;;  %v3573_v32 = vld [vmem:[%s3672_s9 + $0x2ec] ss:$36 sps:$4 sm:$0xff]   ;;  %v3575_v33 = vld [vmem:[%s3672_s9 + $0x140] ss:$36 sps:$4 sm:$0xff]  }
  0xd6   : > { %2092 = vmatmul.mubr.bf16.gmra.mrb[88].mxu0 %v3528_v34  ;;  %2189 = vmatmul.mubr.bf16.gmra.mrb[88].mxu1 %v3529_v35 }
  0xd7   : > { %2099 = vmatprep.mubr.bf16.mxu0 %v3531_v36  ;;  %2196 = vmatprep.mubr.bf16.mxu1 %v3533_v37 }
  0xde   : > { %2100 = vmatmul.mubr.bf16.gmra.mrb[92].mxu0 %v3535_v38  ;;  %2197 = vmatmul.mubr.bf16.gmra.mrb[92].mxu1 %v3536_v39 }
  0xdf   : > { %2107 = vmatprep.mubr.bf16.mxu0 %v3537_v40  ;;  %2204 = vmatprep.mubr.bf16.mxu1 %v3539_v41 }
  0xe6   : > { %2108 = vmatmul.mubr.bf16.gmra.mrb[96].mxu0 %v3541_v42  ;;  %2205 = vmatmul.mubr.bf16.gmra.mrb[96].mxu1 %v3542_v43  ;;  %v3576_v42 = vld [vmem:[%s3672_s9 + $0x2e8] ss:$36 sps:$4 sm:$0xff]  }
  0xe7   : > { %2115 = vmatprep.mubr.bf16.mxu0 %v3544_v44  ;;  %2212 = vmatprep.mubr.bf16.mxu1 %v3546_v45  ;;  %v3577_v43 = vld [vmem:[%s3672_s9 + $0x188] ss:$36 sps:$4 sm:$0xff]  }
  0xee   : > { %2116 = vmatmul.mubr.bf16.gmra.mrb[100].mxu0 %v3548_v46  ;;  %2213 = vmatmul.mubr.bf16.gmra.mrb[100].mxu1 %v3549_v47 }
  0xef   : > { %2123 = vmatprep.mubr.bf16.mxu0 %v3550_v48  ;;  %2220 = vmatprep.mubr.bf16.mxu1 %v3552_v49  ;;  %v3578_v48 = vld [vmem:[%s3672_s9 + $0x334] ss:$36 sps:$4 sm:$0xff]  }
  0xf0   : > { %v3580_v49 = vld [vmem:[%s3672_s9 + $0x1d0] ss:$36 sps:$4 sm:$0xff]  }
  0xf6   : > { %2124 = vmatmul.mubr.bf16.gmra.mrb[104].mxu0 %v3554_v50  ;;  %2221 = vmatmul.mubr.bf16.gmra.mrb[104].mxu1 %v3555_v51 }
  0xf7   : > { %2131 = vmatprep.mubr.bf16.mxu0 %v3557_v52  ;;  %2228 = vmatprep.mubr.bf16.mxu1 %v3559_v53 }
  0xf9   : > { %v2866_v54 = vpop.f32.mrb[0].mxu1  ;;  %v2794_v55 = vpop.f32.mrb[0].mxu0 }
  0xfa   : > { %v2867_v56 = vpop.f32.mrb[1].mxu1  ;;  %v2795_v57 = vpop.f32.mrb[1].mxu0 }
  0xfb   : > { %v3975_v60 = vadd.f32 %v2867_v56, %v2866_v54  ;;  %v2869_v61 = vpop.f32.mrb[2].mxu1  ;;  %v3977_v62 = vadd.f32 %v2795_v57, %v2794_v55  ;;  %v2797_v63 = vpop.f32.mrb[2].mxu0  ;;  %v4024_v54 = vld [vmem:[%s4423_s2] ss:$0 sm:$0xff] }
  0xfc   : > { %v2870_v2 = vpop.f32.mrb[3].mxu1  ;;  %v2798_v3 = vpop.f32.mrb[3].mxu0 }
  0xfd   : > { %v3981_v4 = vadd.f32 %v2870_v2, %v2869_v61  ;;  %v3983_v5 = vadd.f32 %v2798_v3, %v2797_v63  ;;  %v3582_v61 = vld [vmem:[%s3672_s9 + $0x218] ss:$36 sps:$4 sm:$0xff]   ;;  %v1692_v63 = vadd.f32 %v3977_v62, %v4024_v54 }
  0xfe   : > { %2132 = vmatmul.mubr.bf16.gmra.mrb[108].mxu0 %v3561_v58  ;;  %2229 = vmatmul.mubr.bf16.gmra.mrb[108].mxu1 %v3562_v59  ;;  %v3581_v59 = vld [vmem:[%s3672_s9 + $0x330] ss:$36 sps:$4 sm:$0xff]  }
  0xff   : > { %2236 = vmatprep.mubr.bf16.mxu1 %v3563_v0  ;;  %3266 = vmatprep.mubr.bf16.mxu0 %v3565_v1 }
 0x101   : > { %v2872_v6 = vpop.f32.mrb[4].mxu1  ;;  %v2800_v7 = vpop.f32.mrb[4].mxu0 }
 0x102   : > { %v2873_v8 = vpop.f32.mrb[5].mxu1  ;;  %v2801_v9 = vpop.f32.mrb[5].mxu0 }
 0x103   : > { %v3987_v12 = vadd.f32 %v2873_v8, %v2872_v6  ;;  %v2875_v13 = vpop.f32.mrb[6].mxu1  ;;  %v3989_v14 = vadd.f32 %v2801_v9, %v2800_v7  ;;  %v2803_v15 = vpop.f32.mrb[6].mxu0  ;;  %v3583_v6 = vld [vmem:[%s3672_s9 + $0x37c] ss:$36 sps:$4 sm:$0xff]  }
 0x104   : > { %v2876_v18 = vpop.f32.mrb[7].mxu1  ;;  %v2804_v19 = vpop.f32.mrb[7].mxu0  ;;  %v3585_v7 = vld [vmem:[%s3672_s9 + $0x260] ss:$36 sps:$4 sm:$0xff]  }
 0x105   : > { %v3993_v20 = vadd.f32 %v2876_v18, %v2875_v13  ;;  %v3995_v21 = vadd.f32 %v2804_v19, %v2803_v15 }
 0x106   : > { %2237 = vmatmul.mubr.bf16.gmra.mrb[112].mxu1 %v3566_v10  ;;  %3267 = vmatmul.mubr.bf16.vlgmr.msra.gmra.mrb[112].mxu0 %v3567_v11  ;;  %v1695_v10 = vadd.f32 %v3983_v5, %v4024_v54  ;;  %v1700_v5 = vadd.f32 %v3989_v14, %v4024_v54 }
 0x107   : > { %2244 = vmatprep.mubr.bf16.mxu1 %v3568_v16  ;;  %3270 = vmatprep.mubr.bf16.mxu0 %v3570_v17 }
 0x109   : > { %v2878_v22 = vpop.f32.mrb[8].mxu1  ;;  %v2806_v23 = vpop.f32.mrb[8].mxu0 }
 0x10a   : > { %v2879_v24 = vpop.f32.mrb[9].mxu1  ;;  %v2807_v25 = vpop.f32.mrb[9].mxu0 }
 0x10b   : > { %v3999_v28 = vadd.f32 %v2879_v24, %v2878_v22  ;;  %v2881_v29 = vpop.f32.mrb[10].mxu1  ;;  %v4001_v30 = vadd.f32 %v2807_v25, %v2806_v23  ;;  %v2809_v31 = vpop.f32.mrb[10].mxu0  ;;  %v3586_v22 = vld [vmem:[%s3672_s9 + $0x378] ss:$36 sps:$4 sm:$0xff]   ;;  %v3587_v23 = vld [vmem:[%s3672_s9 + $0x2a8] ss:$36 sps:$4 sm:$0xff]  }
 0x10c   : > { %v2882_v34 = vpop.f32.mrb[11].mxu1  ;;  %v2810_v35 = vpop.f32.mrb[11].mxu0 }
 0x10d   : > { %v4005_v36 = vadd.f32 %v2882_v34, %v2881_v29  ;;  %v4007_v37 = vadd.f32 %v2810_v35, %v2809_v31  ;;  %v3588_v29 = vld [vmem:[%s3672_s9 + $0x3c4] ss:$36 sps:$4 sm:$0xff]   ;;  %v3590_v31 = vld [vmem:[%s3672_s9 + $0x2f0] ss:$36 sps:$4 sm:$0xff]   ;;  %v1703_v34 = vadd.f32 %v3995_v21, %v4024_v54  ;;  %v1708_v21 = vadd.f32 %v4001_v30, %v4024_v54 }
 0x10e   : > { %2245 = vmatmul.mubr.bf16.gmra.mrb[116].mxu1 %v3571_v26  ;;  %3271 = vmatmul.mubr.bf16.gmra.mrb[116].mxu0 %v3572_v27 }
 0x10f   : > { %2252 = vmatprep.mubr.bf16.mxu1 %v3573_v32  ;;  %3274 = vmatprep.mubr.bf16.mxu0 %v3575_v33 }
 0x111   : > { %v2884_v38 = vpop.f32.mrb[12].mxu1  ;;  %v2812_v39 = vpop.f32.mrb[12].mxu0 }
 0x112   : > { %v2885_v40 = vpop.f32.mrb[13].mxu1  ;;  %v2813_v41 = vpop.f32.mrb[13].mxu0 }
 0x113   : > { %v4011_v44 = vadd.f32 %v2885_v40, %v2884_v38  ;;  %v2887_v45 = vpop.f32.mrb[14].mxu1  ;;  %v4013_v46 = vadd.f32 %v2813_v41, %v2812_v39  ;;  %v2815_v47 = vpop.f32.mrb[14].mxu0 }
 0x114   : > { %v2888_v50 = vpop.f32.mrb[15].mxu1  ;;  %v2816_v51 = vpop.f32.mrb[15].mxu0 }
 0x115   : > { %v4017_v52 = vadd.f32 %v2888_v50, %v2887_v45  ;;  %v4019_v53 = vadd.f32 %v2816_v51, %v2815_v47  ;;  %v3591_v45 = vld [vmem:[%s3672_s9 + $0x3c0] ss:$36 sps:$4 sm:$0xff]   ;;  %v3592_v47 = vld [vmem:[%s3672_s9 + $0x338] ss:$36 sps:$4 sm:$0xff]  }
 0x116   : > { %2253 = vmatmul.mubr.bf16.gmra.mrb[120].mxu1 %v3576_v42  ;;  %3275 = vmatmul.mubr.bf16.gmra.mrb[120].mxu0 %v3577_v43 }
 0x117   : > { %2260 = vmatprep.mubr.bf16.mxu1 %v3578_v48  ;;  %3278 = vmatprep.mubr.bf16.mxu0 %v3580_v49 }
 0x119   : > { %v2906_v55 = vpop.f32.mrb[16].mxu1  ;;  %v2818_v56 = vpop.f32.mrb[16].mxu0 }
 0x11a   : > { %v2907_v57 = vpop.f32.mrb[17].mxu1  ;;  %v2819_v58 = vpop.f32.mrb[17].mxu0 }
 0x11b   : > { %v2908_v0 = vadd.f32 %v2907_v57, %v2906_v55  ;;  %v2909_v1 = vpop.f32.mrb[18].mxu1  ;;  %v4030_v2 = vadd.f32 %v2819_v58, %v2818_v56  ;;  %v2821_v3 = vpop.f32.mrb[18].mxu0  ;;  %v3593_v55 = vld [vmem:[%s3672_s9 + $0x40c] ss:$36 sps:$4 sm:$0xff]   ;;  %v3595_v56 = vld [vmem:[%s3672_s9 + $0x380] ss:$36 sps:$4 sm:$0xff]  }
 0x11c   : > { %v2910_v8 = vpop.f32.mrb[19].mxu1  ;;  %v2822_v9 = vpop.f32.mrb[19].mxu0 }
 0x11d   : > { %v4036_v11 = vadd.f32 %v2908_v0, %v1692_v63  ;;  %v2911_v13 = vadd.f32 %v2910_v8, %v2909_v1  ;;  %v4038_v15 = vadd.f32 %v2822_v9, %v2821_v3  ;;  %v3596_v8 = vld [vmem:[%s3672_s9 + $0x408] ss:$36 sps:$4 sm:$0xff]  }
 0x11e   : > { %2261 = vmatmul.mubr.bf16.gmra.mrb[124].mxu1 %v3581_v59  ;;  %3279 = vmatmul.mubr.bf16.gmra.mrb[124].mxu0 %v3582_v61  ;;  %v1711_v59 = vadd.f32 %v4007_v37, %v4024_v54  ;;  %v3597_v9 = vld [vmem:[%s3672_s9 + $0x3c8] ss:$36 sps:$4 sm:$0xff]   ;;  %v1716_v37 = vadd.f32 %v4013_v46, %v4024_v54 }
 0x11f   : > { %v4040_v62 = vadd.f32 %v2911_v13, %v1695_v10  ;;  %2268 = vmatprep.mubr.bf16.mxu1 %v3583_v6  ;;  %3282 = vmatprep.mubr.bf16.mxu0 %v3585_v7 }
 0x121   : > { %v2912_v16 = vpop.f32.mrb[20].mxu1  ;;  %v2824_v17 = vpop.f32.mrb[20].mxu0 }
 0x122   : > { %v2913_v18 = vpop.f32.mrb[21].mxu1  ;;  %v2825_v19 = vpop.f32.mrb[21].mxu0 }
 0x123   : > { %v2914_v24 = vadd.f32 %v2913_v18, %v2912_v16  ;;  %v2915_v25 = vpop.f32.mrb[22].mxu1  ;;  %v4046_v26 = vadd.f32 %v2825_v19, %v2824_v17  ;;  %v2827_v27 = vpop.f32.mrb[22].mxu0  ;;  %v3598_v18 = vld [vmem:[%s3672_s9 + $0x454] ss:$36 sps:$4 sm:$0xff]  }
 0x124   : > { %v2916_v32 = vpop.f32.mrb[23].mxu1  ;;  %v2828_v33 = vpop.f32.mrb[23].mxu0  ;;  %v3600_v19 = vld [vmem:[%s3672_s9 + $0x410] ss:$36 sps:$4 sm:$0xff]  }
 0x125   : > { %v4052_v35 = vadd.f32 %v2914_v24, %v1700_v5  ;;  %v2917_v38 = vadd.f32 %v2916_v32, %v2915_v25  ;;  %v4054_v39 = vadd.f32 %v2828_v33, %v2827_v27  ;;  %v1719_v5 = vadd.f32 %v4019_v53, %v4024_v54 }
 0x126   : > { %2269 = vmatmul.mubr.bf16.gmra.mrb[128].mxu1 %v3586_v22  ;;  %3283 = vmatmul.mubr.bf16.gmra.mrb[128].mxu0 %v3587_v23  ;;  %v1724_v53 = vadd.f32 %v4030_v2, %v4024_v54 }
 0x127   : > { %v4056_v14 = vadd.f32 %v2917_v38, %v1703_v34  ;;  %2276 = vmatprep.mubr.bf16.mxu1 %v3588_v29  ;;  %3286 = vmatprep.mubr.bf16.mxu0 %v3590_v31  ;;  %v3601_v34 = vld [vmem:[%s3672_s9 + $0x450] ss:$36 sps:$4 sm:$0xff]   ;;  %v3602_v38 = vld [vmem:[%s3672_s9 + $0x458] ss:$36 sps:$4 sm:$0xff]   ;;  %s2558_s9 = sshll.u32 %s4426_s16, 3 }
 0x128   : > { %s4346_s22 = scalar_lea.vmem %s4424_s3, %s2558_s9 }
 0x129   : > { %v2918_v40 = vpop.f32.mrb[24].mxu1  ;;  %v2830_v41 = vpop.f32.mrb[24].mxu0 }
 0x12a   : > { %v2919_v42 = vpop.f32.mrb[25].mxu1  ;;  %v2831_v43 = vpop.f32.mrb[25].mxu0 }
 0x12b   : > { %v2920_v48 = vadd.f32 %v2919_v42, %v2918_v40  ;;  %v2921_v49 = vpop.f32.mrb[26].mxu1  ;;  %v4062_v50 = vadd.f32 %v2831_v43, %v2830_v41  ;;  %v2833_v51 = vpop.f32.mrb[26].mxu0 }
 0x12c   : > { %v2922_v57 = vpop.f32.mrb[27].mxu1  ;;  %v2834_v58 = vpop.f32.mrb[27].mxu0 }
 0x12d   : > { %v4068_v61 = vadd.f32 %v2920_v48, %v1708_v21  ;;  %v2923_v63 = vadd.f32 %v2922_v57, %v2921_v49  ;;  %v4070_v0 = vadd.f32 %v2834_v58, %v2833_v51  ;;  %v1727_v21 = vadd.f32 %v4038_v15, %v4024_v54 }
 0x12e   : > { %2277 = vmatmul.mubr.bf16.gmra.mrb[132].mxu1 %v3591_v45  ;;  %3287 = vmatmul.mubr.bf16.gmra.mrb[132].mxu0 %v3592_v47 }
 0x12f   : > { %v4072_v30 = vadd.f32 %v2923_v63, %v1711_v59  ;;  %2284 = vmatprep.mubr.bf16.mxu1 %v3593_v55  ;;  %3290 = vmatprep.mubr.bf16.mxu0 %v3595_v56  ;;  %v1732_v59 = vadd.f32 %v4046_v26, %v4024_v54 }
 0x131   : > { %v2924_v1 = vpop.f32.mrb[28].mxu1  ;;  %v2836_v3 = vpop.f32.mrb[28].mxu0 }
 0x132   : > { %v2925_v6 = vpop.f32.mrb[29].mxu1  ;;  %v2837_v7 = vpop.f32.mrb[29].mxu0 }
 0x133   : > { %v2926_v10 = vadd.f32 %v2925_v6, %v2924_v1  ;;  %v2927_v13 = vpop.f32.mrb[30].mxu1  ;;  %v4078_v16 = vadd.f32 %v2837_v7, %v2836_v3  ;;  %v2839_v17 = vpop.f32.mrb[30].mxu0 }
 0x134   : > { %v2928_v22 = vpop.f32.mrb[31].mxu1  ;;  %v2840_v23 = vpop.f32.mrb[31].mxu0 }
 0x135   : > { %v4084_v24 = vadd.f32 %v2926_v10, %v1716_v37  ;;  %v2929_v25 = vadd.f32 %v2928_v22, %v2927_v13  ;;  %v4086_v27 = vadd.f32 %v2840_v23, %v2839_v17  ;;  %v1740_v22 = vadd.f32 %v4062_v50, %v4024_v54 }
 0x136   : > { %2285 = vmatmul.mubr.bf16.gmra.mrb[136].mxu1 %v3596_v8  ;;  %3291 = vmatmul.mubr.bf16.gmra.mrb[136].mxu0 %v3597_v9  ;;  %v1735_v8 = vadd.f32 %v4054_v39, %v4024_v54 }
 0x137   : > { %v4088_v46 = vadd.f32 %v2929_v25, %v1719_v5  ;;  %2292 = vmatprep.mubr.bf16.mxu1 %v3598_v18  ;;  %3294 = vmatprep.mubr.bf16.mxu0 %v3600_v19 }
 0x139   : > { %v2930_v29 = vpop.f32.mrb[32].mxu1  ;;  %v2842_v31 = vpop.f32.mrb[32].mxu0 }
 0x13a   : > { %v2931_v32 = vpop.f32.mrb[33].mxu1  ;;  %v2843_v33 = vpop.f32.mrb[33].mxu0 }
 0x13b   : > { %v2932_v40 = vadd.f32 %v2931_v32, %v2930_v29  ;;  %v2933_v41 = vpop.f32.mrb[34].mxu1  ;;  %v4094_v42 = vadd.f32 %v2843_v33, %v2842_v31  ;;  %v2845_v43 = vpop.f32.mrb[34].mxu0  ;;  %v1743_v32 = vadd.f32 %v4070_v0, %v4024_v54 }
 0x13c   : > { %v2934_v45 = vpop.f32.mrb[35].mxu1  ;;  %v2846_v47 = vpop.f32.mrb[35].mxu0 }
 0x13d   : > { %v4098_v48 = vadd.f32 %v2932_v40, %v1724_v53  ;;  %v2935_v49 = vadd.f32 %v2934_v45, %v2933_v41  ;;  %v2847_v51 = vadd.f32 %v2846_v47, %v2845_v43  ;;  %v1748_v45 = vadd.f32 %v4078_v16, %v4024_v54 }
 0x13e   : > { %2293 = vmatmul.mubr.bf16.gmra.mrb[140].mxu1 %v3601_v34  ;;  %3295 = vmatmul.mubr.bf16.gmra.mrb[140].mxu0 %v3602_v38 }
 0x13f   : > { %v4100_v55 = vadd.f32 %v2935_v49, %v1727_v21 }
 0x141   : > { %v2936_v56 = vpop.f32.mrb[36].mxu1  ;;  %v2848_v2 = vpop.f32.mrb[36].mxu0 }
 0x142   : > { %v2937_v57 = vpop.f32.mrb[37].mxu1  ;;  %v2849_v58 = vpop.f32.mrb[37].mxu0 }
 0x143   : > { %v2938_v63 = vadd.f32 %v2937_v57, %v2936_v56  ;;  %v2939_v1 = vpop.f32.mrb[38].mxu1  ;;  %v4104_v3 = vadd.f32 %v2849_v58, %v2848_v2  ;;  %v2851_v15 = vpop.f32.mrb[38].mxu0  ;;  %v1751_v57 = vadd.f32 %v4086_v27, %v4024_v54  ;;  %v1759_v27 = vadd.f32 %v2847_v51, %v4024_v54 }
 0x144   : > { %v2940_v6 = vpop.f32.mrb[39].mxu1  ;;  %v2852_v7 = vpop.f32.mrb[39].mxu0 }
 0x145   : > { %v4108_v9 = vadd.f32 %v2938_v63, %v1732_v59  ;;  %v2941_v37 = vadd.f32 %v2940_v6, %v2939_v1  ;;  %v2853_v10 = vadd.f32 %v2852_v7, %v2851_v15  ;;  %v1764_v51 = vadd.f32 %v4104_v3, %v4024_v54 }
 0x147   : > { %v4110_v13 = vadd.f32 %v2941_v37, %v1735_v8  ;;  %v1756_v8 = vadd.f32 %v4094_v42, %v4024_v54 }
 0x149   : > { %v2942_v17 = vpop.f32.mrb[40].mxu1  ;;  %v2854_v18 = vpop.f32.mrb[40].mxu0 }
 0x14a   : > { %v2943_v19 = vpop.f32.mrb[41].mxu1  ;;  %v2855_v26 = vpop.f32.mrb[41].mxu0 }
 0x14b   : > { %v2944_v23 = vadd.f32 %v2943_v19, %v2942_v17  ;;  %v2945_v5 = vpop.f32.mrb[42].mxu1  ;;  %v4114_v25 = vadd.f32 %v2855_v26, %v2854_v18  ;;  %v2857_v29 = vpop.f32.mrb[42].mxu0 }
 0x14c   : > { %v2946_v31 = vpop.f32.mrb[43].mxu1  ;;  %v2858_v39 = vpop.f32.mrb[43].mxu0 }
 0x14d   : > { %v4118_v33 = vadd.f32 %v2944_v23, %v1740_v22  ;;  %v2947_v34 = vadd.f32 %v2946_v31, %v2945_v5  ;;  %v4120_v38 = vadd.f32 %v2858_v39, %v2857_v29 }
 0x14f   : > { %v4122_v53 = vadd.f32 %v2947_v34, %v1743_v32 }
 0x151   : > { %v2948_v40 = vpop.f32.mrb[44].mxu1  ;;  %v2860_v41 = vpop.f32.mrb[44].mxu0 }
 0x152   : > { %v2949_v50 = vpop.f32.mrb[45].mxu1  ;;  %v2861_v43 = vpop.f32.mrb[45].mxu0 }
 0x153   : > { %v2950_v47 = vadd.f32 %v2949_v50, %v2948_v40  ;;  %v2951_v21 = vpop.f32.mrb[46].mxu1  ;;  %v4126_v49 = vadd.f32 %v2861_v43, %v2860_v41  ;;  %v2863_v56 = vpop.f32.mrb[46].mxu0 }
 0x154   : > { %v2952_v0 = vpop.f32.mrb[47].mxu1  ;;  %v2864_v2 = vpop.f32.mrb[47].mxu0 }
 0x155   : > { %v4130_v58 = vadd.f32 %v2950_v47, %v1748_v45  ;;  %v2953_v59 = vadd.f32 %v2952_v0, %v2951_v21  ;;  %v4132_v63 = vadd.f32 %v2864_v2, %v2863_v56 }
 0x157   : > { %v4134_v1 = vadd.f32 %v2953_v59, %v1751_v57 }
 0x159   : > { %v2954_v15 = vpop.f32.mrb[48].mxu1  ;;  %v3018_v6 = vpop.f32.mrb[48].mxu0 }
 0x15a   : > { %v2955_v16 = vpop.f32.mrb[49].mxu1  ;;  %v3019_v7 = vpop.f32.mrb[49].mxu0 }
 0x15b   : > { %v2956_v37 = vadd.f32 %v2955_v16, %v2954_v15  ;;  %v3020_v17 = vadd.f32 %v3019_v7, %v3018_v6  ;;  %v2957_v18 = vpop.f32.mrb[50].mxu1  ;;  %v3021_v19 = vpop.f32.mrb[50].mxu0 }
 0x15c   : > { %v2958_v26 = vpop.f32.mrb[51].mxu1  ;;  %v3022_v22 = vpop.f32.mrb[51].mxu0 }
 0x15d   : > { %v4139_v23 = vadd.f32 %v2956_v37, %v1756_v8  ;;  %v4142_v5 = vadd.f32 %v3020_v17, %v4036_v11  ;;  %v2959_v29 = vadd.f32 %v2958_v26, %v2957_v18  ;;  %v3023_v31 = vadd.f32 %v3022_v22, %v3021_v19 }
 0x15e   : > { %v1767_v11 = vadd.f32 %v2853_v10, %v4024_v54  ;;  %v1772_v10 = vadd.f32 %v4114_v25, %v4024_v54 }
 0x15f   : > { %v4144_v39 = vadd.f32 %v2959_v29, %v1759_v27  ;;  %v4147_v32 = vadd.f32 %v3023_v31, %v4040_v62 }
 0x161   : > { %v2960_v42 = vpop.f32.mrb[52].mxu1  ;;  %v3024_v34 = vpop.f32.mrb[52].mxu0 }
 0x162   : > { %v2961_v40 = vpop.f32.mrb[53].mxu1  ;;  %v3025_v41 = vpop.f32.mrb[53].mxu0 }
 0x163   : > { %v2962_v50 = vadd.f32 %v2961_v40, %v2960_v42  ;;  %v3026_v43 = vadd.f32 %v3025_v41, %v3024_v34  ;;  %v2963_v45 = vpop.f32.mrb[54].mxu1  ;;  %v3027_v47 = vpop.f32.mrb[54].mxu0 }
 0x164   : > { %v2964_v21 = vpop.f32.mrb[55].mxu1  ;;  %v3028_v56 = vpop.f32.mrb[55].mxu0 }
 0x165   : > { %v4152_v0 = vadd.f32 %v2962_v50, %v1764_v51  ;;  %v4155_v62 = vadd.f32 %v3026_v43, %v4052_v35  ;;  %v2965_v2 = vadd.f32 %v2964_v21, %v2963_v45  ;;  %v3029_v57 = vadd.f32 %v3028_v56, %v3027_v47 }
 0x166   : > { %v1775_v35 = vadd.f32 %v4120_v38, %v4024_v54  ;;  %v1780_v38 = vadd.f32 %v4126_v49, %v4024_v54 }
 0x167   : > { %v4157_v59 = vadd.f32 %v2965_v2, %v1767_v11  ;;  %v4160_v15 = vadd.f32 %v3029_v57, %v4056_v14 }
 0x169   : > { %v2966_v3 = vpop.f32.mrb[56].mxu1  ;;  %v3030_v6 = vpop.f32.mrb[56].mxu0 }
 0x16a   : > { %v2967_v16 = vpop.f32.mrb[57].mxu1  ;;  %v3031_v7 = vpop.f32.mrb[57].mxu0 }
 0x16b   : > { %v2968_v8 = vadd.f32 %v2967_v16, %v2966_v3  ;;  %v3032_v37 = vadd.f32 %v3031_v7, %v3030_v6  ;;  %v2969_v17 = vpop.f32.mrb[58].mxu1  ;;  %v3033_v18 = vpop.f32.mrb[58].mxu0 }
 0x16c   : > { %v2970_v19 = vpop.f32.mrb[59].mxu1  ;;  %v3034_v27 = vpop.f32.mrb[59].mxu0 }
 0x16d   : > { %v4166_v26 = vadd.f32 %v2968_v8, %v1772_v10  ;;  %v4169_v14 = vadd.f32 %v3032_v37, %v4068_v61  ;;  %v2971_v22 = vadd.f32 %v2970_v19, %v2969_v17  ;;  %v3035_v29 = vadd.f32 %v3034_v27, %v3033_v18 }
 0x16e   : > { %v1783_v61 = vadd.f32 %v4132_v63, %v4024_v54  ;;  %v1788_v63 = vadd.f32 %v3975_v60, %v4024_v54 }
 0x16f   : > { %v4171_v31 = vadd.f32 %v2971_v22, %v1775_v35  ;;  %v4174_v25 = vadd.f32 %v3035_v29, %v4072_v30 }
 0x171   : > { %v2972_v42 = vpop.f32.mrb[60].mxu1  ;;  %v3036_v34 = vpop.f32.mrb[60].mxu0 }
 0x172   : > { %v2973_v40 = vpop.f32.mrb[61].mxu1  ;;  %v3037_v41 = vpop.f32.mrb[61].mxu0 }
 0x173   : > { %v2974_v51 = vadd.f32 %v2973_v40, %v2972_v42  ;;  %v3038_v50 = vadd.f32 %v3037_v41, %v3036_v34  ;;  %v2975_v43 = vpop.f32.mrb[62].mxu1  ;;  %v3039_v45 = vpop.f32.mrb[62].mxu0 }
 0x174   : > { %v2976_v47 = vpop.f32.mrb[63].mxu1  ;;  %v3040_v11 = vpop.f32.mrb[63].mxu0 }
 0x175   : > { %v4180_v21 = vadd.f32 %v2974_v51, %v1780_v38  ;;  %v4183_v30 = vadd.f32 %v3038_v50, %v4084_v24  ;;  %v2977_v56 = vadd.f32 %v2976_v47, %v2975_v43  ;;  %v3041_v2 = vadd.f32 %v3040_v11, %v3039_v45 }
 0x176   : > { %v1791_v24 = vadd.f32 %v3981_v4, %v4024_v54  ;;  %v1796_v4 = vadd.f32 %v3987_v12, %v4024_v54 }
 0x177   : > { %v4185_v57 = vadd.f32 %v2977_v56, %v1783_v61  ;;  %v4188_v49 = vadd.f32 %v3041_v2, %v4088_v46 }
 0x179   : > { %v2978_v3 = vpop.f32.mrb[64].mxu1  ;;  %v3042_v6 = vpop.f32.mrb[64].mxu0 }
 0x17a   : > { %v2979_v16 = vpop.f32.mrb[65].mxu1  ;;  %v3043_v7 = vpop.f32.mrb[65].mxu0 }
 0x17b   : > { %v2980_v10 = vadd.f32 %v2979_v16, %v2978_v3  ;;  %v3044_v8 = vadd.f32 %v3043_v7, %v3042_v6  ;;  %v2981_v37 = vpop.f32.mrb[66].mxu1  ;;  %v3045_v17 = vpop.f32.mrb[66].mxu0 }
 0x17c   : > { %v2982_v18 = vpop.f32.mrb[67].mxu1  ;;  %v3046_v35 = vpop.f32.mrb[67].mxu0 }
 0x17d   : > { %v4194_v19 = vadd.f32 %v2980_v10, %v1788_v63  ;;  %v4197_v46 = vadd.f32 %v3044_v8, %v4098_v48  ;;  %v2983_v27 = vadd.f32 %v2982_v18, %v2981_v37  ;;  %v3047_v22 = vadd.f32 %v3046_v35, %v3045_v17 }
 0x17e   : > { %v1799_v48 = vadd.f32 %v3993_v20, %v4024_v54  ;;  %v1804_v20 = vadd.f32 %v3999_v28, %v4024_v54 }
 0x17f   : > { %v4199_v29 = vadd.f32 %v2983_v27, %v1791_v24  ;;  %v4202_v60 = vadd.f32 %v3047_v22, %v4100_v55 }
 0x181   : > { %v2984_v42 = vpop.f32.mrb[68].mxu1  ;;  %v3048_v34 = vpop.f32.mrb[68].mxu0 }
 0x182   : > { %v2985_v40 = vpop.f32.mrb[69].mxu1  ;;  %v3049_v41 = vpop.f32.mrb[69].mxu0 }
 0x183   : > { %v2986_v38 = vadd.f32 %v2985_v40, %v2984_v42  ;;  %v3050_v51 = vadd.f32 %v3049_v41, %v3048_v34  ;;  %v2987_v50 = vpop.f32.mrb[70].mxu1  ;;  %v3051_v43 = vpop.f32.mrb[70].mxu0 }
 0x184   : > { %v2988_v45 = vpop.f32.mrb[71].mxu1  ;;  %v3052_v61 = vpop.f32.mrb[71].mxu0 }
 0x185   : > { %v4208_v47 = vadd.f32 %v2986_v38, %v1796_v4  ;;  %v4211_v55 = vadd.f32 %v3050_v51, %v4108_v9  ;;  %v2989_v11 = vadd.f32 %v2988_v45, %v2987_v50  ;;  %v3053_v56 = vadd.f32 %v3052_v61, %v3051_v43 }
 0x186   : > { %v1807_v9 = vadd.f32 %v4005_v36, %v4024_v54  ;;  %v1812_v36 = vadd.f32 %v4011_v44, %v4024_v54 }
 0x187   : > { %v4213_v2 = vadd.f32 %v2989_v11, %v1799_v48  ;;  %v4216_v12 = vadd.f32 %v3053_v56, %v4110_v13 }
 0x189   : > { %v2990_v3 = vpop.f32.mrb[72].mxu1  ;;  %v3054_v6 = vpop.f32.mrb[72].mxu0 }
 0x18a   : > { %v2991_v16 = vpop.f32.mrb[73].mxu1  ;;  %v3055_v7 = vpop.f32.mrb[73].mxu0 }
 0x18b   : > { %v2992_v63 = vadd.f32 %v2991_v16, %v2990_v3  ;;  %v3056_v10 = vadd.f32 %v3055_v7, %v3054_v6  ;;  %v2993_v8 = vpop.f32.mrb[74].mxu1  ;;  %v3057_v37 = vpop.f32.mrb[74].mxu0 }
 0x18c   : > { %v2994_v17 = vpop.f32.mrb[75].mxu1  ;;  %v3058_v24 = vpop.f32.mrb[75].mxu0 }
 0x18d   : > { %v4222_v18 = vadd.f32 %v2992_v63, %v1804_v20  ;;  %v4225_v13 = vadd.f32 %v3056_v10, %v4118_v33  ;;  %v2995_v35 = vadd.f32 %v2994_v17, %v2993_v8  ;;  %v3059_v27 = vadd.f32 %v3058_v24, %v3057_v37 }
 0x18e   : > { %v1815_v33 = vadd.f32 %v4017_v52, %v4024_v54 }
 0x18f   : > { %v4227_v22 = vadd.f32 %v2995_v35, %v1807_v9  ;;  %v4230_v28 = vadd.f32 %v3059_v27, %v4122_v53 }
 0x191   : > { %v2996_v42 = vpop.f32.mrb[76].mxu1  ;;  %v3060_v34 = vpop.f32.mrb[76].mxu0 }
 0x192   : > { %v2997_v40 = vpop.f32.mrb[77].mxu1  ;;  %v3061_v41 = vpop.f32.mrb[77].mxu0 }
 0x193   : > { %v2998_v4 = vadd.f32 %v2997_v40, %v2996_v42  ;;  %v3062_v38 = vadd.f32 %v3061_v41, %v3060_v34  ;;  %v2999_v51 = vpop.f32.mrb[78].mxu1  ;;  %v3063_v50 = vpop.f32.mrb[78].mxu0 }
 0x194   : > { %v3000_v43 = vpop.f32.mrb[79].mxu1  ;;  %v3064_v48 = vpop.f32.mrb[79].mxu0 }
 0x195   : > { %v4236_v45 = vadd.f32 %v2998_v4, %v1812_v36  ;;  %v4239_v53 = vadd.f32 %v3062_v38, %v4130_v58  ;;  %v3001_v61 = vadd.f32 %v3000_v43, %v2999_v51  ;;  %v3065_v11 = vadd.f32 %v3064_v48, %v3063_v50 }
 0x197   : > { %v4241_v56 = vadd.f32 %v3001_v61, %v1815_v33  ;;  %v4244_v44 = vadd.f32 %v3065_v11, %v4134_v1 }
 0x199   : > { %v3066_v3 = vpop.f32.mrb[80].mxu0  ;;  %v3130_v6 = vpop.f32.mrb[80].mxu1 }
 0x19a   : > { %v3067_v16 = vpop.f32.mrb[81].mxu0  ;;  %v3131_v7 = vpop.f32.mrb[81].mxu1 }
 0x19b   : > { %v3068_v20 = vadd.f32 %v3067_v16, %v3066_v3  ;;  %v3132_v52 = vadd.f32 %v3131_v7, %v3130_v6  ;;  %v3069_v54 = vpop.f32.mrb[82].mxu0  ;;  %v3133_v63 = vpop.f32.mrb[82].mxu1 }
 0x19c   : > { %v3070_v10 = vpop.f32.mrb[83].mxu0  ;;  %v3134_v8 = vpop.f32.mrb[83].mxu1 }
 0x19d   : > { %v4247_v58 = vadd.f32 %v3068_v20, %v4139_v23  ;;  %v3071_v37 = vadd.f32 %v3070_v10, %v3069_v54  ;;  %v3135_v9 = vadd.f32 %v3134_v8, %v3133_v63  ;;  %v4250_v17 = vadd.f32 %v3132_v52, %v4142_v5 }
 0x19f   : > { %v4253_v1 = vadd.f32 %v3071_v37, %v4144_v39  ;;  %v4256_v24 = vadd.f32 %v3135_v9, %v4147_v32 }
 0x1a1   : > { %v3072_v35 = vpop.f32.mrb[84].mxu0  ;;  %v3136_v27 = vpop.f32.mrb[84].mxu1 }
 0x1a2   : > { %v3073_v42 = vpop.f32.mrb[85].mxu0  ;;  %v3137_v34 = vpop.f32.mrb[85].mxu1 }
 0x1a3   : > { %v3074_v40 = vadd.f32 %v3073_v42, %v3072_v35  ;;  %v3138_v41 = vadd.f32 %v3137_v34, %v3136_v27  ;;  %v3075_v36 = vpop.f32.mrb[86].mxu0  ;;  %v3139_v23 = vpop.f32.mrb[86].mxu1 }
 0x1a4   : > { %v3076_v4 = vpop.f32.mrb[87].mxu0  ;;  %v3140_v38 = vpop.f32.mrb[87].mxu1 }
 0x1a5   : > { %v4259_v51 = vadd.f32 %v3074_v40, %v4152_v0  ;;  %v3077_v5 = vadd.f32 %v3076_v4, %v3075_v36  ;;  %v3141_v50 = vadd.f32 %v3140_v38, %v3139_v23  ;;  %v4262_v39 = vadd.f32 %v3138_v41, %v4155_v62 }
 0x1a7   : > { %v4265_v32 = vadd.f32 %v3077_v5, %v4157_v59  ;;  %v4268_v33 = vadd.f32 %v3141_v50, %v4160_v15 }
 0x1a9   : > { %v3078_v43 = vpop.f32.mrb[88].mxu0  ;;  %v3142_v48 = vpop.f32.mrb[88].mxu1 }
 0x1aa   : > { %v3079_v61 = vpop.f32.mrb[89].mxu0  ;;  %v3143_v11 = vpop.f32.mrb[89].mxu1 }
 0x1ab   : > { %v3080_v3 = vadd.f32 %v3079_v61, %v3078_v43  ;;  %v3144_v6 = vadd.f32 %v3143_v11, %v3142_v48  ;;  %v3081_v16 = vpop.f32.mrb[90].mxu0  ;;  %v3145_v0 = vpop.f32.mrb[90].mxu1 }
 0x1ac   : > { %v3082_v7 = vpop.f32.mrb[91].mxu0  ;;  %v3146_v20 = vpop.f32.mrb[91].mxu1 }
 0x1ad   : > { %v4271_v52 = vadd.f32 %v3080_v3, %v4166_v26  ;;  %v3083_v62 = vadd.f32 %v3082_v7, %v3081_v16  ;;  %v3147_v54 = vadd.f32 %v3146_v20, %v3145_v0  ;;  %v4274_v59 = vadd.f32 %v3144_v6, %v4169_v14 }
 0x1af   : > { %v4277_v15 = vadd.f32 %v3083_v62, %v4171_v31  ;;  %v4280_v63 = vadd.f32 %v3147_v54, %v4174_v25 }
 0x1b1   : > { %v3084_v10 = vpop.f32.mrb[92].mxu0  ;;  %v3148_v8 = vpop.f32.mrb[92].mxu1 }
 0x1b2   : > { %v3085_v37 = vpop.f32.mrb[93].mxu0  ;;  %v3149_v9 = vpop.f32.mrb[93].mxu1 }
 0x1b3   : > { %v3086_v35 = vadd.f32 %v3085_v37, %v3084_v10  ;;  %v3150_v27 = vadd.f32 %v3149_v9, %v3148_v8  ;;  %v3087_v42 = vpop.f32.mrb[94].mxu0  ;;  %v3151_v26 = vpop.f32.mrb[94].mxu1 }
 0x1b4   : > { %v3088_v34 = vpop.f32.mrb[95].mxu0  ;;  %v3152_v40 = vpop.f32.mrb[95].mxu1 }
 0x1b5   : > { %v4283_v41 = vadd.f32 %v3086_v35, %v4180_v21  ;;  %v3089_v14 = vadd.f32 %v3088_v34, %v3087_v42  ;;  %v3153_v36 = vadd.f32 %v3152_v40, %v3151_v26  ;;  %v4286_v31 = vadd.f32 %v3150_v27, %v4183_v30 }
 0x1b7   : > { %v4289_v25 = vadd.f32 %v3089_v14, %v4185_v57  ;;  %v4292_v23 = vadd.f32 %v3153_v36, %v4188_v49 }
 0x1b9   : > { %v3090_v4 = vpop.f32.mrb[96].mxu0  ;;  %v3154_v38 = vpop.f32.mrb[96].mxu1 }
 0x1ba   : > { %v3091_v5 = vpop.f32.mrb[97].mxu0  ;;  %v3155_v50 = vpop.f32.mrb[97].mxu1 }
 0x1bb   : > { %v3092_v43 = vadd.f32 %v3091_v5, %v3090_v4  ;;  %v3156_v48 = vadd.f32 %v3155_v50, %v3154_v38  ;;  %v3093_v61 = vpop.f32.mrb[98].mxu0  ;;  %v3157_v21 = vpop.f32.mrb[98].mxu1 }
 0x1bc   : > { %v3094_v11 = vpop.f32.mrb[99].mxu0  ;;  %v3158_v3 = vpop.f32.mrb[99].mxu1 }
 0x1bd   : > { %v4295_v6 = vadd.f32 %v3092_v43, %v4194_v19  ;;  %v3095_v30 = vadd.f32 %v3094_v11, %v3093_v61  ;;  %v3159_v16 = vadd.f32 %v3158_v3, %v3157_v21  ;;  %v4298_v57 = vadd.f32 %v3156_v48, %v4197_v46 }
 0x1bf   : > { %v4301_v49 = vadd.f32 %v3095_v30, %v4199_v29  ;;  %v4304_v0 = vadd.f32 %v3159_v16, %v4202_v60 }
 0x1c1   : > { %v3096_v7 = vpop.f32.mrb[100].mxu0  ;;  %v3160_v20 = vpop.f32.mrb[100].mxu1 }
 0x1c2   : > { %v3097_v62 = vpop.f32.mrb[101].mxu0  ;;  %v3161_v54 = vpop.f32.mrb[101].mxu1 }
 0x1c3   : > { %v3098_v10 = vadd.f32 %v3097_v62, %v3096_v7  ;;  %v3162_v8 = vadd.f32 %v3161_v54, %v3160_v20  ;;  %v3099_v37 = vpop.f32.mrb[102].mxu0  ;;  %v3163_v19 = vpop.f32.mrb[102].mxu1 }
 0x1c4   : > { %v3100_v9 = vpop.f32.mrb[103].mxu0  ;;  %v3164_v35 = vpop.f32.mrb[103].mxu1 }
 0x1c5   : > { %v4307_v27 = vadd.f32 %v3098_v10, %v4208_v47  ;;  %v3101_v46 = vadd.f32 %v3100_v9, %v3099_v37  ;;  %v3165_v42 = vadd.f32 %v3164_v35, %v3163_v19  ;;  %v4310_v29 = vadd.f32 %v3162_v8, %v4211_v55 }
 0x1c7   : > { %v4313_v60 = vadd.f32 %v3101_v46, %v4213_v2  ;;  %v4316_v26 = vadd.f32 %v3165_v42, %v4216_v12 }
 0x1c9   : > { %v3102_v34 = vpop.f32.mrb[104].mxu0  ;;  %v3166_v40 = vpop.f32.mrb[104].mxu1 }
 0x1ca   : > { %v3103_v14 = vpop.f32.mrb[105].mxu0  ;;  %v3167_v36 = vpop.f32.mrb[105].mxu1 }
 0x1cb   : > { %v3104_v4 = vadd.f32 %v3103_v14, %v3102_v34  ;;  %v3168_v38 = vadd.f32 %v3167_v36, %v3166_v40  ;;  %v3105_v5 = vpop.f32.mrb[106].mxu0  ;;  %v3169_v47 = vpop.f32.mrb[106].mxu1 }
 0x1cc   : > { %v3106_v50 = vpop.f32.mrb[107].mxu0  ;;  %v3170_v43 = vpop.f32.mrb[107].mxu1 }
 0x1cd   : > { %v4319_v48 = vadd.f32 %v3104_v4, %v4222_v18  ;;  %v3107_v55 = vadd.f32 %v3106_v50, %v3105_v5  ;;  %v3171_v61 = vadd.f32 %v3170_v43, %v3169_v47  ;;  %v4322_v2 = vadd.f32 %v3168_v38, %v4225_v13 }
 0x1cf   : > { %v4325_v12 = vadd.f32 %v3107_v55, %v4227_v22  ;;  %v4328_v21 = vadd.f32 %v3171_v61, %v4230_v28 }
 0x1d1   : > { %v3108_v11 = vpop.f32.mrb[108].mxu0  ;;  %v3172_v3 = vpop.f32.mrb[108].mxu1 }
 0x1d2   : > { %v3109_v30 = vpop.f32.mrb[109].mxu0  ;;  %v3173_v16 = vpop.f32.mrb[109].mxu1 }
 0x1d3   : > { %v3110_v7 = vadd.f32 %v3109_v30, %v3108_v11  ;;  %v3174_v20 = vadd.f32 %v3173_v16, %v3172_v3  ;;  %v3111_v18 = vpop.f32.mrb[110].mxu0  ;;  %v3175_v62 = vpop.f32.mrb[110].mxu1 }
 0x1d4   : > { %v3112_v54 = vpop.f32.mrb[111].mxu0  ;;  %v3176_v10 = vpop.f32.mrb[111].mxu1 }
 0x1d5   : > { %v4331_v13 = vadd.f32 %v3110_v7, %v4236_v45  ;;  %v3113_v8 = vadd.f32 %v3112_v54, %v3111_v18  ;;  %v3177_v22 = vadd.f32 %v3176_v10, %v3175_v62  ;;  %v4334_v37 = vadd.f32 %v3174_v20, %v4239_v53 }
 0x1d7   : > { %v4338_v28 = vadd.f32 %v3113_v8, %v4241_v56  ;;  %v4341_v19 = vadd.f32 %v3177_v22, %v4244_v44 }
 0x1d9   : > { %v3178_v9 = vpop.f32.mrb[112].mxu1  ;;  %v3268_v45 = vpop.f32.mrb[112].mxu0 }
 0x1da   : > { %v2344_v53 = vadd.f32 %v3268_v45, %v4262_v39  ;;  %v3179_v35 = vpop.f32.mrb[113].mxu1  ;;  %v2335_v46 = vpop.f32.mrb[113].mxu0 }
 0x1db   : > { %v3180_v56 = vadd.f32 %v3179_v35, %v3178_v9  ;;  %v2336_v42 = vadd.f32 %v2335_v46, %v4250_v17  ;;  %v3181_v44 = vpop.f32.mrb[114].mxu1  ;;  %v3269_v34 = vpop.f32.mrb[114].mxu0 }
 0x1dc   : > { %2464 = vst [vmem:[%s4346_s22 + $0x10] sm:$0xff] %v2344_v53  ;;  %v2347_v40 = vadd.f32 %v3269_v34, %v4268_v33  ;;  %v3182_v14 = vpop.f32.mrb[115].mxu1  ;;  %v2338_v36 = vpop.f32.mrb[115].mxu0 }
 0x1dd   : > { %2462 = vst [vmem:[%s4346_s22] sm:$0xff] %v2336_v42  ;;  %v3183_v4 = vadd.f32 %v3182_v14, %v3181_v44  ;;  %v2339_v38 = vadd.f32 %v2338_v36, %v4256_v24  ;;  %v4355_v39 = vadd.f32 %v3180_v56, %v4247_v58 }
 0x1de   : > { %2465 = vst [vmem:[%s4346_s22 + $0x18] sm:$0xff] %v2347_v40 }
 0x1df   : > { %2463 = vst [vmem:[%s4346_s22 + $0x8] sm:$0xff] %v2339_v38  ;;  %v4360_v17 = vadd.f32 %v3183_v4, %v4253_v1 }
 0x1e1   : > { %v3184_v5 = vpop.f32.mrb[116].mxu1  ;;  %v3272_v47 = vpop.f32.mrb[116].mxu0 }
 0x1e2   : > { %v2360_v33 = vadd.f32 %v3272_v47, %v4286_v31  ;;  %v3185_v50 = vpop.f32.mrb[117].mxu1  ;;  %v2351_v43 = vpop.f32.mrb[117].mxu0 }
 0x1e3   : > { %v3186_v55 = vadd.f32 %v3185_v50, %v3184_v5  ;;  %v2352_v24 = vadd.f32 %v2351_v43, %v4274_v59  ;;  %v3187_v61 = vpop.f32.mrb[118].mxu1  ;;  %v3273_v58 = vpop.f32.mrb[118].mxu0 }
 0x1e4   : > { %2468 = vst [vmem:[%s4346_s22 + $0x30] sm:$0xff] %v2360_v33  ;;  %v2363_v11 = vadd.f32 %v3273_v58, %v4292_v23  ;;  %v3188_v3 = vpop.f32.mrb[119].mxu1  ;;  %v2354_v30 = vpop.f32.mrb[119].mxu0 }
 0x1e5   : > { %2466 = vst [vmem:[%s4346_s22 + $0x20] sm:$0xff] %v2352_v24  ;;  %v3189_v1 = vadd.f32 %v3188_v3, %v3187_v61  ;;  %v2355_v16 = vadd.f32 %v2354_v30, %v4280_v63  ;;  %v2247_v31 = vadd.f32 %v3186_v55, %v4259_v51 }
 0x1e6   : > { %2469 = vst [vmem:[%s4346_s22 + $0x38] sm:$0xff] %v2363_v11 }
 0x1e7   : > { %2467 = vst [vmem:[%s4346_s22 + $0x28] sm:$0xff] %v2355_v16  ;;  %v2250_v7 = vadd.f32 %v3189_v1, %v4265_v32 }
 0x1e9   : > { %v3190_v59 = vpop.f32.mrb[120].mxu1  ;;  %v3276_v20 = vpop.f32.mrb[120].mxu0 }
 0x1ea   : > { %v2376_v18 = vadd.f32 %v3276_v20, %v4310_v29  ;;  %v3191_v23 = vpop.f32.mrb[121].mxu1  ;;  %v2367_v62 = vpop.f32.mrb[121].mxu0 }
 0x1eb   : > { %v3192_v54 = vadd.f32 %v3191_v23, %v3190_v59  ;;  %v2368_v10 = vadd.f32 %v2367_v62, %v4298_v57  ;;  %v3193_v8 = vpop.f32.mrb[122].mxu1  ;;  %v3277_v63 = vpop.f32.mrb[122].mxu0 }
 0x1ec   : > { %2472 = vst [vmem:[%s4346_s22 + $0x50] sm:$0xff] %v2376_v18  ;;  %v2379_v51 = vadd.f32 %v3277_v63, %v4316_v26  ;;  %v3194_v22 = vpop.f32.mrb[123].mxu1  ;;  %v2370_v9 = vpop.f32.mrb[123].mxu0 }
 0x1ed   : > { %2470 = vst [vmem:[%s4346_s22 + $0x40] sm:$0xff] %v2368_v10  ;;  %v3195_v32 = vadd.f32 %v3194_v22, %v3193_v8  ;;  %v2371_v45 = vadd.f32 %v2370_v9, %v4304_v0  ;;  %v2255_v29 = vadd.f32 %v3192_v54, %v4271_v52 }
 0x1ee   : > { %2473 = vst [vmem:[%s4346_s22 + $0x58] sm:$0xff] %v2379_v51 }
 0x1ef   : > { %2471 = vst [vmem:[%s4346_s22 + $0x48] sm:$0xff] %v2371_v45  ;;  %v2258_v53 = vadd.f32 %v3195_v32, %v4277_v15 }
 0x1f1   : > { %v3196_v57 = vpop.f32.mrb[124].mxu1  ;;  %v3280_v35 = vpop.f32.mrb[124].mxu0 }
 0x1f2   : > { %v2392_v46 = vadd.f32 %v3280_v35, %v4334_v37  ;;  %v3197_v26 = vpop.f32.mrb[125].mxu1  ;;  %v2383_v56 = vpop.f32.mrb[125].mxu0 }
 0x1f3   : > { %v3198_v42 = vadd.f32 %v3197_v26, %v3196_v57  ;;  %v2384_v44 = vadd.f32 %v2383_v56, %v4322_v2  ;;  %v3199_v34 = vpop.f32.mrb[126].mxu1  ;;  %v3281_v0 = vpop.f32.mrb[126].mxu0 }
 0x1f4   : > { %2476 = vst [vmem:[%s4346_s22 + $0x70] sm:$0xff] %v2392_v46  ;;  %v2395_v52 = vadd.f32 %v3281_v0, %v4341_v19  ;;  %v3200_v40 = vpop.f32.mrb[127].mxu1  ;;  %v2386_v14 = vpop.f32.mrb[127].mxu0 }
 0x1f5   : > { %2474 = vst [vmem:[%s4346_s22 + $0x60] sm:$0xff] %v2384_v44  ;;  %v3201_v15 = vadd.f32 %v3200_v40, %v3199_v34  ;;  %v2387_v36 = vadd.f32 %v2386_v14, %v4328_v21  ;;  %v2263_v37 = vadd.f32 %v3198_v42, %v4283_v41 }
 0x1f6   : > { %2477 = vst [vmem:[%s4346_s22 + $0x78] sm:$0xff] %v2395_v52 }
 0x1f7   : > { %2475 = vst [vmem:[%s4346_s22 + $0x68] sm:$0xff] %v2387_v36  ;;  %v2266_v4 = vadd.f32 %v3201_v15, %v4289_v25 }
 0x1f9   : > { %v3202_v2 = vpop.f32.mrb[128].mxu1  ;;  %v3284_v38 = vpop.f32.mrb[128].mxu0 }
 0x1fa   : > { %v2408_v5 = vadd.f32 %v3284_v38, %v2247_v31  ;;  %v3203_v19 = vpop.f32.mrb[129].mxu1  ;;  %v2399_v47 = vpop.f32.mrb[129].mxu0 }
 0x1fb   : > { %v3204_v33 = vadd.f32 %v3203_v19, %v3202_v2  ;;  %v2400_v50 = vadd.f32 %v2399_v47, %v4355_v39  ;;  %v3205_v43 = vpop.f32.mrb[130].mxu1  ;;  %v3285_v55 = vpop.f32.mrb[130].mxu0 }
 0x1fc   : > { %2480 = vst [vmem:[%s4346_s22 + $0x90] sm:$0xff] %v2408_v5  ;;  %v2411_v21 = vadd.f32 %v3285_v55, %v2250_v7  ;;  %v3206_v41 = vpop.f32.mrb[131].mxu1  ;;  %v2402_v24 = vpop.f32.mrb[131].mxu0 }
 0x1fd   : > { %2478 = vst [vmem:[%s4346_s22 + $0x80] sm:$0xff] %v2400_v50  ;;  %v3207_v61 = vadd.f32 %v3206_v41, %v3205_v43  ;;  %v2403_v25 = vadd.f32 %v2402_v24, %v4360_v17  ;;  %v2271_v58 = vadd.f32 %v3204_v33, %v4295_v6 }
 0x1fe   : > { %2481 = vst [vmem:[%s4346_s22 + $0x98] sm:$0xff] %v2411_v21 }
 0x1ff   : > { %2479 = vst [vmem:[%s4346_s22 + $0x88] sm:$0xff] %v2403_v25  ;;  %v2274_v11 = vadd.f32 %v3207_v61, %v4301_v49 }
 0x201   : > { %v3208_v3 = vpop.f32.mrb[132].mxu1  ;;  %v3288_v39 = vpop.f32.mrb[132].mxu0 }
 0x202   : > { %v2424_v30 = vadd.f32 %v3288_v39, %v2263_v37  ;;  %v3209_v1 = vpop.f32.mrb[133].mxu1  ;;  %v2415_v16 = vpop.f32.mrb[133].mxu0 }
 0x203   : > { %v3210_v31 = vadd.f32 %v3209_v1, %v3208_v3  ;;  %v2416_v7 = vadd.f32 %v2415_v16, %v2255_v29  ;;  %v3211_v59 = vpop.f32.mrb[134].mxu1  ;;  %v3289_v20 = vpop.f32.mrb[134].mxu0 }
 0x204   : > { %2484 = vst [vmem:[%s4346_s22 + $0xb0] sm:$0xff] %v2424_v30  ;;  %v2427_v17 = vadd.f32 %v3289_v20, %v2266_v4  ;;  %v3212_v18 = vpop.f32.mrb[135].mxu1  ;;  %v2418_v6 = vpop.f32.mrb[135].mxu0 }
 0x205   : > { %2482 = vst [vmem:[%s4346_s22 + $0xa0] sm:$0xff] %v2416_v7  ;;  %v3213_v23 = vadd.f32 %v3212_v18, %v3211_v59  ;;  %v2419_v62 = vadd.f32 %v2418_v6, %v2258_v53  ;;  %v2279_v49 = vadd.f32 %v3210_v31, %v4307_v27 }
 0x206   : > { %2485 = vst [vmem:[%s4346_s22 + $0xb8] sm:$0xff] %v2427_v17 }
 0x207   : > { %2483 = vst [vmem:[%s4346_s22 + $0xa8] sm:$0xff] %v2419_v62  ;;  %v2282_v54 = vadd.f32 %v3213_v23, %v4313_v60 }
 0x209   : > { %v3214_v10 = vpop.f32.mrb[136].mxu1  ;;  %v3292_v8 = vpop.f32.mrb[136].mxu0 }
 0x20a   : > { %v2440_v63 = vadd.f32 %v3292_v8, %v2279_v49  ;;  %v3215_v51 = vpop.f32.mrb[137].mxu1  ;;  %v2431_v22 = vpop.f32.mrb[137].mxu0 }
 0x20b   : > { %v3216_v9 = vadd.f32 %v3215_v51, %v3214_v10  ;;  %v2432_v32 = vadd.f32 %v2431_v22, %v2271_v58  ;;  %v3217_v45 = vpop.f32.mrb[138].mxu1  ;;  %v3293_v29 = vpop.f32.mrb[138].mxu0 }
 0x20c   : > { %2488 = vst [vmem:[%s4346_s22 + $0xd0] sm:$0xff] %v2440_v63  ;;  %v2443_v53 = vadd.f32 %v3293_v29, %v2282_v54  ;;  %v3218_v57 = vpop.f32.mrb[139].mxu1  ;;  %v2434_v27 = vpop.f32.mrb[139].mxu0 }
 0x20d   : > { %2486 = vst [vmem:[%s4346_s22 + $0xc0] sm:$0xff] %v2432_v32  ;;  %v3219_v35 = vadd.f32 %v3218_v57, %v3217_v45  ;;  %v2435_v46 = vadd.f32 %v2434_v27, %v2274_v11  ;;  %v2287_v60 = vadd.f32 %v3216_v9, %v4319_v48 }
 0x20e   : > { %2489 = vst [vmem:[%s4346_s22 + $0xd8] sm:$0xff] %v2443_v53 }
 0x20f   : > { %2487 = vst [vmem:[%s4346_s22 + $0xc8] sm:$0xff] %v2435_v46  ;;  %v2290_v26 = vadd.f32 %v3219_v35, %v4325_v12 }
 0x211   : > { %v3220_v56 = vpop.f32.mrb[140].mxu1  ;;  %v3296_v42 = vpop.f32.mrb[140].mxu0 }
 0x212   : > { %v3221_v44 = vpop.f32.mrb[141].mxu1  ;;  %v2447_v34 = vpop.f32.mrb[141].mxu0 }
 0x213   : > { %v3222_v0 = vadd.f32 %v3221_v44, %v3220_v56  ;;  %v2448_v52 = vadd.f32 %v2447_v34, %v2287_v60  ;;  %v3223_v40 = vpop.f32.mrb[142].mxu1  ;;  %v3297_v14 = vpop.f32.mrb[142].mxu0 }
 0x214   : > { %v3224_v15 = vpop.f32.mrb[143].mxu1  ;;  %v2450_v36 = vpop.f32.mrb[143].mxu0 }
 0x215   : > { %v2295_v37 = vadd.f32 %v3222_v0, %v4331_v13  ;;  %2490 = vst [vmem:[%s4346_s22 + $0xe0] sm:$0xff] %v2448_v52  ;;  %v3225_v48 = vadd.f32 %v3224_v15, %v3223_v40  ;;  %v2451_v4 = vadd.f32 %v2450_v36, %v2290_v26 }
 0x217   : > { %v2456_v2 = vadd.f32 %v3296_v42, %v2295_v37  ;;  %v2298_v12 = vadd.f32 %v3225_v48, %v4338_v28  ;;  %2491 = vst [vmem:[%s4346_s22 + $0xe8] sm:$0xff] %v2451_v4 }
 0x219   : > { %2492 = vst [vmem:[%s4346_s22 + $0xf0] sm:$0xff] %v2456_v2  ;;  %v2459_v38 = vadd.f32 %v3297_v14, %v2298_v12 }
 0x21b   : > { %2493 = vst [vmem:[%s4346_s22 + $0xf8] sm:$0xff] %v2459_v38 }
 0x21c PF: > { %s13_s12 = sadd.s32 1, %s3609_s12  }
 0x21d   : > { %p10_p4 = scmp.ge.s32.totalorder %s13_s12, 9  }
 0x21f   :  { %12 = sbr.rel (!%p10_p4) target bundleno = 1 (0x1), region = 62 }

</bundles_post_ra>
